<compile_context>
chip_gen: v7x
topology: tpu7x:2x2x1
jax: 0.10.0
libtpu: 0.0.40
codegen_flags: <defaults>
</compile_context>

<pallas_src>
from math import pi, ceil

import jax
import jax.numpy as jnp
from jax.experimental import pallas as pl
from jax.experimental.pallas import tpu as pltpu


# ----------------------------------------------------------------------------
# Pallas kernel: whole INR forward for one tile of tn points (transposed).
# Shapes inside the kernel:
#   x_ref    : (in_f, tn)        input coordinates (lane axis = points)
#   rcat_ref : (2H or 3H, in_f)  [R0_rows ; R2_rows (; Wx_t)] zero-padded cols
#   a_ref    : (H, 1)            2*omega*exp(dilate)
#   c_ref    : (H, 1)            -4*sigma^2*exp(2*dilate)
#   wb       : per linear layer (W, b) stored (out, in) / (out, 1); the skip
#              layer's W is the h-part only (x-part lives in rcat_ref).
#   o_ref    : (out_pad, tn)
# ----------------------------------------------------------------------------
def make_inr_kernel(hidden_features, hidden_layers, skip):
    H = hidden_features
    skip_li = ceil(hidden_layers / 2)      # linear index receiving the concat
    n_linear = hidden_layers + 1           # hidden ReLU linears + final linear

    def kernel(x_ref, rcat_ref, a_ref, c_ref, *rest):
        o_ref = rest[-1]
        wb = rest[:-1]

        x_t = x_ref[...]                                           # (in_f, tn)

        # --- SphericalGaborLayer (rotation + skip x-projection fused) -------
        rc = jnp.dot(rcat_ref[...], x_t,
                     preferred_element_type=jnp.float32)           # (2H|3H, tn)
        xr = rc[:H, :]                                             # (H, tn)
        zr = rc[H:2 * H, :]                                        # (H, tn)
        skip_x = rc[2 * H:, :] if skip else None                   # (H, tn)

        denom = 1e-6 + 1.0 + zr
        inv = pl.reciprocal(denom, approx=True)   # EUP-only, shared by both terms
        h = (jnp.cos(a_ref[...] * xr * inv) *
             jnp.exp(c_ref[...] * (1.0 - zr) * inv))               # (H, tn) f32

        # --- hidden ReLU layers + final linear -------------------------------
        p = 0
        for li in range(n_linear):
            w = wb[p][...]
            b = wb[p + 1][...]
            p += 2
            acc = jnp.dot(w, h.astype(w.dtype),
                          preferred_element_type=jnp.float32)
            if skip and li == skip_li:
                # torch: h = cat([h, x_in]) @ W  ==  Wh@h + Wx@x_in  (Wx fused)
                acc = acc + skip_x
            h = acc + b
            if li < n_linear - 1:
                h = jnp.maximum(h, 0.0)                 # ReLU (not on final)

        o_ref[...] = h.astype(o_ref.dtype)

    return kernel


# ----------------------------------------------------------------------------
# Wrapper: layout plumbing (transpose/pad, constant folding, weight splitting
# and padding), BlockSpecs / grid, pallas_call.  Takes x as (N, in_features),
# returns (N, out_features) — same semantics as the torch module.  Intended to
# be called under jax.jit so the plumbing fuses with the kernel.
# ----------------------------------------------------------------------------
def inr_forward_pallas(x, params, *, omega, sigma, hidden_layers, skip,
                       tn=2048, mxu_bf16=True):
    N, in_f = x.shape
    H = params["dilate"].shape[-1]
    n_linear = len(params["linears"])
    out_f = params["linears"][-1][0].shape[-1]
    assert n_linear == hidden_layers + 1
    assert in_f >= 3, "first 3 features must be the 3D point on the sphere"
    assert H % 8 == 0, "hidden_features must be a multiple of 8 (sublane-aligned split)"
    # The torch module can only build the skip concat if it feeds a hidden
    # (widened) linear; guard so the concat is never silently dropped.
    assert (not skip) or hidden_layers >= 2, "skip=True requires hidden_layers >= 2"

    # --- tile sizing: multiple of 128 lanes; guarantee >=2 grid steps (v7x) --
    tn = max(128, (tn // 128) * 128)
    n128 = -(-N // 128) * 128
    if n128 >= 256:
        tn_cap = max(128, (n128 // 2 // 128) * 128)
    else:
        tn_cap = n128
    tn = min(tn, tn_cap)
    N_pad = -(-N // tn) * tn

    w_dtype = jnp.bfloat16 if mxu_bf16 else jnp.float32

    # --- layout plumbing (tiny one-off XLA ops, fused under the caller's jit) -
    x_t = jnp.transpose(x.astype(jnp.float32))                    # (in_f, N)
    if N_pad != N:
        x_t = jnp.pad(x_t, ((0, 0), (0, N_pad - N)))

    dil = jnp.exp(params["dilate"].reshape(-1).astype(jnp.float32))   # (H,)
    a_const = (2.0 * omega * dil).reshape(H, 1)
    c_const = (-4.0 * sigma * sigma * dil * dil).reshape(H, 1)

    skip_li = ceil(hidden_layers / 2)

    # Fused rotation matrix: rows 0..H-1 rotated-x, H..2H-1 rotated-z, and (if
    # skip) 2H..3H-1 the skip layer's x-projection Wx_t.  Zero-padded past col 3
    # for the rotation rows.
    rcat = jnp.concatenate([jnp.transpose(params["R0"]),
                            jnp.transpose(params["R2"])], axis=0)      # (2H, 3)
    rcat_full = jnp.zeros((2 * H, in_f), jnp.float32).at[:, :3].set(rcat)
    if skip:
        w_skip = params["linears"][skip_li][0]                         # (H+in_f, H)
        wx_t = jnp.transpose(w_skip[H:, :]).astype(jnp.float32)        # (H, in_f)
        rcat_full = jnp.concatenate([rcat_full, wx_t], axis=0)         # (3H, in_f)

    out_pad = max(8, -(-out_f // 8) * 8)      # unmasked stores on the output

    weight_args = [rcat_full, a_const, c_const]
    for li, (w, b) in enumerate(params["linears"]):
        b_t = b.reshape(-1, 1).astype(jnp.float32)                 # (out, 1)
        if skip and li == skip_li:
            w_t = jnp.transpose(w[:H, :])                          # (H, H) on h
        else:
            w_t = jnp.transpose(w)                                 # (out, in)
        if li == n_linear - 1 and out_pad != out_f:
            w_t = jnp.pad(w_t, ((0, out_pad - out_f), (0, 0)))
            b_t = jnp.pad(b_t, ((0, out_pad - out_f), (0, 0)))
        weight_args += [w_t.astype(w_dtype), b_t]

    # --- specs / grid ---------------------------------------------------------
    def full_spec(arr):
        return pl.BlockSpec(arr.shape, lambda i: (0, 0))          # resident

    in_specs = [pl.BlockSpec((in_f, tn), lambda i: (0, i))]
    in_specs += [full_spec(arr) for arr in weight_args]

    # VMEM budget: double-buffered x/out blocks + resident weights (x2 margin)
    # + rc and a handful of (H, tn) f32 temporaries.
    def nbytes(a):
        return a.size * a.dtype.itemsize
    resident = sum(nbytes(a) for a in weight_args)
    io_bytes = 2 * (in_f * tn * 4 + out_pad * tn * 4)
    temps = ((3 if skip else 2) + 6) * H * tn * 4
    vmem_est = 2 * resident + io_bytes + temps
    vmem_limit = int(min(64 * 2**20, max(32 * 2**20, 2 * vmem_est)))

    kernel = make_inr_kernel(H, hidden_layers, skip)

    out_t = pl.pallas_call(
        kernel,
        out_shape=jax.ShapeDtypeStruct((out_pad, N_pad), jnp.float32),
        grid_spec=pltpu.PrefetchScalarGridSpec(
            num_scalar_prefetch=0,
            grid=(N_pad // tn,),
            in_specs=in_specs,
            out_specs=pl.BlockSpec((out_pad, tn), lambda i: (0, i)),
        ),
        compiler_params=pltpu.CompilerParams(
            dimension_semantics=("parallel",),
            vmem_limit_bytes=vmem_limit),
    )(x_t, *weight_args)

    return jnp.transpose(out_t[:out_f, :N])                        # (N, out_f)


# ----------------------------------------------------------------------------
# Parameter construction (deterministic, synthetic) + pure-JAX reference.
# Parameters are kept in torch layout: W (in, out), b (1, out), R0/R2 (3, H).
# ----------------------------------------------------------------------------
def build_params(key, in_features, hidden_features, hidden_layers, out_features, skip):
    H = hidden_features
    ks = jax.random.split(key, 8 + 2 * (hidden_layers + 1))
    dilate = jax.random.normal(ks[0], (1, H), jnp.float32)
    u = jax.random.uniform(ks[1], (H,), jnp.float32)
    v = jax.random.uniform(ks[2], (H,), jnp.float32)
    w = jax.random.uniform(ks[3], (H,), jnp.float32)

    alpha = 2.0 * pi * u
    beta = jnp.arccos(jnp.clip(2.0 * v - 1.0, -1.0 + 1e-6, 1.0 - 1e-6))
    gamma = 2.0 * pi * w
    ca, cb, cg = jnp.cos(alpha), jnp.cos(beta), jnp.cos(gamma)
    sa, sb, sg = jnp.sin(alpha), jnp.sin(beta), jnp.sin(gamma)
    z, o = jnp.zeros_like(u), jnp.ones_like(u)
    Rz_a = jnp.stack([jnp.stack([ca, -sa, z], 1),
                      jnp.stack([sa, ca, z], 1),
                      jnp.stack([z, z, o], 1)], 1)
    Rx_b = jnp.stack([jnp.stack([o, z, z], 1),
                      jnp.stack([z, cb, -sb], 1),
                      jnp.stack([z, sb, cb], 1)], 1)
    Rz_g = jnp.stack([jnp.stack([cg, -sg, z], 1),
                      jnp.stack([sg, cg, z], 1),
                      jnp.stack([z, z, o], 1)], 1)
    R = jnp.einsum("hij,hjk->hik", jnp.einsum("hij,hjk->hik", Rz_g, Rx_b), Rz_a)
    R0 = jnp.transpose(R[:, 0, :])  # (3, H): x-component of rotated point
    R2 = jnp.transpose(R[:, 2, :])  # (3, H): z-component of rotated point

    skip_build = ceil(hidden_layers / 2)
    linears = []
    kidx = 4
    for i in range(hidden_layers):
        fin = H + in_features if (skip and i == skip_build) else H
        bound = 1.0 / jnp.sqrt(fin)
        W = jax.random.uniform(ks[kidx], (fin, H), jnp.float32, -bound, bound)
        b = jax.random.uniform(ks[kidx + 1], (1, H), jnp.float32, -bound, bound)
        linears.append((W, b))
        kidx += 2
    bound = 1.0 / jnp.sqrt(H)
    Wf = jax.random.uniform(ks[kidx], (H, out_features), jnp.float32, -bound, bound)
    bf = jax.random.uniform(ks[kidx + 1], (1, out_features), jnp.float32, -bound, bound)
    linears.append((Wf, bf))

    return {"R0": R0, "R2": R2, "dilate": dilate, "linears": linears}


def inr_reference(x, params, *, omega, sigma, hidden_layers, skip):
    pts = x[:, 0:3]
    xr = pts @ params["R0"]
    zr = pts @ params["R2"]
    dil = jnp.exp(params["dilate"])
    denom = 1e-6 + 1.0 + zr
    h = jnp.cos(omega * (2.0 * dil * xr / denom)) * \
        jnp.exp(-(sigma * sigma) * (4.0 * dil * dil * (1.0 - zr) / denom))
    x_in = x
    skip_at = ceil(hidden_layers / 2) + 1
    n_linear = len(params["linears"])
    for li, (w, b) in enumerate(params["linears"]):
        if skip and li + 1 == skip_at:
            h = jnp.concatenate([h, x_in], axis=-1)
        h = h @ w + b
        if li < n_linear - 1:
            h = jnp.maximum(h, 0.0)
    return h


# ----------------------------------------------------------------------------
if __name__ == "__main__":
    N = 4096                # number of query points
    in_features = 3
    hidden_features = 32
    hidden_layers = 2
    out_features = 4
    skip = True
    omega = 10.0
    sigma = 1.0

    key = jax.random.PRNGKey(0)
    kx, kp = jax.random.split(key)
    pts = jax.random.normal(kx, (N, in_features), jnp.float32)
    x = pts / jnp.linalg.norm(pts, axis=-1, keepdims=True)   # points on unit sphere

    params = build_params(kp, in_features, hidden_features, hidden_layers,
                          out_features, skip)

    ref = inr_reference(x, params, omega=omega, sigma=sigma,
                        hidden_layers=hidden_layers, skip=skip)

    # f32-MXU path (tight tolerance; approx reciprocal only source of drift).
    fwd_f32 = jax.jit(lambda xx: inr_forward_pallas(
        xx, params, omega=omega, sigma=sigma, hidden_layers=hidden_layers,
        skip=skip, tn=1024, mxu_bf16=False))
    out_f32 = jax.block_until_ready(fwd_f32(x))
    assert out_f32.shape == (N, out_features)
    err32 = float(jnp.max(jnp.abs(out_f32 - ref)))
    assert jnp.allclose(out_f32, ref, atol=2e-3, rtol=2e-3), f"f32 max abs err {err32}"

    # bf16-MXU path (production default): MLP weights/activations fed to the
    # MXU as bf16, rotation matmul + Gabor elementwise math stay f32.
    fwd_bf16 = jax.jit(lambda xx: inr_forward_pallas(
        xx, params, omega=omega, sigma=sigma, hidden_layers=hidden_layers,
        skip=skip, tn=1024, mxu_bf16=True))
    out_bf16 = jax.block_until_ready(fwd_bf16(x))
    assert out_bf16.shape == (N, out_features)
    err16 = float(jnp.max(jnp.abs(out_bf16 - ref)))
    assert jnp.allclose(out_bf16, ref, atol=4e-2, rtol=4e-2), f"bf16 max abs err {err16}"

    print("KERNEL_OK")
</pallas_src>

<mosaic_0001>
module attributes {stable_mosaic.version = 11 : i64} {
  func.func @kernel(%arg0: i32, %arg1: memref<3x1024xf32, #tpu.memory_space<vmem>>, %arg2: memref<96x3xf32, #tpu.memory_space<vmem>>, %arg3: memref<32x1xf32, #tpu.memory_space<vmem>>, %arg4: memref<32x1xf32, #tpu.memory_space<vmem>>, %arg5: memref<32x32xf32, #tpu.memory_space<vmem>>, %arg6: memref<32x1xf32, #tpu.memory_space<vmem>>, %arg7: memref<32x32xf32, #tpu.memory_space<vmem>>, %arg8: memref<32x1xf32, #tpu.memory_space<vmem>>, %arg9: memref<8x32xf32, #tpu.memory_space<vmem>>, %arg10: memref<8x1xf32, #tpu.memory_space<vmem>>, %arg11: memref<8x1024xf32, #tpu.memory_space<vmem>>) attributes {dimension_semantics = [#tpu.dimension_semantics<parallel>], iteration_bounds = array<i64: 4>, scalar_prefetch = 0 : i64, scratch_operands = 0 : i64, tpu.core_type = #tpu.core_type<tc>, window_params = [{transform_indices = @transform_0, window_bounds = array<i64: 3, 1024>}, {pipeline_mode = #tpu.pipeline_mode<synchronous>, transform_indices = @transform_1, window_bounds = array<i64: 96, 3>}, {pipeline_mode = #tpu.pipeline_mode<synchronous>, transform_indices = @transform_2, window_bounds = array<i64: 32, 1>}, {pipeline_mode = #tpu.pipeline_mode<synchronous>, transform_indices = @transform_3, window_bounds = array<i64: 32, 1>}, {pipeline_mode = #tpu.pipeline_mode<synchronous>, transform_indices = @transform_4, window_bounds = array<i64: 32, 32>}, {pipeline_mode = #tpu.pipeline_mode<synchronous>, transform_indices = @transform_5, window_bounds = array<i64: 32, 1>}, {pipeline_mode = #tpu.pipeline_mode<synchronous>, transform_indices = @transform_6, window_bounds = array<i64: 32, 32>}, {pipeline_mode = #tpu.pipeline_mode<synchronous>, transform_indices = @transform_7, window_bounds = array<i64: 32, 1>}, {pipeline_mode = #tpu.pipeline_mode<synchronous>, transform_indices = @transform_8, window_bounds = array<i64: 8, 32>}, {pipeline_mode = #tpu.pipeline_mode<synchronous>, transform_indices = @transform_9, window_bounds = array<i64: 8, 1>}, {transform_indices = @transform_10, window_bounds = array<i64: 8, 1024>}]} {
    %c0 = arith.constant 0 : index
    %c0_0 = arith.constant 0 : index
    %0 = vector.load %arg1[%c0, %c0_0] : memref<3x1024xf32, #tpu.memory_space<vmem>>, vector<3x1024xf32>
    %c0_1 = arith.constant 0 : index
    %c0_2 = arith.constant 0 : index
    %1 = vector.load %arg2[%c0_1, %c0_2] : memref<96x3xf32, #tpu.memory_space<vmem>>, vector<96x3xf32>
    %cst = arith.constant dense<0.000000e+00> : vector<96x1024xf32>
    %2 = tpu.matmul %1, %0, %cst {dimension_numbers = #tpu.dot_dimension_numbers<[1], [0], [0], [1], [0, 0, 1, 1], [], []>} : vector<96x3xf32>, vector<3x1024xf32>, vector<96x1024xf32> -> vector<96x1024xf32>
    %3 = vector.extract_strided_slice %2 {offsets = [0, 0], sizes = [32, 1024], strides = [1, 1]} : vector<96x1024xf32> to vector<32x1024xf32>
    %4 = vector.extract_strided_slice %2 {offsets = [32, 0], sizes = [32, 1024], strides = [1, 1]} : vector<96x1024xf32> to vector<32x1024xf32>
    %5 = vector.extract_strided_slice %2 {offsets = [64, 0], sizes = [32, 1024], strides = [1, 1]} : vector<96x1024xf32> to vector<32x1024xf32>
    %cst_3 = arith.constant 1.00000095 : f32
    %6 = vector.broadcast %cst_3 : f32 to vector<32x1024xf32>
    %7 = arith.addf %6, %4 : vector<32x1024xf32>
    %8 = tpu.reciprocal %7 {approx = true} : vector<32x1024xf32> -> vector<32x1024xf32>
    %c0_4 = arith.constant 0 : index
    %c0_5 = arith.constant 0 : index
    %9 = vector.load %arg3[%c0_4, %c0_5] : memref<32x1xf32, #tpu.memory_space<vmem>>, vector<32x1xf32>
    %10 = vector.broadcast %9 : vector<32x1xf32> to vector<32x1024xf32>
    %11 = arith.mulf %10, %3 : vector<32x1024xf32>
    %12 = arith.mulf %11, %8 : vector<32x1024xf32>
    %13 = math.cos %12 : vector<32x1024xf32>
    %c0_6 = arith.constant 0 : index
    %c0_7 = arith.constant 0 : index
    %14 = vector.load %arg4[%c0_6, %c0_7] : memref<32x1xf32, #tpu.memory_space<vmem>>, vector<32x1xf32>
    %cst_8 = arith.constant 1.000000e+00 : f32
    %15 = vector.broadcast %cst_8 : f32 to vector<32x1024xf32>
    %16 = arith.subf %15, %4 : vector<32x1024xf32>
    %17 = vector.broadcast %14 : vector<32x1xf32> to vector<32x1024xf32>
    %18 = arith.mulf %17, %16 : vector<32x1024xf32>
    %19 = arith.mulf %18, %8 : vector<32x1024xf32>
    %20 = math.exp %19 : vector<32x1024xf32>
    %21 = arith.mulf %13, %20 : vector<32x1024xf32>
    %c0_9 = arith.constant 0 : index
    %c0_10 = arith.constant 0 : index
    %22 = vector.load %arg5[%c0_9, %c0_10] : memref<32x32xf32, #tpu.memory_space<vmem>>, vector<32x32xf32>
    %c0_11 = arith.constant 0 : index
    %c0_12 = arith.constant 0 : index
    %23 = vector.load %arg6[%c0_11, %c0_12] : memref<32x1xf32, #tpu.memory_space<vmem>>, vector<32x1xf32>
    %cst_13 = arith.constant dense<0.000000e+00> : vector<32x1024xf32>
    %24 = tpu.matmul %22, %21, %cst_13 {dimension_numbers = #tpu.dot_dimension_numbers<[1], [0], [0], [1], [0, 0, 1, 1], [], []>} : vector<32x32xf32>, vector<32x1024xf32>, vector<32x1024xf32> -> vector<32x1024xf32>
    %25 = vector.broadcast %23 : vector<32x1xf32> to vector<32x1024xf32>
    %26 = arith.addf %24, %25 : vector<32x1024xf32>
    %cst_14 = arith.constant 0.000000e+00 : f32
    %27 = vector.broadcast %cst_14 : f32 to vector<32x1024xf32>
    %28 = arith.maximumf %26, %27 : vector<32x1024xf32>
    %c0_15 = arith.constant 0 : index
    %c0_16 = arith.constant 0 : index
    %29 = vector.load %arg7[%c0_15, %c0_16] : memref<32x32xf32, #tpu.memory_space<vmem>>, vector<32x32xf32>
    %c0_17 = arith.constant 0 : index
    %c0_18 = arith.constant 0 : index
    %30 = vector.load %arg8[%c0_17, %c0_18] : memref<32x1xf32, #tpu.memory_space<vmem>>, vector<32x1xf32>
    %cst_19 = arith.constant dense<0.000000e+00> : vector<32x1024xf32>
    %31 = tpu.matmul %29, %28, %cst_19 {dimension_numbers = #tpu.dot_dimension_numbers<[1], [0], [0], [1], [0, 0, 1, 1], [], []>} : vector<32x32xf32>, vector<32x1024xf32>, vector<32x1024xf32> -> vector<32x1024xf32>
    %32 = arith.addf %31, %5 : vector<32x1024xf32>
    %33 = vector.broadcast %30 : vector<32x1xf32> to vector<32x1024xf32>
    %34 = arith.addf %32, %33 : vector<32x1024xf32>
    %cst_20 = arith.constant 0.000000e+00 : f32
    %35 = vector.broadcast %cst_20 : f32 to vector<32x1024xf32>
    %36 = arith.maximumf %34, %35 : vector<32x1024xf32>
    %c0_21 = arith.constant 0 : index
    %c0_22 = arith.constant 0 : index
    %37 = vector.load %arg9[%c0_21, %c0_22] : memref<8x32xf32, #tpu.memory_space<vmem>>, vector<8x32xf32>
    %c0_23 = arith.constant 0 : index
    %c0_24 = arith.constant 0 : index
    %38 = vector.load %arg10[%c0_23, %c0_24] : memref<8x1xf32, #tpu.memory_space<vmem>>, vector<8x1xf32>
    %cst_25 = arith.constant dense<0.000000e+00> : vector<8x1024xf32>
    %39 = tpu.matmul %37, %36, %cst_25 {dimension_numbers = #tpu.dot_dimension_numbers<[1], [0], [0], [1], [0, 0, 1, 1], [], []>} : vector<8x32xf32>, vector<32x1024xf32>, vector<8x1024xf32> -> vector<8x1024xf32>
    %40 = vector.broadcast %38 : vector<8x1xf32> to vector<8x1024xf32>
    %41 = arith.addf %39, %40 : vector<8x1024xf32>
    %c0_26 = arith.constant 0 : index
    %c0_27 = arith.constant 0 : index
    %42 = vector.load %arg11[%c0_26, %c0_27] : memref<8x1024xf32, #tpu.memory_space<vmem>>, vector<8x1024xf32>
    tpu.vector_store %arg11[%c0_26, %c0_27], %41 {strides = array<i32>} : memref<8x1024xf32, #tpu.memory_space<vmem>>, vector<8x1024xf32>,
    return
  }
  func.func @transform_0(%arg0: i32) -> (i32, i32) {
    %c0_i32 = arith.constant 0 : i32
    %c0_i32_0 = arith.constant 0 : i32
    return %c0_i32, %arg0 : i32, i32
  }
  func.func @transform_1(%arg0: i32) -> (i32, i32) {
    %c0_i32 = arith.constant 0 : i32
    %c0_i32_0 = arith.constant 0 : i32
    %c0_i32_1 = arith.constant 0 : i32
    return %c0_i32, %c0_i32_0 : i32, i32
  }
  func.func @transform_2(%arg0: i32) -> (i32, i32) {
    %c0_i32 = arith.constant 0 : i32
    %c0_i32_0 = arith.constant 0 : i32
    %c0_i32_1 = arith.constant 0 : i32
    return %c0_i32, %c0_i32_0 : i32, i32
  }
  func.func @transform_3(%arg0: i32) -> (i32, i32) {
    %c0_i32 = arith.constant 0 : i32
    %c0_i32_0 = arith.constant 0 : i32
    %c0_i32_1 = arith.constant 0 : i32
    return %c0_i32, %c0_i32_0 : i32, i32
  }
  func.func @transform_4(%arg0: i32) -> (i32, i32) {
    %c0_i32 = arith.constant 0 : i32
    %c0_i32_0 = arith.constant 0 : i32
    %c0_i32_1 = arith.constant 0 : i32
    return %c0_i32, %c0_i32_0 : i32, i32
  }
  func.func @transform_5(%arg0: i32) -> (i32, i32) {
    %c0_i32 = arith.constant 0 : i32
    %c0_i32_0 = arith.constant 0 : i32
    %c0_i32_1 = arith.constant 0 : i32
    return %c0_i32, %c0_i32_0 : i32, i32
  }
  func.func @transform_6(%arg0: i32) -> (i32, i32) {
    %c0_i32 = arith.constant 0 : i32
    %c0_i32_0 = arith.constant 0 : i32
    %c0_i32_1 = arith.constant 0 : i32
    return %c0_i32, %c0_i32_0 : i32, i32
  }
  func.func @transform_7(%arg0: i32) -> (i32, i32) {
    %c0_i32 = arith.constant 0 : i32
    %c0_i32_0 = arith.constant 0 : i32
    %c0_i32_1 = arith.constant 0 : i32
    return %c0_i32, %c0_i32_0 : i32, i32
  }
  func.func @transform_8(%arg0: i32) -> (i32, i32) {
    %c0_i32 = arith.constant 0 : i32
    %c0_i32_0 = arith.constant 0 : i32
    %c0_i32_1 = arith.constant 0 : i32
    return %c0_i32, %c0_i32_0 : i32, i32
  }
  func.func @transform_9(%arg0: i32) -> (i32, i32) {
    %c0_i32 = arith.constant 0 : i32
    %c0_i32_0 = arith.constant 0 : i32
    %c0_i32_1 = arith.constant 0 : i32
    return %c0_i32, %c0_i32_0 : i32, i32
  }
  func.func @transform_10(%arg0: i32) -> (i32, i32) {
    %c0_i32 = arith.constant 0 : i32
    %c0_i32_0 = arith.constant 0 : i32
    return %c0_i32, %arg0 : i32, i32
  }
}

</mosaic_0001>

<bundles_post_ra>
// kernel: _lambda_.1
= control target key start
LH: loop header
LB: loop body
LE: loop exit
PB: predicated region body
PF: predicated region fallthrough
CT: control target
= control target key end

     0   :  { %s12287_s0 = inlined_call_operand.hbm [shape: f32[3,4096], index: 0, kind: input, shape index: {}]   ;;  %s12288_s1 = inlined_call_operand.hbm [shape: f32[96,3], index: 1, kind: input, shape index: {}]   ;;  %s12289_s2 = inlined_call_operand.hbm [shape: f32[32,1], index: 2, kind: input, shape index: {}]   ;;  %s12290_s3 = inlined_call_operand.hbm [shape: f32[32,1], index: 3, kind: input, shape index: {}]   ;;  %s12291_s4 = inlined_call_operand.hbm [shape: f32[32,32], index: 4, kind: input, shape index: {}]   ;;  %s12292_s5 = inlined_call_operand.hbm [shape: f32[32,1], index: 5, kind: input, shape index: {}]   ;;  %s12293_s6 = inlined_call_operand.hbm [shape: f32[32,32], index: 6, kind: input, shape index: {}]   ;;  %s12294_s7 = inlined_call_operand.hbm [shape: f32[32,1], index: 7, kind: input, shape index: {}]   ;;  %s12295_s8 = inlined_call_operand.vmem [shape: f32[8,32], index: 8, kind: input, shape index: {}]   ;;  %s12296_s9 = inlined_call_operand.vmem [shape: f32[8,1], index: 9, kind: input, shape index: {}]   ;;  %s12297_s10 = inlined_call_operand.vmem [shape: f32[8,4096], index: 10, kind: output, shape index: {}]  }
   0x1   :  { %12475 = sst [smem:[#allocation126_spill]] %s12288_s1 }
   0x2   :  { %12476 = sst [smem:[#allocation127_spill]] %s12295_s8 }
   0x3   :  { %12477 = sst [smem:[#allocation128_spill]] %s12297_s10 }
   0x4   :  { %15 = vsyncpa [#allocation3], 0 }
   0x5   :  { %17 = vsyncpa [#allocation3 + $0x1], 0 }
   0x6   :  { %18 = vsyncpa [#allocation5], 0 }
   0x7   :  { %19 = vsyncpa [#allocation8], 0 }
   0x8   :  { %20 = vsyncpa [#allocation11], 0 }
   0x9   :  { %21 = vsyncpa [#allocation14], 0  ;;  %s7338_s13 = smov 0   ;;  %s7340_s14 = smov 0  }
   0xa   :  { %s7342_s15 = smov 0   ;;  %s7344_s16 = smov 0  }
   0xb LB: > { %s7265_s17 = smov [#allocation4]   ;;  %s12298_s19 = sadd.s32 4294967295, %s7263_s16   ;;  %s7263_s16 = sphi %s7344_s16, %s12865_s16   ;;  %s7259_s15 = sphi %s7342_s15, %s12864_s15   ;;  %s7255_s14 = sphi %s7340_s14, %s12863_s14   ;;  %s7251_s13 = sphi %s7338_s13, %s12862_s13  }
   0xc   : > { %s285_s18 = sshll.u32 %s7265_s17, 4  ;;  %p6099_p0 = scmp.ge.s32.totalorder %s7263_s16, 1  ;;  %s7367_s18 = int_to_ptr.vmem [resolvable:$true] %s285_s18 }
   0xd   : > { %p7362_p1 = scmp.eq.s32.totalorder %s12298_s19, 0  ;;  %p273_p2 = scmp.lt.s32.totalorder %s7263_s16, 5 }
   0xe   : > { %s7266_s22 = smov [#allocation7]   ;;  %s7267_s25 = smov [#allocation10]  }
   0xf   : > { %s12478_s20 = scalar_select %p7362_p1, 1, 0 }
  0x10   : > { %p7369_p3 = pnand %p6099_p0, %p273_p2  ;;  %s311_s23 = sshll.u32 %s7266_s22, 4  ;;  %s7381_s23 = int_to_ptr.vmem [resolvable:$true] %s311_s23 }
  0x11   : > { %s337_s26 = sshll.u32 %s7267_s25, 4  ;;  %s12481_s1 = sld [smem:[#allocation126_spill]]  ;;  %s7383_s26 = int_to_ptr.vmem [resolvable:$true] %s337_s26 }
  0x12   : > { %s12479_s21 = scalar_select %p7369_p3, 1, 0 }
  0x13   : > { %p6631_p4 = pneg %p7369_p3 }
  0x15   : > { %p7377_p5 = pnand %p6631_p4, %p7362_p1 }
  0x17   : > { %s6987_s29 = scalar_lea.hbm %s12481_s1, 1536  ;;  %p7393_p7 = pneg %p7377_p5 }
  0x18   : > { %p6988_p6 = scmp.ne.s32.totalorder %s12481_s1, %s6987_s29  ;;  %p6994_p10 = scmp.lt.u32.totalorder %s6987_s29, %s12481_s1 }
  0x1a   : > { %p6990_p8 = pnand %p7393_p7, %p6988_p6 }
  0x1c   : > { %p6991_p9 = pneg %p6990_p8 }
  0x1e   : > { %p6996_p11 = pnand %p6994_p10, %p6991_p9 }
  0x20   : > { %6999 = shalt.err (!%p6996_p11)
}
  0x21   : > { %s7000_s25 = scalar_lea.vmem %s7367_s18, 1536  ;;  %p7008_p2 = scmp.lt.s32.totalorder %s7367_s18, %s7367_s18 }
  0x22   : > { %p7001_p12 = scmp.ne.s32.totalorder %s7367_s18, %s7000_s25  ;;  %p7009_p4 = scmp.lt.s32.totalorder %s7000_s25, %s7000_s25 }
  0x24   : > { %p7003_p13 = pnand %p7001_p12, %p7393_p7  ;;  %p7010_p6 = por %p7009_p4, %p7008_p2 }
  0x26   : > { %p7004_p0 = pneg %p7003_p13 }
  0x28   : > { %p7011_p8 = pnand %p7010_p6, %p7004_p0 }
  0x2a   : > { %7014 = shalt.err (!%p7011_p8)
}
  0x2b   : > { %s7268_s27 = smov 128   ;;  %s7269_s28 = smov 8  }
  0x2c   : > { %6634 = dma.hbm_to_vmem [thread:$0]  (!%p7377_p5), %s12481_s1, 1536, %s7367_s18, [#allocation5], %s7268_s27, %s7268_s27, %s7269_s28  }
  0x2d   : > { %s7015_s22 = scalar_lea.hbm %s12290_s3, 512 }
  0x2e   : > { %p7016_p9 = scmp.ne.s32.totalorder %s12290_s3, %s7015_s22  ;;  %p7022_p12 = scmp.lt.u32.totalorder %s7015_s22, %s12290_s3 }
  0x30   : > { %p7018_p10 = pnand %p7016_p9, %p7393_p7 }
  0x32   : > { %p7019_p11 = pneg %p7018_p10 }
  0x34   : > { %p7024_p13 = pnand %p7022_p12, %p7019_p11 }
  0x36   : > { %7027 = shalt.err (!%p7024_p13)
}
  0x37   : > { %s7028_s18 = scalar_lea.vmem %s7381_s23, 512  ;;  %p7036_p6 = scmp.lt.s32.totalorder %s7381_s23, %s7381_s23 }
  0x38   : > { %p7029_p0 = scmp.ne.s32.totalorder %s7381_s23, %s7028_s18  ;;  %p7037_p8 = scmp.lt.s32.totalorder %s7028_s18, %s7028_s18 }
  0x3a   : > { %p7031_p2 = pnand %p7029_p0, %p7393_p7  ;;  %p7038_p9 = por %p7037_p8, %p7036_p6 }
  0x3c   : > { %p7032_p4 = pneg %p7031_p2 }
  0x3e   : > { %p7039_p10 = pnand %p7038_p9, %p7032_p4 }
  0x40   : > { %7042 = shalt.err (!%p7039_p10)
}
  0x41   : > { %6640 = dma.hbm_to_vmem [thread:$0]  (!%p7377_p5), %s12290_s3, 512, %s7381_s23, [#allocation8], %s7268_s27, %s7268_s27, %s7269_s28  }
  0x42   : > { %s7043_s30 = scalar_lea.hbm %s12292_s5, 512 }
  0x43   : > { %p7044_p11 = scmp.ne.s32.totalorder %s12292_s5, %s7043_s30  ;;  %p7050_p0 = scmp.lt.u32.totalorder %s7043_s30, %s12292_s5 }
  0x45   : > { %p7046_p12 = pnand %p7044_p11, %p7393_p7 }
  0x47   : > { %p7047_p13 = pneg %p7046_p12 }
  0x49   : > { %p7052_p2 = pnand %p7050_p0, %p7047_p13 }
  0x4b   : > { %7055 = shalt.err (!%p7052_p2)
}
  0x4c   : > { %s7056_s23 = scalar_lea.vmem %s7383_s26, 512  ;;  %p7064_p9 = scmp.lt.s32.totalorder %s7383_s26, %s7383_s26 }
  0x4d   : > { %p7057_p4 = scmp.ne.s32.totalorder %s7383_s26, %s7056_s23  ;;  %p7065_p10 = scmp.lt.s32.totalorder %s7056_s23, %s7056_s23 }
  0x4f   : > { %p7059_p6 = pnand %p7057_p4, %p7393_p7  ;;  %p7066_p11 = por %p7065_p10, %p7064_p9 }
  0x51   : > { %p7060_p8 = pneg %p7059_p6 }
  0x53   : > { %p7067_p12 = pnand %p7066_p11, %p7060_p8 }
  0x55   : > { %7070 = shalt.err (!%p7067_p12)
}
  0x56   : > { %6646 = dma.hbm_to_vmem [thread:$0]  (!%p7377_p5), %s12292_s5, 512, %s7383_s26, [#allocation11], %s7268_s27, %s7268_s27, %s7269_s28  }
  0x57   : > { %s7270_s10 = smov [#allocation6]   ;;  %s7271_s29 = smov [#allocation9]  }
  0x58   : > { %s298_s19 = sshll.u32 %s7270_s10, 4  ;;  %s324_s30 = sshll.u32 %s7271_s29, 4  ;;  %s299_s19 = int_to_ptr.vmem [resolvable:$true] %s298_s19  ;;  %s325_s30 = int_to_ptr.vmem [resolvable:$true] %s324_s30 }
  0x59   : > { %s7071_s22 = scalar_lea.hbm %s12289_s2, 512 }
  0x5a   : > { %p7072_p13 = scmp.ne.s32.totalorder %s12289_s2, %s7071_s22  ;;  %p7078_p4 = scmp.lt.u32.totalorder %s7071_s22, %s12289_s2 }
  0x5c   : > { %p7074_p0 = pnand %p7072_p13, %p7393_p7 }
  0x5e   : > { %p7075_p2 = pneg %p7074_p0 }
  0x60   : > { %p7080_p6 = pnand %p7078_p4, %p7075_p2 }
  0x62   : > { %7083 = shalt.err (!%p7080_p6)
}
  0x63   : > { %s7084_s26 = scalar_lea.vmem %s299_s19, 512  ;;  %p7092_p11 = scmp.lt.s32.totalorder %s299_s19, %s299_s19 }
  0x64   : > { %p7085_p8 = scmp.ne.s32.totalorder %s299_s19, %s7084_s26  ;;  %p7093_p12 = scmp.lt.s32.totalorder %s7084_s26, %s7084_s26 }
  0x66   : > { %p7087_p9 = pnand %p7085_p8, %p7393_p7  ;;  %p7094_p3 = por %p7093_p12, %p7092_p11 }
  0x68   : > { %p7088_p10 = pneg %p7087_p9 }
  0x6a   : > { %p7095_p1 = pnand %p7094_p3, %p7088_p10 }
  0x6c   : > { %7098 = shalt.err (!%p7095_p1)
}
  0x6d   : > { %6637 = dma.hbm_to_vmem [thread:$0]  (!%p7377_p5), %s12289_s2, 512, %s299_s19, [#allocation5], %s7268_s27, %s7268_s27, %s7269_s28  }
  0x6e   : > { %s7099_s11 = scalar_lea.hbm %s12291_s4, 512 }
  0x6f   : > { %p7100_p3 = scmp.ne.s32.totalorder %s12291_s4, %s7099_s11  ;;  %p7106_p0 = scmp.lt.u32.totalorder %s7099_s11, %s12291_s4 }
  0x71   : > { %p7102_p1 = pnand %p7100_p3, %p7393_p7 }
  0x73   : > { %p7103_p13 = pneg %p7102_p1 }
  0x75   : > { %p7108_p2 = pnand %p7106_p0, %p7103_p13 }
  0x77   : > { %7111 = shalt.err (!%p7108_p2)
}
  0x78   : > { %s7112_s18 = scalar_lea.vmem %s325_s30, 512  ;;  %p7120_p9 = scmp.lt.s32.totalorder %s325_s30, %s325_s30 }
  0x79   : > { %p7113_p4 = scmp.ne.s32.totalorder %s325_s30, %s7112_s18  ;;  %p7121_p10 = scmp.lt.s32.totalorder %s7112_s18, %s7112_s18 }
  0x7b   : > { %p7115_p6 = pnand %p7113_p4, %p7393_p7  ;;  %p7122_p11 = por %p7121_p10, %p7120_p9 }
  0x7d   : > { %p7116_p8 = pneg %p7115_p6 }
  0x7f   : > { %p7123_p12 = pnand %p7122_p11, %p7116_p8 }
  0x81   : > { %7126 = shalt.err (!%p7123_p12)
}
  0x82   : > { %6643 = dma.hbm_to_vmem [thread:$0]  (!%p7377_p5), %s12291_s4, 512, %s325_s30, [#allocation8], %s7268_s27, %s7268_s27, %s7269_s28  }
  0x83   : > { %s7272_s1 = smov [#allocation12]   ;;  %s7273_s10 = smov [#allocation13]  }
  0x84   : > { %s350_s8 = sshll.u32 %s7272_s1, 4  ;;  %s363_s29 = sshll.u32 %s7273_s10, 4  ;;  %s351_s8 = int_to_ptr.vmem [resolvable:$true] %s350_s8  ;;  %s364_s29 = int_to_ptr.vmem [resolvable:$true] %s363_s29 }
  0x85   : > { %s7127_s22 = scalar_lea.hbm %s12293_s6, 512 }
  0x86   : > { %p7128_p3 = scmp.ne.s32.totalorder %s12293_s6, %s7127_s22  ;;  %p7134_p0 = scmp.lt.u32.totalorder %s7127_s22, %s12293_s6 }
  0x88   : > { %p7130_p1 = pnand %p7128_p3, %p7393_p7 }
  0x8a   : > { %p7131_p13 = pneg %p7130_p1 }
  0x8c   : > { %p7136_p2 = pnand %p7134_p0, %p7131_p13 }
  0x8e   : > { %7139 = shalt.err (!%p7136_p2)
}
  0x8f   : > { %s7140_s30 = scalar_lea.vmem %s351_s8, 512  ;;  %p7148_p9 = scmp.lt.s32.totalorder %s351_s8, %s351_s8 }
  0x90   : > { %p7141_p4 = scmp.ne.s32.totalorder %s351_s8, %s7140_s30  ;;  %p7149_p10 = scmp.lt.s32.totalorder %s7140_s30, %s7140_s30 }
  0x92   : > { %p7143_p6 = pnand %p7141_p4, %p7393_p7  ;;  %p7150_p11 = por %p7149_p10, %p7148_p9 }
  0x94   : > { %p7144_p8 = pneg %p7143_p6 }
  0x96   : > { %p7151_p12 = pnand %p7150_p11, %p7144_p8 }
  0x98   : > { %7154 = shalt.err (!%p7151_p12)
}
  0x99   : > { %6649 = dma.hbm_to_vmem [thread:$0]  (!%p7377_p5), %s12293_s6, 512, %s351_s8, [#allocation11], %s7268_s27, %s7268_s27, %s7269_s28  }
  0x9a   : > { %s7155_s17 = scalar_lea.hbm %s12294_s7, 512 }
  0x9b   : > { %p7156_p3 = scmp.ne.s32.totalorder %s12294_s7, %s7155_s17  ;;  %p7162_p0 = scmp.lt.u32.totalorder %s7155_s17, %s12294_s7 }
  0x9d   : > { %p7158_p1 = pnand %p7156_p3, %p7393_p7 }
  0x9f   : > { %p7159_p13 = pneg %p7158_p1 }
  0xa1   : > { %p7164_p2 = pnand %p7162_p0, %p7159_p13 }
  0xa3   : > { %7167 = shalt.err (!%p7164_p2)
}
  0xa4   : > { %s7168_s19 = scalar_lea.vmem %s364_s29, 512  ;;  %p7176_p9 = scmp.lt.s32.totalorder %s364_s29, %s364_s29 }
  0xa5   : > { %p7169_p4 = scmp.ne.s32.totalorder %s364_s29, %s7168_s19  ;;  %p7177_p10 = scmp.lt.s32.totalorder %s7168_s19, %s7168_s19 }
  0xa7   : > { %p7171_p6 = pnand %p7169_p4, %p7393_p7  ;;  %p7178_p11 = por %p7177_p10, %p7176_p9 }
  0xa9   : > { %p7172_p8 = pneg %p7171_p6 }
  0xab   : > { %p7179_p12 = pnand %p7178_p11, %p7172_p8 }
  0xad   : > { %7182 = shalt.err (!%p7179_p12)
}
  0xae   : > { %6652 = dma.hbm_to_vmem [thread:$0]  (!%p7377_p5), %s12294_s7, 512, %s364_s29, [#allocation14], %s7268_s27, %s7268_s27, %s7269_s28  }
  0xaf   : > { %s7554_s24 = sadd.s32 1, %s7263_s16   ;;  %s34_s26 = sadd.s32 1, %s7259_s15 }
  0xb0   : > { %s31_s12 = ssub.s32 %s7263_s16, %s7554_s24  ;;  %p41_p3 = scmp.ne.s32.totalorder %s7259_s15, %s7255_s14 }
  0xb1   : > { %p32_p7 = scmp.eq.s32.totalorder %s31_s12, 0  ;;  %p42_p1 = scmp.eq.s32.totalorder %s7263_s16, 0 }
  0xb2   : > { %p47_p13 = scmp.ne.s32.totalorder %s7255_s14, %s7251_s13  ;;  %p12483_p2 = scmp.ne.s32.totalorder %s12478_s20, 0 }
  0xb3   : > { %s7565_s1 = scalar_select %p32_p7, %s7259_s15, %s34_s26  }
  0xb4   : > { %p43_p0 = por %p42_p1, %p41_p3  ;;  %p7569_p4 = por %p12483_p2, %p47_p13 }
  0xb5   : > { %p6664_p6 = scmp.lt.s32.totalorder %s7263_s16, 4  ;;  %s383_s11 = sand.u32 1, %s7259_s15  }
  0xb6   : > { %s6108_s27 = sshll.u32 %s383_s11, 5  ;;  %s6344_s28 = sshll.u32 %s7263_s16, 9 }
  0xb7   : > { %s7579_s22 = scalar_lea.hbm %s12287_s0, %s6344_s28  ;;  %s387_s13 = scalar_lea.vmem [#allocation2], %s6108_s27 }
  0xb8   : > { %s395_s25 = sshll.u32 %s387_s13, 4  ;;  %p7583_p5 = pnand %p6664_p6, %p43_p0  ;;  %s7581_s25 = int_to_ptr.vmem [resolvable:$true] %s395_s25 }
  0xb9   : > { %s384_s18 = scalar_lea.sflag [#allocation3], %s383_s11  ;;  %s7183_s19 = scalar_lea.hbm %s7579_s22, 512 }
  0xba   : > { %p7184_p8 = scmp.ne.s32.totalorder %s7579_s22, %s7183_s19  ;;  %p7185_p9 = pneg %p7583_p5 }
  0xbb   : > { %s7188_s12 = scalar_lea.hbm %s12287_s0, 2048  ;;  %p7189_p12 = scmp.lt.u32.totalorder %s7579_s22, %s12287_s0 }
  0xbc   : > { %p7186_p10 = pnand %p7185_p9, %p7184_p8  ;;  %p7190_p7 = scmp.lt.u32.totalorder %s7188_s12, %s7183_s19 }
  0xbd   : > { %p7192_p1 = scmp.lt.u32.totalorder %s7183_s19, %s7579_s22 }
  0xbe   : > { %p7187_p11 = pneg %p7186_p10  ;;  %p7191_p3 = por %p7190_p7, %p7189_p12 }
  0xc0   : > { %p7193_p13 = por %p7192_p1, %p7191_p3 }
  0xc2   : > { %p7194_p0 = pnand %p7193_p13, %p7187_p11 }
  0xc4   : > { %7197 = shalt.err (!%p7194_p0)
}
  0xc5   : > { %s7198_s11 = scalar_lea.vmem %s7581_s25, 512  ;;  %s7274_s28 = smov [#allocation2]  }
  0xc6   : > { %p7199_p2 = scmp.ne.s32.totalorder %s7581_s25, %s7198_s11  ;;  %s7203_s29 = sshll.u32 %s7274_s28, 4  ;;  %s7204_s29 = int_to_ptr.vmem [resolvable:$false] %s7203_s29 }
  0xc7   : > { %s7205_s17 = scalar_lea.vmem %s7204_s29, 1024  ;;  %p7206_p10 = scmp.lt.s32.totalorder %s7581_s25, %s7204_s29 }
  0xc8   : > { %p7201_p6 = pnand %p7199_p2, %p7185_p9  ;;  %p7207_p12 = scmp.lt.s32.totalorder %s7205_s17, %s7198_s11 }
  0xca   : > { %p7202_p8 = pneg %p7201_p6  ;;  %p7208_p7 = por %p7207_p12, %p7206_p10 }
  0xcc   : > { %p7209_p3 = pnand %p7208_p7, %p7202_p8 }
  0xce   : > { %7212 = shalt.err (!%p7209_p3)
}
  0xcf   : > { %6656 = dma.hbm_to_vmem [thread:$0]  (!%p7583_p5), %s7579_s22, 512, %s7581_s25, %s384_s18  }
  0xd0   : > { %p12486_p11 = scmp.ne.s32.totalorder %s12479_s21, 0 }
  0xd2   : > { %404 = sbr.rel (%p12486_p11) target bundleno = 2078 (0x81e), region = 60 }
  0xd9   : > { %s406_s13 = sand.u32 1, %s7255_s14  }
  0xda   : > { %s6112_s19 = sshll.u32 %s406_s13, 5  ;;  %s407_s8 = scalar_lea.sflag [#allocation3], %s406_s13 }
  0xdb   : > { %s410_s30 = scalar_lea.vmem [#allocation2], %s6112_s19 }
  0xdc   : > { %7230 = dma.done.wait (%p7569_p4), %s407_s8, 512  }
  0xdd   : > { %7232 = vsyncadd (%p7569_p4), %s407_s8, 4294966784  ;;  %p12487_p9 = scmp.ne.s32.totalorder %s12478_s20, 0 }
  0xdf   : > { %7234 = dma.done.wait (%p12487_p9), [#allocation5], 2048  }
  0xe0   : > { %7236 = vsyncadd (%p12487_p9), [#allocation5], 4294965248 }
  0xe1   : > { %7238 = dma.done.wait (%p12487_p9), [#allocation8], 1024  }
  0xe2   : > { %7240 = vsyncadd (%p12487_p9), [#allocation8], 4294966272 }
  0xe3   : > { %7242 = dma.done.wait (%p12487_p9), [#allocation11], 1024  }
  0xe4   : > { %7244 = vsyncadd (%p12487_p9), [#allocation11], 4294966272 }
  0xe5   : > { %7246 = dma.done.wait (%p12487_p9), [#allocation14], 512  }
  0xe6   : > { %7248 = vsyncadd (%p12487_p9), [#allocation14], 4294966784  ;;  %v12302_v0 = vmov 0.0   ;;  %v7276_v1 = vmov 0   ;;  %v482_v2 = vld [vmem:[%s410_s30] sm:$0x77] }
  0xe7   : > { %624 = vmatprep.mubr.f32.mxu0 %v12302_v0  ;;  %761 = vmatprep.mubr.f32.mxu1 %v12302_v0  ;;  %vm543_vm0 = vcmask 1042432   ;;  %v483_v3 = vld [vmem:[%s410_s30 + $0x8] sm:$0x77]  ;;  %v502_v4 = vcombine.high %v482_v2, %v482_v2  ;;  %v484_v6 = vld [vmem:[%s410_s30 + $0x10] sm:$0x77]  ;;  %v7637_v8 = vld [vmem:[#allocation4] sm:$0xff] }
  0xe8   : > { %6721 = vset.pattern.permute.xlu0 %v7276_v1  ;;  %6722 = vset.pattern.permute.xlu1 %v7276_v1  ;;  %v503_v5 = vcombine.high %v483_v3, %v483_v3  ;;  %v485_v7 = vld [vmem:[%s410_s30 + $0x18] sm:$0x77]  ;;  %vm506_vm1 = vcmask 23552   ;;  %v504_v9 = vcombine.high %v484_v6, %v484_v6  ;;  %v7649_v11 = vld [vmem:[#allocation4 + $0x8] sm:$0xff]  ;;  %v1172_v12 = vld [vmem:[#allocation6] sm:$0xff]  ;;  %s12859_s25 = sld [smem:[#allocation127_spill]] }
  0xe9   : > { %6122 = vmatprep.subr.msk.mxu0 %vm543_vm0, %v502_v4  ;;  %v505_v10 = vcombine.high %v485_v7, %v485_v7  ;;  %v1174_v13 = vld [vmem:[#allocation6 + $0x10] sm:$0xff]  ;;  %1178 = vperm.xlu0 %6721, %v1172_v12   ;;  %v1173_v15 = vld [vmem:[#allocation6 + $0x8] sm:$0xff]  ;;  %v1175_v16 = vld [vmem:[#allocation6 + $0x18] sm:$0xff]  ;;  %s12860_s23 = sadd.s32 4294967295, %s7263_s16   ;;  %s12861_s27 = sld [smem:[#allocation128_spill]] }
  0xea   : > { %6136 = vmatprep.subr.msk.mxu1 %vm543_vm0, %v503_v5  ;;  %6123 = vmatpush1.msk.msra.mxu0 %vm543_vm0, %v482_v2  ;;  %v7661_v14 = vld [vmem:[#allocation4 + $0x10] sm:$0xff]  ;;  %v7669_v17 = vld [vmem:[#allocation4 + $0x18] sm:$0xff]  ;;  %v4556_v18 = vld [vmem:[#allocation7] sm:$0xff]  ;;  %s6120_s18 = sshll.u32 %s12860_s23, 3 }
  0xeb   : > { %6137 = vmatpush1.msk.msra.mxu1 %vm543_vm0, %v483_v3  ;;  %6124 = vmatmul.mubr.msk.f32.vlgmr.msra.gmra.mrb[0].mxu0 %vm506_vm1, %v7637_v8  ;;  %v4557_v19 = vld [vmem:[#allocation7 + $0x8] sm:$0xff]  ;;  %v7677_v20 = vld [vmem:[#allocation4 + $0x20] sm:$0xff]  ;;  %v4558_v21 = vld [vmem:[#allocation7 + $0x10] sm:$0xff]  ;;  %p477_p4 = scmp.lt.s32.totalorder %s6120_s18, 31 }
  0xec   : > { %6138 = vmatmul.mubr.msk.f32.vlgmr.msra.gmra.mrb[0].mxu1 %vm506_vm1, %v7637_v8  ;;  %630 = vmatprep.mubr.f32.mxu0 %v12302_v0  ;;  %v4559_v22 = vld [vmem:[#allocation7 + $0x18] sm:$0xff]  ;;  %v7685_v23 = vld [vmem:[#allocation4 + $0x28] sm:$0xff]  ;;  %v4776_v24 = vld [vmem:[#allocation10] sm:$0xff] }
  0xed   : > { %767 = vmatprep.mubr.f32.mxu1 %v12302_v0  ;;  %6150 = vmatprep.subr.msk.mxu0 %vm543_vm0, %v504_v9  ;;  %v4777_v25 = vld [vmem:[#allocation10 + $0x8] sm:$0xff]  ;;  %v7693_v26 = vld [vmem:[#allocation4 + $0x30] sm:$0xff]  ;;  %v4779_v28 = vld [vmem:[#allocation10 + $0x18] sm:$0xff]  ;;  %s12867_s18 = smov (!%p477_p4, %s6120_s18), 31 }
  0xee   : > { %6164 = vmatprep.subr.msk.mxu1 %vm543_vm0, %v505_v10  ;;  %6151 = vmatpush1.msk.msra.mxu0 %vm543_vm0, %v484_v6  ;;  %v4778_v27 = vld [vmem:[#allocation10 + $0x10] sm:$0xff]  ;;  %v7701_v29 = vld [vmem:[#allocation4 + $0x38] sm:$0xff]  ;;  %v5205_v30 = vld [vmem:[#allocation13] sm:$0xff]  ;;  %s6121_s16 = sshll.u32 %s12867_s18, 3 }
  0xef   : > { %6165 = vmatpush1.msk.msra.mxu1 %vm543_vm0, %v485_v7  ;;  %6125 = vmatmul.mubr.msk.f32.gmra.mrb[2].mxu0 %vm506_vm1, %v7649_v11  ;;  %v5206_v31 = vld [vmem:[#allocation13 + $0x8] sm:$0xff]  ;;  %v494_v32 = vld [vmem:[#allocation4 + $0x40] sm:$0xff]  ;;  %v5207_v33 = vld [vmem:[#allocation13 + $0x10] sm:$0xff]  ;;  %s12244_s11 = scalar_lea.vmem %s12861_s27, %s6121_s16 }
  0xf0   : > { %6139 = vmatmul.mubr.msk.f32.gmra.mrb[2].mxu1 %vm506_vm1, %v7649_v11  ;;  %636 = vmatprep.mubr.f32.mxu0 %v12302_v0  ;;  %v5208_v34 = vld [vmem:[#allocation13 + $0x18] sm:$0xff]  ;;  %v495_v35 = vld [vmem:[#allocation4 + $0x48] sm:$0xff]  ;;  %v5662_v36 = vld [vmem:[%s12296_s9] sm:$0xff] }
  0xf1   : > { %773 = vmatprep.mubr.f32.mxu1 %v12302_v0  ;;  %1188 = vperm.xlu1 %6722, %v1174_v13   ;;  %v496_v37 = vld [vmem:[#allocation4 + $0x50] sm:$0xff]  ;;  %v497_v38 = vld [vmem:[#allocation4 + $0x58] sm:$0xff] }
  0xf2   : > { %1183 = vperm.xlu0 %6721, %v1173_v15  }
  0xf3   : > { %6126 = vmatmul.mubr.msk.f32.gmra.mrb[4].mxu0 %vm506_vm1, %v7661_v14 }
  0xf4   : > { %6140 = vmatmul.mubr.msk.f32.gmra.mrb[4].mxu1 %vm506_vm1, %v7661_v14  ;;  %642 = vmatprep.mubr.f32.mxu0 %v12302_v0 }
  0xf5   : > { %779 = vmatprep.mubr.f32.mxu1 %v12302_v0  ;;  %1193 = vperm.xlu1 %6722, %v1175_v16  }
  0xf6   : > { %4594 = vperm.xlu0 %6721, %v4556_v18  }
  0xf7   : > { %6127 = vmatmul.mubr.msk.f32.gmra.mrb[6].mxu0 %vm506_vm1, %v7669_v17 }
  0xf8   : > { %6141 = vmatmul.mubr.msk.f32.gmra.mrb[6].mxu1 %vm506_vm1, %v7669_v17  ;;  %648 = vmatprep.mubr.f32.mxu0 %v12302_v0 }
  0xf9   : > { %785 = vmatprep.mubr.f32.mxu1 %v12302_v0  ;;  %4599 = vperm.xlu1 %6722, %v4557_v19  }
  0xfa   : > { %4604 = vperm.xlu0 %6721, %v4558_v21  }
  0xfb   : > { %6128 = vmatmul.mubr.msk.f32.gmra.mrb[8].mxu0 %vm506_vm1, %v7677_v20 }
  0xfc   : > { %6142 = vmatmul.mubr.msk.f32.gmra.mrb[8].mxu1 %vm506_vm1, %v7677_v20  ;;  %654 = vmatprep.mubr.f32.mxu0 %v12302_v0 }
  0xfd   : > { %791 = vmatprep.mubr.f32.mxu1 %v12302_v0  ;;  %4609 = vperm.xlu1 %6722, %v4559_v22  }
  0xfe   : > { %4782 = vperm.xlu0 %6721, %v4776_v24  }
  0xff   : > { %6129 = vmatmul.mubr.msk.f32.gmra.mrb[10].mxu0 %vm506_vm1, %v7685_v23 }
 0x100   : > { %6143 = vmatmul.mubr.msk.f32.gmra.mrb[10].mxu1 %vm506_vm1, %v7685_v23  ;;  %660 = vmatprep.mubr.f32.mxu0 %v12302_v0 }
 0x101   : > { %797 = vmatprep.mubr.f32.mxu1 %v12302_v0  ;;  %4787 = vperm.xlu1 %6722, %v4777_v25  }
 0x102   : > { %4792 = vperm.xlu0 %6721, %v4778_v27  }
 0x103   : > { %6130 = vmatmul.mubr.msk.f32.gmra.mrb[12].mxu0 %vm506_vm1, %v7693_v26 }
 0x104   : > { %6144 = vmatmul.mubr.msk.f32.gmra.mrb[12].mxu1 %vm506_vm1, %v7693_v26  ;;  %666 = vmatprep.mubr.f32.mxu0 %v12302_v0 }
 0x105   : > { %803 = vmatprep.mubr.f32.mxu1 %v12302_v0  ;;  %4797 = vperm.xlu1 %6722, %v4779_v28  }
 0x106   : > { %5579 = vperm.xlu0 %6721, %v5205_v30  }
 0x107   : > { %6131 = vmatmul.mubr.msk.f32.gmra.mrb[14].mxu0 %vm506_vm1, %v7701_v29 }
 0x108   : > { %6145 = vmatmul.mubr.msk.f32.gmra.mrb[14].mxu1 %vm506_vm1, %v7701_v29  ;;  %672 = vmatprep.mubr.f32.mxu0 %v12302_v0 }
 0x109   : > { %809 = vmatprep.mubr.f32.mxu1 %v12302_v0  ;;  %5584 = vperm.xlu1 %6722, %v5206_v31  }
 0x10a   : > { %5589 = vperm.xlu0 %6721, %v5207_v33  }
 0x10b   : > { %6132 = vmatmul.mubr.msk.f32.gmra.mrb[16].mxu0 %vm506_vm1, %v494_v32 }
 0x10c   : > { %6146 = vmatmul.mubr.msk.f32.gmra.mrb[16].mxu1 %vm506_vm1, %v494_v32  ;;  %678 = vmatprep.mubr.f32.mxu0 %v12302_v0 }
 0x10d   : > { %815 = vmatprep.mubr.f32.mxu1 %v12302_v0  ;;  %5594 = vperm.xlu1 %6722, %v5208_v34  }
 0x10e   : > { %5665 = vperm.xlu0 %6721, %v5662_v36  }
 0x10f   : > { %6133 = vmatmul.mubr.msk.f32.gmra.mrb[18].mxu0 %vm506_vm1, %v495_v35 }
 0x110   : > { %6147 = vmatmul.mubr.msk.f32.gmra.mrb[18].mxu1 %vm506_vm1, %v495_v35  ;;  %684 = vmatprep.mubr.f32.mxu0 %v12302_v0 }
 0x111   : > { %821 = vmatprep.mubr.f32.mxu1 %v12302_v0 }
 0x113   : > { %6134 = vmatmul.mubr.msk.f32.gmra.mrb[20].mxu0 %vm506_vm1, %v496_v37 }
 0x114   : > { %6148 = vmatmul.mubr.msk.f32.gmra.mrb[20].mxu1 %vm506_vm1, %v496_v37  ;;  %690 = vmatprep.mubr.f32.mxu0 %v12302_v0 }
 0x115   : > { %827 = vmatprep.mubr.f32.mxu1 %v12302_v0 }
 0x117   : > { %6135 = vmatmul.mubr.msk.f32.gmra.mrb[22].mxu0 %vm506_vm1, %v497_v38 }
 0x118   : > { %6149 = vmatmul.mubr.msk.f32.gmra.mrb[22].mxu1 %vm506_vm1, %v497_v38  ;;  %898 = vmatprep.mubr.f32.mxu0 %v12302_v0 }
 0x119   : > { %1035 = vmatprep.mubr.f32.mxu1 %v12302_v0 }
 0x11b   : > { %6152 = vmatmul.mubr.msk.f32.vlgmr.msra.gmra.mrb[24].mxu0 %vm506_vm1, %v7637_v8 }
 0x11c   : > { %6166 = vmatmul.mubr.msk.f32.vlgmr.msra.gmra.mrb[24].mxu1 %vm506_vm1, %v7637_v8  ;;  %904 = vmatprep.mubr.f32.mxu0 %v12302_v0 }
 0x11d   : > { %1041 = vmatprep.mubr.f32.mxu1 %v12302_v0 }
 0x11f   : > { %6153 = vmatmul.mubr.msk.f32.gmra.mrb[26].mxu0 %vm506_vm1, %v7649_v11 }
 0x120   : > { %6167 = vmatmul.mubr.msk.f32.gmra.mrb[26].mxu1 %vm506_vm1, %v7649_v11  ;;  %910 = vmatprep.mubr.f32.mxu0 %v12302_v0 }
 0x121   : > { %1047 = vmatprep.mubr.f32.mxu1 %v12302_v0 }
 0x123   : > { %6154 = vmatmul.mubr.msk.f32.gmra.mrb[28].mxu0 %vm506_vm1, %v7661_v14 }
 0x124   : > { %6168 = vmatmul.mubr.msk.f32.gmra.mrb[28].mxu1 %vm506_vm1, %v7661_v14  ;;  %916 = vmatprep.mubr.f32.mxu0 %v12302_v0 }
 0x125   : > { %1053 = vmatprep.mubr.f32.mxu1 %v12302_v0 }
 0x127   : > { %6155 = vmatmul.mubr.msk.f32.gmra.mrb[30].mxu0 %vm506_vm1, %v7669_v17 }
 0x128   : > { %6169 = vmatmul.mubr.msk.f32.gmra.mrb[30].mxu1 %vm506_vm1, %v7669_v17  ;;  %922 = vmatprep.mubr.f32.mxu0 %v12302_v0 }
 0x129   : > { %1059 = vmatprep.mubr.f32.mxu1 %v12302_v0 }
 0x12b   : > { %6156 = vmatmul.mubr.msk.f32.gmra.mrb[32].mxu0 %vm506_vm1, %v7677_v20 }
 0x12c   : > { %6170 = vmatmul.mubr.msk.f32.gmra.mrb[32].mxu1 %vm506_vm1, %v7677_v20  ;;  %928 = vmatprep.mubr.f32.mxu0 %v12302_v0 }
 0x12d   : > { %1065 = vmatprep.mubr.f32.mxu1 %v12302_v0 }
 0x12f   : > { %6157 = vmatmul.mubr.msk.f32.gmra.mrb[34].mxu0 %vm506_vm1, %v7685_v23 }
 0x130   : > { %6171 = vmatmul.mubr.msk.f32.gmra.mrb[34].mxu1 %vm506_vm1, %v7685_v23  ;;  %934 = vmatprep.mubr.f32.mxu0 %v12302_v0 }
 0x131   : > { %1071 = vmatprep.mubr.f32.mxu1 %v12302_v0 }
 0x133   : > { %6158 = vmatmul.mubr.msk.f32.gmra.mrb[36].mxu0 %vm506_vm1, %v7693_v26 }
 0x134   : > { %6172 = vmatmul.mubr.msk.f32.gmra.mrb[36].mxu1 %vm506_vm1, %v7693_v26  ;;  %940 = vmatprep.mubr.f32.mxu0 %v12302_v0 }
 0x135   : > { %1077 = vmatprep.mubr.f32.mxu1 %v12302_v0 }
 0x137   : > { %6159 = vmatmul.mubr.msk.f32.gmra.mrb[38].mxu0 %vm506_vm1, %v7701_v29 }
 0x138   : > { %6173 = vmatmul.mubr.msk.f32.gmra.mrb[38].mxu1 %vm506_vm1, %v7701_v29  ;;  %946 = vmatprep.mubr.f32.mxu0 %v12302_v0 }
 0x139   : > { %1083 = vmatprep.mubr.f32.mxu1 %v12302_v0 }
 0x13b   : > { %6160 = vmatmul.mubr.msk.f32.gmra.mrb[40].mxu0 %vm506_vm1, %v494_v32 }
 0x13c   : > { %6174 = vmatmul.mubr.msk.f32.gmra.mrb[40].mxu1 %vm506_vm1, %v494_v32  ;;  %952 = vmatprep.mubr.f32.mxu0 %v12302_v0 }
 0x13d   : > { %1089 = vmatprep.mubr.f32.mxu1 %v12302_v0 }
 0x13f   : > { %6161 = vmatmul.mubr.msk.f32.gmra.mrb[42].mxu0 %vm506_vm1, %v495_v35 }
 0x140   : > { %6175 = vmatmul.mubr.msk.f32.gmra.mrb[42].mxu1 %vm506_vm1, %v495_v35  ;;  %958 = vmatprep.mubr.f32.mxu0 %v12302_v0 }
 0x141   : > { %1095 = vmatprep.mubr.f32.mxu1 %v12302_v0 }
 0x143   : > { %6162 = vmatmul.mubr.msk.f32.gmra.mrb[44].mxu0 %vm506_vm1, %v496_v37 }
 0x144   : > { %6176 = vmatmul.mubr.msk.f32.gmra.mrb[44].mxu1 %vm506_vm1, %v496_v37  ;;  %964 = vmatprep.mubr.f32.mxu0 %v12302_v0 }
 0x145   : > { %1101 = vmatprep.mubr.f32.mxu1 %v12302_v0 }
 0x147   : > { %6163 = vmatmul.mubr.msk.f32.gmra.mrb[46].mxu0 %vm506_vm1, %v497_v38 }
 0x148   : > { %6177 = vmatmul.mubr.msk.f32.gmra.mrb[46].mxu1 %vm506_vm1, %v497_v38  ;;  %4877 = vmatprep.mubr.f32.mxu0 %v12302_v0 }
 0x149   : > { %4966 = vmatprep.mubr.f32.mxu1 %v12302_v0 }
 0x168   : > { %v7808_v51 = vpop.permute.xlu0 %1178 }
 0x171   : > { %v7818_v62 = vpop.permute.xlu0 %1183 }
 0x175   : > { %v7828_v6 = vpop.permute.xlu0 %4594 }
 0x1be   : > { %v626_v39 = vpop.f32.mrb[0].mxu0 }
 0x1bf   : > { %v763_v40 = vpop.f32.mrb[0].mxu1  ;;  %v628_v41 = vpop.f32.mrb[1].mxu0  ;;  %v1196_v15 = vmul.f32 %v7808_v51, %v626_v39 }
 0x1c0   : > { %v765_v42 = vpop.f32.mrb[1].mxu1  ;;  %v1198_v20 = vmul.f32 %v7808_v51, %v763_v40  ;;  %v1197_v21 = vmul.f32 %v7808_v51, %v628_v41 }
 0x1c1   : > { %v1199_v22 = vmul.f32 %v7808_v51, %v765_v42 }
 0x1c2   : > { %v7792_v43 = vpop.f32.mrb[2].mxu0 }
 0x1c3   : > { %v7794_v44 = vpop.f32.mrb[2].mxu1  ;;  %v7796_v45 = vpop.f32.mrb[3].mxu0 }
 0x1c4   : > { %v7798_v46 = vpop.f32.mrb[3].mxu1 }
 0x1c6   : > { %v7800_v47 = vpop.f32.mrb[4].mxu0 }
 0x1c7   : > { %v7802_v48 = vpop.f32.mrb[4].mxu1  ;;  %v7804_v49 = vpop.f32.mrb[5].mxu0 }
 0x1c8   : > { %v7806_v50 = vpop.f32.mrb[5].mxu1 }
 0x1ca   : > { %v7810_v52 = vpop.f32.mrb[6].mxu0 }
 0x1cb   : > { %v7812_v53 = vpop.f32.mrb[6].mxu1  ;;  %v7814_v54 = vpop.f32.mrb[7].mxu0 }
 0x1cc   : > { %v7816_v55 = vpop.f32.mrb[7].mxu1 }
 0x1ce   : > { %v650_v56 = vpop.f32.mrb[8].mxu0 }
 0x1cf   : > { %v787_v57 = vpop.f32.mrb[8].mxu1  ;;  %v1108_v58 = vadd.f32 1.000001, %v650_v56  ;;  %v652_v60 = vpop.f32.mrb[9].mxu0  ;;  %v4560_v7 = vsub.f32 1.0, %v650_v56 }
 0x1d0   : > { %v1110_v59 = vadd.f32 1.000001, %v787_v57  ;;  %v789_v61 = vpop.f32.mrb[9].mxu1  ;;  %v1109_v63 = vadd.f32 1.000001, %v652_v60  ;;  %v4562_v10 = vsub.f32 1.0, %v787_v57  ;;  %v7868_v57 = vpop.permute.xlu1 %1188 }
 0x1d1   : > { %6727 = vrcp.f32 %v1108_v58  ;;  %v1111_v1 = vadd.f32 1.000001, %v789_v61  ;;  %v4561_v13 = vsub.f32 1.0, %v652_v60  ;;  %v4563_v14 = vsub.f32 1.0, %v789_v61  ;;  %12492 = vst [vmem:[#allocation24_spill] sm:$0xff] %v7868_v57  ;;  %v7870_v58 = vpop.permute.xlu0 %4604 }
 0x1d2   : > { %6729 = vrcp.f32 %v1110_v59  ;;  %v7820_v2 = vpop.f32.mrb[10].mxu0  ;;  %v4612_v16 = vmul.f32 %v7828_v6, %v4560_v7  ;;  %v4614_v23 = vmul.f32 %v7828_v6, %v4562_v10  ;;  %12493 = vst [vmem:[#allocation25_spill] sm:$0xff] %v7870_v58  ;;  %v1214_v7 = vmul.f32 %v7868_v57, %v7802_v48 }
 0x1d3   : > { %v7822_v3 = vpop.f32.mrb[10].mxu1  ;;  %6731 = vrcp.f32 %v1109_v63  ;;  %v7824_v4 = vpop.f32.mrb[11].mxu0  ;;  %v4613_v29 = vmul.f32 %v7828_v6, %v4561_v13  ;;  %v4615_v34 = vmul.f32 %v7828_v6, %v4563_v14  ;;  %v1212_v63 = vmul.f32 %v7868_v57, %v7800_v47 }
 0x1d4   : > { %6733 = vrcp.f32 %v1111_v1  ;;  %v7826_v5 = vpop.f32.mrb[11].mxu1  ;;  %v1118_v48 = vadd.f32 1.000001, %v7822_v3 }
 0x1d6   : > { %v662_v8 = vpop.f32.mrb[12].mxu0 }
 0x1d7   : > { %v799_v9 = vpop.f32.mrb[12].mxu1  ;;  %v7830_v11 = vpop.f32.mrb[13].mxu0  ;;  %v1124_v30 = vadd.f32 1.000001, %v662_v8  ;;  %v4576_v42 = vsub.f32 1.0, %v662_v8 }
 0x1d8   : > { %v7832_v12 = vpop.f32.mrb[13].mxu1  ;;  %v1126_v35 = vadd.f32 1.000001, %v799_v9  ;;  %v1125_v41 = vadd.f32 1.000001, %v7830_v11  ;;  %v4578_v59 = vsub.f32 1.0, %v799_v9 }
 0x1d9   : > { %6735 = vrcp.f32 %v1124_v30  ;;  %v1127_v56 = vadd.f32 1.000001, %v7832_v12  ;;  %v4628_v1 = vmul.f32 %v7870_v58, %v4576_v42  ;;  %v1116_v8 = vadd.f32 1.000001, %v7820_v2 }
 0x1da   : > { %v7836_v17 = vpop.f32.mrb[14].mxu0  ;;  %6737 = vrcp.f32 %v1126_v35  ;;  %v4630_v9 = vmul.f32 %v7870_v58, %v4578_v59  ;;  %v4579_v35 = vsub.f32 1.0, %v7832_v12 }
 0x1db   : > { %v7838_v18 = vpop.f32.mrb[14].mxu1  ;;  %v6728_v19 = vpop.eup %6727  ;;  %6739 = vrcp.f32 %v1125_v41  ;;  %v1215_v41 = vmul.f32 %v7868_v57, %v7806_v50 }
 0x1dc   : > { %v7844_v24 = vpop.f32.mrb[15].mxu0  ;;  %v7846_v25 = vpop.f32.mrb[15].mxu1  ;;  %v7848_v27 = vmul.f32 %v6728_v19, %v1196_v15  ;;  %v7850_v28 = vmul.f32 %v6728_v19, %v4612_v16  ;;  %6741 = vrcp.f32 %v1127_v56 }
 0x1dd   : > { %v6730_v26 = vpop.eup %6729  ;;  %6743 = vrcp.f32 %v1116_v8  ;;  %v4631_v8 = vmul.f32 %v7870_v58, %v4579_v35 }
 0x1de   : > { %12488 = vst [vmem:[#allocation20_spill] sm:$0xff] %v7848_v27  ;;  %v6732_v31 = vpop.eup %6731  ;;  %v7853_v32 = vmul.f32 %v6730_v26, %v1198_v20  ;;  %v7855_v33 = vmul.f32 %v6730_v26, %v4614_v23  ;;  %6745 = vrcp.f32 %v1118_v48 }
 0x1df   : > { %v6734_v36 = vpop.eup %6733  ;;  %v7858_v37 = vmul.f32 %v6732_v31, %v1197_v21  ;;  %v7860_v38 = vmul.f32 %v6732_v31, %v4613_v29  ;;  %v4577_v21 = vsub.f32 1.0, %v7830_v11  ;;  %v1213_v31 = vmul.f32 %v7868_v57, %v7804_v49 }
 0x1e0   : > { %12489 = vst [vmem:[#allocation21_spill] sm:$0xff] %v7853_v32  ;;  %v7862_v39 = vmul.f32 %v6734_v36, %v1199_v22  ;;  %v7864_v40 = vmul.f32 %v6734_v36, %v4615_v34  ;;  %v1263_v34 = vand.u32 2139095040, %v7848_v27  ;;  %v1119_v49 = vadd.f32 1.000001, %v7826_v5 }
 0x1e1   : > { %12490 = vst [vmem:[#allocation22_spill] sm:$0xff] %v7858_v37  ;;  %v4629_v11 = vmul.f32 %v7870_v58, %v4577_v21  ;;  %v4678_v57 = vmul.f32 1.442695, %v7860_v38 }
 0x1e2   : > { %12491 = vst [vmem:[#allocation23_spill] sm:$0xff] %v7862_v39 }
 0x1e3   : > { %v6736_v60 = vpop.eup %6735 }
 0x1e4   : > { %v6738_v61 = vpop.eup %6737  ;;  %v7878_v10 = vmul.f32 %v6736_v60, %v1212_v63  ;;  %v7880_v13 = vmul.f32 %v6736_v60, %v4628_v1  ;;  %v1117_v60 = vadd.f32 1.000001, %v7824_v4  ;;  %v1264_v1 = vshrl.u32 %v1263_v34, 23 }
 0x1e5   : > { %v7883_v14 = vmul.f32 %v6738_v61, %v1214_v7  ;;  %v7889_v47 = vmul.f32 %v6738_v61, %v4630_v9  ;;  %v6740_v26 = vpop.eup %6739  ;;  %v1469_v7 = vand.u32 2139095040, %v7853_v32  ;;  %v1366_v9 = vand.u32 2139095040, %v7858_v37  ;;  %v7945_v32 = vpop.permute.xlu1 %1193 }
 0x1e6   : > { %12494 = vst [vmem:[#allocation26_spill] sm:$0xff] %v7878_v10  ;;  %v6742_v36 = vpop.eup %6741  ;;  %v7912_v42 = vmul.f32 %v6740_v26, %v1213_v31  ;;  %v7920_v61 = vmul.f32 %v6740_v26, %v4629_v11  ;;  %6747 = vrcp.f32 %v1117_v60  ;;  %v6178_v0 = vadd.s32 4294967169, %v1264_v1  ;;  %12507 = vst [vmem:[#allocation39_spill] sm:$0xff] %v7945_v32 }
 0x1e7   : > { %12495 = vst [vmem:[#allocation27_spill] sm:$0xff] %v7883_v14  ;;  %v7927_v50 = vmul.f32 %v6742_v36, %v1215_v41  ;;  %v7931_v48 = vmul.f32 %v6742_v36, %v4631_v8  ;;  %v7937_v26 = vpop.eup %6743  ;;  %v1204_v41 = vmul.f32 %v7818_v62, %v7792_v43  ;;  %v1470_v35 = vshrl.u32 %v1469_v7, 23 }
 0x1e8   : > { %12496 = vst [vmem:[#allocation28_spill] sm:$0xff] %v7912_v42  ;;  %12504 = vst [vmem:[#allocation36_spill] sm:$0xff] %v7937_v26  ;;  %6749 = vrcp.f32 %v1119_v49  ;;  %v1367_v36 = vshrl.u32 %v1366_v9, 23  ;;  %v1572_v8 = vand.u32 2139095040, %v7862_v39  ;;  %v7948_v27 = vpop.eup %6745  ;;  %v1206_v43 = vmul.f32 %v7818_v62, %v7794_v44 }
 0x1e9   : > { %12501 = vst [vmem:[#allocation33_spill] sm:$0xff] %v7927_v50  ;;  %12508 = vst [vmem:[#allocation40_spill] sm:$0xff] %v7948_v27  ;;  %v7951_v37 = vmul.f32 %v7937_v26, %v1204_v41  ;;  %v1205_v49 = vmul.f32 %v7818_v62, %v7796_v45  ;;  %v1207_v1 = vmul.f32 %v7818_v62, %v7798_v46  ;;  %v1270_v26 = vadd.s32 1, %v6178_v0  ;;  %v7976_v46 = vpop.permute.xlu1 %4599 }
 0x1ea   : > { %v7969_v41 = vmul.f32 %v7945_v32, %v7810_v52  ;;  %v6186_v39 = vadd.s32 4294967169, %v1470_v35  ;;  %v1573_v44 = vshrl.u32 %v1572_v8, 23  ;;  %v4570_v45 = vsub.f32 1.0, %v7822_v3 }
 0x1eb   : > { %12509 = vst [vmem:[#allocation41_spill] sm:$0xff] %v7951_v37  ;;  %v2087_v52 = vand.u32 2139095040, %v7951_v37  ;;  %v4569_v0 = vsub.f32 1.0, %v7824_v4  ;;  %v1132_v35 = vadd.f32 1.000001, %v7836_v17  ;;  %v7991_v8 = vmul.f32 %v7945_v32, %v7814_v54 }
 0x1ec   : > { %v7995_v3 = vmul.f32 %v7945_v32, %v7816_v55  ;;  %vm1271_vm2 = vcmp.gt.s32.totalorder %v1270_v26, 0  ;;  %v1476_v37 = vadd.s32 1, %v6186_v39  ;;  %v6190_v55 = vadd.s32 4294967169, %v1573_v44 }
 0x1ed   : > { %v8017_v39 = vmul.f32 %v7976_v46, %v4569_v0  ;;  %6751 = vrcp.f32 %v1132_v35  ;;  %v4682_v44 = vmul.f32 1.442695, %v7864_v40 }
 0x1ee   : > { %v7885_v15 = vpop.f32.mrb[24].mxu0  ;;  %vm1477_vm3 = vcmp.gt.s32.totalorder %v1476_v37, 0  ;;  %v1579_v35 = vadd.s32 1, %v6190_v55 }
 0x1ef   : > { %v7887_v16 = vpop.f32.mrb[24].mxu1  ;;  %v7891_v19 = vpop.f32.mrb[25].mxu0  ;;  %12515 = vst [vmem:[#allocation47_spill] sm:$0xff] %v8017_v39 }
 0x1f0   : > { %v7893_v20 = vpop.f32.mrb[25].mxu1  ;;  %v8007_v54 = vpop.eup %6747  ;;  %vm1580_vm5 = vcmp.gt.s32.totalorder %v1579_v35, 0 }
 0x1f1   : > { %12512 = vst [vmem:[#allocation44_spill] sm:$0xff] %v8007_v54 }
 0x1f2   : > { %v7897_v22 = vpop.f32.mrb[26].mxu0 }
 0x1f3   : > { %v7899_v23 = vpop.f32.mrb[26].mxu1  ;;  %v7901_v29 = vpop.f32.mrb[27].mxu0 }
 0x1f4   : > { %v7903_v30 = vpop.f32.mrb[27].mxu1 }
 0x1f6   : > { %v7914_v56 = vpop.f32.mrb[28].mxu0 }
 0x1f7   : > { %12497 = vst [vmem:[#allocation29_spill] sm:$0xff] %v7914_v56  ;;  %v7916_v59 = vpop.f32.mrb[28].mxu1  ;;  %v7922_v63 = vpop.f32.mrb[29].mxu0  ;;  %v2088_v56 = vshrl.u32 %v2087_v52, 23  ;;  %v8033_v52 = vmul.f32 %v8007_v54, %v1205_v49  ;;  %v1478_v49 = vsel %vm1477_vm3, %v1476_v37, 0 }
 0x1f8   : > { %12498 = vst [vmem:[#allocation30_spill] sm:$0xff] %v7916_v59  ;;  %12499 = vst [vmem:[#allocation31_spill] sm:$0xff] %v7922_v63  ;;  %v7924_v12 = vpop.f32.mrb[29].mxu1  ;;  %v4680_v63 = vmul.f32 1.442695, %v7855_v33 }
 0x1f9   : > { %12500 = vst [vmem:[#allocation32_spill] sm:$0xff] %v7924_v12  ;;  %v7980_v12 = vmul.f32 %v7945_v32, %v7812_v53  ;;  %v4676_v53 = vmul.f32 1.442695, %v7850_v28  ;;  %v8011_v28 = vmul.f32 %v7976_v46, %v4570_v45  ;;  %12517 = vst [vmem:[#allocation49_spill] sm:$0xff] %v8033_v52 }
 0x1fa   : > { %v7933_v21 = vpop.f32.mrb[30].mxu0 }
 0x1fb   : > { %12502 = vst [vmem:[#allocation34_spill] sm:$0xff] %v7933_v21  ;;  %v7935_v31 = vpop.f32.mrb[30].mxu1  ;;  %v7939_v11 = vpop.f32.mrb[31].mxu0  ;;  %v7973_v21 = vmul.f32 %v7948_v27, %v1206_v43  ;;  %v4571_v43 = vsub.f32 1.0, %v7826_v5  ;;  %12513 = vst [vmem:[#allocation45_spill] sm:$0xff] %v8011_v28  ;;  %6753 = vpow2.f32 %v4676_v53 }
 0x1fc   : > { %12503 = vst [vmem:[#allocation35_spill] sm:$0xff] %v7935_v31  ;;  %12505 = vst [vmem:[#allocation37_spill] sm:$0xff] %v7939_v11  ;;  %v7941_v34 = vpop.f32.mrb[31].mxu1  ;;  %v6182_v31 = vadd.s32 4294967169, %v1367_v36  ;;  %v8013_v5 = vpop.eup %6749  ;;  %6755 = vpow2.f32 %v4680_v63 }
 0x1fd   : > { %12506 = vst [vmem:[#allocation38_spill] sm:$0xff] %v7941_v34  ;;  %v4568_v34 = vsub.f32 1.0, %v7820_v2  ;;  %12510 = vst [vmem:[#allocation42_spill] sm:$0xff] %v7973_v21  ;;  %v2293_v32 = vand.u32 2139095040, %v7973_v21  ;;  %v8026_v45 = vmul.f32 %v7976_v46, %v4571_v43  ;;  %v8037_v53 = vmul.f32 %v8013_v5, %v1207_v1 }
 0x1fe   : > { %v7953_v60 = vpop.f32.mrb[32].mxu0  ;;  %v1373_v58 = vadd.s32 1, %v6182_v31  ;;  %12514 = vst [vmem:[#allocation46_spill] sm:$0xff] %v8013_v5  ;;  %v1272_v31 = vsel %vm1271_vm2, %v1270_v26, 0  ;;  %6757 = vpow2.f32 %v4678_v57  ;;  %v6210_v43 = vadd.s32 4294967169, %v2088_v56 }
 0x1ff   : > { %v7955_v11 = vpop.f32.mrb[32].mxu1  ;;  %v7963_v7 = vpop.f32.mrb[33].mxu0  ;;  %v8005_v59 = vmul.f32 %v7976_v46, %v4568_v34  ;;  %12516 = vst [vmem:[#allocation48_spill] sm:$0xff] %v8026_v45  ;;  %v2294_v26 = vshrl.u32 %v2293_v32, 23  ;;  %12518 = vst [vmem:[#allocation50_spill] sm:$0xff] %v8037_v53  ;;  %v8039_v40 = vand.u32 31, %v1272_v31  ;;  %6759 = vpow2.f32 %v4682_v44 }
 0x200   : > { %v7965_v9 = vpop.f32.mrb[33].mxu1  ;;  %vm1374_vm4 = vcmp.gt.s32.totalorder %v1373_v58, 0  ;;  %v8042_v21 = vadd.f32 1.000001, %v7838_v18  ;;  %v1112_v0 = vadd.f32 1.000001, %v7953_v60 }
 0x201   : > { %12511 = vst [vmem:[#allocation43_spill] sm:$0xff] %v8005_v59  ;;  %12519 = vst [vmem:[#allocation51_spill] sm:$0xff] %v8039_v40  ;;  %v1114_v32 = vadd.f32 1.000001, %v7955_v11  ;;  %v8052_v1 = vshrl.u32 %v1272_v31, 5  ;;  %v1375_v57 = vsel %vm1374_vm4, %v1373_v58, 0 }
 0x202   : > { %v7985_v2 = vpop.f32.mrb[34].mxu0  ;;  %v2190_v56 = vand.u32 2139095040, %v8033_v52  ;;  %v1113_v5 = vadd.f32 1.000001, %v7963_v7  ;;  %v6218_v54 = vadd.s32 4294967169, %v2294_v26  ;;  %v2396_v37 = vand.u32 2139095040, %v8037_v53  ;;  %v8069_v52 = vpop.eup %6751 }
 0x203   : > { %v7987_v36 = vpop.f32.mrb[34].mxu1  ;;  %v7999_v27 = vpop.f32.mrb[35].mxu0  ;;  %12521 = vst [vmem:[#allocation53_spill] sm:$0xff] %v8052_v1  ;;  %6761 = vrcp.f32 %v1112_v0  ;;  %v8060_v44 = vshrl.u32 %v1478_v49, 5  ;;  %v2094_v39 = vadd.s32 1, %v6210_v43  ;;  %v8064_v31 = vsub.s32 32, %v8039_v40 }
 0x204   : > { %v8001_v4 = vpop.f32.mrb[35].mxu1  ;;  %6763 = vrcp.f32 %v1114_v32  ;;  %v8066_v58 = vand.u32 31, %v1478_v49  ;;  %v1115_v1 = vadd.f32 1.000001, %v7965_v9  ;;  %12526 = vst [vmem:[#allocation58_spill] sm:$0xff] %v8069_v52  ;;  %v8071_v26 = vand.u32 31, %v1375_v57 }
 0x205   : > { %12523 = vst [vmem:[#allocation55_spill] sm:$0xff] %v8060_v44  ;;  %12524 = vst [vmem:[#allocation56_spill] sm:$0xff] %v8064_v31  ;;  %6765 = vrcp.f32 %v1113_v5  ;;  %v1581_v53 = vsel %vm1580_vm5, %v1579_v35, 0  ;;  %v2191_v0 = vshrl.u32 %v2190_v56, 23  ;;  %v1120_v44 = vadd.f32 1.000001, %v7985_v2  ;;  %v8074_v43 = vpop.eup %6753 }
 0x206   : > { %v8019_v33 = vpop.f32.mrb[36].mxu0  ;;  %12525 = vst [vmem:[#allocation57_spill] sm:$0xff] %v8066_v58  ;;  %12527 = vst [vmem:[#allocation59_spill] sm:$0xff] %v8071_v26  ;;  %v2397_v32 = vshrl.u32 %v2396_v37, 23  ;;  %6767 = vrcp.f32 %v1115_v1  ;;  %v1122_v49 = vadd.f32 1.000001, %v7987_v36  ;;  %v8079_v40 = vpop.eup %6755 }
 0x207   : > { %v8021_v34 = vpop.f32.mrb[36].mxu1  ;;  %v8028_v28 = vpop.f32.mrb[37].mxu0  ;;  %12528 = vst [vmem:[#allocation60_spill] sm:$0xff] %v8074_v43  ;;  %12529 = vst [vmem:[#allocation61_spill] sm:$0xff] %v8079_v40  ;;  %vm2095_vm6 = vcmp.gt.s32.totalorder %v2094_v39, 0  ;;  %v4564_v31 = vsub.f32 1.0, %v7953_v60  ;;  %6769 = vrcp.f32 %v1120_v44 }
 0x208   : > { %v8030_v38 = vpop.f32.mrb[37].mxu1  ;;  %v8083_v35 = vsub.s32 32, %v8066_v58  ;;  %v8085_v56 = vshrl.u32 %v1375_v57, 5  ;;  %v4566_v43 = vsub.f32 1.0, %v7955_v11  ;;  %6771 = vrcp.f32 %v1122_v49 }
 0x209   : > { %v8091_v1 = vsub.s32 32, %v8071_v26  ;;  %v8093_v37 = vshrl.u32 %v1581_v53, 5  ;;  %v8095_v40 = vand.u32 31, %v1581_v53  ;;  %v4565_v60 = vsub.f32 1.0, %v7963_v7 }
 0x20a   : > { %v8044_v59 = vpop.f32.mrb[38].mxu0  ;;  %12530 = vst [vmem:[#allocation62_spill] sm:$0xff] %v8083_v35  ;;  %12531 = vst [vmem:[#allocation63_spill] sm:$0xff] %v8085_v56  ;;  %v2096_v44 = vsel %vm2095_vm6, %v2094_v39, 0  ;;  %v6214_v57 = vadd.s32 4294967169, %v2191_v0  ;;  %v6222_v58 = vadd.s32 4294967169, %v2397_v32  ;;  %v1200_v35 = vmul.f32 %v7808_v51, %v7885_v15 }
 0x20b   : > { %v8046_v63 = vpop.f32.mrb[38].mxu1  ;;  %v8050_v55 = vpop.f32.mrb[39].mxu0  ;;  %12533 = vst [vmem:[#allocation65_spill] sm:$0xff] %v8091_v1  ;;  %12534 = vst [vmem:[#allocation66_spill] sm:$0xff] %v8093_v37  ;;  %v3117_v49 = vand.u32 2139095040, %v7883_v14  ;;  %v1202_v53 = vmul.f32 %v7808_v51, %v7887_v16  ;;  %v4618_v7 = vmul.f32 %v7828_v6, %v4566_v43  ;;  %v4567_v39 = vsub.f32 1.0, %v7965_v9 }
 0x20c   : > { %12520 = vst [vmem:[#allocation52_spill] sm:$0xff] %v8050_v55  ;;  %v8057_v45 = vpop.f32.mrb[39].mxu1  ;;  %v2911_v55 = vand.u32 2139095040, %v7878_v10  ;;  %v8076_v10 = vadd.s32 1, %v6218_v54  ;;  %v8088_v54 = vpop.eup %6757  ;;  %v1201_v32 = vmul.f32 %v7808_v51, %v7891_v19  ;;  %v4617_v15 = vmul.f32 %v7828_v6, %v4565_v60 }
 0x20d   : > { %12522 = vst [vmem:[#allocation54_spill] sm:$0xff] %v8057_v45  ;;  %12532 = vst [vmem:[#allocation64_spill] sm:$0xff] %v8088_v54  ;;  %v4616_v54 = vmul.f32 %v7828_v6, %v4564_v31  ;;  %v4572_v43 = vsub.f32 1.0, %v7985_v2  ;;  %v1123_v9 = vadd.f32 1.000001, %v8001_v4  ;;  %v2197_v26 = vadd.s32 1, %v6214_v57 }
 0x20e   : > { %v2912_v5 = vshrl.u32 %v2911_v55, 23  ;;  %v8098_v55 = vpop.eup %6759  ;;  %vm2301_vm7 = vcmp.gt.s32.totalorder %v8076_v10, 0  ;;  %v2403_v1 = vadd.s32 1, %v6222_v58  ;;  %v4619_v60 = vmul.f32 %v7828_v6, %v4567_v39 }
 0x20f   : > { %12535 = vst [vmem:[#allocation67_spill] sm:$0xff] %v8098_v55  ;;  %v6762_v37 = vpop.eup %6761  ;;  %v1121_v55 = vadd.f32 1.000001, %v7999_v27  ;;  %v3118_v2 = vshrl.u32 %v3117_v49, 23  ;;  %v1208_v58 = vmul.f32 %v7818_v62, %v7897_v22  ;;  %v3014_v6 = vand.u32 2139095040, %v7912_v42 }
 0x210   : > { %v6242_v11 = vadd.s32 4294967169, %v2912_v5  ;;  %v6764_v0 = vpop.eup %6763  ;;  %v8112_v5 = vmul.f32 %v6762_v37, %v1200_v35  ;;  %v8114_v14 = vmul.f32 %v6762_v37, %v4616_v54  ;;  %v1133_v54 = vadd.f32 1.000001, %v7844_v24 }
 0x211   : > { %v6766_v31 = vpop.eup %6765  ;;  %v8117_v56 = vmul.f32 %v6764_v0, %v1202_v53  ;;  %v8119_v16 = vmul.f32 %v6764_v0, %v4618_v7  ;;  %v1203_v37 = vmul.f32 %v7808_v51, %v7893_v20  ;;  %6773 = vrcp.f32 %v1121_v55 }
 0x212   : > { %12536 = vst [vmem:[#allocation68_spill] sm:$0xff] %v8112_v5  ;;  %v8123_v45 = vmul.f32 %v6766_v31, %v1201_v32  ;;  %v8125_v19 = vmul.f32 %v6766_v31, %v4617_v15  ;;  %v6768_v35 = vpop.eup %6767  ;;  %v2918_v7 = vadd.s32 1, %v6242_v11  ;;  %6775 = vrcp.f32 %v8042_v21 }
 0x213   : > { %12537 = vst [vmem:[#allocation69_spill] sm:$0xff] %v8117_v56  ;;  %v6770_v53 = vpop.eup %6769  ;;  %v8134_v0 = vmul.f32 %v6768_v35, %v1203_v37  ;;  %v8136_v32 = vmul.f32 %v6768_v35, %v4619_v60  ;;  %v4624_v15 = vmul.f32 %v7976_v46, %v4572_v43  ;;  %6777 = vrcp.f32 %v1123_v9 }
 0x214   : > { %12538 = vst [vmem:[#allocation70_spill] sm:$0xff] %v8123_v45  ;;  %v6772_v57 = vpop.eup %6771  ;;  %v8139_v51 = vand.u32 31, %v2096_v44  ;;  %v1210_v20 = vmul.f32 %v7818_v62, %v7899_v23  ;;  %v8144_v55 = vmul.f32 %v6770_v53, %v1208_v58  ;;  %v2302_v22 = vsel %vm2301_vm7, %v8076_v10, 0 }
 0x215   : > { %12539 = vst [vmem:[#allocation71_spill] sm:$0xff] %v8134_v0  ;;  %vm2198_vm8 = vcmp.gt.s32.totalorder %v2197_v26, 0  ;;  %6779 = vrcp.f32 %v1133_v54  ;;  %v8149_v21 = vmul.f32 %v6770_v53, %v4624_v15  ;;  %vm2404_vm9 = vcmp.gt.s32.totalorder %v2403_v1, 0 }
 0x216   : > { %12540 = vst [vmem:[#allocation72_spill] sm:$0xff] %v8144_v55  ;;  %vm2919_vm10 = vcmp.gt.s32.totalorder %v2918_v7, 0  ;;  %v6250_v11 = vadd.s32 4294967169, %v3118_v2  ;;  %v8151_v49 = vmul.f32 %v6772_v57, %v1210_v20  ;;  %v3220_v39 = vand.u32 2139095040, %v7927_v50 }
 0x217   : > { %v8156_v23 = vmul.f32 %v8069_v52, %v7969_v41  ;;  %v1135_v31 = vadd.f32 1.000001, %v7846_v25  ;;  %v4574_v43 = vsub.f32 1.0, %v7987_v36  ;;  %v8161_v10 = vsub.s32 32, %v8095_v40 }
 0x218   : > { %12541 = vst [vmem:[#allocation73_spill] sm:$0xff] %v8151_v49  ;;  %v8163_v9 = vand.u32 31, %v2302_v22  ;;  %v4708_v35 = vmul.f32 1.442695, %v7880_v13  ;;  %v3015_v54 = vshrl.u32 %v3014_v6, 23  ;;  %v8166_v37 = vshrl.u32 %v2096_v44, 5 }
 0x219   : > { %12542 = vst [vmem:[#allocation74_spill] sm:$0xff] %v8156_v23  ;;  %v8169_v60 = vsub.s32 32, %v8139_v51  ;;  %v8171_v53 = vshrl.u32 %v2302_v22, 5  ;;  %v2199_v41 = vsel %vm2198_vm8, %v2197_v26, 0  ;;  %v2405_v2 = vsel %vm2404_vm9, %v2403_v1, 0 }
 0x21a   : > { %12543 = vst [vmem:[#allocation75_spill] sm:$0xff] %v8163_v9  ;;  %v2920_v36 = vsel %vm2919_vm10, %v2918_v7, 0  ;;  %v3124_v58 = vadd.s32 1, %v6250_v11  ;;  %v4573_v15 = vsub.f32 1.0, %v7999_v27  ;;  %v3221_v52 = vshrl.u32 %v3220_v39, 23 }
 0x21b   : > { %12544 = vst [vmem:[#allocation76_spill] sm:$0xff] %v8171_v53  ;;  %v6774_v20 = vpop.eup %6773  ;;  %v3735_v13 = vand.u32 2139095040, %v8156_v23  ;;  %6781 = vrcp.f32 %v1135_v31  ;;  %v4626_v44 = vmul.f32 %v7976_v46, %v4574_v43  ;;  %v8182_v22 = vsub.s32 32, %v8163_v9 }
 0x21c   : > { %v8179_v6 = vpop.eup %6775  ;;  %6783 = vpow2.f32 %v4708_v35  ;;  %v6246_v26 = vadd.s32 4294967169, %v3015_v54  ;;  %v1209_v1 = vmul.f32 %v7818_v62, %v7901_v29  ;;  %v8186_v11 = vand.u32 31, %v2199_v41 }
 0x21d   : > { %12545 = vst [vmem:[#allocation77_spill] sm:$0xff] %v8179_v6  ;;  %v6778_v7 = vpop.eup %6777  ;;  %v8188_v27 = vand.u32 31, %v2405_v2  ;;  %v4712_v39 = vmul.f32 1.442695, %v7889_v47  ;;  %v8191_v31 = vmul.f32 %v6772_v57, %v4626_v44  ;;  %v8193_v43 = vand.u32 31, %v2920_v36 }
 0x21e   : > { %v1211_v23 = vmul.f32 %v7818_v62, %v7903_v30  ;;  %v8197_v50 = vmul.f32 %v6774_v20, %v1209_v1  ;;  %v4625_v35 = vmul.f32 %v7976_v46, %v4573_v15  ;;  %vm3125_vm11 = vcmp.gt.s32.totalorder %v3124_v58, 0 }
 0x21f   : > { %12546 = vst [vmem:[#allocation78_spill] sm:$0xff] %v8193_v43  ;;  %v8200_v54 = vpop.eup %6779  ;;  %v4710_v29 = vmul.f32 1.442695, %v7920_v61  ;;  %v6254_v42 = vadd.s32 4294967169, %v3221_v52  ;;  %v3736_v53 = vshrl.u32 %v3735_v13, 23  ;;  %v3021_v9 = vadd.s32 1, %v6246_v26 }
 0x220   : > { %12547 = vst [vmem:[#allocation79_spill] sm:$0xff] %v8197_v50  ;;  %12548 = vst [vmem:[#allocation80_spill] sm:$0xff] %v8200_v54  ;;  %v8205_v47 = vmul.f32 %v8179_v6, %v7980_v12  ;;  %v8207_v57 = vmul.f32 %v6774_v20, %v4625_v35  ;;  %v8209_v44 = vmul.f32 %v6778_v7, %v1211_v23  ;;  %v8211_v62 = vshrl.u32 %v2199_v41, 5 }
 0x221   : > { %v8214_v30 = vsub.s32 32, %v8186_v11  ;;  %v8216_v15 = vshrl.u32 %v2405_v2, 5  ;;  %6785 = vpow2.f32 %v4712_v39  ;;  %v8219_v61 = vsub.s32 32, %v8188_v27 }
 0x222   : > { %12549 = vst [vmem:[#allocation81_spill] sm:$0xff] %v8205_v47  ;;  %v8221_v52 = vshrl.u32 %v2920_v36, 5  ;;  %v3126_v13 = vsel %vm3125_vm11, %v3124_v58, 0  ;;  %v8225_v12 = vmul.f32 %v8200_v54, %v7991_v8  ;;  %v3227_v23 = vadd.s32 1, %v6254_v42 }
 0x223   : > { %v6274_v20 = vadd.s32 4294967169, %v3736_v53  ;;  %v4575_v41 = vsub.f32 1.0, %v8001_v4  ;;  %v1128_v26 = vadd.f32 1.000001, %v8019_v33  ;;  %v8230_v2 = vsub.s32 32, %v8193_v43 }
 0x224   : > { %12550 = vst [vmem:[#allocation82_spill] sm:$0xff] %v8221_v52  ;;  %12551 = vst [vmem:[#allocation83_spill] sm:$0xff] %v8225_v12  ;;  %vm3022_vm12 = vcmp.gt.s32.totalorder %v3021_v9, 0  ;;  %6787 = vpow2.f32 %v4710_v29  ;;  %v3941_v1 = vand.u32 2139095040, %v8205_v47  ;;  %v8235_v58 = vand.u32 31, %v3126_v13  ;;  %v8245_v52 = vpop.permute.xlu1 %4609 }
 0x225   : > { %12552 = vst [vmem:[#allocation84_spill] sm:$0xff] %v8230_v2  ;;  %v8233_v36 = vpop.eup %6781  ;;  %v4714_v8 = vmul.f32 1.442695, %v7931_v48  ;;  %v4586_v42 = vsub.f32 1.0, %v7838_v18  ;;  %v4627_v53 = vmul.f32 %v7976_v46, %v4575_v41  ;;  %v3838_v39 = vand.u32 2139095040, %v8225_v12 }
 0x226   : > { %12553 = vst [vmem:[#allocation85_spill] sm:$0xff] %v8233_v36  ;;  %12554 = vst [vmem:[#allocation86_spill] sm:$0xff] %v8235_v58  ;;  %v8240_v4 = vpop.eup %6783  ;;  %v4585_v35 = vsub.f32 1.0, %v7844_v24  ;;  %6789 = vrcp.f32 %v1128_v26  ;;  %v1130_v29 = vadd.f32 1.000001, %v8021_v34  ;;  %v3023_v6 = vsel %vm3022_vm12, %v3021_v9, 0 }
 0x227   : > { %12555 = vst [vmem:[#allocation87_spill] sm:$0xff] %v8240_v4  ;;  %vm3228_vm13 = vcmp.gt.s32.totalorder %v3227_v23, 0  ;;  %v3742_v47 = vadd.s32 1, %v6274_v20  ;;  %v8247_v43 = vmul.f32 %v6778_v7, %v4627_v53  ;;  %v3942_v48 = vshrl.u32 %v3941_v1, 23 }
 0x228   : > { %v8251_v18 = vmul.f32 %v8233_v36, %v7995_v3  ;;  %6791 = vrcp.f32 %v1130_v29  ;;  %v1129_v46 = vadd.f32 1.000001, %v8028_v28  ;;  %v8254_v41 = vshrl.u32 %v3126_v13, 5 }
 0x229   : > { %v8257_v24 = vsub.s32 32, %v8235_v58  ;;  %6793 = vpow2.f32 %v4714_v8  ;;  %v8260_v20 = vand.u32 31, %v3023_v6  ;;  %v3839_v7 = vshrl.u32 %v3838_v39, 23  ;;  %v12569_v58 = vld [vmem:[#allocation25_spill] sm:$0xff] }
 0x22a   : > { %12556 = vst [vmem:[#allocation88_spill] sm:$0xff] %v8251_v18  ;;  %12557 = vst [vmem:[#allocation89_spill] sm:$0xff] %v8254_v41  ;;  %v12560_v26 = vsub.f32 1.0, %v7836_v17  ;;  %6795 = vrcp.f32 %v1129_v46  ;;  %v8269_v53 = vshrl.u32 %v3023_v6, 5  ;;  %v8272_v13 = vsel %vm3228_vm13, %v3227_v23, 0 }
 0x22b   : > { %12558 = vst [vmem:[#allocation90_spill] sm:$0xff] %v8257_v24  ;;  %12559 = vst [vmem:[#allocation91_spill] sm:$0xff] %v8260_v20  ;;  %v8267_v3 = vpop.eup %6785  ;;  %v4580_v8 = vsub.f32 1.0, %v8019_v33  ;;  %v1131_v29 = vadd.f32 1.000001, %v8030_v38  ;;  %vm3743_vm14 = vcmp.gt.s32.totalorder %v3742_v47, 0  ;;  %v8282_v46 = vmul.f32 %v8245_v52, %v4586_v42 }
 0x22c   : > { %v8265_v1 = vmul.f32 %v8245_v52, %v12560_v26  ;;  %12562 = vst [vmem:[#allocation93_spill] sm:$0xff] %v8267_v3  ;;  %12563 = vst [vmem:[#allocation94_spill] sm:$0xff] %v8269_v53  ;;  %v6282_v9 = vadd.s32 4294967169, %v3942_v48  ;;  %v4044_v39 = vand.u32 2139095040, %v8251_v18  ;;  %v1136_v17 = vadd.f32 1.000001, %v8044_v59 }
 0x22d   : > { %v8279_v26 = vmul.f32 %v8245_v52, %v4585_v35  ;;  %12565 = vst [vmem:[#allocation96_spill] sm:$0xff] %v8282_v46  ;;  %v4582_v6 = vsub.f32 1.0, %v8021_v34  ;;  %6797 = vrcp.f32 %v1131_v29  ;;  %v8288_v33 = vsub.s32 32, %v8260_v20  ;;  %v12568_v35 = vld [vmem:[#allocation24_spill] sm:$0xff]  ;;  %v12571_v18 = vld [vmem:[#allocation30_spill] sm:$0xff] }
 0x22e   : > { %12561 = vst [vmem:[#allocation92_spill] sm:$0xff] %v8265_v1  ;;  %v8285_v23 = vpop.eup %6787  ;;  %v8291_v48 = vand.u32 31, %v8272_v13  ;;  %v6278_v3 = vadd.s32 4294967169, %v3839_v7  ;;  %6799 = vrcp.f32 %v1136_v17  ;;  %v3744_v4 = vsel %vm3743_vm14, %v3742_v47, 0  ;;  %v12567_v1 = vld [vmem:[#allocation29_spill] sm:$0xff] }
 0x22f   : > { %12564 = vst [vmem:[#allocation95_spill] sm:$0xff] %v8279_v26  ;;  %12566 = vst [vmem:[#allocation97_spill] sm:$0xff] %v8285_v23  ;;  %v1216_v41 = vmul.f32 %v12568_v35, %v12567_v1  ;;  %v4632_v42 = vmul.f32 %v12569_v58, %v4580_v8  ;;  %v1138_v46 = vadd.f32 1.000001, %v8046_v63  ;;  %v3948_v29 = vadd.s32 1, %v6282_v9  ;;  %v12570_v23 = vld [vmem:[#allocation52_spill] sm:$0xff] }
 0x230   : > { %v6790_v34 = vpop.eup %6789  ;;  %v4045_v24 = vshrl.u32 %v4044_v39, 23  ;;  %v4581_v36 = vsub.f32 1.0, %v8028_v28  ;;  %v1137_v2 = vadd.f32 1.000001, %v12570_v23  ;;  %v1218_v54 = vmul.f32 %v12568_v35, %v12571_v18  ;;  %v12574_v26 = vld [vmem:[#allocation31_spill] sm:$0xff] }
 0x231   : > { %v8301_v7 = vmul.f32 %v6790_v34, %v1216_v41  ;;  %v8303_v47 = vmul.f32 %v6790_v34, %v4632_v42  ;;  %v4634_v1 = vmul.f32 %v12569_v58, %v4582_v6  ;;  %v3845_v8 = vadd.s32 1, %v6278_v3  ;;  %v12579_v34 = vld [vmem:[#allocation32_spill] sm:$0xff] }
 0x232   : > { %v6792_v17 = vpop.eup %6791  ;;  %v1217_v12 = vmul.f32 %v12568_v35, %v12574_v26  ;;  %v1675_v9 = vand.u32 2139095040, %v8112_v5  ;;  %v4583_v28 = vsub.f32 1.0, %v8030_v38  ;;  %v4588_v41 = vsub.f32 1.0, %v8044_v59 }
 0x233   : > { %12572 = vst [vmem:[#allocation29_spill] sm:$0xff] %v8301_v7  ;;  %12573 = vst [vmem:[#allocation24_spill] sm:$0xff] %v8303_v47  ;;  %v8310_v39 = vpop.eup %6793  ;;  %v8312_v53 = vmul.f32 %v6792_v17, %v1218_v54  ;;  %v8314_v18 = vmul.f32 %v6792_v17, %v4634_v1  ;;  %6801 = vrcp.f32 %v1138_v46  ;;  %vm3949_vm15 = vcmp.gt.s32.totalorder %v3948_v29, 0  ;;  %v12580_v54 = vld [vmem:[#allocation54_spill] sm:$0xff]  ;;  %v12582_v17 = vld [vmem:[#allocation39_spill] sm:$0xff] }
 0x234   : > { %12575 = vst [vmem:[#allocation25_spill] sm:$0xff] %v8310_v39  ;;  %v6796_v42 = vpop.eup %6795  ;;  %v6286_v6 = vadd.s32 4294967169, %v4045_v24  ;;  %v4633_v3 = vmul.f32 %v12569_v58, %v4581_v36  ;;  %6803 = vrcp.f32 %v1137_v2  ;;  %v8318_v26 = vand.u32 31, %v3744_v4  ;;  %v12581_v1 = vld [vmem:[#allocation34_spill] sm:$0xff] }
 0x235   : > { %12576 = vst [vmem:[#allocation52_spill] sm:$0xff] %v8312_v53  ;;  %12577 = vst [vmem:[#allocation30_spill] sm:$0xff] %v8314_v18  ;;  %v1219_v38 = vmul.f32 %v12568_v35, %v12579_v34  ;;  %v1881_v5 = vand.u32 2139095040, %v8117_v56  ;;  %v1139_v39 = vadd.f32 1.000001, %v12580_v54  ;;  %v1224_v18 = vmul.f32 %v12582_v17, %v12581_v1 }
 0x236   : > { %12578 = vst [vmem:[#allocation31_spill] sm:$0xff] %v8318_v26  ;;  %v8326_v59 = vmul.f32 %v6796_v42, %v1217_v12  ;;  %v8328_v46 = vmul.f32 %v6796_v42, %v4633_v3  ;;  %v4635_v24 = vmul.f32 %v12569_v58, %v4583_v28  ;;  %v3950_v2 = vsel %vm3949_vm15, %v3948_v29, 0 }
 0x237   : > { %v6798_v36 = vpop.eup %6797  ;;  %vm3846_vm0 = vcmp.gt.s32.totalorder %v3845_v8, 0  ;;  %v1676_v53 = vshrl.u32 %v1675_v9, 23  ;;  %v4640_v47 = vmul.f32 %v8245_v52, %v4588_v41  ;;  %v4051_v34 = vadd.s32 1, %v6286_v6 }
 0x238   : > { %12583 = vst [vmem:[#allocation32_spill] sm:$0xff] %v8326_v59  ;;  %12584 = vst [vmem:[#allocation54_spill] sm:$0xff] %v8328_v46  ;;  %v6800_v35 = vpop.eup %6799  ;;  %v1778_v56 = vand.u32 2139095040, %v8123_v45  ;;  %v8333_v7 = vmul.f32 %v6798_v36, %v1219_v38  ;;  %v8335_v20 = vmul.f32 %v6798_v36, %v4635_v24  ;;  %v1882_v12 = vshrl.u32 %v1881_v5, 23  ;;  %v12595_v24 = vld [vmem:[#allocation37_spill] sm:$0xff]  ;;  %v12596_v36 = vld [vmem:[#allocation38_spill] sm:$0xff] }
 0x239   : > { %v8337_v1 = vmul.f32 %v6800_v35, %v1224_v18  ;;  %v8339_v42 = vmul.f32 %v6800_v35, %v4640_v47  ;;  %6805 = vrcp.f32 %v1139_v39  ;;  %v8342_v58 = vshrl.u32 %v8272_v13, 5  ;;  %v12594_v18 = vld [vmem:[#allocation35_spill] sm:$0xff] }
 0x23a   : > { %12585 = vst [vmem:[#allocation34_spill] sm:$0xff] %v8333_v7  ;;  %12586 = vst [vmem:[#allocation39_spill] sm:$0xff] %v8335_v20  ;;  %v8344_v29 = vand.u32 31, %v3950_v2  ;;  %v12590_v9 = vsub.f32 1.0, %v7846_v25  ;;  %v4590_v41 = vsub.f32 1.0, %v8046_v63  ;;  %v8353_v6 = vsub.s32 32, %v8291_v48 }
 0x23b   : > { %12587 = vst [vmem:[#allocation98_spill] sm:$0xff] %v8337_v1  ;;  %12588 = vst [vmem:[#allocation99_spill] sm:$0xff] %v8339_v42  ;;  %v8355_v5 = vshrl.u32 %v3744_v4, 5  ;;  %v3847_v47 = vsel %vm3846_vm0, %v3845_v8, 0  ;;  %v6194_v39 = vadd.s32 4294967169, %v1676_v53  ;;  %v8359_v13 = vsub.s32 32, %v8318_v26 }
 0x23c   : > { %12589 = vst [vmem:[#allocation100_spill] sm:$0xff] %v8344_v29  ;;  %v8349_v28 = vmul.f32 %v8245_v52, %v12590_v9  ;;  %vm4052_vm1 = vcmp.gt.s32.totalorder %v4051_v34, 0  ;;  %v1226_v25 = vmul.f32 %v12582_v17, %v12594_v18  ;;  %v1779_v3 = vshrl.u32 %v1778_v56, 23 }
 0x23d   : > { %12592 = vst [vmem:[#allocation102_spill] sm:$0xff] %v8355_v5  ;;  %12593 = vst [vmem:[#allocation103_spill] sm:$0xff] %v8359_v13  ;;  %v6802_v38 = vpop.eup %6801  ;;  %v1225_v63 = vmul.f32 %v12582_v17, %v12595_v24  ;;  %v1227_v35 = vmul.f32 %v12582_v17, %v12596_v36  ;;  %v6202_v4 = vadd.s32 4294967169, %v1882_v12  ;;  %v1984_v9 = vand.u32 2139095040, %v8134_v0  ;;  %v12620_v5 = vld [vmem:[#allocation63_spill] sm:$0xff] }
 0x23e   : > { %12591 = vst [vmem:[#allocation101_spill] sm:$0xff] %v8349_v28  ;;  %v6804_v8 = vpop.eup %6803  ;;  %v8368_v53 = vshrl.u32 %v3950_v2, 5  ;;  %v8371_v42 = vsub.s32 32, %v8344_v29  ;;  %v8373_v45 = vand.u32 31, %v3847_v47  ;;  %v4642_v56 = vmul.f32 %v8245_v52, %v4590_v41 }
 0x23f   : > { %v4053_v18 = vsel %vm4052_vm1, %v4051_v34, 0  ;;  %v1682_v1 = vadd.s32 1, %v6194_v39  ;;  %v4684_v24 = vmul.f32 1.442695, %v8114_v14  ;;  %v4688_v20 = vmul.f32 1.442695, %v8119_v16 }
 0x240   : > { %12597 = vst [vmem:[#allocation35_spill] sm:$0xff] %v8368_v53  ;;  %12598 = vst [vmem:[#allocation37_spill] sm:$0xff] %v8371_v42  ;;  %v6198_v17 = vadd.s32 4294967169, %v1779_v3  ;;  %v8378_v12 = vmul.f32 %v6802_v38, %v1226_v25  ;;  %v8380_v36 = vmul.f32 %v6802_v38, %v4642_v56  ;;  %v4589_v2 = vsub.f32 1.0, %v12570_v23 }
 0x241   : > { %v1888_v0 = vadd.s32 1, %v6202_v4  ;;  %v1985_v53 = vshrl.u32 %v1984_v9, 23  ;;  %v8383_v29 = vmul.f32 %v6804_v8, %v1225_v63  ;;  %v4591_v42 = vsub.f32 1.0, %v12580_v54 }
 0x242   : > { %12599 = vst [vmem:[#allocation38_spill] sm:$0xff] %v8378_v12  ;;  %12600 = vst [vmem:[#allocation104_spill] sm:$0xff] %v8380_v36  ;;  %v8386_v41 = vshrl.u32 %v3847_v47, 5  ;;  %v8389_v34 = vsub.s32 32, %v8373_v45  ;;  %v8391_v14 = vshrl.u32 %v4053_v18, 5  ;;  %v2499_v16 = vand.u32 2139095040, %v8144_v55 }
 0x243   : > { %12601 = vst [vmem:[#allocation105_spill] sm:$0xff] %v8383_v29  ;;  %v6806_v39 = vpop.eup %6805  ;;  %v8394_v25 = vand.u32 31, %v4053_v18  ;;  %vm1683_vm2 = vcmp.gt.s32.totalorder %v1682_v1, 0  ;;  %6807 = vpow2.f32 %v4684_v24  ;;  %v4686_v23 = vmul.f32 1.442695, %v8125_v19 }
 0x244   : > { %12602 = vst [vmem:[#allocation106_spill] sm:$0xff] %v8391_v14  ;;  %6809 = vpow2.f32 %v4688_v20  ;;  %v1785_v3 = vadd.s32 1, %v6198_v17  ;;  %v4690_v54 = vmul.f32 1.442695, %v8136_v32  ;;  %v4641_v47 = vmul.f32 %v8245_v52, %v4589_v2 }
 0x245   : > { %12603 = vst [vmem:[#allocation107_spill] sm:$0xff] %v8394_v25  ;;  %vm1889_vm3 = vcmp.gt.s32.totalorder %v1888_v0, 0  ;;  %v6206_v38 = vadd.s32 4294967169, %v1985_v53  ;;  %v4700_v63 = vmul.f32 1.442695, %v8149_v21  ;;  %v4643_v4 = vmul.f32 %v8245_v52, %v4591_v42  ;;  %v12607_v21 = vld [vmem:[#allocation22_spill] sm:$0xff] }
 0x246   : > { %v1684_v9 = vsel %vm1683_vm2, %v1682_v1, 0  ;;  %v2500_v56 = vshrl.u32 %v2499_v16, 23  ;;  %v8401_v18 = vmul.f32 %v6804_v8, %v4641_v47  ;;  %v8403_v36 = vmul.f32 %v6806_v39, %v1227_v35  ;;  %v12609_v35 = vld [vmem:[#allocation65_spill] sm:$0xff] }
 0x247   : > { %v8406_v19 = vsub.s32 32, %v8394_v25  ;;  %6811 = vpow2.f32 %v4686_v23  ;;  %v2705_v32 = vand.u32 2139095040, %v8151_v49  ;;  %v8409_v20 = vmul.f32 %v6806_v39, %v4643_v4 }
 0x248   : > { %12604 = vst [vmem:[#allocation108_spill] sm:$0xff] %v8401_v18  ;;  %12605 = vst [vmem:[#allocation109_spill] sm:$0xff] %v8403_v36  ;;  %v1890_v24 = vsel %vm1889_vm3, %v1888_v0, 0  ;;  %vm1786_vm4 = vcmp.gt.s32.totalorder %v1785_v3, 0  ;;  %6813 = vpow2.f32 %v4690_v54  ;;  %v12401_v53 = vand.u32 2147483647, %v12607_v21 }
 0x249   : > { %12606 = vst [vmem:[#allocation110_spill] sm:$0xff] %v8409_v20  ;;  %v8412_v52 = vshrl.u32 %v1684_v9, 5  ;;  %v1991_v1 = vadd.s32 1, %v6206_v38  ;;  %6815 = vpow2.f32 %v4700_v63  ;;  %v12394_v42 = vmov 2102212464   ;;  %v12612_v63 = vld [vmem:[#allocation59_spill] sm:$0xff] }
 0x24a   : > { %v1387_v8 = vshrl.u32 %v12394_v42, %v12609_v35  ;;  %v8416_v17 = vand.u32 31, %v1684_v9  ;;  %v6226_v2 = vadd.s32 4294967169, %v2500_v56  ;;  %v12406_v16 = vmov 2475754826  }
 0x24b   : > { %12608 = vst [vmem:[#allocation22_spill] sm:$0xff] %v8412_v52  ;;  %v1381_v39 = vshrl.u32 %v12406_v16, %v12609_v35  ;;  %v12399_v0 = vmov 2131351028   ;;  %v8422_v54 = vshrl.u32 %v1890_v24, 5  ;;  %v1787_v47 = vsel %vm1786_vm4, %v1785_v3, 0 }
 0x24c   : > { %12610 = vst [vmem:[#allocation65_spill] sm:$0xff] %v8416_v17  ;;  %v1384_v23 = vshrl.u32 %v12399_v0, %v12609_v35  ;;  %v2706_v38 = vshrl.u32 %v2705_v32, 23  ;;  %v1386_v4 = vshll.u32 %v12399_v0, %v12612_v63  ;;  %v1370_v9 = vand.u32 8388607, %v12401_v53 }
 0x24d   : > { %12611 = vst [vmem:[#allocation111_spill] sm:$0xff] %v8422_v54  ;;  %v12403_v42 = vmov 683565275   ;;  %v1383_v20 = vshll.u32 %v12406_v16, %v12612_v63  ;;  %v12411_v18 = vmov 920167782   ;;  %v8434_v12 = vpop.eup %6807  ;;  %v8436_v3 = vand.u32 31, %v1890_v24 }
 0x24e   : > { %v1380_v56 = vshll.u32 %v12403_v42, %v12612_v63  ;;  %v1390_v49 = vshrl.u32 %v12411_v18, %v12609_v35  ;;  %12613 = vst [vmem:[#allocation59_spill] sm:$0xff] %v8434_v12  ;;  %vm1992_vm5 = vcmp.gt.s32.totalorder %v1991_v1, 0  ;;  %v1388_v32 = vor.u32 %v1387_v8, %v1386_v4  ;;  %v8440_v54 = vpop.eup %6809 }
 0x24f   : > { %12614 = vst [vmem:[#allocation112_spill] sm:$0xff] %v8436_v3  ;;  %v12615_v0 = vmov 2102212464   ;;  %12616 = vst [vmem:[#allocation113_spill] sm:$0xff] %v8440_v54  ;;  %v8443_v42 = vsub.s32 32, %v8416_v17  ;;  %v2506_v36 = vadd.s32 1, %v6226_v2  ;;  %v1385_v55 = vor.u32 %v1384_v23, %v1383_v20 }
 0x250   : > { %v1389_v53 = vshll.u32 %v12615_v0, %v12612_v63  ;;  %v1382_v16 = vor.u32 %v1381_v39, %v1380_v56  ;;  %v8445_v52 = vshrl.u32 %v1787_v47, 5  ;;  %v12619_v12 = vmov 920167782  }
 0x251   : > { %12617 = vst [vmem:[#allocation114_spill] sm:$0xff] %v8443_v42  ;;  %v1392_v24 = vshll.u32 %v12619_v12, %v12612_v63  ;;  %v12418_v29 = vmov 1326507024   ;;  %v8451_v4 = vsel %vm1992_vm5, %v1991_v1, 0  ;;  %v6234_v7 = vadd.s32 4294967169, %v2706_v38  ;;  %v8454_v17 = vpop.eup %6811 }
 0x252   : > { %12618 = vst [vmem:[#allocation115_spill] sm:$0xff] %v8445_v52  ;;  %v1391_v18 = vor.u32 %v1390_v49, %v1389_v53  ;;  %v1393_v8 = vshrl.u32 %v12418_v29, %v12609_v35  ;;  %v1371_v54 = vor.u32 8388608, %v1370_v9  ;;  %vm1398_vm6 = vcmp.lt.s32.totalorder %v12620_v5, 4  ;;  %12621 = vst [vmem:[#allocation63_spill] sm:$0xff] %v8454_v17  ;;  %v8459_v53 = vpop.eup %6813  ;;  %v12626_v52 = vld [vmem:[#allocation49_spill] sm:$0xff] }
 0x253   : > { %v12622_v20 = vmov 683565275   ;;  %vm1395_vm7 = vcmp.lt.s32.totalorder %v12620_v5, 1  ;;  %v1400_v49 = vsel %vm1398_vm6, %v1388_v32, 2102212464  ;;  %12623 = vst [vmem:[#allocation116_spill] sm:$0xff] %v8459_v53  ;;  %v8463_v23 = vpop.eup %6815 }
 0x254   : > { %v1379_v2 = vshrl.u32 %v12622_v20, %v12609_v35  ;;  %v1394_v39 = vor.u32 %v1393_v8, %v1392_v24  ;;  %vm2507_vm8 = vcmp.gt.s32.totalorder %v2506_v36, 0  ;;  %vm1396_vm9 = vcmp.lt.s32.totalorder %v12620_v5, 2  ;;  %12624 = vst [vmem:[#allocation117_spill] sm:$0xff] %v8463_v23 }
 0x255   : > { %vm1397_vm10 = vcmp.lt.s32.totalorder %v12620_v5, 3  ;;  %v1403_v1 = vsel %vm1395_vm7, %v1382_v16, %v1385_v55  ;;  %v1404_v63 = vsel %vm1398_vm6, %v1391_v18, 920167782  ;;  %v1407_v9 = vsel %vm1395_vm7, %v1385_v55, %v1388_v32 }
 0x256   : > { %v1399_v38 = vsel %vm1395_vm7, %v1379_v2, %v1382_v16  ;;  %v1408_v56 = vsel %vm1398_vm6, %v1394_v39, 1326507024  ;;  %v1401_v29 = vsel %vm1397_vm10, %v1385_v55, %v1400_v49  ;;  %v1405_v35 = vsel %vm1397_vm10, %v1388_v32, %v1404_v63 }
 0x257   : > { %v1409_v24 = vsel %vm1397_vm10, %v1391_v18, %v1408_v56  ;;  %v1411_v8 = vshll.u32 %v1371_v54, 8  ;;  %v8465_v42 = vand.u32 31, %v1787_v47  ;;  %v1406_v53 = vsel %vm1396_vm9, %v1403_v1, %v1405_v35 }
 0x258   : > { %v1410_v17 = vsel %vm1396_vm9, %v1407_v9, %v1409_v24  ;;  %v12425_v26 = vand.u32 2147483647, %v12626_v52  ;;  %v8480_v55 = vand.u32 31, %v8451_v4  ;;  %v8483_v18 = vsel %vm2507_vm8, %v2506_v36, 0 }
 0x259   : > { %12625 = vst [vmem:[#allocation118_spill] sm:$0xff] %v8465_v42  ;;  %v8472_v13 = vmul.u32.u64.low %v1411_v8, %v1410_v17  ;;  %v8473_v23 = vmul.u32.u64.high %v1411_v8, %v1410_v17, %v8472_v13  ;;  %v8475_v16 = vmul.u32.u64.low %v1411_v8, %v1406_v53  ;;  %v8476_v2 = vmul.u32.u64.high %v1411_v8, %v1406_v53, %v8475_v16 }
 0x25a   : > { %12627 = vst [vmem:[#allocation49_spill] sm:$0xff] %v8480_v55  ;;  %v2602_v54 = vand.u32 2139095040, %v8197_v50  ;;  %v1402_v47 = vsel %vm1396_vm9, %v1399_v38, %v1401_v29  ;;  %v2712_v32 = vadd.s32 1, %v6234_v7  ;;  %v2194_v17 = vand.u32 8388607, %v12425_v26 }
 0x25b   : > { %v2204_v13 = vshll.u32 %v12622_v20, %v8186_v11  ;;  %v12628_v39 = vmov 2475754826   ;;  %v12629_v36 = vmov 2131351028   ;;  %v2211_v7 = vshrl.u32 %v12615_v0, %v8214_v30 }
 0x25c   : > { %v2205_v49 = vshrl.u32 %v12628_v39, %v8214_v30  ;;  %v2207_v53 = vshll.u32 %v12628_v39, %v8186_v11  ;;  %v2208_v1 = vshrl.u32 %v12629_v36, %v8214_v30  ;;  %v2210_v5 = vshll.u32 %v12629_v36, %v8186_v11 }
 0x25d   : > { %v1418_v29 = vmul.u32 %v1411_v8, %v1402_v47  ;;  %vm1420_vm11 = vc.u32 %v8473_v23, %v8475_v16  ;;  %v1421_v38 = vadd.s32 1, %v8476_v2  ;;  %v2213_v35 = vshll.u32 %v12615_v0, %v8186_v11 }
 0x25e   : > { %v2206_v63 = vor.u32 %v2205_v49, %v2204_v13  ;;  %v2209_v9 = vor.u32 %v2208_v1, %v2207_v53  ;;  %v2212_v56 = vor.u32 %v2211_v7, %v2210_v5  ;;  %v2214_v24 = vshrl.u32 %v12619_v12, %v8214_v30 }
 0x25f   : > { %v1422_v26 = vsel %vm1420_vm11, %v1421_v38, %v8476_v2  ;;  %v2195_v50 = vor.u32 8388608, %v2194_v17  ;;  %v2216_v8 = vshll.u32 %v12619_v12, %v8186_v11  ;;  %v12630_v47 = vmov 1326507024  }
 0x260   : > { %v2217_v28 = vshrl.u32 %v12630_v47, %v8214_v30  ;;  %v1423_v46 = vadd.s32 %v1422_v26, %v1418_v29  ;;  %v2203_v13 = vshrl.u32 %v12622_v20, %v8214_v30  ;;  %v2215_v49 = vor.u32 %v2214_v24, %v2213_v35 }
 0x261   : > { %vm2219_vm12 = vcmp.lt.s32.totalorder %v8211_v62, 1  ;;  %vm2221_vm13 = vcmp.lt.s32.totalorder %v8211_v62, 3  ;;  %vm2222_vm14 = vcmp.lt.s32.totalorder %v8211_v62, 4  ;;  %vm2220_vm15 = vcmp.lt.s32.totalorder %v8211_v62, 2 }
 0x262   : > { %v2218_v53 = vor.u32 %v2217_v28, %v2216_v8  ;;  %v2227_v2 = vsel %vm2219_vm12, %v2206_v63, %v2209_v9  ;;  %v1424_v17 = vadd.s32 536870912, %v1423_v46  ;;  %v2224_v1 = vsel %vm2222_vm14, %v2212_v56, 2102212464 }
 0x263   : > { %v2228_v5 = vsel %vm2222_vm14, %v2215_v49, 920167782  ;;  %v2231_v11 = vsel %vm2219_vm12, %v2209_v9, %v2212_v56  ;;  %v2235_v29 = vshll.u32 %v2195_v50, 8  ;;  %v2223_v30 = vsel %vm2219_vm12, %v2203_v13, %v2206_v63 }
 0x264   : > { %v2229_v7 = vsel %vm2221_vm13, %v2212_v56, %v2228_v5  ;;  %v2232_v26 = vsel %vm2222_vm14, %v2218_v53, 1326507024  ;;  %v8520_v38 = vshrl.u32 %v1424_v17, 30  ;;  %v2225_v24 = vsel %vm2221_vm13, %v2209_v9, %v2224_v1 }
 0x265   : > { %v2230_v28 = vsel %vm2220_vm15, %v2227_v2, %v2229_v7  ;;  %v2233_v35 = vsel %vm2221_vm13, %v2215_v49, %v2232_v26  ;;  %v4704_v25 = vmul.f32 1.442695, %v8191_v31  ;;  %v8536_v63 = vsub.s32 32, %v8436_v3  ;;  %v12635_v7 = vld [vmem:[#allocation23_spill] sm:$0xff] }
 0x266   : > { %v2234_v8 = vsel %vm2220_vm15, %v2231_v11, %v2233_v35  ;;  %v8526_v59 = vmul.u32.u64.low %v2235_v29, %v2230_v28  ;;  %v8527_v14 = vmul.u32.u64.high %v2235_v29, %v2230_v28, %v8526_v59  ;;  %v1426_v56 = vshll.u32 %v8520_v38, 30 }
 0x267   : > { %v8532_v50 = vmul.u32.u64.low %v2235_v29, %v2234_v8  ;;  %v8533_v53 = vmul.u32.u64.high %v2235_v29, %v2234_v8, %v8532_v50  ;;  %12631 = vst [vmem:[#allocation119_spill] sm:$0xff] %v8536_v63  ;;  %v8539_v13 = vsub.s32 32, %v8465_v42  ;;  %v8542_v9 = vand.u32 31, %v8483_v18 }
 0x268   : > { %vm2713_vm0 = vcmp.gt.s32.totalorder %v2712_v32, 0  ;;  %v2603_v49 = vshrl.u32 %v2602_v54, 23  ;;  %v4702_v2 = vmul.f32 1.442695, %v8207_v57  ;;  %v8545_v17 = vsub.s32 %v1423_v46, %v1426_v56 }
 0x269   : > { %12632 = vst [vmem:[#allocation120_spill] sm:$0xff] %v8542_v9  ;;  %v2226_v31 = vsel %vm2220_vm15, %v2223_v30, %v2225_v24  ;;  %v8550_v1 = vshrl.u32 %v8451_v4, 5  ;;  %v8553_v5 = vsub.s32 32, %v8480_v55  ;;  %v2245_v11 = vadd.s32 1, %v8527_v14 }
 0x26a   : > { %v12432_v26 = vand.u32 2147483647, %v12635_v7  ;;  %v8557_v28 = vsel %vm2713_vm0, %v2712_v32, 0  ;;  %6817 = vpow2.f32 %v4704_v25  ;;  %v1429_v57 = vsub.s32 0, %v8545_v17 }
 0x26b   : > { %12633 = vst [vmem:[#allocation121_spill] sm:$0xff] %v8550_v1  ;;  %12634 = vst [vmem:[#allocation122_spill] sm:$0xff] %v8553_v5  ;;  %vm2244_vm1 = vc.u32 %v8533_v53, %v8526_v59  ;;  %v8563_v62 = vshrl.u32 %v8483_v18, 5  ;;  %v2242_v4 = vmul.u32 %v2235_v29, %v2226_v31  ;;  %v8568_v30 = vsub.s32 32, %v8542_v9 }
 0x26c   : > { %v2246_v54 = vsel %vm2244_vm1, %v2245_v11, %v8527_v14  ;;  %v8570_v35 = vadd.s32 4294967169, %v2603_v49  ;;  %6819 = vpow2.f32 %v4702_v2  ;;  %v6183_v25 = vmin.u32 %v1429_v57, %v8545_v17 }
 0x26d   : > { %12636 = vst [vmem:[#allocation23_spill] sm:$0xff] %v8563_v62  ;;  %12637 = vst [vmem:[#allocation123_spill] sm:$0xff] %v8568_v30  ;;  %v8574_v32 = vand.u32 31, %v8557_v28  ;;  %v1419_v18 = vadd.s32 %v8475_v16, %v8473_v23  ;;  %v2247_v24 = vadd.s32 %v2246_v54, %v2242_v4  ;;  %v1576_v29 = vand.u32 8388607, %v12432_v26 }
 0x26e   : > { %v1431_v8 = vclz %v6183_v25  ;;  %v1449_v14 = vsub.s32 4, %v8520_v38  ;;  %v1587_v56 = vshrl.u32 %v12628_v39, %v8161_v10  ;;  %v1593_v50 = vshrl.u32 %v12615_v0, %v8161_v10 }
 0x26f   : > { %12638 = vst [vmem:[#allocation124_spill] sm:$0xff] %v8574_v32  ;;  %v2248_v49 = vadd.s32 536870912, %v2247_v24  ;;  %v1585_v2 = vshrl.u32 %v12622_v20, %v8161_v10  ;;  %v1590_v23 = vshrl.u32 %v12629_v36, %v8161_v10  ;;  %v1596_v16 = vshrl.u32 %v12619_v12, %v8161_v10 }
 0x270   : > { %vm1365_vm2 = vcmp.lt.s32.totalorder %v12607_v21, 0  ;;  %v6184_v31 = vadd.s32 4294967294, %v1431_v8  ;;  %v1586_v11 = vshll.u32 %v12622_v20, %v8095_v40  ;;  %v1592_v57 = vshll.u32 %v12629_v36, %v8095_v40 }
 0x271   : > { %v1599_v4 = vshrl.u32 %v12630_v47, %v8161_v10  ;;  %v2249_v54 = vshrl.u32 %v2248_v49, 30  ;;  %v1577_v25 = vor.u32 8388608, %v1576_v29  ;;  %v1589_v26 = vshll.u32 %v12628_v39, %v8095_v40 }
 0x272   : > { %v1595_v46 = vshll.u32 %v12615_v0, %v8095_v40  ;;  %vm6185_vm3 = vcmp.lt.s32.totalorder %v6184_v31, 0  ;;  %v1588_v3 = vor.u32 %v1587_v56, %v1586_v11  ;;  %v1594_v8 = vor.u32 %v1593_v50, %v1592_v57  ;;  %v12643_v56 = vld [vmem:[#allocation66_spill] sm:$0xff] }
 0x273   : > { %v1598_v63 = vshll.u32 %v12619_v12, %v8095_v40  ;;  %v12639_v62 = vand.u32 2147483647, %v12607_v21  ;;  %v1434_v10 = vsel %vm6185_vm3, 0, %v6184_v31  ;;  %v2250_v29 = vshll.u32 %v2249_v54, 30 }
 0x274   : > { %v1591_v49 = vor.u32 %v1590_v23, %v1589_v26  ;;  %v1597_v30 = vor.u32 %v1596_v16, %v1595_v46  ;;  %v8610_v1 = vpop.eup %6817  ;;  %v1435_v5 = vsub.s32 32, %v1434_v10  ;;  %v1439_v55 = vsub.s32 4294967266, %v1434_v10 }
 0x275   : > { %vm8606_vm4 = vcmp.le.f32.partialorder %v12639_v62, 0.7853982  ;;  %12642 = vst [vmem:[#allocation125_spill] sm:$0xff] %v8610_v1  ;;  %v1600_v42 = vor.u32 %v1599_v4, %v1598_v63  ;;  %vm1601_vm5 = vcmp.lt.s32.totalorder %v12643_v56, 1  ;;  %v8613_v50 = vsub.s32 %v2247_v24, %v2250_v29 }
 0x276   : > { %v2273_v40 = vsub.s32 4, %v2249_v54  ;;  %vm1603_vm6 = vcmp.lt.s32.totalorder %v12643_v56, 3  ;;  %vm1604_vm7 = vcmp.lt.s32.totalorder %v12643_v56, 4  ;;  %v8617_v62 = vpop.eup %6819  ;;  %v1436_v31 = vshll.u32 %v8545_v17, %v1434_v10 }
 0x277   : > { %v1437_v26 = vshrl.u32 %v1419_v18, %v1435_v5  ;;  %v1440_v46 = vadd.s32 127, %v1439_v55  ;;  %v1606_v23 = vsel %vm1604_vm7, %v1594_v8, 2102212464  ;;  %v2253_v16 = vsub.s32 0, %v8613_v50 }
 0x278   : > { %v1609_v63 = vsel %vm1601_vm5, %v1588_v3, %v1591_v49  ;;  %v1610_v11 = vsel %vm1604_vm7, %v1597_v30, 920167782  ;;  %v1613_v24 = vsel %vm1601_vm5, %v1591_v49, %v1594_v8  ;;  %v1614_v1 = vsel %vm1604_vm7, %v1600_v42, 1326507024 }
 0x279   : > { %v1438_v57 = vor.u32 %v1437_v26, %v1436_v31  ;;  %v1441_v4 = vshll.u32 %v1440_v46, 23  ;;  %v1611_v29 = vsel %vm1603_vm6, %v1594_v8, %v1610_v11  ;;  %v1450_v55 = vsel %vm1365_vm2, %v1449_v14, %v8520_v38 }
 0x27a   : > { %vm2189_vm8 = vcmp.lt.s32.totalorder %v12626_v52, 0  ;;  %v6215_v17 = vmin.u32 %v2253_v16, %v8613_v50  ;;  %vm1602_vm9 = vcmp.lt.s32.totalorder %v12643_v56, 2  ;;  %v1605_v18 = vsel %vm1601_vm5, %v1585_v2, %v1588_v3 }
 0x27b   : > { %v1442_v5 = vor.u32 4788187, %v1441_v4  ;;  %v1607_v10 = vsel %vm1603_vm6, %v1591_v49, %v1606_v23  ;;  %v1615_v42 = vsel %vm1603_vm6, %v1597_v30, %v1614_v1  ;;  %v1612_v38 = vsel %vm1602_vm9, %v1609_v63, %v1611_v29  ;;  %v12644_v1 = vld [vmem:[#allocation50_spill] sm:$0xff]  ;;  %v12649_v29 = vld [vmem:[#allocation44_spill] sm:$0xff] }
 0x27c   : > { %v2255_v8 = vclz %v6215_v17  ;;  %v1616_v14 = vsel %vm1602_vm9, %v1613_v24, %v1615_v42  ;;  %v1617_v31 = vshll.u32 %v1577_v25, 8  ;;  %v1445_v46 = vcvt.s32.f32 %v1438_v57 }
 0x27d   : > { %v1443_v26 = vand.u32 2147483647, %v1442_v5  ;;  %v1452_v16 = vsel %vm8606_vm4, 0, %v1450_v55  ;;  %v2274_v3 = vsel %vm2189_vm8, %v2273_v40, %v2249_v54  ;;  %v12446_v30 = vand.u32 2147483647, %v12644_v1  ;;  %v12648_v40 = vld [vmem:[#allocation47_spill] sm:$0xff] }
 0x27e   : > { %v6216_v2 = vadd.s32 4294967294, %v2255_v8  ;;  %v8647_v49 = vmul.u32.u64.low %v1617_v31, %v1616_v14  ;;  %v8648_v23 = vmul.u32.u64.high %v1617_v31, %v1616_v14, %v8647_v49  ;;  %v1608_v63 = vsel %vm1602_vm9, %v1605_v18, %v1607_v10 }
 0x27f   : > { %v1446_v11 = vmul.f32 %v1445_v46, %v1443_v26  ;;  %v8653_v24 = vmul.u32.u64.low %v1617_v31, %v1612_v38  ;;  %v8654_v25 = vmul.u32.u64.high %v1617_v31, %v1612_v38, %v8653_v24  ;;  %v8657_v57 = vand.u32 3, %v1452_v16 }
 0x280   : > { %v12645_v4 = vand.u32 2147483647, %v12626_v52  ;;  %vm6217_vm11 = vcmp.lt.s32.totalorder %v6216_v2, 0  ;;  %v4653_v55 = vmul.f32 %v12649_v29, %v12648_v40  ;;  %v2243_v56 = vadd.s32 %v8526_v59, %v8533_v53 }
 0x281   : > { %v1447_v17 = vxor.u32 2147483648, %v1446_v11  ;;  %v2258_v5 = vsel %vm6217_vm11, 0, %v6216_v2  ;;  %v1624_v8 = vmul.u32 %v1617_v31, %v1608_v63  ;;  %v8673_v38 = vand.u32 8388607, %v12446_v30 }
 0x282   : > { %vm8661_vm10 = vcmp.le.f32.partialorder %v12645_v4, 0.7853982  ;;  %v2259_v10 = vsub.s32 32, %v2258_v5  ;;  %v2263_v42 = vsub.s32 4294967266, %v2258_v5  ;;  %vm1626_vm12 = vc.u32 %v8648_v23, %v8653_v24 }
 0x283   : > { %v2276_v18 = vsel %vm8661_vm10, 0, %v2274_v3  ;;  %v1448_v14 = vsel %vm1365_vm2, %v1447_v17, %v1446_v11  ;;  %v1627_v26 = vadd.s32 1, %v8654_v25  ;;  %v2411_v59 = vshrl.u32 %v12628_v39, %v8219_v61 }
 0x284   : > { %v1451_v53 = vsel %vm8606_vm4, %v12607_v21, %v1448_v14  ;;  %v2260_v31 = vshll.u32 %v8613_v50, %v2258_v5  ;;  %v2261_v46 = vshrl.u32 %v2243_v56, %v2259_v10  ;;  %v2264_v16 = vadd.s32 127, %v2263_v42 }
 0x285   : > { %6821 = vcosq.f32 %v1451_v53  ;;  %v1628_v3 = vsel %vm1626_vm12, %v1627_v26, %v8654_v25  ;;  %v2413_v2 = vshll.u32 %v12628_v39, %v8188_v27  ;;  %v2414_v49 = vshrl.u32 %v12629_v36, %v8219_v61 }
 0x286   : > { %6823 = vsinq.f32 %v1451_v53  ;;  %v2262_v11 = vor.u32 %v2261_v46, %v2260_v31  ;;  %v2265_v63 = vshll.u32 %v2264_v16, 23  ;;  %v1629_v4 = vadd.s32 %v1628_v3, %v1624_v8 }
 0x287   : > { %v2416_v9 = vshll.u32 %v12629_v36, %v8188_v27  ;;  %v2417_v50 = vshrl.u32 %v12615_v0, %v8219_v61  ;;  %v2419_v40 = vshll.u32 %v12615_v0, %v8188_v27  ;;  %v2420_v25 = vshrl.u32 %v12619_v12, %v8219_v61 }
 0x288   : > { %v2266_v29 = vor.u32 4788187, %v2265_v63  ;;  %v1630_v17 = vadd.s32 536870912, %v1629_v4  ;;  %v2422_v56 = vshll.u32 %v12619_v12, %v8188_v27  ;;  %v2423_v5 = vshrl.u32 %v12630_v47, %v8219_v61 }
 0x289   : > { %v2269_v10 = vcvt.s32.f32 %v2262_v11  ;;  %v2410_v42 = vshll.u32 %v12622_v20, %v8188_v27  ;;  %v2415_v8 = vor.u32 %v2414_v49, %v2413_v2  ;;  %v2421_v14 = vor.u32 %v2420_v25, %v2419_v40 }
 0x28a   : > { %v2267_v26 = vand.u32 2147483647, %v2266_v29  ;;  %v8705_v53 = vshrl.u32 %v1630_v17, 30  ;;  %v2418_v31 = vor.u32 %v2417_v50, %v2416_v9  ;;  %v2424_v46 = vor.u32 %v2423_v5, %v2422_v56 }
 0x28b   : > { %vm1458_vm13 = vcmp.eq.s32.totalorder %v8657_v57, 0  ;;  %vm1461_vm14 = vcmp.eq.s32.totalorder %v8657_v57, 2  ;;  %v4694_v16 = vmul.f32 1.442695, %v4653_v55  ;;  %v2412_v3 = vor.u32 %v2411_v59, %v2410_v42 }
 0x28c   : > { %v2270_v63 = vmul.f32 %v2269_v10, %v2267_v26  ;;  %v8709_v30 = vand.u32 3, %v2276_v18  ;;  %v1632_v11 = vshll.u32 %v8705_v53, 30  ;;  %vm2428_vm15 = vcmp.lt.s32.totalorder %v8216_v15, 4 }
 0x28d   : > { %v2401_v27 = vor.u32 8388608, %v8673_v38  ;;  %vm2425_vm0 = vcmp.lt.s32.totalorder %v8216_v15, 1  ;;  %v2434_v2 = vsel %vm2428_vm15, %v2421_v14, 920167782  ;;  %v2438_v49 = vsel %vm2428_vm15, %v2424_v46, 1326507024 }
 0x28e   : > { %v2271_v9 = vxor.u32 2147483648, %v2270_v63  ;;  %v8719_v55 = vsub.s32 %v1629_v4, %v1632_v11  ;;  %vm2427_vm1 = vcmp.lt.s32.totalorder %v8216_v15, 3  ;;  %v2437_v18 = vsel %vm2425_vm0, %v2415_v8, %v2418_v31 }
 0x28f   : > { %v6822_v59 = vpop.eup %6821  ;;  %vm2426_vm2 = vcmp.lt.s32.totalorder %v8216_v15, 2  ;;  %v2433_v38 = vsel %vm2425_vm0, %v2412_v3, %v2415_v8  ;;  %v2435_v50 = vsel %vm2427_vm1, %v2418_v31, %v2434_v2  ;;  %v2439_v40 = vsel %vm2427_vm1, %v2421_v14, %v2438_v49 }
 0x290   : > { %v6824_v25 = vpop.eup %6823  ;;  %v1462_v4 = vxor.u32 2147483648, %v6822_v59  ;;  %v2272_v29 = vsel %vm2189_vm8, %v2271_v9, %v2270_v63  ;;  %v1635_v17 = vsub.s32 0, %v8719_v55  ;;  %v2430_v56 = vsel %vm2428_vm15, %v2418_v31, 2102212464 }
 0x291   : > { %v1459_v5 = vxor.u32 2147483648, %v6824_v25  ;;  %v2275_v10 = vsel %vm8661_vm10, %v12626_v52, %v2272_v29  ;;  %v2409_v42 = vshrl.u32 %v12622_v20, %v8219_v61  ;;  %v2440_v14 = vsel %vm2426_vm2, %v2437_v18, %v2439_v40 }
 0x292   : > { %6825 = vcosq.f32 %v2275_v10  ;;  %v6191_v26 = vmin.u32 %v1635_v17, %v8719_v55  ;;  %v2436_v46 = vsel %vm2426_vm2, %v2433_v38, %v2435_v50  ;;  %v2441_v63 = vshll.u32 %v2401_v27, 8 }
 0x293   : > { %v1463_v31 = vsel %vm1461_vm14, %v1462_v4, %v6824_v25  ;;  %6827 = vsinq.f32 %v2275_v10  ;;  %v2429_v54 = vsel %vm2425_vm0, %v2409_v42, %v2412_v3  ;;  %v2431_v61 = vsel %vm2427_vm1, %v2415_v8, %v2430_v56 }
 0x294   : > { %v1460_v11 = vsel %vm1458_vm13, %v6822_v59, %v1459_v5  ;;  %v1637_v2 = vclz %v6191_v26  ;;  %v8754_v49 = vmul.u32.u64.low %v2441_v63, %v2440_v14  ;;  %v8755_v9 = vmul.u32.u64.high %v2441_v63, %v2440_v14, %v8754_v49 }
 0x295   : > { %v8758_v18 = vshrl.u32 %v8557_v28, 5  ;;  %v12651_v27 = vand.u32 2139095040, %v8209_v44  ;;  %v8764_v50 = vmul.u32.u64.low %v2441_v63, %v2436_v46  ;;  %v8765_v40 = vmul.u32.u64.high %v2441_v63, %v2436_v46, %v8764_v50 }
 0x296   : > { %v8769_v8 = vsub.s32 32, %v8574_v32  ;;  %v8772_v3 = vadd.s32 1, %v8570_v35  ;;  %vm1457_vm3 = vcmp.lt.s32.totalorder %v8657_v57, 2  ;;  %v6192_v59 = vadd.s32 4294967294, %v1637_v2  ;;  %v12656_v2 = vld [vmem:[#allocation64_spill] sm:$0xff] }
 0x297   : > { %12650 = vst [vmem:[#allocation66_spill] sm:$0xff] %v8758_v18  ;;  %v8762_v38 = vshrl.u32 %v12651_v27, 23  ;;  %vm1455_vm4 = vweird.f32 %v12607_v21  ;;  %v1464_v28 = vsel %vm1457_vm3, %v1460_v11, %v1463_v31  ;;  %6829 = vpow2.f32 %v4694_v16  ;;  %v12653_v21 = vld [vmem:[#allocation20_spill] sm:$0xff] }
 0x298   : > { %12652 = vst [vmem:[#allocation50_spill] sm:$0xff] %v8769_v8  ;;  %v2432_v25 = vsel %vm2426_vm2, %v2429_v54, %v2431_v61  ;;  %vm2281_vm5 = vcmp.lt.s32.totalorder %v8709_v30, 2  ;;  %v1625_v4 = vadd.s32 %v8653_v24, %v8648_v23  ;;  %vm6193_vm6 = vcmp.lt.s32.totalorder %v6192_v59, 0  ;;  %v12654_v16 = vld [vmem:[#allocation56_spill] sm:$0xff]  ;;  %v12655_v24 = vld [vmem:[#allocation51_spill] sm:$0xff] }
 0x299   : > { %vm2450_vm7 = vc.u32 %v8755_v9, %v8764_v50  ;;  %vm2279_vm8 = vweird.f32 %v12626_v52  ;;  %v1640_v35 = vsel %vm6193_vm6, 0, %v6192_v59  ;;  %v2451_v57 = vadd.s32 1, %v8765_v40 }
 0x29a   : > { %v12447_v29 = vand.u32 2147483647, %v12653_v21  ;;  %v1278_v15 = vshrl.u32 %v12628_v39, %v12654_v16  ;;  %v1465_v17 = vsel %vm1455_vm4, nan, %v1464_v28  ;;  %v1641_v56 = vsub.s32 32, %v1640_v35 }
 0x29b   : > { %v1645_v5 = vsub.s32 4294967266, %v1640_v35  ;;  %v2448_v10 = vmul.u32 %v2441_v63, %v2432_v25  ;;  %vm2282_vm9 = vcmp.eq.s32.totalorder %v8709_v30, 0  ;;  %vm2285_vm10 = vcmp.eq.s32.totalorder %v8709_v30, 2 }
 0x29c   : > { %v2452_v23 = vsel %vm2450_vm7, %v2451_v57, %v8765_v40  ;;  %v1277_v42 = vshll.u32 %v12622_v20, %v12655_v24  ;;  %v6826_v14 = vpop.eup %6825  ;;  %v1642_v26 = vshll.u32 %v8719_v55, %v1640_v35  ;;  %v1643_v46 = vshrl.u32 %v1625_v4, %v1641_v56 }
 0x29d   : > { %v1646_v31 = vadd.s32 127, %v1645_v5  ;;  %v2453_v54 = vadd.s32 %v2452_v23, %v2448_v10  ;;  %v6828_v61 = vpop.eup %6827  ;;  %v2286_v11 = vxor.u32 2147483648, %v6826_v14  ;;  %v4741_v49 = vmul.f32 %v12656_v2, %v1465_v17 }
 0x29e   : > { %v1267_v63 = vand.u32 8388607, %v12447_v29  ;;  %v1279_v27 = vor.u32 %v1278_v15, %v1277_v42  ;;  %v2283_v59 = vxor.u32 2147483648, %v6828_v61  ;;  %v1644_v28 = vor.u32 %v1643_v46, %v1642_v26 }
 0x29f   : > { %v1647_v40 = vshll.u32 %v1646_v31, 23  ;;  %v2454_v25 = vadd.s32 536870912, %v2453_v54  ;;  %v2287_v57 = vsel %vm2285_vm10, %v2286_v11, %v6828_v61  ;;  %v1280_v55 = vshll.u32 %v12628_v39, %v12655_v24 }
 0x2a0   : > { %v1281_v4 = vshrl.u32 %v12629_v36, %v12654_v16  ;;  %v1287_v35 = vshrl.u32 %v12619_v12, %v12654_v16  ;;  %v2284_v17 = vsel %vm2282_vm9, %v6826_v14, %v2283_v59  ;;  %v1283_v5 = vshll.u32 %v12629_v36, %v12655_v24 }
 0x2a1   : > { %v1648_v15 = vor.u32 4788187, %v1647_v40  ;;  %v8807_v56 = vshrl.u32 %v2454_v25, 30  ;;  %v6830_v10 = vpop.eup %6829  ;;  %v2288_v23 = vsel %vm2281_vm5, %v2284_v17, %v2287_v57  ;;  %v1284_v42 = vshrl.u32 %v12615_v0, %v12654_v16 }
 0x2a2   : > { %v1286_v26 = vshll.u32 %v12615_v0, %v12655_v24  ;;  %v1290_v46 = vshrl.u32 %v12630_v47, %v12654_v16  ;;  %v2289_v14 = vsel %vm2279_vm8, nan, %v2288_v23  ;;  %v1651_v61 = vcvt.s32.f32 %v1644_v28 }
 0x2a3   : > { %v1649_v31 = vand.u32 2147483647, %v1648_v15  ;;  %v2456_v11 = vshll.u32 %v8807_v56, 30  ;;  %v4749_v2 = vmul.f32 %v6830_v10, %v2289_v14  ;;  %v1282_v59 = vor.u32 %v1281_v4, %v1280_v55  ;;  %v12657_v55 = vld [vmem:[#allocation53_spill] sm:$0xff] }
 0x2a4   : > { %v1288_v30 = vor.u32 %v1287_v35, %v1286_v26  ;;  %v1289_v40 = vshll.u32 %v12619_v12, %v12655_v24  ;;  %vm2610_vm11 = vcmp.gt.s32.totalorder %v8772_v3, 0  ;;  %v6238_v25 = vadd.s32 4294967169, %v8762_v38 }
 0x2a5   : > { %v1652_v57 = vmul.f32 %v1651_v61, %v1649_v31  ;;  %v8826_v17 = vsub.s32 %v2453_v54, %v2456_v11  ;;  %v6345_v29 = vpack.c.bf16 %v4749_v2, %v4741_v49  ;;  %vm1571_vm12 = vcmp.lt.s32.totalorder %v12635_v7, 0 }
 0x2a6   : > { %v1285_v52 = vor.u32 %v1284_v42, %v1283_v5  ;;  %v1291_v28 = vor.u32 %v1290_v46, %v1289_v40  ;;  %vm1292_vm13 = vcmp.lt.s32.totalorder %v12657_v55, 1  ;;  %vm1295_vm14 = vcmp.lt.s32.totalorder %v12657_v55, 4 }
 0x2a7   : > { %v1653_v15 = vxor.u32 2147483648, %v1652_v57  ;;  %v2459_v10 = vsub.s32 0, %v8826_v17  ;;  %6346 = vmatprep.subr.bf16.mxu0 %v6345_v29  ;;  %v1655_v24 = vsub.s32 4, %v8705_v53  ;;  %v1268_v4 = vor.u32 8388608, %v1267_v63 }
 0x2a8   : > { %v1300_v38 = vsel %vm1292_vm13, %v1279_v27, %v1282_v59  ;;  %v1301_v54 = vsel %vm1295_vm14, %v1288_v30, 920167782  ;;  %v12658_v49 = vand.u32 2147483647, %v12635_v7  ;;  %vm1294_vm0 = vcmp.lt.s32.totalorder %v12657_v55, 3 }
 0x2a9   : > { %v1654_v5 = vsel %vm1571_vm12, %v1653_v15, %v1652_v57  ;;  %v6223_v29 = vmin.u32 %v2459_v10, %v8826_v17  ;;  %vm1293_vm1 = vcmp.lt.s32.totalorder %v12657_v55, 2  ;;  %v1297_v63 = vsel %vm1295_vm14, %v1285_v52, 2102212464 }
 0x2aa   : > { %vm8839_vm15 = vcmp.le.f32.partialorder %v12658_v49, 0.7853982  ;;  %v1302_v23 = vsel %vm1294_vm0, %v1285_v52, %v1301_v54  ;;  %v1304_v42 = vsel %vm1292_vm13, %v1282_v59, %v1285_v52  ;;  %v1276_v46 = vshrl.u32 %v12622_v20, %v12654_v16 }
 0x2ab   : > { %v2461_v26 = vclz %v6223_v29  ;;  %v1303_v14 = vsel %vm1293_vm1, %v1300_v38, %v1302_v23  ;;  %v1305_v31 = vsel %vm1295_vm14, %v1291_v28, 1326507024  ;;  %v1656_v61 = vsel %vm1571_vm12, %v1655_v24, %v8705_v53  ;;  %v12664_v29 = vld [vmem:[#allocation41_spill] sm:$0xff] }
 0x2ac   : > { %v1657_v11 = vsel %vm8839_vm15, %v12635_v7, %v1654_v5  ;;  %v1306_v2 = vsel %vm1294_vm0, %v1288_v30, %v1305_v31  ;;  %v1308_v40 = vshll.u32 %v1268_v4, 8  ;;  %v1296_v16 = vsel %vm1292_vm13, %v1276_v46, %v1279_v27  ;;  %v12665_v31 = vld [vmem:[#allocation48_spill] sm:$0xff] }
 0x2ad   : > { %v6224_v57 = vadd.s32 4294967294, %v2461_v26  ;;  %v1298_v52 = vsel %vm1294_vm0, %v1282_v59, %v1297_v63  ;;  %v1307_v15 = vsel %vm1293_vm1, %v1304_v42, %v1306_v2  ;;  %v8878_v53 = vsel %vm2610_vm11, %v8772_v3, 0 }
 0x2ae   : > { %v8868_v10 = vmul.u32.u64.low %v1308_v40, %v1307_v15  ;;  %v8869_v28 = vmul.u32.u64.high %v1308_v40, %v1307_v15, %v8868_v10  ;;  %v8871_v38 = vmul.u32.u64.low %v1308_v40, %v1303_v14  ;;  %v8872_v54 = vmul.u32.u64.high %v1308_v40, %v1303_v14, %v8871_v38 }
 0x2af   : > { %v8880_v30 = vadd.s32 1, %v6238_v25  ;;  %6831 = vcosq.f32 %v1657_v11  ;;  %vm6225_vm2 = vcmp.lt.s32.totalorder %v6224_v57, 0  ;;  %v1658_v27 = vsel %vm8839_vm15, 0, %v1656_v61 }
 0x2b0   : > { %vm2395_vm3 = vcmp.lt.s32.totalorder %v12644_v1, 0  ;;  %v2464_v59 = vsel %vm6225_vm2, 0, %v6224_v57  ;;  %v1299_v24 = vsel %vm1293_vm1, %v1296_v16, %v1298_v52  ;;  %6833 = vsinq.f32 %v1657_v11 }
 0x2b1   : > { %v12661_v4 = vand.u32 2147483647, %v12644_v1  ;;  %v2449_v3 = vadd.s32 %v8764_v50, %v8755_v9  ;;  %v2465_v25 = vsub.s32 32, %v2464_v59  ;;  %v2469_v5 = vsub.s32 4294967266, %v2464_v59  ;;  %v12666_v9 = vld [vmem:[#allocation46_spill] sm:$0xff] }
 0x2b2   : > { %v2479_v35 = vsub.s32 4, %v8807_v56  ;;  %vm1317_vm5 = vc.u32 %v8869_v28, %v8871_v38  ;;  %v1318_v55 = vadd.s32 1, %v8872_v54  ;;  %v12449_v63 = vand.u32 2147483647, %v12664_v29 }
 0x2b3   : > { %vm8889_vm4 = vcmp.le.f32.partialorder %v12661_v4, 0.7853982  ;;  %v2466_v23 = vshll.u32 %v8826_v17, %v2464_v59  ;;  %v2467_v42 = vshrl.u32 %v2449_v3, %v2465_v25  ;;  %v2470_v26 = vadd.s32 127, %v2469_v5 }
 0x2b4   : > { %v1315_v46 = vmul.u32 %v1308_v40, %v1299_v24  ;;  %v8901_v14 = vand.u32 3, %v1658_v27  ;;  %v4655_v50 = vmul.f32 %v12666_v9, %v12665_v31  ;;  %v1319_v61 = vsel %vm1317_vm5, %v1318_v55, %v8872_v54 }
 0x2b5   : > { %v2102_v11 = vshrl.u32 %v12628_v39, %v8169_v60  ;;  %v2468_v2 = vor.u32 %v2467_v42, %v2466_v23  ;;  %v2471_v57 = vshll.u32 %v2470_v26, 23  ;;  %v2105_v52 = vshrl.u32 %v12629_v36, %v8169_v60 }
 0x2b6   : > { %v1320_v16 = vadd.s32 %v1319_v61, %v1315_v46  ;;  %v2480_v17 = vsel %vm2395_vm3, %v2479_v35, %v8807_v56  ;;  %v2091_v40 = vand.u32 8388607, %v12449_v63  ;;  %v2101_v15 = vshll.u32 %v12622_v20, %v8139_v51 }
 0x2b7   : > { %v2111_v10 = vshrl.u32 %v12619_v12, %v8169_v60  ;;  %v2472_v54 = vor.u32 4788187, %v2471_v57  ;;  %v2104_v59 = vshll.u32 %v12628_v39, %v8139_v51  ;;  %v2108_v24 = vshrl.u32 %v12615_v0, %v8169_v60 }
 0x2b8   : > { %v1321_v27 = vadd.s32 536870912, %v1320_v16  ;;  %v2103_v4 = vor.u32 %v2102_v11, %v2101_v15  ;;  %v2107_v56 = vshll.u32 %v12629_v36, %v8139_v51  ;;  %v2110_v3 = vshll.u32 %v12615_v0, %v8139_v51 }
 0x2b9   : > { %v2114_v25 = vshrl.u32 %v12630_v47, %v8169_v60  ;;  %v6832_v5 = vpop.eup %6831  ;;  %v2473_v35 = vand.u32 2147483647, %v2472_v54  ;;  %v2475_v55 = vcvt.s32.f32 %v2468_v2  ;;  %v2106_v42 = vor.u32 %v2105_v52, %v2104_v59 }
 0x2ba   : > { %v8929_v23 = vshrl.u32 %v1321_v27, 30  ;;  %v2482_v26 = vsel %vm8889_vm4, 0, %v2480_v17  ;;  %v4698_v46 = vmul.f32 1.442695, %v4655_v50  ;;  %v2112_v31 = vor.u32 %v2111_v10, %v2110_v3  ;;  %v6834_v61 = vpop.eup %6833 }
 0x2bb   : > { %v2113_v9 = vshll.u32 %v12619_v12, %v8139_v51  ;;  %vm1664_vm6 = vcmp.eq.s32.totalorder %v8901_v14, 0  ;;  %vm1667_vm7 = vcmp.eq.s32.totalorder %v8901_v14, 2  ;;  %v2476_v11 = vmul.f32 %v2475_v55, %v2473_v35 }
 0x2bc   : > { %v1323_v57 = vshll.u32 %v8929_v23, 30  ;;  %v2100_v2 = vshrl.u32 %v12622_v20, %v8169_v60  ;;  %v2109_v52 = vor.u32 %v2108_v24, %v2107_v56  ;;  %v1668_v15 = vxor.u32 2147483648, %v6832_v5 }
 0x2bd   : > { %v2092_v54 = vor.u32 8388608, %v2091_v40  ;;  %v2115_v17 = vor.u32 %v2114_v25, %v2113_v9  ;;  %vm2116_vm8 = vcmp.lt.s32.totalorder %v8166_v37, 1  ;;  %v2477_v50 = vxor.u32 2147483648, %v2476_v11 }
 0x2be   : > { %v8941_v10 = vsub.s32 %v1320_v16, %v1323_v57  ;;  %vm2119_vm9 = vcmp.lt.s32.totalorder %v8166_v37, 4  ;;  %v2124_v51 = vsel %vm2116_vm8, %v2103_v4, %v2106_v42  ;;  %v1665_v27 = vxor.u32 2147483648, %v6834_v61 }
 0x2bf   : > { %vm2117_vm10 = vcmp.lt.s32.totalorder %v8166_v37, 2  ;;  %vm2118_vm11 = vcmp.lt.s32.totalorder %v8166_v37, 3  ;;  %v2125_v60 = vsel %vm2119_vm9, %v2112_v31, 920167782  ;;  %v2478_v40 = vsel %vm2395_vm3, %v2477_v50, %v2476_v11 }
 0x2c0   : > { %v1326_v59 = vsub.s32 0, %v8941_v10  ;;  %v2121_v24 = vsel %vm2119_vm9, %v2109_v52, 2102212464  ;;  %v2126_v16 = vsel %vm2118_vm11, %v2109_v52, %v2125_v60  ;;  %v2481_v56 = vsel %vm8889_vm4, %v12644_v1, %v2478_v40 }
 0x2c1   : > { %v2127_v3 = vsel %vm2117_vm10, %v2124_v51, %v2126_v16  ;;  %v2128_v25 = vsel %vm2116_vm8, %v2106_v42, %v2109_v52  ;;  %v2129_v35 = vsel %vm2119_vm9, %v2115_v17, 1326507024  ;;  %6835 = vcosq.f32 %v2481_v56  ;;  %v12668_v16 = vld [vmem:[#allocation62_spill] sm:$0xff] }
 0x2c2   : > { %v8960_v55 = vand.u32 3, %v2482_v26  ;;  %v6179_v9 = vmin.u32 %v1326_v59, %v8941_v10  ;;  %v2132_v11 = vshll.u32 %v2092_v54, 8  ;;  %6837 = vsinq.f32 %v2481_v56 }
 0x2c3   : > { %v2120_v57 = vsel %vm2116_vm8, %v2100_v2, %v2103_v4  ;;  %v2122_v49 = vsel %vm2118_vm11, %v2106_v42, %v2121_v24  ;;  %v2130_v50 = vsel %vm2118_vm11, %v2112_v31, %v2129_v35  ;;  %v1666_v54 = vsel %vm1664_vm6, %v6832_v5, %v1665_v27 }
 0x2c4   : > { %v1328_v51 = vclz %v6179_v9  ;;  %v2131_v52 = vsel %vm2117_vm10, %v2128_v25, %v2130_v50  ;;  %v8971_v17 = vmul.u32.u64.low %v2132_v11, %v2127_v3  ;;  %v8972_v26 = vmul.u32.u64.high %v2132_v11, %v2127_v3, %v8971_v17  ;;  %v12669_v25 = vld [vmem:[#allocation57_spill] sm:$0xff] }
 0x2c5   : > { %v1669_v4 = vsel %vm1667_vm7, %v1668_v15, %v6834_v61  ;;  %v8979_v2 = vmul.u32.u64.low %v2132_v11, %v2131_v52  ;;  %v8980_v60 = vmul.u32.u64.high %v2132_v11, %v2131_v52, %v8979_v2  ;;  %v8983_v42 = vmul.f32 1.442695, %v8247_v43 }
 0x2c6   : > { %vm1661_vm12 = vweird.f32 %v12635_v7  ;;  %v6180_v31 = vadd.s32 4294967294, %v1328_v51  ;;  %v2123_v40 = vsel %vm2117_vm10, %v2120_v57, %v2122_v49  ;;  %vm1663_vm13 = vcmp.lt.s32.totalorder %v8901_v14, 2  ;;  %v12667_v14 = vld [vmem:[#allocation21_spill] sm:$0xff] }
 0x2c7   : > { %vm2488_vm14 = vcmp.eq.s32.totalorder %v8960_v55, 0  ;;  %vm2491_vm15 = vcmp.eq.s32.totalorder %v8960_v55, 2  ;;  %6839 = vpow2.f32 %v4698_v46  ;;  %v1670_v5 = vsel %vm1663_vm13, %v1666_v54, %v1669_v4 }
 0x2c8   : > { %vm2487_vm0 = vcmp.lt.s32.totalorder %v8960_v55, 2  ;;  %v1316_v43 = vadd.s32 %v8871_v38, %v8869_v28  ;;  %vm6181_vm1 = vcmp.lt.s32.totalorder %v6180_v31, 0  ;;  %v2142_v61 = vadd.s32 1, %v8972_v26 }
 0x2c9   : > { %vm2485_vm2 = vweird.f32 %v12644_v1  ;;  %v1331_v37 = vsel %vm6181_vm1, 0, %v6180_v31  ;;  %v2139_v15 = vmul.u32 %v2132_v11, %v2123_v40  ;;  %vm2141_vm3 = vc.u32 %v8980_v60, %v8971_v17 }
 0x2ca   : > { %v12448_v27 = vand.u32 2147483647, %v12667_v14  ;;  %v1332_v59 = vsub.s32 32, %v1331_v37  ;;  %v1336_v46 = vsub.s32 4294967266, %v1331_v37  ;;  %v2143_v24 = vsel %vm2141_vm3, %v2142_v61, %v8972_v26 }
 0x2cb   : > { %v1484_v56 = vshrl.u32 %v12628_v39, %v12668_v16  ;;  %v1671_v28 = vsel %vm1661_vm12, nan, %v1670_v5  ;;  %v1346_v38 = vsub.s32 4, %v8929_v23  ;;  %v2144_v3 = vadd.s32 %v2143_v24, %v2139_v15  ;;  %v6836_v9 = vpop.eup %6835 }
 0x2cc   : > { %v1483_v35 = vshll.u32 %v12622_v20, %v12669_v25  ;;  %v1333_v11 = vshll.u32 %v8941_v10, %v1331_v37  ;;  %v1334_v57 = vshrl.u32 %v1316_v43, %v1332_v59  ;;  %v1337_v49 = vadd.s32 127, %v1336_v46  ;;  %v6838_v51 = vpop.eup %6837 }
 0x2cd   : > { %v1486_v50 = vshll.u32 %v12628_v39, %v12669_v25  ;;  %v2492_v52 = vxor.u32 2147483648, %v6836_v9  ;;  %v2145_v26 = vadd.s32 536870912, %v2144_v3  ;;  %v1473_v7 = vand.u32 8388607, %v12448_v27 }
 0x2ce   : > { %v1487_v54 = vshrl.u32 %v12629_v36, %v12668_v16  ;;  %v2489_v4 = vxor.u32 2147483648, %v6838_v51  ;;  %vm1262_vm4 = vcmp.lt.s32.totalorder %v12653_v21, 0  ;;  %v1335_v2 = vor.u32 %v1334_v57, %v1333_v11 }
 0x2cf   : > { %v1338_v31 = vshll.u32 %v1337_v49, 23  ;;  %v1485_v10 = vor.u32 %v1484_v56, %v1483_v35  ;;  %v2493_v40 = vsel %vm2491_vm15, %v2492_v52, %v6838_v51  ;;  %v9017_v5 = vshrl.u32 %v2145_v26, 30  ;;  %v12670_v26 = vld [vmem:[#allocation67_spill] sm:$0xff] }
 0x2d0   : > { %v1490_v43 = vshrl.u32 %v12615_v0, %v12668_v16  ;;  %v1493_v61 = vshrl.u32 %v12619_v12, %v12668_v16  ;;  %v2490_v37 = vsel %vm2488_vm14, %v6836_v9, %v2489_v4  ;;  %v1489_v59 = vshll.u32 %v12629_v36, %v12669_v25 }
 0x2d1   : > { %v1339_v15 = vor.u32 4788187, %v1338_v31  ;;  %v1492_v46 = vshll.u32 %v12615_v0, %v12669_v25  ;;  %v6840_v24 = vpop.eup %6839  ;;  %v2494_v56 = vsel %vm2487_vm0, %v2490_v37, %v2493_v40  ;;  %v1342_v35 = vcvt.s32.f32 %v1335_v2  ;;  %v12674_v37 = vld [vmem:[#allocation55_spill] sm:$0xff] }
 0x2d2   : > { %v2147_v11 = vshll.u32 %v9017_v5, 30  ;;  %v1488_v57 = vor.u32 %v1487_v54, %v1486_v50  ;;  %v2495_v49 = vsel %vm2485_vm2, nan, %v2494_v56  ;;  %v1496_v52 = vshrl.u32 %v12630_v47, %v12668_v16 }
 0x2d3   : > { %v1340_v51 = vand.u32 2147483647, %v1339_v15  ;;  %v1494_v9 = vor.u32 %v1493_v61, %v1492_v46  ;;  %v4743_v4 = vmul.f32 %v12670_v26, %v1671_v28  ;;  %v4751_v31 = vmul.f32 %v6840_v24, %v2495_v49 }
 0x2d4   : > { %v9037_v27 = vsub.s32 %v2144_v3, %v2147_v11  ;;  %v1491_v63 = vor.u32 %v1490_v43, %v1489_v59  ;;  %v12671_v55 = vand.u32 2147483647, %v12653_v21  ;;  %v1474_v1 = vor.u32 8388608, %v1473_v7 }
 0x2d5   : > { %v1343_v50 = vmul.f32 %v1342_v35, %v1340_v51  ;;  %v1495_v54 = vshll.u32 %v12619_v12, %v12669_v25  ;;  %v6353_v40 = vpack.c.bf16 %v4751_v31, %v4743_v4  ;;  %vm1498_vm6 = vcmp.lt.s32.totalorder %v12674_v37, 1 }
 0x2d6   : > { %vm9041_vm5 = vcmp.le.f32.partialorder %v12671_v55, 0.7853982  ;;  %v2150_v61 = vsub.s32 0, %v9037_v27  ;;  %vm1501_vm7 = vcmp.lt.s32.totalorder %v12674_v37, 4  ;;  %v1506_v43 = vsel %vm1498_vm6, %v1485_v10, %v1488_v57 }
 0x2d7   : > { %v1344_v28 = vxor.u32 2147483648, %v1343_v50  ;;  %v1497_v3 = vor.u32 %v1496_v52, %v1495_v54  ;;  %v1507_v15 = vsel %vm1501_vm7, %v1494_v9, 920167782  ;;  %6354 = vmatprep.subr.bf16.mxu1 %v6353_v40  ;;  %v1347_v25 = vsel %vm1262_vm4, %v1346_v38, %v8929_v23 }
 0x2d8   : > { %v6211_v7 = vmin.u32 %v2150_v61, %v9037_v27  ;;  %vm1500_vm8 = vcmp.lt.s32.totalorder %v12674_v37, 3  ;;  %v1503_v59 = vsel %vm1501_vm7, %v1491_v63, 2102212464  ;;  %v1482_v24 = vshrl.u32 %v12622_v20, %v12668_v16 }
 0x2d9   : > { %v1345_v46 = vsel %vm1262_vm4, %v1344_v28, %v1343_v50  ;;  %vm1499_vm9 = vcmp.lt.s32.totalorder %v12674_v37, 2  ;;  %v1508_v56 = vsel %vm1500_vm8, %v1491_v63, %v1507_v15  ;;  %v1510_v11 = vsel %vm1498_vm6, %v1488_v57, %v1491_v63 }
 0x2da   : > { %v1348_v23 = vsel %vm9041_vm5, %v12653_v21, %v1345_v46  ;;  %v2152_v38 = vclz %v6211_v7  ;;  %v1509_v35 = vsel %vm1499_vm9, %v1506_v43, %v1508_v56  ;;  %v1502_v49 = vsel %vm1498_vm6, %v1482_v24, %v1485_v10  ;;  %v12676_v43 = vld [vmem:[#allocation36_spill] sm:$0xff] }
 0x2db   : > { %v1504_v16 = vsel %vm1500_vm8, %v1488_v57, %v1503_v59  ;;  %v1511_v51 = vsel %vm1501_vm7, %v1497_v3, 1326507024  ;;  %v1514_v52 = vshll.u32 %v1474_v1, 8  ;;  %v1349_v26 = vsel %vm9041_vm5, 0, %v1347_v25  ;;  %v12675_v3 = vld [vmem:[#allocation43_spill] sm:$0xff]  ;;  %v12677_v59 = vld [vmem:[#allocation42_spill] sm:$0xff] }
 0x2dc   : > { %6841 = vcosq.f32 %v1348_v23  ;;  %v6212_v4 = vadd.s32 4294967294, %v2152_v38  ;;  %v1512_v31 = vsel %vm1500_vm8, %v1494_v9, %v1511_v51  ;;  %v2170_v63 = vsub.s32 4, %v9017_v5 }
 0x2dd   : > { %v1513_v10 = vsel %vm1499_vm9, %v1510_v11, %v1512_v31  ;;  %v9088_v55 = vmul.u32.u64.low %v1514_v52, %v1509_v35  ;;  %v9089_v50 = vmul.u32.u64.high %v1514_v52, %v1509_v35, %v9088_v55  ;;  %v1505_v57 = vsel %vm1499_vm9, %v1502_v49, %v1504_v16 }
 0x2de   : > { %vm6213_vm10 = vcmp.lt.s32.totalorder %v6212_v4, 0  ;;  %v9094_v2 = vmul.u32.u64.low %v1514_v52, %v1513_v10  ;;  %v9095_v1 = vmul.u32.u64.high %v1514_v52, %v1513_v10, %v9094_v2  ;;  %6843 = vsinq.f32 %v1348_v23 }
 0x2df   : > { %v9097_v54 = vand.u32 3, %v1349_v26  ;;  %vm2086_vm11 = vcmp.lt.s32.totalorder %v12664_v29, 0  ;;  %v2155_v9 = vsel %vm6213_vm10, 0, %v6212_v4  ;;  %v2140_v40 = vadd.s32 %v8971_v17, %v8980_v60 }
 0x2e0   : > { %v2156_v61 = vsub.s32 32, %v2155_v9  ;;  %v2160_v28 = vsub.s32 4294967266, %v2155_v9  ;;  %v4652_v15 = vmul.f32 %v12676_v43, %v12675_v3  ;;  %v2171_v37 = vsel %vm2086_vm11, %v2170_v63, %v9017_v5 }
 0x2e1   : > { %v1521_v25 = vmul.u32 %v1514_v52, %v1505_v57  ;;  %v1524_v7 = vadd.s32 1, %v9089_v50  ;;  %v12450_v46 = vand.u32 2147483647, %v12677_v59  ;;  %v2157_v24 = vshll.u32 %v9037_v27, %v2155_v9  ;;  %v12681_v57 = vld [vmem:[#allocation75_spill] sm:$0xff] }
 0x2e2   : > { %v2158_v56 = vshrl.u32 %v2140_v40, %v2156_v61  ;;  %v2161_v23 = vadd.s32 127, %v2160_v28  ;;  %vm1523_vm12 = vc.u32 %v9095_v1, %v9088_v55  ;;  %v9113_v17 = vshrl.u32 %v8878_v53, 5 }
 0x2e3   : > { %v9116_v60 = vand.u32 31, %v8878_v53  ;;  %v12678_v5 = vand.u32 2147483647, %v12664_v29  ;;  %v1525_v35 = vsel %vm1523_vm12, %v1524_v7, %v9089_v50  ;;  %vm1358_vm14 = vcmp.eq.s32.totalorder %v9097_v54, 2 }
 0x2e4   : > { %v2159_v27 = vor.u32 %v2158_v56, %v2157_v24  ;;  %v2162_v11 = vshll.u32 %v2161_v23, 23  ;;  %v9126_v49 = vmul.f32 1.442695, %v4652_v15  ;;  %v1526_v16 = vadd.s32 %v1525_v35, %v1521_v25 }
 0x2e5   : > { %vm9120_vm13 = vcmp.le.f32.partialorder %v12678_v5, 0.7853982  ;;  %v2297_v53 = vand.u32 8388607, %v12450_v46  ;;  %v2308_v52 = vshrl.u32 %v12628_v39, %v8182_v22  ;;  %v2317_v26 = vshrl.u32 %v12619_v12, %v8182_v22 }
 0x2e6   : > { %v2173_v51 = vsel %vm9120_vm13, 0, %v2171_v37  ;;  %v6842_v4 = vpop.eup %6841  ;;  %v2163_v31 = vor.u32 4788187, %v2162_v11  ;;  %v1527_v63 = vadd.s32 536870912, %v1526_v16  ;;  %v2311_v10 = vshrl.u32 %v12629_v36, %v8182_v22 }
 0x2e7   : > { %v2314_v50 = vshrl.u32 %v12615_v0, %v8182_v22  ;;  %vm1355_vm15 = vcmp.eq.s32.totalorder %v9097_v54, 0  ;;  %v2307_v2 = vshll.u32 %v12622_v20, %v12681_v57  ;;  %v2310_v9 = vshll.u32 %v12628_v39, %v12681_v57 }
 0x2e8   : > { %v2316_v40 = vshll.u32 %v12615_v0, %v12681_v57  ;;  %v2320_v61 = vshrl.u32 %v12630_v47, %v8182_v22  ;;  %vm2816_vm0 = vcmp.gt.s32.totalorder %v8880_v30, 0  ;;  %v2164_v28 = vand.u32 2147483647, %v2163_v31  ;;  %v6844_v37 = vpop.eup %6843 }
 0x2e9   : > { %v2166_v3 = vcvt.s32.f32 %v2159_v27  ;;  %v9150_v43 = vshrl.u32 %v1527_v63, 30  ;;  %v2313_v15 = vshll.u32 %v12629_v36, %v12681_v57  ;;  %v1359_v25 = vxor.u32 2147483648, %v6842_v4 }
 0x2ea   : > { %v2309_v7 = vor.u32 %v2308_v52, %v2307_v2  ;;  %v2318_v24 = vor.u32 %v2317_v26, %v2316_v40  ;;  %v2319_v56 = vshll.u32 %v12619_v12, %v12681_v57  ;;  %v2312_v35 = vor.u32 %v2311_v10, %v2310_v9  ;;  %v12682_v52 = vld [vmem:[#allocation76_spill] sm:$0xff] }
 0x2eb   : > { %v2167_v23 = vmul.f32 %v2166_v3, %v2164_v28  ;;  %v1529_v5 = vshll.u32 %v9150_v43, 30  ;;  %v2315_v11 = vor.u32 %v2314_v50, %v2313_v15  ;;  %v9157_v46 = vand.u32 3, %v2173_v51 }
 0x2ec   : > { %v2298_v27 = vor.u32 8388608, %v2297_v53  ;;  %v2306_v31 = vshrl.u32 %v12622_v20, %v8182_v22  ;;  %v2321_v63 = vor.u32 %v2320_v61, %v2319_v56  ;;  %v1356_v18 = vxor.u32 2147483648, %v6844_v37 }
 0x2ed   : > { %v2168_v32 = vxor.u32 2147483648, %v2167_v23  ;;  %v9161_v8 = vsub.s32 %v1526_v16, %v1529_v5  ;;  %vm2325_vm1 = vcmp.lt.s32.totalorder %v12682_v52, 4  ;;  %v1360_v26 = vsel %vm1358_vm14, %v1359_v25, %v6844_v37 }
 0x2ee   : > { %vm2322_vm2 = vcmp.lt.s32.totalorder %v12682_v52, 1  ;;  %vm2324_vm3 = vcmp.lt.s32.totalorder %v12682_v52, 3  ;;  %v2331_v51 = vsel %vm2325_vm1, %v2318_v24, 920167782  ;;  %v2327_v10 = vsel %vm2325_vm1, %v2315_v11, 2102212464 }
 0x2ef   : > { %v2169_v53 = vsel %vm2086_vm11, %v2168_v32, %v2167_v23  ;;  %v1532_v22 = vsub.s32 0, %v9161_v8  ;;  %v2330_v16 = vsel %vm2322_vm2, %v2309_v7, %v2312_v35  ;;  %v2332_v57 = vsel %vm2324_vm3, %v2315_v11, %v2331_v51 }
 0x2f0   : > { %v2172_v50 = vsel %vm9120_vm13, %v12664_v29, %v2169_v53  ;;  %v2334_v2 = vsel %vm2322_vm2, %v2312_v35, %v2315_v11  ;;  %v2335_v9 = vsel %vm2325_vm1, %v2321_v63, 1326507024  ;;  %v1357_v32 = vsel %vm1355_vm15, %v6842_v4, %v1356_v18 }
 0x2f1   : > { %6845 = vcosq.f32 %v2172_v50  ;;  %v6187_v40 = vmin.u32 %v1532_v22, %v9161_v8  ;;  %vm2323_vm4 = vcmp.lt.s32.totalorder %v12682_v52, 2  ;;  %v2326_v38 = vsel %vm2322_vm2, %v2306_v31, %v2309_v7 }
 0x2f2   : > { %6847 = vsinq.f32 %v2172_v50  ;;  %v2328_v61 = vsel %vm2324_vm3, %v2312_v35, %v2327_v10  ;;  %v2336_v28 = vsel %vm2324_vm3, %v2318_v24, %v2335_v9  ;;  %v2333_v15 = vsel %vm2323_vm4, %v2330_v16, %v2332_v57 }
 0x2f3   : > { %v1534_v3 = vclz %v6187_v40  ;;  %v2337_v18 = vsel %vm2323_vm4, %v2334_v2, %v2336_v28  ;;  %v2338_v4 = vshll.u32 %v2298_v27, 8  ;;  %v9197_v37 = vsel %vm2816_vm0, %v8880_v30, 0  ;;  %v12683_v30 = vld [vmem:[#allocation28_spill] sm:$0xff] }
 0x2f4   : > { %vm1352_vm5 = vweird.f32 %v12653_v21  ;;  %vm1354_vm6 = vcmp.lt.s32.totalorder %v9097_v54, 2  ;;  %6849 = vpow2.f32 %v9126_v49  ;;  %v2329_v23 = vsel %vm2323_vm4, %v2326_v38, %v2328_v61 }
 0x2f5   : > { %v1361_v25 = vsel %vm1354_vm6, %v1357_v32, %v1360_v26  ;;  %v6188_v7 = vadd.s32 4294967294, %v1534_v3  ;;  %v9202_v24 = vmul.u32.u64.low %v2338_v4, %v2337_v18  ;;  %v9203_v56 = vmul.u32.u64.high %v2338_v4, %v2337_v18, %v9202_v24 }
 0x2f6   : > { %v9207_v5 = vmul.u32.u64.low %v2338_v4, %v2333_v15  ;;  %v9208_v35 = vmul.u32.u64.high %v2338_v4, %v2333_v15, %v9207_v5  ;;  %v12456_v11 = vand.u32 2147483647, %v12683_v30  ;;  %vm2178_vm7 = vcmp.lt.s32.totalorder %v9157_v46, 2 }
 0x2f7   : > { %vm2179_vm8 = vcmp.eq.s32.totalorder %v9157_v46, 0  ;;  %vm2182_vm9 = vcmp.eq.s32.totalorder %v9157_v46, 2  ;;  %vm6189_vm10 = vcmp.lt.s32.totalorder %v6188_v7, 0  ;;  %vm2176_vm11 = vweird.f32 %v12664_v29 }
 0x2f8   : > { %v1522_v54 = vadd.s32 %v9088_v55, %v9095_v1  ;;  %v1537_v49 = vsel %vm6189_vm10, 0, %v6188_v7  ;;  %v1552_v27 = vsub.s32 4, %v9150_v43  ;;  %v3029_v31 = vshrl.u32 %v12628_v39, %v8288_v33  ;;  %v12684_v1 = vld [vmem:[#allocation91_spill] sm:$0xff] }
 0x2f9   : > { %v1362_v63 = vsel %vm1352_vm5, nan, %v1361_v25  ;;  %v1538_v52 = vsub.s32 32, %v1537_v49  ;;  %v1542_v26 = vsub.s32 4294967266, %v1537_v49  ;;  %v2345_v51 = vmul.u32 %v2338_v4, %v2329_v23 }
 0x2fa   : > { %vm2347_vm12 = vc.u32 %v9203_v56, %v9207_v5  ;;  %v2348_v53 = vadd.s32 1, %v9208_v35  ;;  %v9228_v55 = vand.u32 8388607, %v12456_v11  ;;  %v3028_v22 = vshll.u32 %v12622_v20, %v12684_v1 }
 0x2fb   : > { %v6846_v10 = vpop.eup %6845  ;;  %v1539_v16 = vshll.u32 %v9161_v8, %v1537_v49  ;;  %v1540_v21 = vshrl.u32 %v1522_v54, %v1538_v52  ;;  %v1543_v50 = vadd.s32 127, %v1542_v26  ;;  %v3032_v57 = vshrl.u32 %v12629_v36, %v8288_v33 }
 0x2fc   : > { %v6848_v2 = vpop.eup %6847  ;;  %v2183_v9 = vxor.u32 2147483648, %v6846_v10  ;;  %v2349_v32 = vsel %vm2347_vm12, %v2348_v53, %v9208_v35  ;;  %v3030_v40 = vor.u32 %v3029_v31, %v3028_v22  ;;  %v3031_v38 = vshll.u32 %v12628_v39, %v12684_v1 }
 0x2fd   : > { %v2180_v61 = vxor.u32 2147483648, %v6848_v2  ;;  %v1541_v28 = vor.u32 %v1540_v21, %v1539_v16  ;;  %v1544_v3 = vshll.u32 %v1543_v50, 23  ;;  %v2350_v15 = vadd.s32 %v2349_v32, %v2345_v51 }
 0x2fe   : > { %v6850_v18 = vpop.eup %6849  ;;  %v2184_v8 = vsel %vm2182_vm9, %v2183_v9, %v6848_v2  ;;  %v3035_v4 = vshrl.u32 %v12615_v0, %v8288_v33  ;;  %v3037_v25 = vshll.u32 %v12615_v0, %v12684_v1  ;;  %v3038_v7 = vshrl.u32 %v12619_v12, %v8288_v33 }
 0x2ff   : > { %v2181_v24 = vsel %vm2179_vm8, %v6846_v10, %v2180_v61  ;;  %v1545_v23 = vor.u32 4788187, %v1544_v3  ;;  %v2351_v35 = vadd.s32 536870912, %v2350_v15  ;;  %v3033_v54 = vor.u32 %v3032_v57, %v3031_v38  ;;  %v12685_v10 = vld [vmem:[#allocation60_spill] sm:$0xff]  ;;  %v12686_v38 = vld [vmem:[#allocation94_spill] sm:$0xff] }
 0x300   : > { %v2185_v49 = vsel %vm2178_vm7, %v2181_v24, %v2184_v8  ;;  %v3034_v31 = vshll.u32 %v12629_v36, %v12684_v1  ;;  %v3039_v52 = vor.u32 %v3038_v7, %v3037_v25  ;;  %v3041_v26 = vshrl.u32 %v12630_v47, %v8288_v33 }
 0x301   : > { %v2186_v51 = vsel %vm2176_vm11, nan, %v2185_v49  ;;  %v1546_v53 = vand.u32 2147483647, %v1545_v23  ;;  %v1548_v22 = vcvt.s32.f32 %v1541_v28  ;;  %v9256_v16 = vshrl.u32 %v2351_v35, 30 }
 0x302   : > { %v4740_v21 = vmul.f32 %v12685_v10, %v1362_v63  ;;  %v4748_v50 = vmul.f32 %v6850_v18, %v2186_v51  ;;  %v3036_v57 = vor.u32 %v3035_v4, %v3034_v31  ;;  %v3040_v46 = vshll.u32 %v12619_v12, %v12684_v1 }
 0x303   : > { %v1549_v2 = vmul.f32 %v1548_v22, %v1546_v53  ;;  %v2353_v9 = vshll.u32 %v9256_v16, 30  ;;  %v3019_v32 = vor.u32 8388608, %v9228_v55  ;;  %vm3046_vm13 = vcmp.lt.s32.totalorder %v12686_v38, 4 }
 0x304   : > { %v6347_v29 = vpack.c.bf16 %v4748_v50, %v4740_v21  ;;  %v3042_v61 = vor.u32 %v3041_v26, %v3040_v46  ;;  %vm3043_vm14 = vcmp.lt.s32.totalorder %v12686_v38, 1  ;;  %v3052_v28 = vsel %vm3046_vm13, %v3039_v52, 920167782 }
 0x305   : > { %v1550_v63 = vxor.u32 2147483648, %v1549_v2  ;;  %v9267_v3 = vsub.s32 %v2350_v15, %v2353_v9  ;;  %vm3045_vm15 = vcmp.lt.s32.totalorder %v12686_v38, 3  ;;  %v3051_v1 = vsel %vm3043_vm14, %v3030_v40, %v3033_v54 }
 0x306   : > { %v9273_v18 = vand.u32 31, %v9197_v37  ;;  %6851 = vpow2.f32 %v8983_v42  ;;  %6348 = vmatpush1.bf16.msra.mxu0 %v6347_v29  ;;  %vm1468_vm0 = vcmp.lt.s32.totalorder %v12667_v14, 0  ;;  %v3053_v55 = vsel %vm3045_vm15, %v3036_v57, %v3052_v28 }
 0x307   : > { %v1551_v8 = vsel %vm1468_vm0, %v1550_v63, %v1549_v2  ;;  %v2356_v15 = vsub.s32 0, %v9267_v3  ;;  %vm3044_vm1 = vcmp.lt.s32.totalorder %v12686_v38, 2  ;;  %v3048_v4 = vsel %vm3046_vm13, %v3036_v57, 2102212464  ;;  %v12693_v63 = vld [vmem:[#allocation45_spill] sm:$0xff] }
 0x308   : > { %v3027_v25 = vshrl.u32 %v12622_v20, %v8288_v33  ;;  %v3054_v42 = vsel %vm3044_vm1, %v3051_v1, %v3053_v55  ;;  %v3055_v7 = vsel %vm3043_vm14, %v3033_v54, %v3036_v57  ;;  %v3056_v24 = vsel %vm3046_vm13, %v3042_v61, 1326507024  ;;  %v12691_v61 = vld [vmem:[#allocation24_spill] sm:$0xff] }
 0x309   : > { %v12687_v23 = vand.u32 2147483647, %v12667_v14  ;;  %v1553_v49 = vsel %vm1468_vm0, %v1552_v27, %v9150_v43  ;;  %v6219_v33 = vmin.u32 %v2356_v15, %v9267_v3  ;;  %v3059_v31 = vshll.u32 %v3019_v32, 8  ;;  %v12690_v32 = vld [vmem:[#allocation29_spill] sm:$0xff]  ;;  %v12694_v1 = vld [vmem:[#allocation40_spill] sm:$0xff] }
 0x30a   : > { %v3047_v51 = vsel %vm3043_vm14, %v3027_v25, %v3030_v40  ;;  %v3049_v53 = vsel %vm3045_vm15, %v3033_v54, %v3048_v4  ;;  %v3057_v22 = vsel %vm3045_vm15, %v3039_v52, %v3056_v24  ;;  %v9317_v50 = vsub.s32 32, %v9116_v60 }
 0x30b   : > { %vm9293_vm2 = vcmp.le.f32.partialorder %v12687_v23, 0.7853982  ;;  %v2358_v10 = vclz %v6219_v33  ;;  %v3058_v43 = vsel %vm3044_vm1, %v3055_v7, %v3057_v22  ;;  %v9325_v54 = vshrl.u32 %v9197_v37, 5 }
 0x30c   : > { %v1554_v26 = vsel %vm9293_vm2, %v12667_v14, %v1551_v8  ;;  %v9312_v27 = vmul.u32.u64.low %v3059_v31, %v3054_v42  ;;  %v9313_v21 = vmul.u32.u64.high %v3059_v31, %v3054_v42, %v9312_v27  ;;  %v1555_v40 = vsel %vm9293_vm2, 0, %v1553_v49 }
 0x30d   : > { %v9321_v57 = vmul.u32.u64.low %v3059_v31, %v3058_v43  ;;  %v9322_v46 = vmul.u32.u64.high %v3059_v31, %v3058_v43, %v9321_v57  ;;  %v9328_v52 = vsub.s32 32, %v9273_v18  ;;  %v6220_v2 = vadd.s32 4294967294, %v2358_v10 }
 0x30e   : > { %v3050_v9 = vsel %vm3044_vm1, %v3047_v51, %v3049_v53  ;;  %v9334_v28 = vmul.f32 1.442695, %v12691_v61  ;;  %6853 = vcosq.f32 %v1554_v26  ;;  %v4654_v55 = vmul.f32 %v12694_v1, %v12693_v63 }
 0x30f   : > { %v9338_v8 = vand.u32 3, %v1555_v40  ;;  %vm2292_vm3 = vcmp.lt.s32.totalorder %v12677_v59, 0  ;;  %vm6221_vm4 = vcmp.lt.s32.totalorder %v6220_v2, 0  ;;  %v3069_v37 = vadd.s32 1, %v9313_v21 }
 0x310   : > { %12692 = vst [vmem:[#allocation47_spill] sm:$0xff] %v9334_v28  ;;  %v9342_v15 = vpop.eup %6851  ;;  %v2346_v38 = vadd.s32 %v9207_v5, %v9203_v56  ;;  %v2361_v4 = vsel %vm6221_vm4, 0, %v6220_v2  ;;  %v3066_v25 = vmul.u32 %v3059_v31, %v3050_v9  ;;  %vm3068_vm5 = vc.u32 %v9322_v46, %v9312_v27  ;;  %v12698_v5 = vld [vmem:[#allocation83_spill] sm:$0xff] }
 0x311   : > { %6855 = vsinq.f32 %v1554_v26  ;;  %v12695_v42 = vand.u32 2147483647, %v12677_v59  ;;  %v2362_v24 = vsub.s32 32, %v2361_v4  ;;  %v2366_v23 = vsub.s32 4294967266, %v2361_v4 }
 0x312   : > { %v3070_v35 = vsel %vm3068_vm5, %v3069_v37, %v9313_v21  ;;  %v2376_v49 = vsub.s32 4, %v9256_v16  ;;  %v9356_v33 = vmul.f32 1.442695, %v4654_v55  ;;  %v12455_v31 = vand.u32 2147483647, %v12698_v5 }
 0x313   : > { %vm9350_vm6 = vcmp.le.f32.partialorder %v12695_v42, 0.7853982  ;;  %v3071_v56 = vadd.s32 %v3070_v35, %v3066_v25  ;;  %v2363_v51 = vshll.u32 %v9267_v3, %v2361_v4  ;;  %v2364_v26 = vshrl.u32 %v2346_v38, %v2362_v24 }
 0x314   : > { %v2367_v53 = vadd.s32 127, %v2366_v23  ;;  %v3852_v22 = vshll.u32 %v12622_v20, %v8373_v45  ;;  %v3853_v43 = vshrl.u32 %v12628_v39, %v8389_v34  ;;  %v3856_v21 = vshrl.u32 %v12629_v36, %v8389_v34 }
 0x315   : > { %v3072_v10 = vadd.s32 536870912, %v3071_v56  ;;  %v3862_v40 = vshrl.u32 %v12619_v12, %v8389_v34  ;;  %v2365_v57 = vor.u32 %v2364_v26, %v2363_v51  ;;  %v3859_v3 = vshrl.u32 %v12615_v0, %v8389_v34 }
 0x316   : > { %v2368_v2 = vshll.u32 %v2367_v53, 23  ;;  %v3865_v9 = vshrl.u32 %v12630_v47, %v8389_v34  ;;  %v3842_v63 = vand.u32 8388607, %v12455_v31  ;;  %v3855_v1 = vshll.u32 %v12628_v39, %v8373_v45 }
 0x317   : > { %v9372_v61 = vshrl.u32 %v3072_v10, 30  ;;  %v3861_v55 = vshll.u32 %v12615_v0, %v8373_v45  ;;  %v2377_v38 = vsel %vm2292_vm3, %v2376_v49, %v9256_v16  ;;  %v3858_v4 = vshll.u32 %v12629_v36, %v8373_v45 }
 0x318   : > { %v2369_v37 = vor.u32 4788187, %v2368_v2  ;;  %v3864_v25 = vshll.u32 %v12619_v12, %v8373_v45  ;;  %v6854_v42 = vpop.eup %6853  ;;  %v3854_v23 = vor.u32 %v3853_v43, %v3852_v22  ;;  %v3857_v35 = vor.u32 %v3856_v21, %v3855_v1 }
 0x319   : > { %v3074_v24 = vshll.u32 %v9372_v61, 30  ;;  %v3863_v51 = vor.u32 %v3862_v40, %v3861_v55  ;;  %v2372_v53 = vcvt.s32.f32 %v2365_v57  ;;  %v3860_v10 = vor.u32 %v3859_v3, %v3858_v4 }
 0x31a   : > { %v2370_v26 = vand.u32 2147483647, %v2369_v37  ;;  %v3866_v2 = vor.u32 %v3865_v9, %v3864_v25  ;;  %v2379_v31 = vsel %vm9350_vm6, 0, %v2377_v38  ;;  %v3843_v49 = vor.u32 8388608, %v3842_v63 }
 0x31b   : > { %v9390_v16 = vsub.s32 %v3071_v56, %v3074_v24  ;;  %v3851_v29 = vshrl.u32 %v12622_v20, %v8389_v34  ;;  %v6856_v45 = vpop.eup %6855  ;;  %v1565_v11 = vxor.u32 2147483648, %v6854_v42  ;;  %vm3867_vm7 = vcmp.lt.s32.totalorder %v8386_v41, 1 }
 0x31c   : > { %v2373_v28 = vmul.f32 %v2372_v53, %v2370_v26  ;;  %vm3870_vm8 = vcmp.lt.s32.totalorder %v8386_v41, 4  ;;  %vm3869_vm9 = vcmp.lt.s32.totalorder %v8386_v41, 3  ;;  %v3875_v43 = vsel %vm3867_vm7, %v3854_v23, %v3857_v35 }
 0x31d   : > { %v3077_v22 = vsub.s32 0, %v9390_v16  ;;  %v3876_v56 = vsel %vm3870_vm8, %v3863_v51, 920167782  ;;  %v3879_v34 = vsel %vm3867_vm7, %v3857_v35, %v3860_v10  ;;  %v3880_v57 = vsel %vm3870_vm8, %v3866_v2, 1326507024 }
 0x31e   : > { %v2374_v21 = vxor.u32 2147483648, %v2373_v28  ;;  %v3877_v40 = vsel %vm3869_vm9, %v3860_v10, %v3876_v56  ;;  %v1562_v3 = vxor.u32 2147483648, %v6856_v45  ;;  %vm3868_vm10 = vcmp.lt.s32.totalorder %v8386_v41, 2  ;;  %v12699_v41 = vld [vmem:[#allocation33_spill] sm:$0xff] }
 0x31f   : > { %v6247_v9 = vmin.u32 %v3077_v22, %v9390_v16  ;;  %v3872_v63 = vsel %vm3870_vm8, %v3860_v10, 2102212464  ;;  %v3878_v55 = vsel %vm3868_vm10, %v3875_v43, %v3877_v40  ;;  %v3881_v37 = vsel %vm3869_vm9, %v3863_v51, %v3880_v57 }
 0x320   : > { %v2375_v1 = vsel %vm2292_vm3, %v2374_v21, %v2373_v28  ;;  %v3883_v38 = vshll.u32 %v3843_v49, 8  ;;  %v3871_v24 = vsel %vm3867_vm7, %v3851_v29, %v3854_v23  ;;  %v3882_v26 = vsel %vm3868_vm10, %v3879_v34, %v3881_v37 }
 0x321   : > { %v2378_v4 = vsel %vm9350_vm6, %v12677_v59, %v2375_v1  ;;  %v3079_v25 = vclz %v6247_v9  ;;  %v3873_v28 = vsel %vm3869_vm9, %v3857_v35, %v3872_v63  ;;  %vm1558_vm11 = vweird.f32 %v12667_v14 }
 0x322   : > { %6857 = vcosq.f32 %v2378_v4  ;;  %v9421_v53 = vmul.u32.u64.low %v3883_v38, %v3882_v26  ;;  %v9422_v10 = vmul.u32.u64.high %v3883_v38, %v3882_v26, %v9421_v53  ;;  %vm1560_vm12 = vcmp.lt.s32.totalorder %v9338_v8, 2 }
 0x323   : > { %6859 = vsinq.f32 %v2378_v4  ;;  %v6248_v51 = vadd.s32 4294967294, %v3079_v25  ;;  %v9424_v2 = vmul.u32.u64.low %v3883_v38, %v3878_v55  ;;  %v9425_v49 = vmul.u32.u64.high %v3883_v38, %v3878_v55, %v9424_v2 }
 0x324   : > { %vm1561_vm13 = vcmp.eq.s32.totalorder %v9338_v8, 0  ;;  %vm1564_vm14 = vcmp.eq.s32.totalorder %v9338_v8, 2  ;;  %v3874_v23 = vsel %vm3868_vm10, %v3871_v24, %v3873_v28  ;;  %v2383_v35 = vand.u32 3, %v2379_v31 }
 0x325   : > { %v1563_v29 = vsel %vm1561_vm13, %v6854_v42, %v1562_v3  ;;  %v1566_v7 = vsel %vm1564_vm14, %v1565_v11, %v6856_v45  ;;  %vm6249_vm15 = vcmp.lt.s32.totalorder %v6248_v51, 0  ;;  %6861 = vpow2.f32 %v9356_v33 }
 0x326   : > { %v3082_v22 = vsel %vm6249_vm15, 0, %v6248_v51  ;;  %vm3892_vm0 = vc.u32 %v9422_v10, %v9424_v2  ;;  %v3067_v43 = vadd.s32 %v9312_v27, %v9322_v46  ;;  %v3893_v40 = vadd.s32 1, %v9425_v49 }
 0x327   : > { %v3083_v56 = vsub.s32 32, %v3082_v22  ;;  %v3087_v21 = vsub.s32 4294967266, %v3082_v22  ;;  %v1567_v11 = vsel %vm1560_vm12, %v1563_v29, %v1566_v7  ;;  %v3890_v42 = vmul.u32 %v3883_v38, %v3874_v23 }
 0x328   : > { %v3217_v45 = vand.u32 2147483647, %v12699_v41  ;;  %v3235_v33 = vshrl.u32 %v12628_v39, %v8353_v6  ;;  %vm2382_vm1 = vweird.f32 %v12677_v59  ;;  %v3084_v31 = vshll.u32 %v9390_v16, %v3082_v22 }
 0x329   : > { %v3085_v34 = vshrl.u32 %v3067_v43, %v3083_v56  ;;  %v3088_v57 = vadd.s32 127, %v3087_v21  ;;  %v3894_v27 = vsel %vm3892_vm0, %v3893_v40, %v9425_v49  ;;  %vm2384_vm2 = vcmp.lt.s32.totalorder %v2383_v35, 2 }
 0x32a   : > { %vm2385_vm3 = vcmp.eq.s32.totalorder %v2383_v35, 0  ;;  %vm2388_vm4 = vcmp.eq.s32.totalorder %v2383_v35, 2  ;;  %v3895_v46 = vadd.s32 %v3894_v27, %v3890_v42  ;;  %v1568_v8 = vsel %vm1558_vm11, nan, %v1567_v11 }
 0x32b   : > { %v3086_v3 = vor.u32 %v3085_v34, %v3084_v31  ;;  %v3089_v9 = vshll.u32 %v3088_v57, 23  ;;  %v3234_v63 = vshll.u32 %v12622_v20, %v8291_v48  ;;  %vm3013_vm5 = vcmp.lt.s32.totalorder %v12683_v30, 0 }
 0x32c   : > { %v6858_v1 = vpop.eup %6857  ;;  %v3896_v16 = vadd.s32 536870912, %v3895_v46  ;;  %v3224_v55 = vand.u32 8388607, %v3217_v45  ;;  %v3237_v37 = vshll.u32 %v12628_v39, %v8291_v48  ;;  %v3238_v38 = vshrl.u32 %v12629_v36, %v8353_v6 }
 0x32d   : > { %v6860_v14 = vpop.eup %6859  ;;  %v2389_v4 = vxor.u32 2147483648, %v6858_v1  ;;  %v3090_v25 = vor.u32 4788187, %v3089_v9  ;;  %v3236_v24 = vor.u32 %v3235_v33, %v3234_v63  ;;  %v3244_v26 = vshrl.u32 %v12619_v12, %v8353_v6 }
 0x32e   : > { %v2386_v28 = vxor.u32 2147483648, %v6860_v14  ;;  %v12700_v53 = vand.u32 2147483647, %v12683_v30  ;;  %v9467_v49 = vshrl.u32 %v3896_v16, 30  ;;  %v3241_v29 = vshrl.u32 %v12615_v0, %v8353_v6  ;;  %v12703_v16 = vld [vmem:[#allocation61_spill] sm:$0xff] }
 0x32f   : > { %v3243_v7 = vshll.u32 %v12615_v0, %v8291_v48  ;;  %v2390_v23 = vsel %vm2388_vm4, %v2389_v4, %v6860_v14  ;;  %v3091_v22 = vand.u32 2147483647, %v3090_v25  ;;  %v3093_v43 = vcvt.s32.f32 %v3086_v3  ;;  %v6862_v21 = vpop.eup %6861 }
 0x330   : > { %vm9463_vm6 = vcmp.le.f32.partialorder %v12700_v53, 0.7853982  ;;  %v3247_v56 = vshrl.u32 %v12630_v47, %v8353_v6  ;;  %v2387_v40 = vsel %vm2385_vm3, %v6858_v1, %v2386_v28  ;;  %v3898_v11 = vshll.u32 %v9467_v49, 30 }
 0x331   : > { %v3239_v42 = vor.u32 %v3238_v38, %v3237_v37  ;;  %v3240_v33 = vshll.u32 %v12629_v36, %v8291_v48  ;;  %v2391_v31 = vsel %vm2384_vm2, %v2387_v40, %v2390_v23  ;;  %v3094_v34 = vmul.f32 %v3093_v43, %v3091_v22 }
 0x332   : > { %v3245_v57 = vor.u32 %v3244_v26, %v3243_v7  ;;  %v3246_v27 = vshll.u32 %v12619_v12, %v8291_v48  ;;  %v2392_v3 = vsel %vm2382_vm1, nan, %v2391_v31  ;;  %v3097_v9 = vsub.s32 4, %v9372_v61 }
 0x333   : > { %v9486_v63 = vsub.s32 %v3895_v46, %v3898_v11  ;;  %v3242_v1 = vor.u32 %v3241_v29, %v3240_v33  ;;  %v4742_v37 = vmul.f32 %v12703_v16, %v1568_v8  ;;  %v4750_v38 = vmul.f32 %v6862_v21, %v2392_v3 }
 0x334   : > { %v3095_v14 = vxor.u32 2147483648, %v3094_v34  ;;  %v3248_v4 = vor.u32 %v3247_v56, %v3246_v27  ;;  %v3225_v25 = vor.u32 8388608, %v3224_v55  ;;  %vm3249_vm7 = vcmp.lt.s32.totalorder %v8342_v58, 1 }
 0x335   : > { %v3901_v35 = vsub.s32 0, %v9486_v63  ;;  %vm3252_vm8 = vcmp.lt.s32.totalorder %v8342_v58, 4  ;;  %v6355_v48 = vpack.c.bf16 %v4750_v38, %v4742_v37  ;;  %v3257_v46 = vsel %vm3249_vm7, %v3236_v24, %v3239_v42 }
 0x336   : > { %v3096_v59 = vsel %vm3013_vm5, %v3095_v14, %v3094_v34  ;;  %v3258_v26 = vsel %vm3252_vm8, %v3245_v57, 920167782  ;;  %vm3250_vm9 = vcmp.lt.s32.totalorder %v8342_v58, 2  ;;  %vm3251_vm10 = vcmp.lt.s32.totalorder %v8342_v58, 3 }
 0x337   : > { %v6279_v8 = vmin.u32 %v3901_v35, %v9486_v63  ;;  %v3261_v55 = vsel %vm3249_vm7, %v3239_v42, %v3242_v1  ;;  %6356 = vmatpush1.bf16.msra.mxu1 %v6355_v48  ;;  %v3099_v28 = vsel %vm9463_vm6, %v12683_v30, %v3096_v59  ;;  %v3254_v53 = vsel %vm3252_vm8, %v3242_v1, 2102212464  ;;  %v12710_v35 = vld [vmem:[#allocation80_spill] sm:$0xff] }
 0x338   : > { %v3259_v29 = vsel %vm3251_vm10, %v3242_v1, %v3258_v26  ;;  %v3262_v7 = vsel %vm3252_vm8, %v3248_v4, 1326507024  ;;  %v3233_v22 = vshrl.u32 %v12622_v20, %v8353_v6  ;;  %v12704_v21 = vand.u32 2139095040, %v12690_v32  ;;  %v12709_v4 = vld [vmem:[#allocation95_spill] sm:$0xff] }
 0x339   : > { %v3903_v23 = vclz %v6279_v8  ;;  %v3260_v43 = vsel %vm3250_vm9, %v3257_v46, %v3259_v29  ;;  %v3263_v56 = vsel %vm3251_vm10, %v3245_v57, %v3262_v7  ;;  %v3098_v11 = vsel %vm3013_vm5, %v3097_v9, %v9372_v61  ;;  %v12705_v61 = vld [vmem:[#allocation52_spill] sm:$0xff] }
 0x33a   : > { %v9514_v40 = vshrl.u32 %v12704_v21, 23  ;;  %v3264_v33 = vsel %vm3250_vm9, %v3261_v55, %v3263_v56  ;;  %v3265_v31 = vshll.u32 %v3225_v25, 8  ;;  %6863 = vcosq.f32 %v3099_v28  ;;  %v12711_v55 = vld [vmem:[#allocation88_spill] sm:$0xff] }
 0x33b   : > { %v6280_v6 = vadd.s32 4294967294, %v3903_v23  ;;  %v3253_v34 = vsel %vm3249_vm7, %v3233_v22, %v3236_v24  ;;  %v3255_v57 = vsel %vm3251_vm10, %v3239_v42, %v3254_v53  ;;  %v3529_v9 = vand.u32 2139095040, %v12705_v61 }
 0x33c   : > { %v9525_v27 = vmul.u32.u64.low %v3265_v31, %v3264_v33  ;;  %v9526_v3 = vmul.u32.u64.high %v3265_v31, %v3264_v33, %v9525_v27  ;;  %v9528_v1 = vmul.u32.u64.low %v3265_v31, %v3260_v43  ;;  %v9529_v16 = vmul.u32.u64.high %v3265_v31, %v3260_v43, %v9528_v1 }
 0x33d   : > { %v3100_v37 = vsel %vm9463_vm6, 0, %v3098_v11  ;;  %vm3837_vm11 = vcmp.lt.s32.totalorder %v12698_v5, 0  ;;  %vm6281_vm12 = vcmp.lt.s32.totalorder %v6280_v6, 0  ;;  %v12706_v24 = vand.u32 2147483647, %v12698_v5  ;;  %v12712_v11 = vld [vmem:[#allocation107_spill] sm:$0xff] }
 0x33e   : > { %v3906_v42 = vsel %vm6281_vm12, 0, %v6280_v6  ;;  %v3921_v14 = vsub.s32 4, %v9467_v49  ;;  %v4669_v25 = vmul.f32 %v12710_v35, %v12709_v4  ;;  %v3256_v48 = vsel %vm3250_vm9, %v3253_v34, %v3255_v57 }
 0x33f   : > { %vm9538_vm13 = vcmp.le.f32.partialorder %v12706_v24, 0.7853982  ;;  %6865 = vsinq.f32 %v3099_v28  ;;  %v3891_v51 = vadd.s32 %v9424_v2, %v9422_v10  ;;  %v3907_v59 = vsub.s32 32, %v3906_v42 }
 0x340   : > { %v3911_v46 = vsub.s32 4294967266, %v3906_v42  ;;  %v9549_v26 = vand.u32 3, %v3100_v37  ;;  %vm3274_vm14 = vc.u32 %v9526_v3, %v9528_v1  ;;  %v3275_v8 = vadd.s32 1, %v9529_v16 }
 0x341   : > { %v4041_v53 = vand.u32 2147483647, %v12711_v55  ;;  %v3908_v29 = vshll.u32 %v9486_v63, %v3906_v42  ;;  %v3909_v7 = vshrl.u32 %v3891_v51, %v3907_v59  ;;  %v3272_v23 = vmul.u32 %v3265_v31, %v3256_v48 }
 0x342   : > { %v3912_v58 = vadd.s32 127, %v3911_v46  ;;  %v3922_v10 = vsel %vm3837_vm11, %v3921_v14, %v9467_v49  ;;  %v9559_v2 = vmul.f32 1.442695, %v4669_v25  ;;  %v3276_v28 = vsel %vm3274_vm14, %v3275_v8, %v9529_v16 }
 0x343   : > { %v4068_v22 = vshrl.u32 %v12619_v12, %v8406_v19  ;;  %v3910_v43 = vor.u32 %v3909_v7, %v3908_v29  ;;  %v3277_v21 = vadd.s32 %v3276_v28, %v3272_v23  ;;  %v4058_v63 = vshll.u32 %v12622_v20, %v12712_v11 }
 0x344   : > { %v3913_v56 = vshll.u32 %v3912_v58, 23  ;;  %vm3109_vm15 = vcmp.eq.s32.totalorder %v9549_v26, 2  ;;  %v4059_v33 = vshrl.u32 %v12628_v39, %v8406_v19  ;;  %v4062_v49 = vshrl.u32 %v12629_v36, %v8406_v19  ;;  %v6864_v34 = vpop.eup %6863 }
 0x345   : > { %v4065_v31 = vshrl.u32 %v12615_v0, %v8406_v19  ;;  %v4067_v6 = vshll.u32 %v12615_v0, %v12712_v11  ;;  %v3278_v27 = vadd.s32 536870912, %v3277_v21  ;;  %v4048_v16 = vand.u32 8388607, %v4041_v53 }
 0x346   : > { %v3914_v57 = vor.u32 4788187, %v3913_v56  ;;  %v4061_v37 = vshll.u32 %v12628_v39, %v12712_v11  ;;  %v4064_v24 = vshll.u32 %v12629_v36, %v12712_v11  ;;  %v4070_v14 = vshll.u32 %v12619_v12, %v12712_v11 }
 0x347   : > { %v4069_v42 = vor.u32 %v4068_v22, %v4067_v6  ;;  %v4071_v4 = vshrl.u32 %v12630_v47, %v8406_v19  ;;  %vm3106_vm0 = vcmp.eq.s32.totalorder %v9549_v26, 0  ;;  %v3917_v25 = vcvt.s32.f32 %v3910_v43  ;;  %v12713_v22 = vld [vmem:[#allocation106_spill] sm:$0xff] }
 0x348   : > { %v3915_v35 = vand.u32 2147483647, %v3914_v57  ;;  %v3924_v48 = vsel %vm9538_vm13, 0, %v3922_v10  ;;  %v9588_v51 = vshrl.u32 %v3278_v27, 30  ;;  %v4060_v59 = vor.u32 %v4059_v33, %v4058_v63 }
 0x349   : > { %v4063_v46 = vor.u32 %v4062_v49, %v4061_v37  ;;  %v4066_v8 = vor.u32 %v4065_v31, %v4064_v24  ;;  %v4072_v29 = vor.u32 %v4071_v4, %v4070_v14  ;;  %v6866_v7 = vpop.eup %6865  ;;  %v3110_v58 = vxor.u32 2147483648, %v6864_v34 }
 0x34a   : > { %v3918_v23 = vmul.f32 %v3917_v25, %v3915_v35  ;;  %v3280_v28 = vshll.u32 %v9588_v51, 30  ;;  %vm4076_vm1 = vcmp.lt.s32.totalorder %v12713_v22, 4  ;;  %v9592_v56 = vand.u32 3, %v3924_v48 }
 0x34b   : > { %v4049_v11 = vor.u32 8388608, %v4048_v16  ;;  %v4057_v43 = vshrl.u32 %v12622_v20, %v8406_v19  ;;  %v4082_v10 = vsel %vm4076_vm1, %v4069_v42, 920167782  ;;  %vm4073_vm2 = vcmp.lt.s32.totalorder %v12713_v22, 1 }
 0x34c   : > { %v3919_v63 = vxor.u32 2147483648, %v3918_v23  ;;  %v9598_v33 = vsub.s32 %v3277_v21, %v3280_v28  ;;  %vm4075_vm3 = vcmp.lt.s32.totalorder %v12713_v22, 3  ;;  %v3107_v49 = vxor.u32 2147483648, %v6866_v7 }
 0x34d   : > { %v4081_v31 = vsel %vm4073_vm2, %v4060_v59, %v4063_v46  ;;  %v4083_v6 = vsel %vm4075_vm3, %v4066_v8, %v4082_v10  ;;  %v4086_v19 = vsel %vm4076_vm1, %v4072_v29, 1326507024  ;;  %v3111_v57 = vsel %vm3109_vm15, %v3110_v58, %v6866_v7  ;;  %v12715_v10 = vld [vmem:[#allocation84_spill] sm:$0xff] }
 0x34e   : > { %v3920_v21 = vsel %vm3837_vm11, %v3919_v63, %v3918_v23  ;;  %v3283_v27 = vsub.s32 0, %v9598_v33  ;;  %v4085_v16 = vsel %vm4073_vm2, %v4063_v46, %v4066_v8  ;;  %vm4074_vm4 = vcmp.lt.s32.totalorder %v12713_v22, 2 }
 0x34f   : > { %v3923_v37 = vsel %vm9538_vm13, %v12698_v5, %v3920_v21  ;;  %v4078_v24 = vsel %vm4076_vm1, %v4066_v8, 2102212464  ;;  %v4087_v14 = vsel %vm4075_vm3, %v4069_v42, %v4086_v19  ;;  %v4084_v35 = vsel %vm4074_vm4, %v4081_v31, %v4083_v6 }
 0x350   : > { %6867 = vcosq.f32 %v3923_v37  ;;  %v6255_v4 = vmin.u32 %v3283_v27, %v9598_v33  ;;  %v4089_v25 = vshll.u32 %v4049_v11, 8  ;;  %v3108_v48 = vsel %vm3106_vm0, %v6864_v34, %v3107_v49 }
 0x351   : > { %6869 = vsinq.f32 %v3923_v37  ;;  %v4077_v38 = vsel %vm4073_vm2, %v4057_v43, %v4060_v59  ;;  %v4088_v8 = vsel %vm4074_vm4, %v4085_v16, %v4087_v14  ;;  %v4079_v42 = vsel %vm4075_vm3, %v4063_v46, %v4078_v24 }
 0x352   : > { %v3285_v29 = vclz %v6255_v4  ;;  %v9634_v7 = vmul.u32.u64.low %v4089_v25, %v4088_v8  ;;  %v9635_v58 = vmul.u32.u64.high %v4089_v25, %v4088_v8, %v9634_v7  ;;  %v9638_v23 = vadd.s32 4294967169, %v9514_v40 }
 0x353   : > { %vm3105_vm5 = vcmp.lt.s32.totalorder %v9549_v26, 2  ;;  %v9641_v34 = vmul.u32.u64.low %v4089_v25, %v4084_v35  ;;  %v9642_v28 = vmul.u32.u64.high %v4089_v25, %v4084_v35, %v9641_v34  ;;  %v9647_v59 = vshrl.u32 %v3529_v9, 23  ;;  %v12714_v26 = vld [vmem:[#allocation26_spill] sm:$0xff] }
 0x354   : > { %vm3103_vm6 = vweird.f32 %v12683_v30  ;;  %v3112_v11 = vsel %vm3105_vm5, %v3108_v48, %v3111_v57  ;;  %v6256_v46 = vadd.s32 4294967294, %v3285_v29  ;;  %vm3930_vm7 = vcmp.eq.s32.totalorder %v9592_v56, 0  ;;  %v12716_v57 = vld [vmem:[#allocation78_spill] sm:$0xff] }
 0x355   : > { %6871 = vpow2.f32 %v9559_v2  ;;  %v4080_v40 = vsel %vm4074_vm4, %v4077_v38, %v4079_v42  ;;  %v12457_v43 = vand.u32 2147483647, %v12714_v26  ;;  %vm3929_vm8 = vcmp.lt.s32.totalorder %v9592_v56, 2 }
 0x356   : > { %vm3933_vm9 = vcmp.eq.s32.totalorder %v9592_v56, 2  ;;  %v3273_v9 = vadd.s32 %v9528_v1, %v9526_v3  ;;  %vm6257_vm10 = vcmp.lt.s32.totalorder %v6256_v46, 0  ;;  %vm4098_vm11 = vc.u32 %v9635_v58, %v9641_v34 }
 0x357   : > { %v3113_v30 = vsel %vm3103_vm6, nan, %v3112_v11  ;;  %vm3927_vm12 = vweird.f32 %v12698_v5  ;;  %v3288_v2 = vsel %vm6257_vm10, 0, %v6256_v46  ;;  %v4099_v22 = vadd.s32 1, %v9642_v28 }
 0x358   : > { %v2926_v63 = vshrl.u32 %v12628_v39, %v12715_v10  ;;  %v3289_v49 = vsub.s32 32, %v3288_v2  ;;  %v3293_v31 = vsub.s32 4294967266, %v3288_v2  ;;  %v3303_v6 = vsub.s32 4, %v9588_v51 }
 0x359   : > { %v4096_v19 = vmul.u32 %v4089_v25, %v4080_v40  ;;  %vm3219_vm13 = vcmp.lt.s32.totalorder %v12699_v41, 0  ;;  %v4100_v3 = vsel %vm4098_vm11, %v4099_v22, %v9642_v28  ;;  %v9670_v1 = vand.u32 8388607, %v12457_v43 }
 0x35a   : > { %v2925_v21 = vshll.u32 %v12622_v20, %v12716_v57  ;;  %v2928_v27 = vshll.u32 %v12628_v39, %v12716_v57  ;;  %v6868_v16 = vpop.eup %6867  ;;  %v3290_v37 = vshll.u32 %v9598_v33, %v3288_v2  ;;  %v3291_v24 = vshrl.u32 %v3273_v9, %v3289_v49 }
 0x35b   : > { %v3294_v14 = vadd.s32 127, %v3293_v31  ;;  %v4101_v4 = vadd.s32 %v4100_v3, %v4096_v19  ;;  %v6870_v35 = vpop.eup %6869  ;;  %v3934_v25 = vxor.u32 2147483648, %v6868_v16  ;;  %v2929_v38 = vshrl.u32 %v12629_v36, %v12715_v10 }
 0x35c   : > { %v2927_v48 = vor.u32 %v2926_v63, %v2925_v21  ;;  %v2935_v8 = vshrl.u32 %v12619_v12, %v12715_v10  ;;  %v3931_v29 = vxor.u32 2147483648, %v6870_v35  ;;  %v3292_v42 = vor.u32 %v3291_v24, %v3290_v37 }
 0x35d   : > { %v3295_v7 = vshll.u32 %v3294_v14, 23  ;;  %v4102_v28 = vadd.s32 536870912, %v4101_v4  ;;  %v3935_v11 = vsel %vm3933_vm9, %v3934_v25, %v6870_v35  ;;  %v2932_v33 = vshrl.u32 %v12615_v0, %v12715_v10  ;;  %v12719_v35 = vld [vmem:[#allocation97_spill] sm:$0xff] }
 0x35e   : > { %v2934_v46 = vshll.u32 %v12615_v0, %v12716_v57  ;;  %v2938_v40 = vshrl.u32 %v12630_v47, %v12715_v10  ;;  %v3932_v9 = vsel %vm3930_vm7, %v6868_v16, %v3931_v29  ;;  %vm9693_vm14 = vcmp.le.f32.partialorder %v3217_v45, 0.7853982 }
 0x35f   : > { %v3296_v22 = vor.u32 4788187, %v3295_v7  ;;  %v9697_v63 = vshrl.u32 %v4102_v28, 30  ;;  %v2931_v49 = vshll.u32 %v12629_v36, %v12716_v57  ;;  %v6872_v31 = vpop.eup %6871  ;;  %v3936_v19 = vsel %vm3929_vm8, %v3932_v9, %v3935_v11 }
 0x360   : > { %v2930_v3 = vor.u32 %v2929_v38, %v2928_v27  ;;  %v2936_v21 = vor.u32 %v2935_v8, %v2934_v46  ;;  %v2937_v16 = vshll.u32 %v12619_v12, %v12716_v57  ;;  %v3937_v45 = vsel %vm3927_vm12, nan, %v3936_v19  ;;  %v12720_v57 = vld [vmem:[#allocation82_spill] sm:$0xff] }
 0x361   : > { %v3297_v37 = vand.u32 2147483647, %v3296_v22  ;;  %v3299_v24 = vcvt.s32.f32 %v3292_v42  ;;  %v4104_v14 = vshll.u32 %v9697_v63, 30  ;;  %v4757_v25 = vmul.f32 %v12719_v35, %v3113_v30 }
 0x362   : > { %v4765_v29 = vmul.f32 %v6872_v31, %v3937_v45  ;;  %v2933_v7 = vor.u32 %v2932_v33, %v2931_v49  ;;  %v2939_v28 = vor.u32 %v2938_v40, %v2937_v16  ;;  %v3304_v56 = vsel %vm3219_vm13, %v3303_v6, %v9588_v51 }
 0x363   : > { %v3300_v43 = vmul.f32 %v3299_v24, %v3297_v37  ;;  %v9712_v27 = vsub.s32 %v4101_v4, %v4104_v14  ;;  %vm2943_vm15 = vcmp.lt.s32.totalorder %v12720_v57, 4  ;;  %v2916_v38 = vor.u32 8388608, %v9670_v1 }
 0x364   : > { %v6349_v5 = vpack.c.bf16 %v4765_v29, %v4757_v25  ;;  %vm2940_vm0 = vcmp.lt.s32.totalorder %v12720_v57, 1  ;;  %v2949_v30 = vsel %vm2943_vm15, %v2936_v21, 920167782  ;;  %vm2942_vm1 = vcmp.lt.s32.totalorder %v12720_v57, 3  ;;  %v12721_v25 = vld [vmem:[#allocation32_spill] sm:$0xff] }
 0x365   : > { %v3301_v8 = vxor.u32 2147483648, %v3300_v43  ;;  %v4107_v42 = vsub.s32 0, %v9712_v27  ;;  %v2948_v51 = vsel %vm2940_vm0, %v2927_v48, %v2930_v3  ;;  %v2924_v6 = vshrl.u32 %v12622_v20, %v12715_v10 }
 0x366   : > { %6350 = vmatprep.subr.bf16.mxu0 %v6349_v5  ;;  %v2950_v1 = vsel %vm2942_vm1, %v2933_v7, %v2949_v30  ;;  %v2952_v4 = vsel %vm2940_vm0, %v2930_v3, %v2933_v7  ;;  %v2953_v11 = vsel %vm2943_vm15, %v2939_v28, 1326507024  ;;  %vm2941_vm2 = vcmp.lt.s32.totalorder %v12720_v57, 2 }
 0x367   : > { %v3302_v33 = vsel %vm3219_vm13, %v3301_v8, %v3300_v43  ;;  %v6287_v46 = vmin.u32 %v4107_v42, %v9712_v27  ;;  %v2945_v40 = vsel %vm2943_vm15, %v2933_v7, 2102212464  ;;  %v2951_v9 = vsel %vm2941_vm2, %v2948_v51, %v2950_v1  ;;  %v12722_v7 = vld [vmem:[#allocation54_spill] sm:$0xff] }
 0x368   : > { %v3305_v10 = vsel %vm9693_vm14, %v12699_v41, %v3302_v33  ;;  %v2954_v22 = vsel %vm2942_vm1, %v2936_v21, %v2953_v11  ;;  %v2956_v49 = vshll.u32 %v2916_v38, 8  ;;  %v3306_v43 = vsel %vm9693_vm14, 0, %v3304_v56  ;;  %v12724_v56 = vld [vmem:[#allocation85_spill] sm:$0xff]  ;;  %v12727_v11 = vld [vmem:[#allocation74_spill] sm:$0xff] }
 0x369   : > { %6873 = vcosq.f32 %v3305_v10  ;;  %v4109_v31 = vclz %v6287_v46  ;;  %v2955_v19 = vsel %vm2941_vm2, %v2952_v4, %v2954_v22  ;;  %v2944_v16 = vsel %vm2940_vm0, %v2924_v6, %v2927_v48  ;;  %v12723_v48 = vld [vmem:[#allocation101_spill] sm:$0xff]  ;;  %v12728_v46 = vld [vmem:[#allocation103_spill] sm:$0xff] }
 0x36a   : > { %v2946_v45 = vsel %vm2942_vm1, %v2930_v3, %v2945_v40  ;;  %v9752_v37 = vmul.u32.u64.low %v2956_v49, %v2955_v19  ;;  %v9753_v24 = vmul.u32.u64.high %v2956_v49, %v2955_v19, %v9752_v37  ;;  %v4127_v21 = vsub.s32 4, %v9697_v63 }
 0x36b   : > { %v6288_v14 = vadd.s32 4294967294, %v4109_v31  ;;  %v9756_v35 = vmul.u32.u64.low %v2956_v49, %v2951_v9  ;;  %v9757_v2 = vmul.u32.u64.high %v2956_v49, %v2951_v9, %v9756_v35  ;;  %v3426_v29 = vand.u32 2139095040, %v12721_v25  ;;  %v12751_v25 = vld [vmem:[#allocation35_spill] sm:$0xff] }
 0x36c   : > { %v9762_v28 = vmul.f32 1.442695, %v12722_v7  ;;  %6875 = vsinq.f32 %v3305_v10  ;;  %v4671_v5 = vmul.f32 %v12724_v56, %v12723_v48  ;;  %v9766_v3 = vand.u32 3, %v3306_v43  ;;  %v12729_v43 = vld [vmem:[#allocation31_spill] sm:$0xff] }
 0x36d   : > { %vm4043_vm3 = vcmp.lt.s32.totalorder %v12711_v55, 0  ;;  %vm6289_vm4 = vcmp.lt.s32.totalorder %v6288_v14, 0  ;;  %v2947_v38 = vsel %vm2941_vm2, %v2944_v16, %v2946_v45  ;;  %vm9773_vm5 = vcmp.le.f32.partialorder %v4041_v53, 0.7853982 }
 0x36e   : > { %v4097_v8 = vadd.s32 %v9641_v34, %v9635_v58  ;;  %v4112_v42 = vsel %vm6289_vm4, 0, %v6288_v14  ;;  %vm2965_vm6 = vc.u32 %v9753_v24, %v9756_v35  ;;  %v4128_v57 = vsel %vm4043_vm3, %v4127_v21, %v9697_v63 }
 0x36f   : > { %v4113_v51 = vsub.s32 32, %v4112_v42  ;;  %v4117_v6 = vsub.s32 4294967266, %v4112_v42  ;;  %v2966_v1 = vadd.s32 1, %v9757_v2  ;;  %v9785_v4 = vmul.f32 1.442695, %v4671_v5 }
 0x370   : > { %v2963_v53 = vmul.u32 %v2956_v49, %v2947_v38  ;;  %v3732_v33 = vand.u32 2147483647, %v12727_v11  ;;  %v3750_v58 = vshrl.u32 %v12628_v39, %v12728_v46  ;;  %vm3315_vm7 = vcmp.eq.s32.totalorder %v9766_v3, 2 }
 0x371   : > { %v4114_v34 = vshll.u32 %v9712_v27, %v4112_v42  ;;  %v4115_v40 = vshrl.u32 %v4097_v8, %v4113_v51  ;;  %v4118_v10 = vadd.s32 127, %v4117_v6  ;;  %v2967_v9 = vsel %vm2965_vm6, %v2966_v1, %v9757_v2 }
 0x372   : > { %v4130_v63 = vsel %vm9773_vm5, 0, %v4128_v57  ;;  %v2968_v22 = vadd.s32 %v2967_v9, %v2963_v53  ;;  %v3749_v49 = vshll.u32 %v12622_v20, %v12729_v43  ;;  %v3753_v31 = vshrl.u32 %v12629_v36, %v12728_v46 }
 0x373   : > { %v6874_v19 = vpop.eup %6873  ;;  %v4116_v16 = vor.u32 %v4115_v40, %v4114_v34  ;;  %v4119_v45 = vshll.u32 %v4118_v10, 23  ;;  %v3756_v27 = vshrl.u32 %v12615_v0, %v12728_v46  ;;  %v3759_v37 = vshrl.u32 %v12619_v12, %v12728_v46 }
 0x374   : > { %vm3312_vm8 = vcmp.eq.s32.totalorder %v9766_v3, 0  ;;  %v2969_v14 = vadd.s32 536870912, %v2968_v22  ;;  %v3739_v21 = vand.u32 8388607, %v3732_v33  ;;  %v3752_v2 = vshll.u32 %v12628_v39, %v12729_v43 }
 0x375   : > { %v3762_v7 = vshrl.u32 %v12630_v47, %v12728_v46  ;;  %v4120_v48 = vor.u32 4788187, %v4119_v45  ;;  %v3751_v56 = vor.u32 %v3750_v58, %v3749_v49  ;;  %v3755_v5 = vshll.u32 %v12629_v36, %v12729_v43 }
 0x376   : > { %v3758_v38 = vshll.u32 %v12615_v0, %v12729_v43  ;;  %v6876_v8 = vpop.eup %6875  ;;  %v3316_v42 = vxor.u32 2147483648, %v6874_v19  ;;  %v9814_v51 = vshrl.u32 %v2969_v14, 30  ;;  %v3754_v6 = vor.u32 %v3753_v31, %v3752_v2  ;;  %v12730_v2 = vld [vmem:[#allocation102_spill] sm:$0xff] }
 0x377   : > { %v3761_v57 = vshll.u32 %v12619_v12, %v12729_v43  ;;  %v4121_v1 = vand.u32 2147483647, %v4120_v48  ;;  %v4123_v53 = vcvt.s32.f32 %v4116_v16  ;;  %v3757_v34 = vor.u32 %v3756_v27, %v3755_v5 }
 0x378   : > { %v3760_v40 = vor.u32 %v3759_v37, %v3758_v38  ;;  %vm3311_vm9 = vcmp.lt.s32.totalorder %v9766_v3, 2  ;;  %v9819_v58 = vand.u32 3, %v4130_v63  ;;  %v2971_v10 = vshll.u32 %v9814_v51, 30 }
 0x379   : > { %v3748_v9 = vshrl.u32 %v12622_v20, %v12728_v46  ;;  %v3763_v49 = vor.u32 %v3762_v7, %v3761_v57  ;;  %v3313_v45 = vxor.u32 2147483648, %v6876_v8  ;;  %v4124_v14 = vmul.f32 %v4123_v53, %v4121_v1 }
 0x37a   : > { %v3740_v31 = vor.u32 8388608, %v3739_v21  ;;  %vm3764_vm10 = vcmp.lt.s32.totalorder %v12730_v2, 1  ;;  %v3317_v43 = vsel %vm3315_vm7, %v3316_v42, %v6876_v8  ;;  %v9827_v16 = vsub.s32 %v2968_v22, %v2971_v10 }
 0x37b   : > { %vm3766_vm11 = vcmp.lt.s32.totalorder %v12730_v2, 3  ;;  %vm3767_vm12 = vcmp.lt.s32.totalorder %v12730_v2, 4  ;;  %v4125_v63 = vxor.u32 2147483648, %v4124_v14  ;;  %v3772_v46 = vsel %vm3764_vm10, %v3751_v56, %v3754_v6 }
 0x37c   : > { %v3769_v27 = vsel %vm3767_vm12, %v3757_v34, 2102212464  ;;  %v3773_v37 = vsel %vm3767_vm12, %v3760_v40, 920167782  ;;  %v2974_v7 = vsub.s32 0, %v9827_v16  ;;  %v3776_v48 = vsel %vm3764_vm10, %v3754_v6, %v3757_v34 }
 0x37d   : > { %v3774_v21 = vsel %vm3766_vm11, %v3757_v34, %v3773_v37  ;;  %v3777_v22 = vsel %vm3767_vm12, %v3763_v49, 1326507024  ;;  %v3314_v5 = vsel %vm3312_vm8, %v6874_v19, %v3313_v45  ;;  %v4126_v38 = vsel %vm4043_vm3, %v4125_v63, %v4124_v14  ;;  %v12733_v37 = vld [vmem:[#allocation25_spill] sm:$0xff] }
 0x37e   : > { %vm3765_vm13 = vcmp.lt.s32.totalorder %v12730_v2, 2  ;;  %v3778_v8 = vsel %vm3766_vm11, %v3760_v40, %v3777_v22  ;;  %v4129_v42 = vsel %vm9773_vm5, %v12711_v55, %v4126_v38  ;;  %v6243_v57 = vmin.u32 %v2974_v7, %v9827_v16 }
 0x37f   : > { %v3775_v1 = vsel %vm3765_vm13, %v3772_v46, %v3774_v21  ;;  %v3780_v53 = vshll.u32 %v3740_v31, 8  ;;  %6877 = vcosq.f32 %v4129_v42  ;;  %v3768_v19 = vsel %vm3764_vm10, %v3748_v9, %v3751_v56 }
 0x380   : > { %v3770_v34 = vsel %vm3766_vm11, %v3754_v6, %v3769_v27  ;;  %v3779_v40 = vsel %vm3765_vm13, %v3776_v48, %v3778_v8  ;;  %6879 = vsinq.f32 %v4129_v42  ;;  %v2976_v10 = vclz %v6243_v57  ;;  %v12734_v48 = vld [vmem:[#allocation86_spill] sm:$0xff] }
 0x381   : > { %v9857_v30 = vmul.u32.u64.low %v3780_v53, %v3779_v40  ;;  %v9858_v49 = vmul.u32.u64.high %v3780_v53, %v3779_v40, %v9857_v30  ;;  %v9861_v45 = vadd.s32 1, %v9638_v23  ;;  %v3318_v14 = vsel %vm3311_vm9, %v3314_v5, %v3317_v43  ;;  %v12732_v43 = vld [vmem:[#allocation90_spill] sm:$0xff] }
 0x382   : > { %v9865_v31 = vmul.u32.u64.low %v3780_v53, %v3775_v1  ;;  %v9866_v63 = vmul.u32.u64.high %v3780_v53, %v3775_v1, %v9865_v31  ;;  %v9870_v56 = vadd.s32 4294967169, %v9647_v59  ;;  %v9874_v6 = vshrl.u32 %v3426_v29, 23 }
 0x383   : > { %6881 = vpow2.f32 %v9762_v28  ;;  %v6244_v9 = vadd.s32 4294967294, %v2976_v10  ;;  %vm3309_vm14 = vweird.f32 %v12699_v41  ;;  %vm4139_vm15 = vcmp.eq.s32.totalorder %v9819_v58, 2  ;;  %v12731_v28 = vld [vmem:[#allocation27_spill] sm:$0xff] }
 0x384   : > { %6883 = vpow2.f32 %v9785_v4  ;;  %v3771_v23 = vsel %vm3765_vm13, %v3768_v19, %v3770_v34  ;;  %v3319_v3 = vsel %vm3309_vm14, nan, %v3318_v14  ;;  %vm4136_vm0 = vcmp.eq.s32.totalorder %v9819_v58, 0 }
 0x385   : > { %v2964_v59 = vadd.s32 %v9756_v35, %v9753_v24  ;;  %vm6245_vm1 = vcmp.lt.s32.totalorder %v6244_v9, 0  ;;  %vm3789_vm2 = vc.u32 %v9858_v49, %v9865_v31  ;;  %vm4135_vm3 = vcmp.lt.s32.totalorder %v9819_v58, 2 }
 0x386   : > { %v2979_v41 = vsel %vm6245_vm1, 0, %v6244_v9  ;;  %v3790_v29 = vadd.s32 1, %v9866_v63  ;;  %v12458_v4 = vand.u32 2147483647, %v12731_v28  ;;  %v3132_v2 = vshrl.u32 %v12628_v39, %v12732_v43 }
 0x387   : > { %vm4133_vm4 = vweird.f32 %v12711_v55  ;;  %vm2910_vm5 = vcmp.lt.s32.totalorder %v12714_v26, 0  ;;  %v2980_v27 = vsub.s32 32, %v2979_v41  ;;  %v2984_v24 = vsub.s32 4294967266, %v2979_v41 }
 0x388   : > { %v2994_v35 = vsub.s32 4, %v9814_v51  ;;  %v3787_v46 = vmul.u32 %v3780_v53, %v3771_v23  ;;  %v4759_v7 = vmul.f32 %v12733_v37, %v3319_v3  ;;  %v3791_v21 = vsel %vm3789_vm2, %v3790_v29, %v9866_v63 }
 0x389   : > { %v3131_v22 = vshll.u32 %v12622_v20, %v12734_v48  ;;  %v3134_v5 = vshll.u32 %v12628_v39, %v12734_v48  ;;  %v2981_v38 = vshll.u32 %v9827_v16, %v2979_v41  ;;  %v2982_v8 = vshrl.u32 %v2964_v59, %v2980_v27  ;;  %v6878_v1 = vpop.eup %6877 }
 0x38a   : > { %v2985_v42 = vadd.s32 127, %v2984_v24  ;;  %v3792_v57 = vadd.s32 %v3791_v21, %v3787_v46  ;;  %v3121_v19 = vand.u32 8388607, %v12458_v4  ;;  %v3135_v34 = vshrl.u32 %v12629_v36, %v12732_v43  ;;  %v6880_v10 = vpop.eup %6879 }
 0x38b   : > { %v9904_v53 = vor.u32 %v3132_v2, %v3131_v22  ;;  %v3141_v40 = vshrl.u32 %v12619_v12, %v12732_v43  ;;  %v4140_v30 = vxor.u32 2147483648, %v6878_v1  ;;  %v12735_v14 = vand.u32 2147483647, %v12714_v26 }
 0x38c   : > { %v2983_v63 = vor.u32 %v2982_v8, %v2981_v38  ;;  %v2986_v9 = vshll.u32 %v2985_v42, 23  ;;  %v3793_v23 = vadd.s32 536870912, %v3792_v57  ;;  %v4137_v3 = vxor.u32 2147483648, %v6880_v10 }
 0x38d   : > { %vm9912_vm6 = vcmp.le.f32.partialorder %v12735_v14, 0.7853982  ;;  %v3138_v59 = vshrl.u32 %v12615_v0, %v12732_v43  ;;  %v3140_v41 = vshll.u32 %v12615_v0, %v12734_v48  ;;  %v3144_v29 = vshrl.u32 %v12630_v47, %v12732_v43  ;;  %v9922_v2 = vpop.eup %6881 }
 0x38e   : > { %12738 = vst [vmem:[#allocation44_spill] sm:$0xff] %v9922_v2  ;;  %v4141_v27 = vsel %vm4139_vm15, %v4140_v30, %v6880_v10  ;;  %v2987_v24 = vor.u32 4788187, %v2986_v9  ;;  %v9926_v46 = vshrl.u32 %v3793_v23, 30  ;;  %v3137_v37 = vshll.u32 %v12629_v36, %v12734_v48  ;;  %v6884_v21 = vpop.eup %6883 }
 0x38f   : > { %v4138_v22 = vsel %vm4136_vm0, %v6878_v1, %v4137_v3  ;;  %v3136_v38 = vor.u32 %v3135_v34, %v3134_v5  ;;  %v3142_v8 = vor.u32 %v3141_v40, %v3140_v41  ;;  %v3143_v42 = vshll.u32 %v12619_v12, %v12734_v48  ;;  %v12739_v48 = vld [vmem:[#allocation89_spill] sm:$0xff] }
 0x390   : > { %v4142_v14 = vsel %vm4135_vm3, %v4138_v22, %v4141_v27  ;;  %v2988_v4 = vand.u32 2147483647, %v2987_v24  ;;  %v2990_v10 = vcvt.s32.f32 %v2983_v63  ;;  %v3795_v30 = vshll.u32 %v9926_v46, 30 }
 0x391   : > { %v4143_v9 = vsel %vm4133_vm4, nan, %v4142_v14  ;;  %v2995_v23 = vsel %vm2910_vm5, %v2994_v35, %v9814_v51  ;;  %v3139_v1 = vor.u32 %v3138_v59, %v3137_v37  ;;  %v3145_v5 = vor.u32 %v3144_v29, %v3143_v42  ;;  %v12740_v35 = vld [vmem:[#allocation34_spill] sm:$0xff] }
 0x392   : > { %v4767_v34 = vmul.f32 %v6884_v21, %v4143_v9  ;;  %v2991_v40 = vmul.f32 %v2990_v10, %v2988_v4  ;;  %v9942_v3 = vsub.s32 %v3792_v57, %v3795_v30  ;;  %vm3149_vm7 = vcmp.lt.s32.totalorder %v12739_v48, 4 }
 0x393   : > { %v3122_v58 = vor.u32 8388608, %v3121_v19  ;;  %vm3146_vm8 = vcmp.lt.s32.totalorder %v12739_v48, 1  ;;  %vm3148_vm9 = vcmp.lt.s32.totalorder %v12739_v48, 3  ;;  %v3155_v55 = vsel %vm3149_vm7, %v3142_v8, 920167782 }
 0x394   : > { %v6357_v63 = vpack.c.bf16 %v4767_v34, %v4759_v7  ;;  %v2992_v41 = vxor.u32 2147483648, %v2991_v40  ;;  %v3798_v51 = vsub.s32 0, %v9942_v3  ;;  %v3154_v4 = vsel %vm3146_vm8, %v9904_v53, %v3136_v38 }
 0x395   : > { %v2997_v19 = vsel %vm9912_vm6, 0, %v2995_v23  ;;  %v3156_v59 = vsel %vm3148_vm9, %v3139_v1, %v3155_v55  ;;  %v3159_v29 = vsel %vm3149_vm7, %v3145_v5, 1326507024  ;;  %vm3147_vm10 = vcmp.lt.s32.totalorder %v12739_v48, 2  ;;  %v12743_v55 = vld [vmem:[#allocation58_spill] sm:$0xff] }
 0x396   : > { %6358 = vmatprep.subr.bf16.mxu1 %v6357_v63  ;;  %v2993_v7 = vsel %vm2910_vm5, %v2992_v41, %v2991_v40  ;;  %v6275_v27 = vmin.u32 %v3798_v51, %v9942_v3  ;;  %v3158_v24 = vsel %vm3146_vm8, %v3136_v38, %v3139_v1  ;;  %v3130_v21 = vshrl.u32 %v12622_v20, %v12732_v43  ;;  %v12741_v40 = vld [vmem:[#allocation39_spill] sm:$0xff] }
 0x397   : > { %v2996_v37 = vsel %vm9912_vm6, %v12714_v26, %v2993_v7  ;;  %v3151_v22 = vsel %vm3149_vm7, %v3139_v1, 2102212464  ;;  %v3157_v42 = vsel %vm3147_vm10, %v3154_v4, %v3156_v59  ;;  %v3160_v10 = vsel %vm3148_vm9, %v3142_v8, %v3159_v29  ;;  %v12745_v4 = vld [vmem:[#allocation98_spill] sm:$0xff] }
 0x398   : > { %6885 = vcosq.f32 %v2996_v37  ;;  %v3800_v14 = vclz %v6275_v27  ;;  %v3162_v30 = vshll.u32 %v3122_v58, 8  ;;  %v3818_v9 = vsub.s32 4, %v9926_v46  ;;  %v12742_v58 = vld [vmem:[#allocation92_spill] sm:$0xff]  ;;  %v12746_v27 = vld [vmem:[#allocation81_spill] sm:$0xff] }
 0x399   : > { %6887 = vsinq.f32 %v2996_v37  ;;  %v3150_v16 = vsel %vm3146_vm8, %v3130_v21, %v9904_v53  ;;  %v3161_v43 = vsel %vm3147_vm10, %v3158_v24, %v3160_v10  ;;  %v3152_v1 = vsel %vm3148_vm9, %v3136_v38, %v3151_v22 }
 0x39a   : > { %v6276_v23 = vadd.s32 4294967294, %v3800_v14  ;;  %v9985_v5 = vmul.u32.u64.low %v3162_v30, %v3161_v43  ;;  %v9986_v34 = vmul.u32.u64.high %v3162_v30, %v3161_v43, %v9985_v5  ;;  %v9989_v8 = vmul.f32 1.442695, %v12741_v40 }
 0x39b   : > { %v4668_v63 = vmul.f32 %v12743_v55, %v12742_v58  ;;  %v9993_v41 = vmul.u32.u64.low %v3162_v30, %v3157_v42  ;;  %v9994_v51 = vmul.u32.u64.high %v3162_v30, %v3157_v42, %v9993_v41  ;;  %v9998_v53 = vadd.s32 1, %v9870_v56 }
 0x39c   : > { %v10001_v29 = vand.u32 3, %v2997_v19  ;;  %vm6277_vm11 = vcmp.lt.s32.totalorder %v6276_v23, 0  ;;  %vm3734_vm12 = vcmp.lt.s32.totalorder %v12727_v11, 0  ;;  %v3153_v7 = vsel %vm3147_vm10, %v3150_v16, %v3152_v1  ;;  %v12749_v16 = vld [vmem:[#allocation37_spill] sm:$0xff] }
 0x39d   : > { %12744 = vst [vmem:[#allocation20_spill] sm:$0xff] %v9998_v53  ;;  %v3803_v38 = vsel %vm6277_vm11, 0, %v6276_v23  ;;  %v12459_v24 = vand.u32 2147483647, %v12746_v27  ;;  %v3788_v37 = vadd.s32 %v9865_v31, %v9858_v49  ;;  %v3819_v56 = vsel %vm3734_vm12, %v3818_v9, %v9926_v46 }
 0x39e   : > { %v3804_v21 = vsub.s32 32, %v3803_v38  ;;  %v3808_v22 = vsub.s32 4294967266, %v3803_v38  ;;  %vm10014_vm13 = vcmp.le.f32.partialorder %v3732_v33, 0.7853982  ;;  %v10018_v42 = vmul.f32 1.442695, %v4668_v63 }
 0x39f   : > { %vm3171_vm14 = vc.u32 %v9986_v34, %v9993_v41  ;;  %v3172_v48 = vadd.s32 1, %v9994_v51  ;;  %vm3006_vm15 = vcmp.eq.s32.totalorder %v10001_v29, 2  ;;  %v3805_v49 = vshll.u32 %v9942_v3, %v3803_v38  ;;  %v12750_v63 = vld [vmem:[#allocation100_spill] sm:$0xff] }
 0x3a0   : > { %v3806_v31 = vshrl.u32 %v3788_v37, %v3804_v21  ;;  %v3809_v14 = vadd.s32 127, %v3808_v22  ;;  %v3169_v46 = vmul.u32 %v3162_v30, %v3153_v7  ;;  %vm3003_vm0 = vcmp.eq.s32.totalorder %v10001_v29, 0 }
 0x3a1   : > { %v3821_v33 = vsel %vm10014_vm13, 0, %v3819_v56  ;;  %v3173_v10 = vsel %vm3171_vm14, %v3172_v48, %v9994_v51  ;;  %v3945_v9 = vand.u32 8388607, %v12459_v24  ;;  %v3965_v43 = vshrl.u32 %v12619_v12, %v12749_v16 }
 0x3a2   : > { %v6886_v23 = vpop.eup %6885  ;;  %v3807_v1 = vor.u32 %v3806_v31, %v3805_v49  ;;  %v3810_v5 = vshll.u32 %v3809_v14, 23  ;;  %v3174_v3 = vadd.s32 %v3173_v10, %v3169_v46  ;;  %v3956_v30 = vshrl.u32 %v12628_v39, %v12749_v16 }
 0x3a3   : > { %v6888_v40 = vpop.eup %6887  ;;  %v3959_v58 = vshrl.u32 %v12629_v36, %v12749_v16  ;;  %v3962_v55 = vshrl.u32 %v12615_v0, %v12749_v16  ;;  %v3964_v51 = vshll.u32 %v12615_v0, %v12750_v63  ;;  %v3968_v38 = vshrl.u32 %v12630_v47, %v12749_v16 }
 0x3a4   : > { %vm3002_vm1 = vcmp.lt.s32.totalorder %v10001_v29, 2  ;;  %v3811_v7 = vor.u32 4788187, %v3810_v5  ;;  %v3175_v37 = vadd.s32 536870912, %v3174_v3  ;;  %v3955_v21 = vshll.u32 %v12622_v20, %v12750_v63 }
 0x3a5   : > { %v3958_v22 = vshll.u32 %v12628_v39, %v12750_v63  ;;  %v3007_v56 = vxor.u32 2147483648, %v6886_v23  ;;  %v3961_v48 = vshll.u32 %v12629_v36, %v12750_v63  ;;  %v3966_v49 = vor.u32 %v3965_v43, %v3964_v51 }
 0x3a6   : > { %v3967_v31 = vshll.u32 %v12619_v12, %v12750_v63  ;;  %v3004_v14 = vxor.u32 2147483648, %v6888_v40  ;;  %v3812_v46 = vand.u32 2147483647, %v3811_v7  ;;  %v3814_v10 = vcvt.s32.f32 %v3807_v1 }
 0x3a7   : > { %v3176_v59 = vshrl.u32 %v3175_v37, 30  ;;  %v3957_v5 = vor.u32 %v3956_v30, %v3955_v21  ;;  %v3960_v57 = vor.u32 %v3959_v58, %v3958_v22  ;;  %v3963_v24 = vor.u32 %v3962_v55, %v3961_v48 }
 0x3a8   : > { %v3969_v61 = vor.u32 %v3968_v38, %v3967_v31  ;;  %v3815_v32 = vmul.f32 %v3814_v10, %v3812_v46  ;;  %v10052_v2 = vand.u32 3, %v3821_v33  ;;  %vm3973_vm2 = vcmp.lt.s32.totalorder %v12751_v25, 4 }
 0x3a9   : > { %v3177_v53 = vshll.u32 %v3176_v59, 30  ;;  %v3008_v43 = vsel %vm3006_vm15, %v3007_v56, %v6888_v40  ;;  %v3946_v51 = vor.u32 8388608, %v3945_v9  ;;  %vm3970_vm3 = vcmp.lt.s32.totalorder %v12751_v25, 1 }
 0x3aa   : > { %v3979_v1 = vsel %vm3973_vm2, %v3966_v49, 920167782  ;;  %v3005_v30 = vsel %vm3003_vm0, %v6886_v23, %v3004_v14  ;;  %v3816_v58 = vxor.u32 2147483648, %v3815_v32  ;;  %vm3972_vm4 = vcmp.lt.s32.totalorder %v12751_v25, 3 }
 0x3ab   : > { %v10062_v55 = vsub.s32 %v3174_v3, %v3177_v53  ;;  %v3954_v33 = vshrl.u32 %v12622_v20, %v12749_v16  ;;  %v3978_v40 = vsel %vm3970_vm3, %v3957_v5, %v3960_v57  ;;  %v3980_v9 = vsel %vm3972_vm4, %v3963_v24, %v3979_v1 }
 0x3ac   : > { %v3983_v63 = vsel %vm3973_vm2, %v3969_v61, 1326507024  ;;  %v3817_v23 = vsel %vm3734_vm12, %v3816_v58, %v3815_v32  ;;  %vm3971_vm5 = vcmp.lt.s32.totalorder %v12751_v25, 2  ;;  %v3982_v3 = vsel %vm3970_vm3, %v3960_v57, %v3963_v24 }
 0x3ad   : > { %v3180_v53 = vsub.s32 0, %v10062_v55  ;;  %v3009_v16 = vsel %vm3002_vm1, %v3005_v30, %v3008_v43  ;;  %v3820_v38 = vsel %vm10014_vm13, %v12727_v11, %v3817_v23  ;;  %v3975_v61 = vsel %vm3973_vm2, %v3963_v24, 2102212464 }
 0x3ae   : > { %v3984_v32 = vsel %vm3972_vm4, %v3966_v49, %v3983_v63  ;;  %6889 = vcosq.f32 %v3820_v38  ;;  %v3981_v37 = vsel %vm3971_vm5, %v3978_v40, %v3980_v9  ;;  %v3986_v21 = vshll.u32 %v3946_v51, 8  ;;  %v12755_v51 = vld [vmem:[#allocation70_spill] sm:$0xff] }
 0x3af   : > { %v6251_v7 = vmin.u32 %v3180_v53, %v10062_v55  ;;  %6891 = vsinq.f32 %v3820_v38  ;;  %v3200_v29 = vsub.s32 4, %v3176_v59  ;;  %v3974_v22 = vsel %vm3970_vm3, %v3954_v33, %v3957_v5 }
 0x3b0   : > { %v3985_v19 = vsel %vm3971_vm5, %v3982_v3, %v3984_v32  ;;  %v3976_v24 = vsel %vm3972_vm4, %v3960_v57, %v3975_v61  ;;  %vm3000_vm6 = vweird.f32 %v12714_v26  ;;  %vm3116_vm7 = vcmp.lt.s32.totalorder %v12731_v28, 0  ;;  %v12757_v3 = vld [vmem:[#allocation118_spill] sm:$0xff] }
 0x3b1   : > { %v3182_v56 = vclz %v6251_v7  ;;  %v10097_v48 = vmul.u32.u64.low %v3986_v21, %v3985_v19  ;;  %v10098_v49 = vmul.u32.u64.high %v3986_v21, %v3985_v19, %v10097_v48  ;;  %v3010_v46 = vsel %vm3000_vm6, nan, %v3009_v16 }
 0x3b2   : > { %v10102_v31 = vmul.u32.u64.low %v3986_v21, %v3981_v37  ;;  %v10103_v14 = vmul.u32.u64.high %v3986_v21, %v3981_v37, %v10102_v31  ;;  %6893 = vpow2.f32 %v10018_v42  ;;  %v12752_v10 = vand.u32 2147483647, %v12731_v28 }
 0x3b3   : > { %v6252_v57 = vadd.s32 4294967294, %v3182_v56  ;;  %vm3827_vm9 = vcmp.eq.s32.totalorder %v10052_v2, 0  ;;  %v10116_v26 = vsel %vm3116_vm7, %v3200_v29, %v3176_v59  ;;  %v3977_v43 = vsel %vm3971_vm5, %v3974_v22, %v3976_v24  ;;  %v12756_v59 = vld [vmem:[#allocation87_spill] sm:$0xff] }
 0x3b4   : > { %vm10109_vm8 = vcmp.le.f32.partialorder %v12752_v10, 0.7853982  ;;  %v12465_v1 = vand.u32 2147483647, %v12755_v51  ;;  %vm3826_vm10 = vcmp.lt.s32.totalorder %v10052_v2, 2  ;;  %vm3830_vm11 = vcmp.eq.s32.totalorder %v10052_v2, 2 }
 0x3b5   : > { %v3170_v42 = vadd.s32 %v9993_v41, %v9986_v34  ;;  %vm6253_vm12 = vcmp.lt.s32.totalorder %v6252_v57, 0  ;;  %vm3995_vm13 = vc.u32 %v10098_v49, %v10102_v31  ;;  %vm3824_vm14 = vweird.f32 %v12727_v11 }
 0x3b6   : > { %v10129_v30 = vmul.f32 %v12756_v59, %v3010_v46  ;;  %v3185_v25 = vsel %vm6253_vm12, 0, %v6252_v57  ;;  %v3996_v58 = vadd.s32 1, %v10103_v14  ;;  %v1793_v33 = vshrl.u32 %v12628_v39, %v8539_v13 }
 0x3b7   : > { %v3186_v40 = vsub.s32 32, %v3185_v25  ;;  %v3190_v9 = vsub.s32 4294967266, %v3185_v25  ;;  %v3203_v34 = vsel %vm10109_vm8, 0, %v10116_v26  ;;  %v3993_v41 = vmul.u32 %v3986_v21, %v3977_v43 }
 0x3b8   : > { %v3997_v63 = vsel %vm3995_vm13, %v3996_v58, %v10103_v14  ;;  %v10140_v23 = vand.u32 8388607, %v12465_v1  ;;  %v1791_v53 = vshrl.u32 %v12622_v20, %v8539_v13  ;;  %v1792_v16 = vshll.u32 %v12622_v20, %v12757_v3  ;;  %v6890_v38 = vpop.eup %6889 }
 0x3b9   : > { %v3187_v61 = vshll.u32 %v10062_v55, %v3185_v25  ;;  %v3188_v32 = vshrl.u32 %v3170_v42, %v3186_v40  ;;  %v3191_v7 = vadd.s32 127, %v3190_v9  ;;  %v3998_v37 = vadd.s32 %v3997_v63, %v3993_v41  ;;  %v6892_v29 = vpop.eup %6891 }
 0x3ba   : > { %v3831_v21 = vxor.u32 2147483648, %v6890_v38  ;;  %v1794_v22 = vor.u32 %v1793_v33, %v1792_v16  ;;  %v1795_v19 = vshll.u32 %v12628_v39, %v12757_v3  ;;  %v1796_v56 = vshrl.u32 %v12629_v36, %v8539_v13 }
 0x3bb   : > { %v3828_v24 = vxor.u32 2147483648, %v6892_v29  ;;  %v3189_v48 = vor.u32 %v3188_v32, %v3187_v61  ;;  %v3192_v14 = vshll.u32 %v3191_v7, 23  ;;  %v3999_v46 = vadd.s32 536870912, %v3998_v37 }
 0x3bc   : > { %v3832_v10 = vsel %vm3830_vm11, %v3831_v21, %v6892_v29  ;;  %vm3940_vm15 = vcmp.lt.s32.totalorder %v12746_v27, 0  ;;  %vm4800_vm0 = vcmask 261120   ;;  %v1799_v55 = vshrl.u32 %v12615_v0, %v8539_v13  ;;  %v6894_v42 = vpop.eup %6893 }
 0x3bd   : > { %v1802_v57 = vshrl.u32 %v12619_v12, %v8539_v13  ;;  %v1805_v43 = vshrl.u32 %v12630_v47, %v8539_v13  ;;  %v3829_v59 = vsel %vm3827_vm9, %v6890_v38, %v3828_v24  ;;  %v3193_v25 = vor.u32 4788187, %v3192_v14  ;;  %v12758_v14 = vld [vmem:[#allocation115_spill] sm:$0xff] }
 0x3be   : > { %v4000_v58 = vshrl.u32 %v3999_v46, 30  ;;  %v1798_v33 = vshll.u32 %v12629_v36, %v12757_v3  ;;  %v3833_v40 = vsel %vm3826_vm10, %v3829_v59, %v3832_v10  ;;  %v1797_v9 = vor.u32 %v1796_v56, %v1795_v19 }
 0x3bf   : > { %v1801_v41 = vshll.u32 %v12615_v0, %v12757_v3  ;;  %v1804_v63 = vshll.u32 %v12619_v12, %v12757_v3  ;;  %vm3331_vm1 = vcmp.gt.s32.totalorder %v9861_v45, 0  ;;  %v3834_v13 = vsel %vm3824_vm14, nan, %v3833_v40 }
 0x3c0   : > { %v3194_v16 = vand.u32 2147483647, %v3193_v25  ;;  %v3196_v38 = vcvt.s32.f32 %v3189_v48  ;;  %v4001_v61 = vshll.u32 %v4000_v58, 30  ;;  %v4764_v32 = vmul.f32 %v6894_v42, %v3834_v13  ;;  %v10203_v13 = vld [vmem:[#allocation9 + $0x8] sm:$0xff] }
 0x3c1   : > { %v1800_v7 = vor.u32 %v1799_v55, %v1798_v33  ;;  %v1803_v29 = vor.u32 %v1802_v57, %v1801_v41  ;;  %v1806_v2 = vor.u32 %v1805_v43, %v1804_v63  ;;  %v4024_v56 = vsub.s32 4, %v4000_v58 }
 0x3c2   : > { %v3197_v21 = vmul.f32 %v3196_v38, %v3194_v16  ;;  %v10173_v19 = vsub.s32 %v3998_v37, %v4001_v61  ;;  %v1783_v24 = vor.u32 8388608, %v10140_v23  ;;  %v6351_v3 = vpack.c.bf16 %v4764_v32, %v10129_v30  ;;  %v10182_v37 = vld [vmem:[#allocation9] sm:$0xff]  ;;  %v12760_v32 = vld [vmem:[#allocation99_spill] sm:$0xff] }
 0x3c3   : > { %vm1807_vm2 = vcmp.lt.s32.totalorder %v12758_v14, 1  ;;  %vm1808_vm3 = vcmp.lt.s32.totalorder %v12758_v14, 2  ;;  %vm1809_vm4 = vcmp.lt.s32.totalorder %v12758_v14, 3  ;;  %vm1810_vm5 = vcmp.lt.s32.totalorder %v12758_v14, 4 }
 0x3c4   : > { %v3198_v11 = vxor.u32 2147483648, %v3197_v21  ;;  %v4004_v48 = vsub.s32 0, %v10173_v19  ;;  %v1811_v46 = vsel %vm1807_vm2, %v1791_v53, %v1794_v22  ;;  %6352 = vmatpush1.bf16.msra.mxu0 %v6351_v3  ;;  %v1815_v10 = vsel %vm1807_vm2, %v1794_v22, %v1797_v9 }
 0x3c5   : > { %v1816_v55 = vsel %vm1810_vm5, %v1803_v29, 920167782  ;;  %v1819_v23 = vsel %vm1807_vm2, %v1797_v9, %v1800_v7  ;;  %v1820_v57 = vsel %vm1810_vm5, %v1806_v2, 1326507024  ;;  %v4025_v42 = vsel %vm3940_vm15, %v4024_v56, %v4000_v58 }
 0x3c6   : > { %v3199_v30 = vsel %vm3116_vm7, %v3198_v11, %v3197_v21  ;;  %v6283_v43 = vmin.u32 %v4004_v48, %v10173_v19  ;;  %v1812_v59 = vsel %vm1810_vm5, %v1800_v7, 2102212464  ;;  %v1817_v25 = vsel %vm1809_vm4, %v1800_v7, %v1816_v55  ;;  %v12766_v11 = vld [vmem:[#allocation96_spill] sm:$0xff]  ;;  %v12767_v48 = vld [vmem:[#allocation77_spill] sm:$0xff] }
 0x3c7   : > { %v3202_v53 = vsel %vm10109_vm8, %v12731_v28, %v3199_v30  ;;  %v1821_v22 = vsel %vm1809_vm4, %v1803_v29, %v1820_v57  ;;  %v1823_v33 = vshll.u32 %v1783_v24, 8  ;;  %6306 = vmatmul.mubr.msk.f32.vlgmr.msra.gmra.mrb[48].mxu0 %vm4800_vm0, %v10182_v37  ;;  %v1818_v58 = vsel %vm1808_vm3, %v1815_v10, %v1817_v25 }
 0x3c8   : > { %6895 = vcosq.f32 %v3202_v53  ;;  %v4006_v40 = vclz %v6283_v43  ;;  %v1822_v41 = vsel %vm1808_vm3, %v1819_v23, %v1821_v22  ;;  %v12759_v63 = vmov 0.0  }
 0x3c9   : > { %6897 = vsinq.f32 %v3202_v53  ;;  %4883 = vmatprep.mubr.f32.mxu0 %v12759_v63  ;;  %v1813_v16 = vsel %vm1809_vm4, %v1797_v9, %v1812_v59  ;;  %v10207_v38 = vmul.u32.u64.low %v1823_v33, %v1822_v41  ;;  %v10208_v61 = vmul.u32.u64.high %v1823_v33, %v1822_v41, %v10207_v38  ;;  %v12769_v59 = vld [vmem:[#allocation79_spill] sm:$0xff] }
 0x3ca   : > { %v10211_v7 = vmul.f32 1.442695, %v12760_v32  ;;  %v6284_v29 = vadd.s32 4294967294, %v4006_v40  ;;  %v10213_v2 = vmul.u32.u64.low %v1823_v33, %v1818_v58  ;;  %v10214_v21 = vmul.u32.u64.high %v1823_v33, %v1818_v58, %v10213_v2 }
 0x3cb   : > { %v10220_v56 = vsel %vm3331_vm1, %v9861_v45, 0  ;;  %v10226_v9 = vand.u32 3, %v3203_v34  ;;  %v12763_v24 = vand.u32 2147483647, %v12746_v27  ;;  %v4670_v10 = vmul.f32 %v12767_v48, %v12766_v11  ;;  %6307 = vmatmul.mubr.msk.f32.gmra.mrb[50].mxu0 %vm4800_vm0, %v10203_v13 }
 0x3cc   : > { %12761 = vst [vmem:[#allocation56_spill] sm:$0xff] %v10211_v7  ;;  %12762 = vst [vmem:[#allocation51_spill] sm:$0xff] %v10220_v56  ;;  %v10237_v55 = vadd.s32 4294967169, %v9874_v6  ;;  %vm6285_vm7 = vcmp.lt.s32.totalorder %v6284_v29, 0  ;;  %v1814_v5 = vsel %vm1808_vm3, %v1811_v46, %v1813_v16  ;;  %v12768_v26 = vand.u32 2139095040, %v12740_v35  ;;  %4889 = vmatprep.mubr.f32.mxu0 %v12759_v63  ;;  %v10251_v6 = vld [vmem:[#allocation9 + $0x10] sm:$0xff] }
 0x3cd   : > { %vm10230_vm6 = vcmp.le.f32.partialorder %v12763_v24, 0.7853982  ;;  %6899 = vpow2.f32 %v9989_v8  ;;  %v4009_v23 = vsel %vm6285_vm7, 0, %v6284_v29  ;;  %vm1832_vm8 = vc.u32 %v10208_v61, %v10213_v2 }
 0x3ce   : > { %v4027_v45 = vsel %vm10230_vm6, 0, %v4025_v42  ;;  %v10247_v34 = vshrl.u32 %v12768_v26, 23  ;;  %v3994_v57 = vadd.s32 %v10102_v31, %v10098_v49  ;;  %v4010_v30 = vsub.s32 32, %v4009_v23  ;;  %v10270_v31 = vld [vmem:[#allocation9 + $0x18] sm:$0xff] }
 0x3cf   : > { %v4014_v14 = vsub.s32 4294967266, %v4009_v23  ;;  %v1833_v46 = vadd.s32 1, %v10214_v21  ;;  %vm3209_vm9 = vcmp.eq.s32.totalorder %v10226_v9, 0  ;;  %vm3212_vm10 = vcmp.eq.s32.totalorder %v10226_v9, 2  ;;  %6308 = vmatmul.mubr.msk.f32.gmra.mrb[52].mxu0 %vm4800_vm0, %v10251_v6 }
 0x3d0   : > { %v10260_v8 = vand.u32 3, %v4027_v45  ;;  %v10262_v43 = vmul.f32 1.442695, %v4670_v10  ;;  %v1830_v42 = vmul.u32 %v1823_v33, %v1814_v5  ;;  %v12464_v53 = vand.u32 2147483647, %v12769_v59  ;;  %4895 = vmatprep.mubr.f32.mxu0 %v12759_v63 }
 0x3d1   : > { %v4011_v25 = vshll.u32 %v10173_v19, %v4009_v23  ;;  %v4012_v22 = vshrl.u32 %v3994_v57, %v4010_v30  ;;  %v4015_v40 = vadd.s32 127, %v4014_v14  ;;  %v1834_v49 = vsel %vm1832_vm8, %v1833_v46, %v10214_v21 }
 0x3d2   : > { %v1835_v58 = vadd.s32 %v1834_v49, %v1830_v42  ;;  %v2616_v41 = vshll.u32 %v12622_v20, %v9116_v60  ;;  %v2617_v33 = vshrl.u32 %v12628_v39, %v9317_v50  ;;  %v2620_v19 = vshrl.u32 %v12629_v36, %v9317_v50  ;;  %v6896_v16 = vpop.eup %6895 }
 0x3d3   : > { %vm3208_vm11 = vcmp.lt.s32.totalorder %v10226_v9, 2  ;;  %v4013_v38 = vor.u32 %v4012_v22, %v4011_v25  ;;  %v4016_v32 = vshll.u32 %v4015_v40, 23  ;;  %v2619_v29 = vshll.u32 %v12628_v39, %v9116_v60  ;;  %v6898_v24 = vpop.eup %6897  ;;  %6309 = vmatmul.mubr.msk.f32.gmra.mrb[54].mxu0 %vm4800_vm0, %v10270_v31 }
 0x3d4   : > { %v2626_v21 = vshrl.u32 %v12619_v12, %v9317_v50  ;;  %v1836_v11 = vadd.s32 536870912, %v1835_v58  ;;  %v2606_v48 = vand.u32 8388607, %v12464_v53  ;;  %v2623_v10 = vshrl.u32 %v12615_v0, %v9317_v50  ;;  %5055 = vmatprep.mubr.f32.mxu0 %v12759_v63 }
 0x3d5   : > { %v2625_v45 = vshll.u32 %v12615_v0, %v9116_v60  ;;  %v3210_v5 = vxor.u32 2147483648, %v6898_v24  ;;  %v3213_v26 = vxor.u32 2147483648, %v6896_v16  ;;  %v4017_v23 = vor.u32 4788187, %v4016_v32 }
 0x3d6   : > { %v2629_v57 = vshrl.u32 %v12630_v47, %v9317_v50  ;;  %vm3206_vm12 = vweird.f32 %v12731_v28  ;;  %v1837_v30 = vshrl.u32 %v1836_v11, 30  ;;  %v2618_v14 = vor.u32 %v2617_v33, %v2616_v41 }
 0x3d7   : > { %v2621_v46 = vor.u32 %v2620_v19, %v2619_v29  ;;  %v2622_v42 = vshll.u32 %v12629_v36, %v9116_v60  ;;  %v4018_v25 = vand.u32 2147483647, %v4017_v23  ;;  %v4020_v22 = vcvt.s32.f32 %v4013_v38  ;;  %v10299_v32 = vpop.eup %6899 }
 0x3d8   : > { %v2627_v40 = vor.u32 %v2626_v21, %v2625_v45  ;;  %v2628_v49 = vshll.u32 %v12619_v12, %v9116_v60  ;;  %12770 = vst [vmem:[#allocation64_spill] sm:$0xff] %v10299_v32  ;;  %v1838_v53 = vshll.u32 %v1837_v30, 30  ;;  %v2607_v1 = vor.u32 8388608, %v2606_v48 }
 0x3d9   : > { %v2615_v11 = vshrl.u32 %v12622_v20, %v9317_v50  ;;  %v2624_v41 = vor.u32 %v2623_v10, %v2622_v42  ;;  %v3211_v33 = vsel %vm3209_vm9, %v6896_v16, %v3210_v5  ;;  %v3214_v19 = vsel %vm3212_vm10, %v3213_v26, %v6898_v24 }
 0x3da   : > { %v4021_v29 = vmul.f32 %v4020_v22, %v4018_v25  ;;  %v2630_v38 = vor.u32 %v2629_v57, %v2628_v49  ;;  %v10307_v21 = vsub.s32 %v1835_v58, %v1838_v53  ;;  %vm2631_vm13 = vcmp.lt.s32.totalorder %v9113_v17, 1 }
 0x3db   : > { %vm2632_vm14 = vcmp.lt.s32.totalorder %v9113_v17, 2  ;;  %vm2634_vm1 = vcmp.lt.s32.totalorder %v9113_v17, 4  ;;  %vm2633_vm2 = vcmp.lt.s32.totalorder %v9113_v17, 3  ;;  %v2639_v50 = vsel %vm2631_vm13, %v2618_v14, %v2621_v46 }
 0x3dc   : > { %v4022_v60 = vxor.u32 2147483648, %v4021_v29  ;;  %v2640_v16 = vsel %vm2634_vm1, %v2627_v40, 920167782  ;;  %v3215_v24 = vsel %vm3208_vm11, %v3211_v33, %v3214_v19  ;;  %v1841_v48 = vsub.s32 0, %v10307_v21 }
 0x3dd   : > { %v1861_v53 = vsub.s32 4, %v1837_v30  ;;  %v2641_v58 = vsel %vm2633_vm2, %v2624_v41, %v2640_v16  ;;  %v2636_v45 = vsel %vm2634_vm1, %v2624_v41, 2102212464  ;;  %v2643_v5 = vsel %vm2631_vm13, %v2621_v46, %v2624_v41 }
 0x3de   : > { %v4023_v10 = vsel %vm3940_vm15, %v4022_v60, %v4021_v29  ;;  %v2644_v26 = vsel %vm2634_vm1, %v2630_v38, 1326507024  ;;  %v6199_v9 = vmin.u32 %v1841_v48, %v10307_v21  ;;  %v2635_v57 = vsel %vm2631_vm13, %v2615_v11, %v2618_v14 }
 0x3df   : > { %v4026_v23 = vsel %vm10230_vm6, %v12746_v27, %v4023_v10  ;;  %v2642_v42 = vsel %vm2632_vm14, %v2639_v50, %v2641_v58  ;;  %v3216_v25 = vsel %vm3206_vm12, nan, %v3215_v24  ;;  %v2645_v22 = vsel %vm2633_vm2, %v2627_v40, %v2644_v26  ;;  %v12776_v24 = vld [vmem:[#allocation93_spill] sm:$0xff] }
 0x3e0   : > { %6901 = vcosq.f32 %v4026_v23  ;;  %v2647_v49 = vshll.u32 %v2607_v1, 8  ;;  %v1843_v41 = vclz %v6199_v9  ;;  %v2637_v3 = vsel %vm2633_vm2, %v2621_v46, %v2636_v45  ;;  %v12778_v26 = vld [vmem:[#allocation49_spill] sm:$0xff]  ;;  %v12779_v9 = vld [vmem:[#allocation122_spill] sm:$0xff] }
 0x3e1   : > { %6903 = vsinq.f32 %v4026_v23  ;;  %v2646_v33 = vsel %vm2632_vm14, %v2643_v5, %v2645_v22  ;;  %v10348_v28 = vshrl.u32 %v10220_v56, 5  ;;  %v12772_v1 = vand.u32 2139095040, %v12745_v4 }
 0x3e2   : > { %v10340_v14 = vmul.u32.u64.low %v2647_v49, %v2646_v33  ;;  %v10341_v11 = vmul.u32.u64.high %v2647_v49, %v2646_v33, %v10340_v14  ;;  %v10343_v19 = vmul.u32.u64.low %v2647_v49, %v2642_v42  ;;  %v10344_v29 = vmul.u32.u64.high %v2647_v49, %v2642_v42, %v10343_v19 }
 0x3e3   : > { %12771 = vst [vmem:[#allocation53_spill] sm:$0xff] %v10348_v28  ;;  %v10352_v40 = vshrl.u32 %v12772_v1, 23  ;;  %vm1777_vm15 = vcmp.lt.s32.totalorder %v12755_v51, 0  ;;  %v6200_v46 = vadd.s32 4294967294, %v1843_v41  ;;  %6905 = vpow2.f32 %v10262_v43 }
 0x3e4   : > { %v12773_v38 = vand.u32 2147483647, %v12755_v51  ;;  %v10364_v50 = vsel %vm1777_vm15, %v1861_v53, %v1837_v30  ;;  %v2638_v16 = vsel %vm2632_vm14, %v2635_v57, %v2637_v3  ;;  %vm4033_vm4 = vcmp.eq.s32.totalorder %v10260_v8, 0  ;;  %v12777_v30 = vld [vmem:[#allocation71_spill] sm:$0xff] }
 0x3e5   : > { %vm4036_vm5 = vcmp.eq.s32.totalorder %v10260_v8, 2  ;;  %v10371_v48 = vmul.f32 %v12776_v24, %v3216_v25  ;;  %v1831_v43 = vadd.s32 %v10213_v2, %v10208_v61  ;;  %vm6201_vm6 = vcmp.lt.s32.totalorder %v6200_v46, 0 }
 0x3e6   : > { %vm10358_vm3 = vcmp.le.f32.partialorder %v12773_v38, 0.7853982  ;;  %vm4032_vm7 = vcmp.lt.s32.totalorder %v10260_v8, 2  ;;  %v1846_v58 = vsel %vm6201_vm6, 0, %v6200_v46  ;;  %vm2656_vm8 = vc.u32 %v10341_v11, %v10343_v19 }
 0x3e7   : > { %v2657_v17 = vadd.s32 1, %v10344_v29  ;;  %v12466_v53 = vand.u32 2147483647, %v12777_v30  ;;  %vm4030_vm9 = vweird.f32 %v12746_v27  ;;  %v1847_v10 = vsub.s32 32, %v1846_v58 }
 0x3e8   : > { %v1851_v45 = vsub.s32 4294967266, %v1846_v58  ;;  %v2654_v61 = vmul.u32 %v2647_v49, %v2638_v16  ;;  %v1998_v23 = vshll.u32 %v12622_v20, %v12778_v26  ;;  %v1999_v57 = vshrl.u32 %v12628_v39, %v12779_v9 }
 0x3e9   : > { %v2658_v2 = vsel %vm2656_vm8, %v2657_v17, %v10344_v29  ;;  %v2001_v42 = vshll.u32 %v12628_v39, %v12778_v26  ;;  %v1848_v25 = vshll.u32 %v10307_v21, %v1846_v58  ;;  %v1849_v22 = vshrl.u32 %v1831_v43, %v1847_v10 }
 0x3ea   : > { %v1852_v41 = vadd.s32 127, %v1851_v45  ;;  %v2659_v3 = vadd.s32 %v2658_v2, %v2654_v61  ;;  %v6902_v33 = vpop.eup %6901  ;;  %v1988_v49 = vand.u32 8388607, %v12466_v53  ;;  %v2002_v14 = vshrl.u32 %v12629_v36, %v12779_v9 }
 0x3eb   : > { %v2004_v29 = vshll.u32 %v12629_v36, %v12778_v26  ;;  %v2008_v1 = vshrl.u32 %v12619_v12, %v12779_v9  ;;  %v6904_v46 = vpop.eup %6903  ;;  %v4037_v38 = vxor.u32 2147483648, %v6902_v33  ;;  %v1850_v16 = vor.u32 %v1849_v22, %v1848_v25 }
 0x3ec   : > { %v1853_v21 = vshll.u32 %v1852_v41, 23  ;;  %v2660_v24 = vadd.s32 536870912, %v2659_v3  ;;  %v4034_v43 = vxor.u32 2147483648, %v6904_v46  ;;  %v2005_v58 = vshrl.u32 %v12615_v0, %v12779_v9 }
 0x3ed   : > { %v2007_v17 = vshll.u32 %v12615_v0, %v12778_v26  ;;  %v2011_v10 = vshrl.u32 %v12630_v47, %v12779_v9  ;;  %v4038_v45 = vsel %vm4036_vm5, %v4037_v38, %v6904_v46  ;;  %v2000_v53 = vor.u32 %v1999_v57, %v1998_v23  ;;  %v6906_v5 = vpop.eup %6905 }
 0x3ee   : > { %v1854_v61 = vor.u32 4788187, %v1853_v21  ;;  %v2661_v2 = vshrl.u32 %v2660_v24, 30  ;;  %v4035_v25 = vsel %vm4033_vm4, %v6902_v33, %v4034_v43  ;;  %v2003_v22 = vor.u32 %v2002_v14, %v2001_v42 }
 0x3ef   : > { %v2009_v41 = vor.u32 %v2008_v1, %v2007_v17  ;;  %v2010_v7 = vshll.u32 %v12619_v12, %v12778_v26  ;;  %v4039_v32 = vsel %vm4032_vm7, %v4035_v25, %v4038_v45  ;;  %v1857_v28 = vcvt.s32.f32 %v1850_v16  ;;  %v12780_v1 = vld [vmem:[#allocation121_spill] sm:$0xff] }
 0x3f0   : > { %v1855_v4 = vand.u32 2147483647, %v1854_v61  ;;  %v2662_v56 = vshll.u32 %v2661_v2, 30  ;;  %v4040_v46 = vsel %vm4030_vm9, nan, %v4039_v32  ;;  %v1997_v23 = vshrl.u32 %v12622_v20, %v12779_v9 }
 0x3f1   : > { %v2006_v57 = vor.u32 %v2005_v58, %v2004_v29  ;;  %v2012_v38 = vor.u32 %v2011_v10, %v2010_v7  ;;  %v4766_v33 = vmul.f32 %v6906_v5, %v4040_v46  ;;  %vm2016_vm10 = vcmp.lt.s32.totalorder %v12780_v1, 4 }
 0x3f2   : > { %v1858_v42 = vmul.f32 %v1857_v28, %v1855_v4  ;;  %v10418_v14 = vsub.s32 %v2659_v3, %v2662_v56  ;;  %v1989_v26 = vor.u32 8388608, %v1988_v49  ;;  %vm2013_vm11 = vcmp.lt.s32.totalorder %v12780_v1, 1 }
 0x3f3   : > { %vm2015_vm12 = vcmp.lt.s32.totalorder %v12780_v1, 3  ;;  %v2022_v27 = vsel %vm2016_vm10, %v2009_v41, 920167782  ;;  %v6359_v8 = vpack.c.bf16 %v4766_v33, %v10371_v48  ;;  %v2021_v4 = vsel %vm2013_vm11, %v2000_v53, %v2003_v22 }
 0x3f4   : > { %v1859_v32 = vxor.u32 2147483648, %v1858_v42  ;;  %v2665_v9 = vsub.s32 0, %v10418_v14  ;;  %vm2014_vm13 = vcmp.lt.s32.totalorder %v12780_v1, 2  ;;  %v2023_v7 = vsel %vm2015_vm12, %v2006_v57, %v2022_v27 }
 0x3f5   : > { %v2025_v56 = vsel %vm2013_vm11, %v2003_v22, %v2006_v57  ;;  %v2026_v28 = vsel %vm2016_vm10, %v2012_v38, 1326507024  ;;  %6360 = vmatpush1.bf16.msra.mxu1 %v6359_v8  ;;  %v2685_v3 = vsub.s32 4, %v2661_v2  ;;  %v2018_v49 = vsel %vm2016_vm10, %v2006_v57, 2102212464 }
 0x3f6   : > { %v1860_v48 = vsel %vm1777_vm15, %v1859_v32, %v1858_v42  ;;  %v6231_v5 = vmin.u32 %v2665_v9, %v10418_v14  ;;  %v2024_v16 = vsel %vm2014_vm13, %v2021_v4, %v2023_v7  ;;  %v2027_v21 = vsel %vm2015_vm12, %v2009_v41, %v2026_v28 }
 0x3f7   : > { %v1863_v29 = vsel %vm10358_vm3, %v12755_v51, %v1860_v48  ;;  %v2029_v24 = vshll.u32 %v1989_v26, 8  ;;  %v2017_v58 = vsel %vm2013_vm11, %v1997_v23, %v2000_v53  ;;  %v2028_v17 = vsel %vm2014_vm13, %v2025_v56, %v2027_v21 }
 0x3f8   : > { %6907 = vcosq.f32 %v1863_v29  ;;  %v2667_v43 = vclz %v6231_v5  ;;  %6310 = vmatmul.mubr.msk.f32.vlgmr.msra.gmra.mrb[48].mxu1 %vm4800_vm0, %v10182_v37  ;;  %v2019_v10 = vsel %vm2015_vm12, %v2003_v22, %v2018_v49  ;;  %v10460_v25 = vadd.s32 1, %v10237_v55  ;;  %v12782_v55 = vld [vmem:[#allocation105_spill] sm:$0xff] }
 0x3f9   : > { %6909 = vsinq.f32 %v1863_v29  ;;  %v10456_v45 = vmul.u32.u64.low %v2029_v24, %v2028_v17  ;;  %v10457_v61 = vmul.u32.u64.high %v2029_v24, %v2028_v17, %v10456_v45  ;;  %4972 = vmatprep.mubr.f32.mxu1 %v12759_v63  ;;  %v10468_v23 = vadd.s32 4294967169, %v10247_v34 }
 0x3fa   : > { %v6232_v41 = vadd.s32 4294967294, %v2667_v43  ;;  %v10463_v53 = vmul.u32.u64.low %v2029_v24, %v2024_v16  ;;  %v10464_v46 = vmul.u32.u64.high %v2029_v24, %v2024_v16, %v10463_v53  ;;  %v10471_v37 = vadd.s32 4294967169, %v10352_v40 }
 0x3fb   : > { %v12781_v22 = vsel %vm10358_vm3, 0, %v10364_v50  ;;  %vm2601_vm14 = vcmp.lt.s32.totalorder %v12769_v59, 0  ;;  %v4250_v38 = vand.u32 2139095040, %v12782_v55  ;;  %v2020_v34 = vsel %vm2014_vm13, %v2017_v58, %v2019_v10 }
 0x3fc   : > { %v10477_v57 = vand.u32 3, %v12781_v22  ;;  %vm6233_vm1 = vcmp.lt.s32.totalorder %v6232_v41, 0  ;;  %v2686_v33 = vsel %vm2601_vm14, %v2685_v3, %v2661_v2  ;;  %6311 = vmatmul.mubr.msk.f32.gmra.mrb[50].mxu1 %vm4800_vm0, %v10203_v13  ;;  %v12783_v40 = vand.u32 2147483647, %v12769_v59 }
 0x3fd   : > { %v2670_v50 = vsel %vm6233_vm1, 0, %v6232_v41  ;;  %vm2038_vm15 = vc.u32 %v10457_v61, %v10463_v53  ;;  %v2805_v42 = vand.u32 2147483647, %v8209_v44  ;;  %4978 = vmatprep.mubr.f32.mxu1 %v12759_v63  ;;  %v2655_v2 = vadd.s32 %v10343_v19, %v10341_v11 }
 0x3fe   : > { %vm10489_vm2 = vcmp.le.f32.partialorder %v12783_v40, 0.7853982  ;;  %v2671_v1 = vsub.s32 32, %v2670_v50  ;;  %v2675_v26 = vsub.s32 4294967266, %v2670_v50  ;;  %v2039_v13 = vadd.s32 1, %v10464_v46 }
 0x3ff   : > { %vm1873_vm3 = vcmp.eq.s32.totalorder %v10477_v57, 2  ;;  %v2688_v27 = vsel %vm10489_vm2, 0, %v2686_v33  ;;  %v2036_v8 = vmul.u32 %v2029_v24, %v2020_v34  ;;  %v2823_v32 = vshrl.u32 %v12628_v39, %v9328_v52 }
 0x400   : > { %vm1870_vm4 = vcmp.eq.s32.totalorder %v10477_v57, 0  ;;  %v2672_v9 = vshll.u32 %v10418_v14, %v2670_v50  ;;  %v2673_v4 = vshrl.u32 %v2655_v2, %v2671_v1  ;;  %v2676_v7 = vadd.s32 127, %v2675_v26  ;;  %6312 = vmatmul.mubr.msk.f32.gmra.mrb[52].mxu1 %vm4800_vm0, %v10251_v6 }
 0x401   : > { %v2040_v11 = vsel %vm2038_vm15, %v2039_v13, %v10464_v46  ;;  %v2812_v56 = vand.u32 8388607, %v2805_v42  ;;  %v2822_v28 = vshll.u32 %v12622_v20, %v9273_v18  ;;  %v2826_v48 = vshrl.u32 %v12629_v36, %v9328_v52  ;;  %4984 = vmatprep.mubr.f32.mxu1 %v12759_v63 }
 0x402   : > { %v2041_v19 = vadd.s32 %v2040_v11, %v2036_v8  ;;  %v6908_v5 = vpop.eup %6907  ;;  %v2674_v14 = vor.u32 %v2673_v4, %v2672_v9  ;;  %v2677_v3 = vshll.u32 %v2676_v7, 23  ;;  %v2829_v49 = vshrl.u32 %v12615_v0, %v9328_v52 }
 0x403   : > { %v2832_v6 = vshrl.u32 %v12619_v12, %v9328_v52  ;;  %v6910_v29 = vpop.eup %6909  ;;  %v2824_v21 = vor.u32 %v2823_v32, %v2822_v28  ;;  %v2825_v24 = vshll.u32 %v12628_v39, %v9273_v18  ;;  %v2835_v43 = vshrl.u32 %v12630_v47, %v9328_v52 }
 0x404   : > { %v2042_v16 = vadd.s32 536870912, %v2041_v19  ;;  %v1874_v58 = vxor.u32 2147483648, %v6908_v5  ;;  %v2678_v17 = vor.u32 4788187, %v2677_v3  ;;  %v2828_v10 = vshll.u32 %v12629_v36, %v9273_v18  ;;  %6313 = vmatmul.mubr.msk.f32.gmra.mrb[54].mxu1 %vm4800_vm0, %v10270_v31 }
 0x405   : > { %v2831_v45 = vshll.u32 %v12615_v0, %v9273_v18  ;;  %vm1869_vm5 = vcmp.lt.s32.totalorder %v10477_v57, 2  ;;  %v1871_v41 = vxor.u32 2147483648, %v6910_v29  ;;  %v2827_v22 = vor.u32 %v2826_v48, %v2825_v24  ;;  %5144 = vmatprep.mubr.f32.mxu1 %v12759_v63 }
 0x406   : > { %v10532_v46 = vshrl.u32 %v2042_v16, 30  ;;  %v2834_v33 = vshll.u32 %v12619_v12, %v9273_v18  ;;  %vm3434_vm6 = vcmp.gt.s32.totalorder %v10460_v25, 0  ;;  %v2679_v34 = vand.u32 2147483647, %v2678_v17 }
 0x407   : > { %v2681_v40 = vcvt.s32.f32 %v2674_v14  ;;  %v2830_v50 = vor.u32 %v2829_v49, %v2828_v10  ;;  %v2833_v2 = vor.u32 %v2832_v6, %v2831_v45  ;;  %v10538_v1 = vand.u32 3, %v2688_v27 }
 0x408   : > { %v2044_v31 = vshll.u32 %v10532_v46, 30  ;;  %v2821_v26 = vshrl.u32 %v12622_v20, %v9328_v52  ;;  %v2836_v13 = vor.u32 %v2835_v43, %v2834_v33  ;;  %v1875_v8 = vsel %vm1873_vm3, %v1874_v58, %v6910_v29 }
 0x409   : > { %v2682_v18 = vmul.f32 %v2681_v40, %v2679_v34  ;;  %v2813_v32 = vor.u32 8388608, %v2812_v56  ;;  %vm2837_vm7 = vcmp.lt.s32.totalorder %v9325_v54, 1  ;;  %v1872_v9 = vsel %vm1870_vm4, %v6908_v5, %v1871_v41  ;;  %v12786_v40 = vld [vmem:[#allocation68_spill] sm:$0xff] }
 0x40a   : > { %v10548_v4 = vsub.s32 %v2041_v19, %v2044_v31  ;;  %vm2839_vm8 = vcmp.lt.s32.totalorder %v9325_v54, 3  ;;  %vm2840_vm9 = vcmp.lt.s32.totalorder %v9325_v54, 4  ;;  %v2845_v52 = vsel %vm2837_vm7, %v2824_v21, %v2827_v22 }
 0x40b   : > { %v2683_v27 = vxor.u32 2147483648, %v2682_v18  ;;  %v2842_v7 = vsel %vm2840_vm9, %v2830_v50, 2102212464  ;;  %v2846_v11 = vsel %vm2840_vm9, %v2833_v2, 920167782  ;;  %v2849_v48 = vsel %vm2837_vm7, %v2827_v22, %v2830_v50 }
 0x40c   : > { %v2047_v28 = vsub.s32 0, %v10548_v4  ;;  %v2847_v56 = vsel %vm2839_vm8, %v2830_v50, %v2846_v11  ;;  %v2850_v14 = vsel %vm2840_vm9, %v2836_v13, 1326507024  ;;  %vm2838_vm10 = vcmp.lt.s32.totalorder %v9325_v54, 2 }
 0x40d   : > { %v2684_v5 = vsel %vm2601_vm14, %v2683_v27, %v2682_v18  ;;  %v2841_v19 = vsel %vm2837_vm7, %v2821_v26, %v2824_v21  ;;  %v2851_v3 = vsel %vm2839_vm8, %v2833_v2, %v2850_v14  ;;  %v2848_v29 = vsel %vm2838_vm10, %v2845_v52, %v2847_v56  ;;  %v12788_v26 = vld [vmem:[#allocation114_spill] sm:$0xff]  ;;  %v12789_v18 = vld [vmem:[#allocation65_spill] sm:$0xff] }
 0x40e   : > { %v2687_v49 = vsel %vm10489_vm2, %v12769_v59, %v2684_v5  ;;  %v6207_v6 = vmin.u32 %v2047_v28, %v10548_v4  ;;  %v2853_v16 = vshll.u32 %v2813_v32, 8  ;;  %v1876_v24 = vsel %vm1869_vm5, %v1872_v9, %v1875_v8 }
 0x40f   : > { %6911 = vcosq.f32 %v2687_v49  ;;  %v2843_v21 = vsel %vm2839_vm8, %v2827_v22, %v2842_v7  ;;  %v2852_v43 = vsel %vm2838_vm10, %v2849_v48, %v2851_v3  ;;  %v10576_v10 = vadd.s32 1, %v10468_v23 }
 0x410   : > { %6913 = vsinq.f32 %v2687_v49  ;;  %v2049_v58 = vclz %v6207_v6  ;;  %v10572_v60 = vmul.u32.u64.low %v2853_v16, %v2852_v43  ;;  %v10573_v17 = vmul.u32.u64.high %v2853_v16, %v2852_v43, %v10572_v60 }
 0x411   : > { %vm1867_vm11 = vweird.f32 %v12755_v51  ;;  %v10579_v45 = vmul.u32.u64.low %v2853_v16, %v2848_v29  ;;  %v10580_v57 = vmul.u32.u64.high %v2853_v16, %v2848_v29, %v10579_v45  ;;  %v10586_v41 = vsel %vm3434_vm6, %v10460_v25, 0 }
 0x412   : > { %v10589_v22 = vadd.s32 1, %v10471_v37  ;;  %v1877_v33 = vsel %vm1867_vm11, nan, %v1876_v24  ;;  %v6208_v34 = vadd.s32 4294967294, %v2049_v58  ;;  %v10593_v23 = vshrl.u32 %v4250_v38, 23  ;;  %v12787_v38 = vld [vmem:[#allocation63_spill] sm:$0xff] }
 0x413   : > { %vm2697_vm12 = vcmp.eq.s32.totalorder %v10538_v1, 2  ;;  %v2844_v51 = vsel %vm2838_vm10, %v2841_v19, %v2843_v21  ;;  %v1672_v50 = vand.u32 2147483647, %v12786_v40  ;;  %vm2694_vm13 = vcmp.eq.s32.totalorder %v10538_v1, 0 }
 0x414   : > { %v2037_v25 = vadd.s32 %v10463_v53, %v10457_v61  ;;  %vm6209_vm14 = vcmp.lt.s32.totalorder %v6208_v34, 0  ;;  %v2067_v37 = vsub.s32 4, %v10532_v46  ;;  %vm2862_vm1 = vc.u32 %v10573_v17, %v10579_v45 }
 0x415   : > { %vm2693_vm2 = vcmp.lt.s32.totalorder %v10538_v1, 2  ;;  %v10607_v2 = vmul.f32 %v12787_v38, %v1877_v33  ;;  %v2052_v54 = vsel %vm6209_vm14, 0, %v6208_v34  ;;  %v2863_v31 = vadd.s32 1, %v10580_v57 }
 0x416   : > { %v1690_v13 = vshrl.u32 %v12628_v39, %v12788_v26  ;;  %vm2691_vm15 = vweird.f32 %v12769_v59  ;;  %vm1983_vm3 = vcmp.lt.s32.totalorder %v12777_v30, 0  ;;  %v2053_v61 = vsub.s32 32, %v2052_v54 }
 0x417   : > { %v2057_v53 = vsub.s32 4294967266, %v2052_v54  ;;  %v2860_v8 = vmul.u32 %v2853_v16, %v2844_v51  ;;  %v1689_v32 = vshll.u32 %v12622_v20, %v12789_v18  ;;  %v2054_v9 = vshll.u32 %v10548_v4, %v2052_v54 }
 0x418   : > { %v2864_v27 = vsel %vm2862_vm1, %v2863_v31, %v10580_v57  ;;  %v1679_v7 = vand.u32 8388607, %v1672_v50  ;;  %v1693_v52 = vshrl.u32 %v12629_v36, %v12788_v26  ;;  %v2055_v11 = vshrl.u32 %v2037_v25, %v2053_v61 }
 0x419   : > { %v2058_v28 = vadd.s32 127, %v2057_v53  ;;  %v2865_v56 = vadd.s32 %v2864_v27, %v2860_v8  ;;  %v1699_v48 = vshrl.u32 %v12619_v12, %v12788_v26  ;;  %v6912_v14 = vpop.eup %6911  ;;  %v1691_v5 = vor.u32 %v1690_v13, %v1689_v32 }
 0x41a   : > { %v1692_v19 = vshll.u32 %v12628_v39, %v12789_v18  ;;  %v1696_v4 = vshrl.u32 %v12615_v0, %v12788_v26  ;;  %v1698_v3 = vshll.u32 %v12615_v0, %v12789_v18  ;;  %v6914_v49 = vpop.eup %6913  ;;  %v2698_v6 = vxor.u32 2147483648, %v6912_v14 }
 0x41b   : > { %v12790_v29 = vand.u32 2147483647, %v12777_v30  ;;  %v2056_v24 = vor.u32 %v2055_v11, %v2054_v9  ;;  %v2059_v21 = vshll.u32 %v2058_v28, 23  ;;  %v2866_v43 = vadd.s32 536870912, %v2865_v56  ;;  %v12793_v9 = vld [vmem:[#allocation22_spill] sm:$0xff] }
 0x41c   : > { %v2695_v58 = vxor.u32 2147483648, %v6914_v49  ;;  %v1695_v60 = vshll.u32 %v12629_v36, %v12789_v18  ;;  %v1700_v57 = vor.u32 %v1699_v48, %v1698_v3  ;;  %v1702_v33 = vshrl.u32 %v12630_v47, %v12788_v26 }
 0x41d   : > { %vm10632_vm4 = vcmp.le.f32.partialorder %v12790_v29, 0.7853982  ;;  %v2699_v34 = vsel %vm2697_vm12, %v2698_v6, %v6914_v49  ;;  %v2060_v51 = vor.u32 4788187, %v2059_v21  ;;  %v2867_v25 = vshrl.u32 %v2866_v43, 30 }
 0x41e   : > { %v1694_v38 = vor.u32 %v1693_v52, %v1692_v19  ;;  %v2696_v54 = vsel %vm2694_vm13, %v6912_v14, %v2695_v58  ;;  %v2063_v31 = vcvt.s32.f32 %v2056_v24  ;;  %v1697_v13 = vor.u32 %v1696_v4, %v1695_v60 }
 0x41f   : > { %v1701_v61 = vshll.u32 %v12619_v12, %v12789_v18  ;;  %v2700_v53 = vsel %vm2693_vm2, %v2696_v54, %v2699_v34  ;;  %v2061_v8 = vand.u32 2147483647, %v2060_v51  ;;  %v2868_v32 = vshll.u32 %v2867_v25, 30 }
 0x420   : > { %vm1707_vm5 = vcmp.lt.s32.totalorder %v12793_v9, 4  ;;  %v2701_v27 = vsel %vm2691_vm15, nan, %v2700_v53  ;;  %v2068_v52 = vsel %vm1983_vm3, %v2067_v37, %v10532_v46  ;;  %vm1704_vm6 = vcmp.lt.s32.totalorder %v12793_v9, 1  ;;  %v12794_v53 = vld [vmem:[#allocation72_spill] sm:$0xff] }
 0x421   : > { %v1703_v11 = vor.u32 %v1702_v33, %v1701_v61  ;;  %v1713_v28 = vsel %vm1707_vm5, %v1700_v57, 920167782  ;;  %v4753_v18 = vmul.f32 %v8617_v62, %v2701_v27  ;;  %v2064_v48 = vmul.f32 %v2063_v31, %v2061_v8 }
 0x422   : > { %v10657_v1 = vsub.s32 %v2865_v56, %v2868_v32  ;;  %v1680_v14 = vor.u32 8388608, %v1679_v7  ;;  %v1688_v59 = vshrl.u32 %v12622_v20, %v12788_v26  ;;  %vm1706_vm7 = vcmp.lt.s32.totalorder %v12793_v9, 3 }
 0x423   : > { %v1712_v46 = vsel %vm1704_vm6, %v1691_v5, %v1694_v38  ;;  %v6361_v37 = vpack.c.bf16 %v4753_v18, %v10607_v2  ;;  %v2065_v19 = vxor.u32 2147483648, %v2064_v48  ;;  %v1714_v62 = vsel %vm1706_vm7, %v1697_v13, %v1713_v28 }
 0x424   : > { %v2871_v4 = vsub.s32 0, %v10657_v1  ;;  %v2070_v56 = vsel %vm10632_vm4, 0, %v2068_v52  ;;  %vm1705_vm8 = vcmp.lt.s32.totalorder %v12793_v9, 2  ;;  %v1716_v26 = vsel %vm1704_vm6, %v1694_v38, %v1697_v13  ;;  %v12795_v52 = vld [vmem:[#allocation109_spill] sm:$0xff] }
 0x425   : > { %v1717_v7 = vsel %vm1707_vm5, %v1703_v11, 1326507024  ;;  %6362 = vmatprep.subr.bf16.mxu0 %v6361_v37  ;;  %v2066_v2 = vsel %vm1983_vm3, %v2065_v19, %v2064_v48  ;;  %v1708_v49 = vsel %vm1704_vm6, %v1688_v59, %v1691_v5  ;;  %v1709_v6 = vsel %vm1707_vm5, %v1697_v13, 2102212464  ;;  %v12798_v37 = vld [vmem:[#allocation123_spill] sm:$0xff] }
 0x426   : > { %v6239_v3 = vmin.u32 %v2871_v4, %v10657_v1  ;;  %v2069_v29 = vsel %vm10632_vm4, %v12777_v30, %v2066_v2  ;;  %v1715_v24 = vsel %vm1705_vm8, %v1712_v46, %v1714_v62  ;;  %v1718_v21 = vsel %vm1706_vm7, %v1700_v57, %v1717_v7 }
 0x427   : > { %v1720_v43 = vshll.u32 %v1680_v14, 8  ;;  %6915 = vcosq.f32 %v2069_v29  ;;  %v2891_v60 = vsub.s32 4, %v2867_v25  ;;  %v1719_v5 = vsel %vm1705_vm8, %v1716_v26, %v1718_v21 }
 0x428   : > { %v2873_v58 = vclz %v6239_v3  ;;  %6917 = vsinq.f32 %v2069_v29  ;;  %v1710_v33 = vsel %vm1706_vm7, %v1694_v38, %v1709_v6  ;;  %v10698_v51 = vshrl.u32 %v10586_v41, 5 }
 0x429   : > { %v10694_v34 = vmul.u32.u64.low %v1720_v43, %v1719_v5  ;;  %v10695_v16 = vmul.u32.u64.high %v1720_v43, %v1719_v5, %v10694_v34  ;;  %v10700_v31 = vmul.u32.u64.low %v1720_v43, %v1715_v24  ;;  %v10701_v57 = vmul.u32.u64.high %v1720_v43, %v1715_v24, %v10700_v31 }
 0x42a   : > { %v6240_v54 = vadd.s32 4294967294, %v2873_v58  ;;  %v10705_v13 = vand.u32 31, %v10586_v41  ;;  %v10707_v61 = vand.u32 3, %v2070_v56  ;;  %vm2807_vm9 = vcmp.lt.s32.totalorder %v8209_v44, 0 }
 0x42b   : > { %v2496_v38 = vand.u32 2147483647, %v12794_v53  ;;  %v10712_v8 = vadd.s32 4294967169, %v10593_v23  ;;  %v10716_v32 = vsel %vm2807_vm9, %v2891_v60, %v2867_v25  ;;  %v1711_v27 = vsel %vm1705_vm8, %v1708_v49, %v1710_v33  ;;  %v12799_v49 = vld [vmem:[#allocation120_spill] sm:$0xff] }
 0x42c   : > { %vm6241_vm10 = vcmp.lt.s32.totalorder %v6240_v54, 0  ;;  %v4456_v41 = vand.u32 2139095040, %v12795_v52  ;;  %vm10723_vm11 = vcmp.le.f32.partialorder %v2805_v42, 0.7853982  ;;  %vm1729_vm12 = vc.u32 %v10695_v16, %v10700_v31 }
 0x42d   : > { %v2876_v28 = vsel %vm6241_vm10, 0, %v6240_v54  ;;  %v2861_v23 = vadd.s32 %v10579_v45, %v10573_v17  ;;  %v1730_v9 = vadd.s32 1, %v10701_v57  ;;  %vm2079_vm13 = vcmp.eq.s32.totalorder %v10707_v61, 2 }
 0x42e   : > { %v2877_v25 = vsub.s32 32, %v2876_v28  ;;  %v2881_v18 = vsub.s32 4294967266, %v2876_v28  ;;  %v2878_v48 = vshll.u32 %v10657_v1, %v2876_v28  ;;  %v2894_v42 = vsel %vm10723_vm11, 0, %v10716_v32 }
 0x42f   : > { %v1727_v14 = vmul.u32 %v1720_v43, %v1711_v27  ;;  %v2503_v59 = vand.u32 8388607, %v2496_v38  ;;  %vm2076_vm14 = vcmp.eq.s32.totalorder %v10707_v61, 0  ;;  %v1731_v45 = vsel %vm1729_vm12, %v1730_v9, %v10701_v57 }
 0x430   : > { %v2879_v46 = vshrl.u32 %v2861_v23, %v2877_v25  ;;  %v2882_v17 = vadd.s32 127, %v2881_v18  ;;  %v2520_v19 = vshrl.u32 %v12615_v0, %v12798_v37  ;;  %v2512_v1 = vshrl.u32 %v12622_v20, %v12798_v37 }
 0x431   : > { %v1732_v4 = vadd.s32 %v1731_v45, %v1727_v14  ;;  %v2514_v62 = vshrl.u32 %v12628_v39, %v12798_v37  ;;  %v2523_v56 = vshrl.u32 %v12619_v12, %v12798_v37  ;;  %v6916_v26 = vpop.eup %6915  ;;  %v2517_v3 = vshrl.u32 %v12629_v36, %v12798_v37 }
 0x432   : > { %v2880_v7 = vor.u32 %v2879_v46, %v2878_v48  ;;  %v2883_v2 = vshll.u32 %v2882_v17, 23  ;;  %v2519_v6 = vshll.u32 %v12629_v36, %v12799_v49  ;;  %v6918_v29 = vpop.eup %6917  ;;  %vm2075_vm1 = vcmp.lt.s32.totalorder %v10707_v61, 2  ;;  %v12800_v17 = vld [vmem:[#allocation23_spill] sm:$0xff] }
 0x433   : > { %v1733_v24 = vadd.s32 536870912, %v1732_v4  ;;  %v2513_v21 = vshll.u32 %v12622_v20, %v12799_v49  ;;  %v2522_v43 = vshll.u32 %v12615_v0, %v12799_v49  ;;  %v2526_v58 = vshrl.u32 %v12630_v47, %v12798_v37 }
 0x434   : > { %v2080_v60 = vxor.u32 2147483648, %v6916_v26  ;;  %v2884_v5 = vor.u32 4788187, %v2883_v2  ;;  %v2516_v33 = vshll.u32 %v12628_v39, %v12799_v49  ;;  %v2521_v34 = vor.u32 %v2520_v19, %v2519_v6 }
 0x435   : > { %v2077_v54 = vxor.u32 2147483648, %v6918_v29  ;;  %v10762_v57 = vshrl.u32 %v1733_v24, 30  ;;  %v2524_v27 = vor.u32 %v2523_v56, %v2522_v43  ;;  %v2525_v28 = vshll.u32 %v12619_v12, %v12799_v49 }
 0x436   : > { %vm3640_vm2 = vcmp.gt.s32.totalorder %v10576_v10, 0  ;;  %v2885_v23 = vand.u32 2147483647, %v2884_v5  ;;  %v2887_v25 = vcvt.s32.f32 %v2880_v7  ;;  %v2515_v18 = vor.u32 %v2514_v62, %v2513_v21 }
 0x437   : > { %v2518_v9 = vor.u32 %v2517_v3, %v2516_v33  ;;  %v1735_v48 = vshll.u32 %v10762_v57, 30  ;;  %v2504_v14 = vor.u32 8388608, %v2503_v59  ;;  %v2527_v46 = vor.u32 %v2526_v58, %v2525_v28 }
 0x438   : > { %vm2528_vm15 = vcmp.lt.s32.totalorder %v12800_v17, 1  ;;  %v2081_v45 = vsel %vm2079_vm13, %v2080_v60, %v6918_v29  ;;  %v2888_v37 = vmul.f32 %v2887_v25, %v2885_v23  ;;  %vm2530_vm3 = vcmp.lt.s32.totalorder %v12800_v17, 3 }
 0x439   : > { %vm2531_vm4 = vcmp.lt.s32.totalorder %v12800_v17, 4  ;;  %v2078_v19 = vsel %vm2076_vm14, %v6916_v26, %v2077_v54  ;;  %v10775_v56 = vsub.s32 %v1732_v4, %v1735_v48  ;;  %vm2529_vm5 = vcmp.lt.s32.totalorder %v12800_v17, 2 }
 0x43a   : > { %v2533_v62 = vsel %vm2531_vm4, %v2521_v34, 2102212464  ;;  %v2537_v7 = vsel %vm2531_vm4, %v2524_v27, 920167782  ;;  %v2889_v2 = vxor.u32 2147483648, %v2888_v37  ;;  %v2536_v59 = vsel %vm2528_vm15, %v2515_v18, %v2518_v9 }
 0x43b   : > { %v2538_v3 = vsel %vm2530_vm3, %v2521_v34, %v2537_v7  ;;  %v1738_v49 = vsub.s32 0, %v10775_v56  ;;  %v2532_v6 = vsel %vm2528_vm15, %v2512_v1, %v2515_v18  ;;  %v2540_v29 = vsel %vm2528_vm15, %v2518_v9, %v2521_v34  ;;  %v12801_v18 = vld [vmem:[#allocation69_spill] sm:$0xff] }
 0x43c   : > { %v2541_v24 = vsel %vm2531_vm4, %v2527_v46, 1326507024  ;;  %v2082_v21 = vsel %vm2075_vm1, %v2078_v19, %v2081_v45  ;;  %v2890_v4 = vsel %vm2807_vm9, %v2889_v2, %v2888_v37  ;;  %v2534_v26 = vsel %vm2530_vm3, %v2518_v9, %v2533_v62  ;;  %v12803_v37 = vld [vmem:[#allocation119_spill] sm:$0xff]  ;;  %v12804_v2 = vld [vmem:[#allocation112_spill] sm:$0xff] }
 0x43d   : > { %v2542_v43 = vsel %vm2530_vm3, %v2524_v27, %v2541_v24  ;;  %v2893_v58 = vsel %vm10723_vm11, %v8209_v44, %v2890_v4  ;;  %v6195_v1 = vmin.u32 %v1738_v49, %v10775_v56  ;;  %v2539_v60 = vsel %vm2529_vm5, %v2536_v59, %v2538_v3 }
 0x43e   : > { %v2544_v61 = vshll.u32 %v2504_v14, 8  ;;  %vm2073_vm6 = vweird.f32 %v12777_v30  ;;  %6919 = vcosq.f32 %v2893_v58  ;;  %v10800_v5 = vand.u32 3, %v2894_v42 }
 0x43f   : > { %v2543_v33 = vsel %vm2529_vm5, %v2540_v29, %v2542_v43  ;;  %6921 = vsinq.f32 %v2893_v58  ;;  %v1740_v34 = vclz %v6195_v1  ;;  %v2083_v28 = vsel %vm2073_vm6, nan, %v2082_v21 }
 0x440   : > { %v10804_v54 = vmul.u32.u64.low %v2544_v61, %v2543_v33  ;;  %v10805_v27 = vmul.u32.u64.high %v2544_v61, %v2543_v33, %v10804_v54  ;;  %v2535_v23 = vsel %vm2529_vm5, %v2532_v6, %v2534_v26  ;;  %v10816_v32 = vsel %vm3640_vm2, %v10576_v10, 0  ;;  %v12802_v10 = vld [vmem:[#allocation116_spill] sm:$0xff] }
 0x441   : > { %v10809_v30 = vmul.u32.u64.low %v2544_v61, %v2539_v60  ;;  %v10810_v25 = vmul.u32.u64.high %v2544_v61, %v2539_v60, %v10809_v30  ;;  %v10819_v11 = vadd.s32 1, %v10712_v8  ;;  %v6196_v42 = vadd.s32 4294967294, %v1740_v34 }
 0x442   : > { %v1878_v9 = vand.u32 2147483647, %v12801_v18  ;;  %v10824_v48 = vshrl.u32 %v4456_v41, 23  ;;  %vm2903_vm7 = vcmp.eq.s32.totalorder %v10800_v5, 2  ;;  %v1728_v14 = vadd.s32 %v10700_v31, %v10695_v16 }
 0x443   : > { %v1758_v46 = vsub.s32 4, %v10762_v57  ;;  %vm2900_vm8 = vcmp.eq.s32.totalorder %v10800_v5, 0  ;;  %v10832_v17 = vmul.f32 %v12802_v10, %v2083_v28  ;;  %vm6197_vm9 = vcmp.lt.s32.totalorder %v6196_v42, 0 }
 0x444   : > { %v2551_v8 = vmul.u32 %v2544_v61, %v2535_v23  ;;  %vm2553_vm10 = vc.u32 %v10805_v27, %v10809_v30  ;;  %vm2899_vm11 = vcmp.lt.s32.totalorder %v10800_v5, 2  ;;  %v1743_v41 = vsel %vm6197_vm9, 0, %v6196_v42 }
 0x445   : > { %v2554_v45 = vadd.s32 1, %v10810_v25  ;;  %v10840_v16 = vshrl.u32 %v12622_v20, %v12803_v37  ;;  %v1896_v31 = vshrl.u32 %v12628_v39, %v12803_v37  ;;  %vm2897_vm12 = vweird.f32 %v8209_v44 }
 0x446   : > { %v1744_v19 = vsub.s32 32, %v1743_v41  ;;  %v1748_v62 = vsub.s32 4294967266, %v1743_v41  ;;  %v10847_v7 = vand.u32 8388607, %v1878_v9  ;;  %v1895_v59 = vshll.u32 %v12622_v20, %v12804_v2 }
 0x447   : > { %v2555_v3 = vsel %vm2553_vm10, %v2554_v45, %v10810_v25  ;;  %v1898_v49 = vshll.u32 %v12628_v39, %v12804_v2  ;;  %v1899_v6 = vshrl.u32 %v12629_v36, %v12803_v37  ;;  %v1905_v29 = vshrl.u32 %v12619_v12, %v12803_v37 }
 0x448   : > { %v1745_v24 = vshll.u32 %v10775_v56, %v1743_v41  ;;  %v1746_v21 = vshrl.u32 %v1728_v14, %v1744_v19  ;;  %v1749_v4 = vadd.s32 127, %v1748_v62  ;;  %v2556_v26 = vadd.s32 %v2555_v3, %v2551_v8  ;;  %v6920_v43 = vpop.eup %6919 }
 0x449   : > { %v1897_v58 = vor.u32 %v1896_v31, %v1895_v59  ;;  %v1902_v1 = vshrl.u32 %v12615_v0, %v12803_v37  ;;  %v1904_v60 = vshll.u32 %v12615_v0, %v12804_v2  ;;  %v1908_v61 = vshrl.u32 %v12630_v47, %v12803_v37  ;;  %v6922_v33 = vpop.eup %6921 }
 0x44a   : > { %v2904_v34 = vxor.u32 2147483648, %v6920_v43  ;;  %vm1674_vm13 = vcmp.lt.s32.totalorder %v12786_v40, 0  ;;  %v1747_v54 = vor.u32 %v1746_v21, %v1745_v24  ;;  %v1750_v56 = vshll.u32 %v1749_v4, 23  ;;  %v12807_v24 = vld [vmem:[#allocation111_spill] sm:$0xff] }
 0x44b   : > { %v2557_v28 = vadd.s32 536870912, %v2556_v26  ;;  %v2901_v23 = vxor.u32 2147483648, %v6922_v33  ;;  %v1901_v25 = vshll.u32 %v12629_v36, %v12804_v2  ;;  %v1906_v42 = vor.u32 %v1905_v29, %v1904_v60 }
 0x44c   : > { %v1907_v14 = vshll.u32 %v12619_v12, %v12804_v2  ;;  %v2905_v10 = vsel %vm2903_vm7, %v2904_v34, %v6922_v33  ;;  %vm10874_vm14 = vcmp.le.f32.partialorder %v1672_v50, 0.7853982  ;;  %v1751_v41 = vor.u32 4788187, %v1750_v56 }
 0x44d   : > { %v2558_v45 = vshrl.u32 %v2557_v28, 30  ;;  %v1900_v37 = vor.u32 %v1899_v6, %v1898_v49  ;;  %v2902_v31 = vsel %vm2900_vm8, %v6920_v43, %v2901_v23  ;;  %v1754_v19 = vcvt.s32.f32 %v1747_v54 }
 0x44e   : > { %v1903_v62 = vor.u32 %v1902_v1, %v1901_v25  ;;  %v1909_v59 = vor.u32 %v1908_v61, %v1907_v14  ;;  %v2906_v2 = vsel %vm2899_vm11, %v2902_v31, %v2905_v10  ;;  %v1752_v3 = vand.u32 2147483647, %v1751_v41 }
 0x44f   : > { %v2559_v29 = vshll.u32 %v2558_v45, 30  ;;  %vm1913_vm1 = vcmp.lt.s32.totalorder %v12807_v24, 4  ;;  %vm4258_vm2 = vcmp.gt.s32.totalorder %v10819_v11, 0  ;;  %v2907_v50 = vsel %vm2897_vm12, nan, %v2906_v2 }
 0x450   : > { %v1886_v49 = vor.u32 8388608, %v10847_v7  ;;  %vm1910_vm15 = vcmp.lt.s32.totalorder %v12807_v24, 1  ;;  %v1919_v6 = vsel %vm1913_vm1, %v1906_v42, 920167782  ;;  %v4755_v21 = vmul.f32 %v9342_v15, %v2907_v50 }
 0x451   : > { %v1755_v4 = vmul.f32 %v1754_v19, %v1752_v3  ;;  %v10889_v43 = vsub.s32 %v2556_v26, %v2559_v29  ;;  %vm1912_vm3 = vcmp.lt.s32.totalorder %v12807_v24, 3  ;;  %v1915_v5 = vsel %vm1913_vm1, %v1903_v62, 2102212464 }
 0x452   : > { %v1918_v1 = vsel %vm1910_vm15, %v1897_v58, %v1900_v37  ;;  %v1920_v44 = vsel %vm1912_vm3, %v1903_v62, %v1919_v6  ;;  %v1923_v60 = vsel %vm1913_vm1, %v1909_v59, 1326507024  ;;  %v6369_v7 = vpack.c.bf16 %v4755_v21, %v10832_v17 }
 0x453   : > { %v1756_v61 = vxor.u32 2147483648, %v1755_v4  ;;  %v2562_v33 = vsub.s32 0, %v10889_v43  ;;  %v1922_v15 = vsel %vm1910_vm15, %v1900_v37, %v1903_v62  ;;  %v1759_v26 = vsel %vm1674_vm13, %v1758_v46, %v10762_v57 }
 0x454   : > { %vm1911_vm4 = vcmp.lt.s32.totalorder %v12807_v24, 2  ;;  %v1914_v34 = vsel %vm1910_vm15, %v10840_v16, %v1897_v58  ;;  %v1924_v17 = vsel %vm1912_vm3, %v1906_v42, %v1923_v60  ;;  %6370 = vmatprep.subr.bf16.mxu1 %v6369_v7  ;;  %v1926_v23 = vshll.u32 %v1886_v49, 8 }
 0x455   : > { %v1757_v54 = vsel %vm1674_vm13, %v1756_v61, %v1755_v4  ;;  %v6227_v56 = vmin.u32 %v2562_v33, %v10889_v43  ;;  %v1921_v28 = vsel %vm1911_vm4, %v1918_v1, %v1920_v44  ;;  %v2582_v46 = vsub.s32 4, %v2558_v45  ;;  %v12811_v44 = vld [vmem:[#allocation73_spill] sm:$0xff] }
 0x456   : > { %v1760_v57 = vsel %vm10874_vm14, %v12786_v40, %v1757_v54  ;;  %v1916_v16 = vsel %vm1912_vm3, %v1900_v37, %v1915_v5  ;;  %v1925_v58 = vsel %vm1911_vm4, %v1922_v15, %v1924_v17  ;;  %v1761_v10 = vsel %vm10874_vm14, 0, %v1759_v26  ;;  %v12808_v37 = vld [vmem:[#allocation38_spill] sm:$0xff]  ;;  %v12813_v26 = vld [vmem:[#allocation124_spill] sm:$0xff] }
 0x457   : > { %6923 = vcosq.f32 %v1760_v57  ;;  %v2564_v25 = vclz %v6227_v56  ;;  %v10923_v42 = vmul.u32.u64.low %v1926_v23, %v1925_v58  ;;  %v10924_v14 = vmul.u32.u64.high %v1926_v23, %v1925_v58, %v10923_v42 }
 0x458   : > { %6925 = vsinq.f32 %v1760_v57  ;;  %v10928_v41 = vmul.u32.u64.low %v1926_v23, %v1921_v28  ;;  %v10929_v31 = vmul.u32.u64.high %v1926_v23, %v1921_v28, %v10928_v41  ;;  %v10933_v19 = vsub.s32 32, %v10705_v13 }
 0x459   : > { %v4353_v62 = vand.u32 2139095040, %v12808_v37  ;;  %vm2498_vm5 = vcmp.lt.s32.totalorder %v12794_v53, 0  ;;  %v6228_v59 = vadd.s32 4294967294, %v2564_v25  ;;  %v10938_v2 = vshrl.u32 %v10816_v32, 5 }
 0x45a   : > { %v10941_v3 = vadd.s32 4294967169, %v10824_v48  ;;  %v2583_v8 = vsel %vm2498_vm5, %v2582_v46, %v2558_v45  ;;  %v1917_v29 = vsel %vm1911_vm4, %v1914_v34, %v1916_v16  ;;  %v10950_v50 = vsel %vm4258_vm2, %v10819_v11, 0 }
 0x45b   : > { %v10952_v49 = vand.u32 3, %v1761_v10  ;;  %vm6229_vm6 = vcmp.lt.s32.totalorder %v6228_v59, 0  ;;  %vm1935_vm7 = vc.u32 %v10924_v14, %v10928_v41  ;;  %vm10958_vm8 = vcmp.le.f32.partialorder %v2496_v38, 0.7853982  ;;  %v12812_v38 = vld [vmem:[#allocation50_spill] sm:$0xff] }
 0x45c   : > { %v2552_v45 = vadd.s32 %v10809_v30, %v10805_v27  ;;  %v2567_v24 = vsel %vm6229_vm6, 0, %v6228_v59  ;;  %v1936_v6 = vadd.s32 1, %v10929_v31  ;;  %v2585_v4 = vsel %vm10958_vm8, 0, %v2583_v8 }
 0x45d   : > { %v2568_v11 = vsub.s32 32, %v2567_v24  ;;  %v2572_v21 = vsub.s32 4294967266, %v2567_v24  ;;  %v1933_v5 = vmul.u32 %v1926_v23, %v1917_v29  ;;  %v2702_v60 = vand.u32 2147483647, %v12811_v44 }
 0x45e   : > { %v1937_v1 = vsel %vm1935_vm7, %v1936_v6, %v10929_v31  ;;  %v2720_v7 = vshrl.u32 %v12628_v39, %v12812_v38  ;;  %v2723_v61 = vshrl.u32 %v12629_v36, %v12812_v38  ;;  %vm1767_vm9 = vcmp.eq.s32.totalorder %v10952_v49, 0 }
 0x45f   : > { %v2569_v27 = vshll.u32 %v10889_v43, %v2567_v24  ;;  %v2570_v30 = vshrl.u32 %v2552_v45, %v2568_v11  ;;  %v2573_v33 = vadd.s32 127, %v2572_v21  ;;  %v1938_v15 = vadd.s32 %v1937_v1, %v1933_v5 }
 0x460   : > { %v2719_v34 = vshll.u32 %v12622_v20, %v12813_v26  ;;  %v2726_v17 = vshrl.u32 %v12615_v0, %v12812_v38  ;;  %v2728_v54 = vshll.u32 %v12615_v0, %v12813_v26  ;;  %v2729_v56 = vshrl.u32 %v12619_v12, %v12812_v38 }
 0x461   : > { %v6924_v28 = vpop.eup %6923  ;;  %v2571_v23 = vor.u32 %v2570_v30, %v2569_v27  ;;  %v2574_v57 = vshll.u32 %v2573_v33, 23  ;;  %v1939_v46 = vadd.s32 536870912, %v1938_v15  ;;  %v2722_v43 = vshll.u32 %v12628_v39, %v12813_v26  ;;  %v12814_v27 = vld [vmem:[#allocation66_spill] sm:$0xff] }
 0x462   : > { %v6926_v16 = vpop.eup %6925  ;;  %vm1766_vm10 = vcmp.lt.s32.totalorder %v10952_v49, 2  ;;  %v2709_v58 = vand.u32 8388607, %v2702_v60  ;;  %v2725_v25 = vshll.u32 %v12629_v36, %v12813_v26  ;;  %v2730_v42 = vor.u32 %v2729_v56, %v2728_v54 }
 0x463   : > { %v2732_v10 = vshrl.u32 %v12630_v47, %v12812_v38  ;;  %v2575_v31 = vor.u32 4788187, %v2574_v57  ;;  %v1940_v59 = vshrl.u32 %v1939_v46, 30  ;;  %v2721_v8 = vor.u32 %v2720_v7, %v2719_v34 }
 0x464   : > { %v2724_v29 = vor.u32 %v2723_v61, %v2722_v43  ;;  %v1768_v45 = vxor.u32 2147483648, %v6926_v16  ;;  %v1771_v24 = vxor.u32 2147483648, %v6924_v28  ;;  %v2727_v6 = vor.u32 %v2726_v17, %v2725_v25 }
 0x465   : > { %v2731_v11 = vshll.u32 %v12619_v12, %v12813_v26  ;;  %v2576_v21 = vand.u32 2147483647, %v2575_v31  ;;  %v2578_v5 = vcvt.s32.f32 %v2571_v23  ;;  %v1941_v1 = vshll.u32 %v1940_v59, 30 }
 0x466   : > { %vm2737_vm11 = vcmp.lt.s32.totalorder %v12814_v27, 4  ;;  %vm1764_vm12 = vweird.f32 %v12786_v40  ;;  %vm1770_vm13 = vcmp.eq.s32.totalorder %v10952_v49, 2  ;;  %v10997_v30 = vand.u32 3, %v2585_v4 }
 0x467   : > { %v2733_v33 = vor.u32 %v2732_v10, %v2731_v11  ;;  %v2743_v7 = vsel %vm2737_vm11, %v2730_v42, 920167782  ;;  %v2579_v61 = vmul.f32 %v2578_v5, %v2576_v21  ;;  %v11001_v34 = vsub.s32 %v1938_v15, %v1941_v1 }
 0x468   : > { %v2710_v17 = vor.u32 8388608, %v2709_v58  ;;  %v2718_v26 = vshrl.u32 %v12622_v20, %v12812_v38  ;;  %v1769_v54 = vsel %vm1767_vm9, %v6924_v28, %v1768_v45  ;;  %v1772_v56 = vsel %vm1770_vm13, %v1771_v24, %v6926_v16 }
 0x469   : > { %vm2734_vm14 = vcmp.lt.s32.totalorder %v12814_v27, 1  ;;  %vm2736_vm1 = vcmp.lt.s32.totalorder %v12814_v27, 3  ;;  %v2580_v4 = vxor.u32 2147483648, %v2579_v61  ;;  %v1944_v23 = vsub.s32 0, %v11001_v34 }
 0x46a   : > { %v2742_v57 = vsel %vm2734_vm14, %v2721_v8, %v2724_v29  ;;  %v2744_v15 = vsel %vm2736_vm1, %v2727_v6, %v2743_v7  ;;  %vm2735_vm2 = vcmp.lt.s32.totalorder %v12814_v27, 2  ;;  %v2738_v46 = vsel %vm2734_vm14, %v2718_v26, %v2721_v8 }
 0x46b   : > { %v2746_v43 = vsel %vm2734_vm14, %v2724_v29, %v2727_v6  ;;  %v2747_v38 = vsel %vm2737_vm11, %v2733_v33, 1326507024  ;;  %v1773_v28 = vsel %vm1766_vm10, %v1769_v54, %v1772_v56  ;;  %v2581_v16 = vsel %vm2498_vm5, %v2580_v4, %v2579_v61  ;;  %v12818_v56 = vld [vmem:[#allocation32_spill] sm:$0xff] }
 0x46c   : > { %v6203_v58 = vmin.u32 %v1944_v23, %v11001_v34  ;;  %v2739_v25 = vsel %vm2737_vm11, %v2727_v6, 2102212464  ;;  %v2584_v10 = vsel %vm10958_vm8, %v12794_v53, %v2581_v16  ;;  %v2745_v31 = vsel %vm2735_vm2, %v2742_v57, %v2744_v15 }
 0x46d   : > { %v2748_v8 = vsel %vm2736_vm1, %v2730_v42, %v2747_v38  ;;  %v2750_v49 = vshll.u32 %v2710_v17, 8  ;;  %6927 = vcosq.f32 %v2584_v10  ;;  %v1964_v24 = vsub.s32 4, %v1940_v59 }
 0x46e   : > { %v1946_v45 = vclz %v6203_v58  ;;  %v2749_v11 = vsel %vm2735_vm2, %v2746_v43, %v2748_v8  ;;  %6929 = vsinq.f32 %v2584_v10  ;;  %v2740_v6 = vsel %vm2736_vm1, %v2724_v29, %v2739_v25 }
 0x46f   : > { %v11033_v21 = vmul.u32.u64.low %v2750_v49, %v2749_v11  ;;  %v11034_v48 = vmul.u32.u64.high %v2750_v49, %v2749_v11, %v11033_v21  ;;  %v1774_v5 = vsel %vm1764_vm12, nan, %v1773_v28  ;;  %v11043_v7 = vand.u32 31, %v10950_v50 }
 0x470   : > { %v6204_v1 = vadd.s32 4294967294, %v1946_v45  ;;  %v11038_v33 = vmul.u32.u64.low %v2750_v49, %v2745_v31  ;;  %v11039_v42 = vmul.u32.u64.high %v2750_v49, %v2745_v31, %v11038_v33  ;;  %v11046_v61 = vadd.s32 1, %v10941_v3 }
 0x471   : > { %vm11050_vm15 = vcmp.le.f32.partialorder %v1878_v9, 0.7853982  ;;  %vm1880_vm3 = vcmp.lt.s32.totalorder %v12801_v18, 0  ;;  %vm2594_vm4 = vcmp.eq.s32.totalorder %v10997_v30, 2  ;;  %v1934_v40 = vadd.s32 %v10928_v41, %v10924_v14  ;;  %v12817_v9 = vld [vmem:[#allocation59_spill] sm:$0xff] }
 0x472   : > { %vm6205_vm5 = vcmp.lt.s32.totalorder %v6204_v1, 0  ;;  %v1965_v17 = vsel %vm1880_vm3, %v1964_v24, %v1940_v59  ;;  %v2741_v3 = vsel %vm2735_vm2, %v2738_v46, %v2740_v6  ;;  %vm2591_vm6 = vcmp.eq.s32.totalorder %v10997_v30, 0 }
 0x473   : > { %v11064_v26 = vmul.f32 %v12817_v9, %v1774_v5  ;;  %v1949_v54 = vsel %vm6205_vm5, 0, %v6204_v1  ;;  %vm2759_vm7 = vc.u32 %v11034_v48, %v11038_v33  ;;  %v3423_v4 = vand.u32 2147483647, %v12818_v56 }
 0x474   : > { %vm2590_vm8 = vcmp.lt.s32.totalorder %v10997_v30, 2  ;;  %v1950_v14 = vsub.s32 32, %v1949_v54  ;;  %v1954_v41 = vsub.s32 4294967266, %v1949_v54  ;;  %v2760_v59 = vadd.s32 1, %v11039_v42 }
 0x475   : > { %v3441_v27 = vshrl.u32 %v12628_v39, %v10933_v19  ;;  %vm2588_vm9 = vweird.f32 %v12794_v53  ;;  %v1967_v23 = vsel %vm11050_vm15, 0, %v1965_v17  ;;  %v2757_v57 = vmul.u32 %v2750_v49, %v2741_v3 }
 0x476   : > { %v3440_v15 = vshll.u32 %v12622_v20, %v10705_v13  ;;  %v3444_v46 = vshrl.u32 %v12629_v36, %v10933_v19  ;;  %v1951_v43 = vshll.u32 %v11001_v34, %v1949_v54  ;;  %v1952_v38 = vshrl.u32 %v1934_v40, %v1950_v14 }
 0x477   : > { %v1955_v28 = vadd.s32 127, %v1954_v41  ;;  %v2761_v16 = vsel %vm2759_vm7, %v2760_v59, %v11039_v42  ;;  %v3430_v25 = vand.u32 8388607, %v3423_v4  ;;  %v3447_v10 = vshrl.u32 %v12615_v0, %v10933_v19  ;;  %v6928_v8 = vpop.eup %6927 }
 0x478   : > { %v2762_v58 = vadd.s32 %v2761_v16, %v2757_v57  ;;  %v3450_v31 = vshrl.u32 %v12619_v12, %v10933_v19  ;;  %v1953_v49 = vor.u32 %v1952_v38, %v1951_v43  ;;  %v3442_v24 = vor.u32 %v3441_v27, %v3440_v15  ;;  %v6930_v11 = vpop.eup %6929 }
 0x479   : > { %v1956_v45 = vshll.u32 %v1955_v28, 23  ;;  %v3443_v34 = vshll.u32 %v12628_v39, %v10705_v13  ;;  %v2595_v6 = vxor.u32 2147483648, %v6928_v8  ;;  %v3446_v5 = vshll.u32 %v12629_v36, %v10705_v13 }
 0x47a   : > { %v2763_v21 = vadd.s32 536870912, %v2762_v58  ;;  %v3449_v1 = vshll.u32 %v12615_v0, %v10705_v13  ;;  %v2592_v42 = vxor.u32 2147483648, %v6930_v11  ;;  %v3453_v3 = vshrl.u32 %v12630_v47, %v10933_v19 }
 0x47b   : > { %v1957_v40 = vor.u32 4788187, %v1956_v45  ;;  %v3445_v17 = vor.u32 %v3444_v46, %v3443_v34  ;;  %v2596_v9 = vsel %vm2594_vm4, %v2595_v6, %v6930_v11  ;;  %v3448_v14 = vor.u32 %v3447_v10, %v3446_v5 }
 0x47c   : > { %v2764_v54 = vshrl.u32 %v2763_v21, 30  ;;  %v3451_v41 = vor.u32 %v3450_v31, %v3449_v1  ;;  %v2593_v59 = vsel %vm2591_vm6, %v6928_v8, %v2592_v42  ;;  %v1960_v57 = vcvt.s32.f32 %v1953_v49 }
 0x47d   : > { %v1958_v27 = vand.u32 2147483647, %v1957_v40  ;;  %v3452_v15 = vshll.u32 %v12619_v12, %v10705_v13  ;;  %vm4464_vm10 = vcmp.gt.s32.totalorder %v11046_v61, 0  ;;  %v2597_v46 = vsel %vm2590_vm8, %v2593_v59, %v2596_v9  ;;  %v12819_v13 = vld [vmem:[#allocation117_spill] sm:$0xff] }
 0x47e   : > { %v11105_v43 = vand.u32 3, %v1967_v23  ;;  %v2765_v38 = vshll.u32 %v2764_v54, 30  ;;  %vm3455_vm11 = vcmp.lt.s32.totalorder %v10698_v51, 1  ;;  %v2598_v28 = vsel %vm2588_vm9, nan, %v2597_v46 }
 0x47f   : > { %v1961_v16 = vmul.f32 %v1960_v57, %v1958_v27  ;;  %vm2704_vm12 = vcmp.lt.s32.totalorder %v12811_v44, 0  ;;  %v3454_v10 = vor.u32 %v3453_v3, %v3452_v15  ;;  %vm3458_vm13 = vcmp.lt.s32.totalorder %v10698_v51, 4 }
 0x480   : > { %v4752_v31 = vmul.f32 %v12819_v13, %v2598_v28  ;;  %v11113_v8 = vsub.s32 %v2762_v58, %v2765_v38  ;;  %vm3457_vm14 = vcmp.lt.s32.totalorder %v10698_v51, 3  ;;  %v3464_v30 = vsel %vm3458_vm13, %v3451_v41, 920167782 }
 0x481   : > { %v1962_v23 = vxor.u32 2147483648, %v1961_v16  ;;  %v3431_v49 = vor.u32 8388608, %v3430_v25  ;;  %v3463_v53 = vsel %vm3455_vm11, %v3442_v24, %v3445_v17  ;;  %v3465_v45 = vsel %vm3457_vm14, %v3448_v14, %v3464_v30 }
 0x482   : > { %v6363_v34 = vpack.c.bf16 %v4752_v31, %v11064_v26  ;;  %v2768_v11 = vsub.s32 0, %v11113_v8  ;;  %v3439_v58 = vshrl.u32 %v12622_v20, %v10933_v19  ;;  %vm3456_vm1 = vcmp.lt.s32.totalorder %v10698_v51, 2 }
 0x483   : > { %v1963_v6 = vsel %vm1880_vm3, %v1962_v23, %v1961_v16  ;;  %v3460_v25 = vsel %vm3458_vm13, %v3448_v14, 2102212464  ;;  %v3467_v21 = vsel %vm3455_vm11, %v3445_v17, %v3448_v14  ;;  %v3468_v5 = vsel %vm3458_vm13, %v3454_v10, 1326507024 }
 0x484   : > { %6364 = vmatpush1.bf16.msra.mxu0 %v6363_v34  ;;  %v1966_v26 = vsel %vm11050_vm15, %v12801_v18, %v1963_v6  ;;  %v6235_v19 = vmin.u32 %v2768_v11, %v11113_v8  ;;  %v2788_v1 = vsub.s32 4, %v2764_v54  ;;  %v3466_v42 = vsel %vm3456_vm1, %v3463_v53, %v3465_v45 }
 0x485   : > { %6931 = vcosq.f32 %v1966_v26  ;;  %v3459_v40 = vsel %vm3455_vm11, %v3439_v58, %v3442_v24  ;;  %v3469_v3 = vsel %vm3457_vm14, %v3451_v41, %v3468_v5  ;;  %v3471_v9 = vshll.u32 %v3431_v49, 8 }
 0x486   : > { %6933 = vsinq.f32 %v1966_v26  ;;  %v2770_v14 = vclz %v6235_v19  ;;  %v3461_v29 = vsel %vm3457_vm14, %v3445_v17, %v3460_v25  ;;  %v3470_v59 = vsel %vm3456_vm1, %v3467_v21, %v3469_v3 }
 0x487   : > { %v11149_v27 = vmul.u32.u64.low %v3471_v9, %v3470_v59  ;;  %v11150_v57 = vmul.u32.u64.high %v3471_v9, %v3470_v59, %v11149_v27  ;;  %v11152_v15 = vmul.u32.u64.low %v3471_v9, %v3466_v42  ;;  %v11153_v46 = vmul.u32.u64.high %v3471_v9, %v3466_v42, %v11152_v15 }
 0x488   : > { %v11157_v24 = vand.u32 31, %v10816_v32  ;;  %v6236_v41 = vadd.s32 4294967294, %v2770_v14  ;;  %v2789_v38 = vsel %vm2704_vm12, %v2788_v1, %v2764_v54  ;;  %v4247_v28 = vand.u32 2147483647, %v12782_v55 }
 0x489   : > { %v11163_v17 = vshrl.u32 %v10950_v50, 5  ;;  %v4262_v16 = vsub.s32 32, %v11043_v7  ;;  %v11169_v10 = vsel %vm4464_vm10, %v11046_v61, 0  ;;  %v3462_v32 = vsel %vm3456_vm1, %v3459_v40, %v3461_v29 }
 0x48a   : > { %vm1976_vm2 = vcmp.eq.s32.totalorder %v11105_v43, 2  ;;  %vm11176_vm15 = vcmp.le.f32.partialorder %v2702_v60, 0.7853982  ;;  %v2758_v50 = vadd.s32 %v11038_v33, %v11034_v48  ;;  %vm6237_vm3 = vcmp.lt.s32.totalorder %v6236_v41, 0 }
 0x48b   : > { %vm1973_vm4 = vcmp.eq.s32.totalorder %v11105_v43, 0  ;;  %v2773_v13 = vsel %vm6237_vm3, 0, %v6236_v41  ;;  %v2791_v61 = vsel %vm11176_vm15, 0, %v2789_v38  ;;  %vm3480_vm5 = vc.u32 %v11150_v57, %v11152_v15 }
 0x48c   : > { %v3481_v51 = vadd.s32 1, %v11153_v46  ;;  %v2774_v31 = vsub.s32 32, %v2773_v13  ;;  %v2778_v60 = vsub.s32 4294967266, %v2773_v13  ;;  %v3478_v30 = vmul.u32 %v3471_v9, %v3462_v32 }
 0x48d   : > { %v11190_v23 = vand.u32 8388607, %v4247_v28  ;;  %v2775_v48 = vshll.u32 %v11113_v8, %v2773_v13  ;;  %v4265_v49 = vshrl.u32 %v12628_v39, %v4262_v16  ;;  %v4268_v53 = vshrl.u32 %v12629_v36, %v4262_v16 }
 0x48e   : > { %v3482_v33 = vsel %vm3480_vm5, %v3481_v51, %v11153_v46  ;;  %vm1972_vm6 = vcmp.lt.s32.totalorder %v11105_v43, 2  ;;  %v2776_v45 = vshrl.u32 %v2758_v50, %v2774_v31  ;;  %v2779_v34 = vadd.s32 127, %v2778_v60 }
 0x48f   : > { %v3483_v11 = vadd.s32 %v3482_v33, %v3478_v30  ;;  %v4274_v58 = vshrl.u32 %v12619_v12, %v4262_v16  ;;  %v6932_v6 = vpop.eup %6931  ;;  %v4264_v25 = vshll.u32 %v12622_v20, %v11043_v7  ;;  %v4267_v8 = vshll.u32 %v12628_v39, %v11043_v7 }
 0x490   : > { %v4271_v21 = vshrl.u32 %v12615_v0, %v4262_v16  ;;  %v4273_v5 = vshll.u32 %v12615_v0, %v11043_v7  ;;  %v6934_v26 = vpop.eup %6933  ;;  %v1977_v19 = vxor.u32 2147483648, %v6932_v6  ;;  %v2777_v1 = vor.u32 %v2776_v45, %v2775_v48 }
 0x491   : > { %v2780_v42 = vshll.u32 %v2779_v34, 23  ;;  %v3484_v40 = vadd.s32 536870912, %v3483_v11  ;;  %vm1970_vm7 = vweird.f32 %v12801_v18  ;;  %v1974_v3 = vxor.u32 2147483648, %v6934_v26 }
 0x492   : > { %v4270_v9 = vshll.u32 %v12629_v36, %v11043_v7  ;;  %v4275_v14 = vor.u32 %v4274_v58, %v4273_v5  ;;  %v4277_v29 = vshrl.u32 %v12630_v47, %v4262_v16  ;;  %v4266_v46 = vor.u32 %v4265_v49, %v4264_v25 }
 0x493   : > { %v2781_v59 = vor.u32 4788187, %v2780_v42  ;;  %v3485_v27 = vshrl.u32 %v3484_v40, 30  ;;  %v4269_v41 = vor.u32 %v4268_v53, %v4267_v8  ;;  %v1978_v38 = vsel %vm1976_vm2, %v1977_v19, %v6934_v26 }
 0x494   : > { %v2784_v32 = vcvt.s32.f32 %v2777_v1  ;;  %vm3425_vm8 = vcmp.lt.s32.totalorder %v12818_v56, 0  ;;  %v4272_v50 = vor.u32 %v4271_v21, %v4270_v9  ;;  %v4276_v13 = vshll.u32 %v12619_v12, %v11043_v7 }
 0x495   : > { %v1975_v51 = vsel %vm1973_vm4, %v6932_v6, %v1974_v3  ;;  %v2782_v31 = vand.u32 2147483647, %v2781_v59  ;;  %v3486_v60 = vshll.u32 %v3485_v27, 30  ;;  %vm4282_vm9 = vcmp.lt.s32.totalorder %v11163_v17, 4 }
 0x496   : > { %v11217_v30 = vand.u32 3, %v2791_v61  ;;  %v4263_v48 = vshrl.u32 %v12622_v20, %v4262_v16  ;;  %v4278_v33 = vor.u32 %v4277_v29, %v4276_v13  ;;  %v4288_v49 = vsel %vm4282_vm9, %v4275_v14, 920167782 }
 0x497   : > { %v2785_v53 = vmul.f32 %v2784_v32, %v2782_v31  ;;  %v11222_v45 = vsub.s32 %v3483_v11, %v3486_v60  ;;  %v4255_v7 = vor.u32 8388608, %v11190_v23  ;;  %vm4279_vm10 = vcmp.lt.s32.totalorder %v11163_v17, 1 }
 0x498   : > { %v1979_v34 = vsel %vm1972_vm6, %v1975_v51, %v1978_v38  ;;  %v3509_v58 = vsub.s32 4, %v3485_v27  ;;  %vm4281_vm11 = vcmp.lt.s32.totalorder %v11163_v17, 3  ;;  %v4284_v16 = vsel %vm4282_vm9, %v4272_v50, 2102212464  ;;  %v12824_v51 = vld [vmem:[#allocation113_spill] sm:$0xff] }
 0x499   : > { %v2786_v61 = vxor.u32 2147483648, %v2785_v53  ;;  %v3489_v6 = vsub.s32 0, %v11222_v45  ;;  %v4287_v25 = vsel %vm4279_vm10, %v4266_v46, %v4269_v41  ;;  %v4289_v11 = vsel %vm4281_vm11, %v4272_v50, %v4288_v49 }
 0x49a   : > { %vm4280_vm13 = vcmp.lt.s32.totalorder %v11163_v17, 2  ;;  %v4283_v23 = vsel %vm4279_vm10, %v4263_v48, %v4266_v46  ;;  %v4291_v8 = vsel %vm4279_vm10, %v4269_v41, %v4272_v50  ;;  %v4292_v43 = vsel %vm4282_vm9, %v4278_v33, 1326507024 }
 0x49b   : > { %v1980_v21 = vsel %vm1970_vm7, nan, %v1979_v34  ;;  %v2787_v5 = vsel %vm2704_vm12, %v2786_v61, %v2785_v53  ;;  %v6263_v26 = vmin.u32 %v3489_v6, %v11222_v45  ;;  %v4285_v19 = vsel %vm4281_vm11, %v4269_v41, %v4284_v16 }
 0x49c   : > { %v2790_v1 = vsel %vm11176_vm15, %v12811_v44, %v2787_v5  ;;  %v4290_v42 = vsel %vm4280_vm13, %v4287_v25, %v4289_v11  ;;  %v4293_v40 = vsel %vm4281_vm11, %v4275_v14, %v4292_v43  ;;  %v4295_v18 = vshll.u32 %v4255_v7, 8 }
 0x49d   : > { %6935 = vcosq.f32 %v2790_v1  ;;  %v3491_v3 = vclz %v6263_v26  ;;  %v11253_v9 = vsel %vm3425_vm8, %v3509_v58, %v3485_v27  ;;  %v4294_v29 = vsel %vm4280_vm13, %v4291_v8, %v4293_v40 }
 0x49e   : > { %6937 = vsinq.f32 %v2790_v1  ;;  %v4286_v54 = vsel %vm4280_vm13, %v4283_v23, %v4285_v19  ;;  %v11259_v59 = vmul.u32.u64.low %v4295_v18, %v4294_v29  ;;  %v11260_v46 = vmul.u32.u64.high %v4295_v18, %v4294_v29, %v11259_v59 }
 0x49f   : > { %v6264_v41 = vadd.s32 4294967294, %v3491_v3  ;;  %v11262_v38 = vmul.u32.u64.low %v4295_v18, %v4290_v42  ;;  %v11263_v14 = vmul.u32.u64.high %v4295_v18, %v4290_v42, %v11262_v38  ;;  %v3629_v32 = vand.u32 2147483647, %v12740_v35 }
 0x4a0   : > { %v3644_v27 = vsub.s32 32, %v11157_v24  ;;  %v11270_v50 = vshrl.u32 %v4353_v62, 23  ;;  %v11273_v13 = vand.u32 31, %v11169_v10  ;;  %vm11277_vm12 = vcmp.le.f32.partialorder %v3423_v4, 0.7853982 }
 0x4a1   : > { %vm2800_vm14 = vcmp.eq.s32.totalorder %v11217_v30, 2  ;;  %v11283_v31 = vmul.f32 %v12824_v51, %v1980_v21  ;;  %v3479_v60 = vadd.s32 %v11152_v15, %v11150_v57  ;;  %vm6265_vm1 = vcmp.lt.s32.totalorder %v6264_v41, 0 }
 0x4a2   : > { %vm2797_vm2 = vcmp.eq.s32.totalorder %v11217_v30, 0  ;;  %v3494_v62 = vsel %vm6265_vm1, 0, %v6264_v41  ;;  %v3512_v48 = vsel %vm11277_vm12, 0, %v11253_v9  ;;  %v4302_v4 = vmul.u32 %v4295_v18, %v4286_v54 }
 0x4a3   : > { %vm4304_vm15 = vc.u32 %v11260_v46, %v11262_v38  ;;  %vm2796_vm3 = vcmp.lt.s32.totalorder %v11217_v30, 2  ;;  %v3495_v33 = vsub.s32 32, %v3494_v62  ;;  %v3499_v49 = vsub.s32 4294967266, %v3494_v62 }
 0x4a4   : > { %v4305_v53 = vadd.s32 1, %v11263_v14  ;;  %v11297_v57 = vand.u32 8388607, %v3629_v32  ;;  %vm2794_vm4 = vweird.f32 %v12811_v44  ;;  %v3496_v15 = vshll.u32 %v11222_v45, %v3494_v62 }
 0x4a5   : > { %v3645_v7 = vshrl.u32 %v12622_v20, %v3644_v27  ;;  %v3646_v34 = vshll.u32 %v12622_v20, %v11157_v24  ;;  %v3647_v58 = vshrl.u32 %v12628_v39, %v3644_v27  ;;  %v3497_v16 = vshrl.u32 %v3479_v60, %v3495_v33 }
 0x4a6   : > { %v3500_v61 = vadd.s32 127, %v3499_v49  ;;  %v4306_v6 = vsel %vm4304_vm15, %v4305_v53, %v11263_v14  ;;  %v3656_v25 = vshrl.u32 %v12619_v12, %v3644_v27  ;;  %v3649_v23 = vshll.u32 %v12628_v39, %v11157_v24 }
 0x4a7   : > { %v4307_v11 = vadd.s32 %v4306_v6, %v4302_v4  ;;  %v3650_v8 = vshrl.u32 %v12629_v36, %v3644_v27  ;;  %v3653_v45 = vshrl.u32 %v12615_v0, %v3644_v27  ;;  %v6936_v43 = vpop.eup %6935  ;;  %v3498_v21 = vor.u32 %v3497_v16, %v3496_v15  ;;  %v12825_v4 = vld [vmem:[#allocation20_spill] sm:$0xff] }
 0x4a8   : > { %v3501_v5 = vshll.u32 %v3500_v61, 23  ;;  %v3652_v26 = vshll.u32 %v12629_v36, %v11157_v24  ;;  %v3655_v19 = vshll.u32 %v12615_v0, %v11157_v24  ;;  %v6938_v1 = vpop.eup %6937  ;;  %v2801_v42 = vxor.u32 2147483648, %v6936_v43  ;;  %v12826_v61 = vld [vmem:[#allocation125_spill] sm:$0xff] }
 0x4a9   : > { %v4308_v40 = vadd.s32 536870912, %v4307_v11  ;;  %v3637_v18 = vor.u32 8388608, %v11297_v57  ;;  %v3659_v3 = vshrl.u32 %v12630_v47, %v3644_v27  ;;  %v2798_v29 = vxor.u32 2147483648, %v6938_v1 }
 0x4aa   : > { %v3502_v54 = vor.u32 4788187, %v3501_v5  ;;  %v3648_v59 = vor.u32 %v3647_v58, %v3646_v34  ;;  %v3657_v41 = vor.u32 %v3656_v25, %v3655_v19  ;;  %v2802_v14 = vsel %vm2800_vm14, %v2801_v42, %v6938_v1 }
 0x4ab   : > { %vm4249_vm5 = vcmp.lt.s32.totalorder %v12782_v55, 0  ;;  %v4309_v51 = vshrl.u32 %v4308_v40, 30  ;;  %v3654_v60 = vor.u32 %v3653_v45, %v3652_v26  ;;  %v3658_v62 = vshll.u32 %v12619_v12, %v11157_v24 }
 0x4ac   : > { %vm3537_vm6 = vcmp.gt.s32.totalorder %v12825_v4, 0  ;;  %vm4155_vm7 = vcmp.gt.s32.totalorder %v10589_v22, 0  ;;  %v2799_v27 = vsel %vm2797_vm2, %v6936_v43, %v2798_v29  ;;  %v3503_v33 = vand.u32 2147483647, %v3502_v54 }
 0x4ad   : > { %v3505_v49 = vcvt.s32.f32 %v3498_v21  ;;  %v3651_v53 = vor.u32 %v3650_v8, %v3649_v23  ;;  %v2803_v57 = vsel %vm2796_vm3, %v2799_v27, %v2802_v14  ;;  %v4310_v15 = vshll.u32 %v4309_v51, 30 }
 0x4ae   : > { %v3660_v34 = vor.u32 %v3659_v3, %v3658_v62  ;;  %vm3664_vm9 = vcmp.lt.s32.totalorder %v10938_v2, 4  ;;  %v2804_v24 = vsel %vm2794_vm4, nan, %v2803_v57  ;;  %vm3661_vm10 = vcmp.lt.s32.totalorder %v10938_v2, 1 }
 0x4af   : > { %v3506_v58 = vmul.f32 %v3505_v49, %v3503_v33  ;;  %v3670_v16 = vsel %vm3664_vm9, %v3657_v41, 920167782  ;;  %v4754_v6 = vmul.f32 %v12826_v61, %v2804_v24  ;;  %v11335_v25 = vsub.s32 %v4307_v11, %v4310_v15 }
 0x4b0   : > { %vm3663_vm11 = vcmp.lt.s32.totalorder %v10938_v2, 3  ;;  %v3666_v30 = vsel %vm3664_vm9, %v3654_v60, 2102212464  ;;  %v4333_v8 = vsub.s32 4, %v4309_v51  ;;  %v3669_v44 = vsel %vm3661_vm10, %v3648_v59, %v3651_v53 }
 0x4b1   : > { %v3507_v23 = vxor.u32 2147483648, %v3506_v58  ;;  %v3671_v45 = vsel %vm3663_vm11, %v3654_v60, %v3670_v16  ;;  %v6371_v43 = vpack.c.bf16 %v4754_v6, %v11283_v31  ;;  %v4313_v21 = vsub.s32 0, %v11335_v25 }
 0x4b2   : > { %v3673_v11 = vsel %vm3661_vm10, %v3651_v53, %v3654_v60  ;;  %v3674_v5 = vsel %vm3664_vm9, %v3660_v34, 1326507024  ;;  %vm3662_vm13 = vcmp.lt.s32.totalorder %v10938_v2, 2  ;;  %v3665_v19 = vsel %vm3661_vm10, %v3645_v7, %v3648_v59  ;;  %v12827_v60 = vld [vmem:[#allocation51_spill] sm:$0xff] }
 0x4b3   : > { %v3508_v26 = vsel %vm3425_vm8, %v3507_v23, %v3506_v58  ;;  %v3675_v1 = vsel %vm3663_vm11, %v3657_v41, %v3674_v5  ;;  %6372 = vmatpush1.bf16.msra.mxu1 %v6371_v43  ;;  %v6295_v42 = vmin.u32 %v4313_v21, %v11335_v25  ;;  %v3672_v40 = vsel %vm3662_vm13, %v3669_v44, %v3671_v45 }
 0x4b4   : > { %v3511_v31 = vsel %vm11277_vm12, %v12818_v56, %v3508_v26  ;;  %v3677_v3 = vshll.u32 %v3637_v18, 8  ;;  %v4334_v29 = vsel %vm4249_vm5, %v4333_v8, %v4309_v51  ;;  %v3667_v7 = vsel %vm3663_vm11, %v3651_v53, %v3666_v30 }
 0x4b5   : > { %6939 = vcosq.f32 %v3511_v31  ;;  %v3676_v54 = vsel %vm3662_vm13, %v3673_v11, %v3675_v1  ;;  %v4315_v59 = vclz %v6295_v42  ;;  %v11373_v62 = vand.u32 31, %v12827_v60 }
 0x4b6   : > { %6941 = vsinq.f32 %v3511_v31  ;;  %v11369_v41 = vmul.u32.u64.low %v3677_v3, %v3676_v54  ;;  %v11370_v14 = vmul.u32.u64.high %v3677_v3, %v3676_v54, %v11369_v41  ;;  %vm11377_vm8 = vcmp.le.f32.partialorder %v4247_v28, 0.7853982 }
 0x4b7   : > { %v11381_v51 = vmul.u32.u64.low %v3677_v3, %v3672_v40  ;;  %v11382_v27 = vmul.u32.u64.high %v3677_v3, %v3672_v40, %v11381_v51  ;;  %v11388_v33 = vsel %vm3537_vm6, %v12825_v4, 0  ;;  %v11393_v49 = vsel %vm4155_vm7, %v10589_v22, 0  ;;  %v12830_v22 = vld [vmem:[#allocation108_spill] sm:$0xff] }
 0x4b8   : > { %v6296_v53 = vadd.s32 4294967294, %v4315_v59  ;;  %v4336_v28 = vsel %vm11377_vm8, 0, %v4334_v29  ;;  %v11398_v57 = vadd.s32 4294967169, %v11270_v50  ;;  %v4468_v15 = vsub.s32 32, %v11273_v13 }
 0x4b9   : > { %v11405_v4 = vand.u32 3, %v3512_v48  ;;  %v3668_v34 = vsel %vm3662_vm13, %v3665_v19, %v3667_v7  ;;  %v11410_v24 = vmul.f32 1.442695, %v12830_v22  ;;  %v11413_v58 = vshrl.u32 %v11169_v10, 5 }
 0x4ba   : > { %vm6297_vm14 = vcmp.lt.s32.totalorder %v6296_v53, 0  ;;  %vm3686_vm1 = vc.u32 %v11370_v14, %v11381_v51  ;;  %v4303_v50 = vadd.s32 %v11262_v38, %v11260_v46  ;;  %v11419_v9 = vand.u32 3, %v4336_v28 }
 0x4bb   : > { %v4318_v17 = vsel %vm6297_vm14, 0, %v6296_v53  ;;  %v3687_v48 = vadd.s32 1, %v11382_v27  ;;  %v3684_v61 = vmul.u32 %v3677_v3, %v3668_v34  ;;  %v4453_v6 = vand.u32 2147483647, %v12795_v52 }
 0x4bc   : > { %v4319_v2 = vsub.s32 32, %v4318_v17  ;;  %v4323_v16 = vsub.s32 4294967266, %v4318_v17  ;;  %vm3518_vm12 = vcmp.eq.s32.totalorder %v11405_v4, 0  ;;  %vm3521_vm2 = vcmp.eq.s32.totalorder %v11405_v4, 2 }
 0x4bd   : > { %v3688_v10 = vsel %vm3686_vm1, %v3687_v48, %v11382_v27  ;;  %v4470_v30 = vshll.u32 %v12622_v20, %v11273_v13  ;;  %v4471_v46 = vshrl.u32 %v12628_v39, %v4468_v15  ;;  %v4480_v38 = vshrl.u32 %v12619_v12, %v4468_v15 }
 0x4be   : > { %v4320_v23 = vshll.u32 %v11335_v25, %v4318_v17  ;;  %v4321_v8 = vshrl.u32 %v4303_v50, %v4319_v2  ;;  %v4324_v44 = vadd.s32 127, %v4323_v16  ;;  %v3689_v45 = vadd.s32 %v3688_v10, %v3684_v61 }
 0x4bf   : > { %v6940_v43 = vpop.eup %6939  ;;  %v4474_v21 = vshrl.u32 %v12629_v36, %v4468_v15  ;;  %v4477_v11 = vshrl.u32 %v12615_v0, %v4468_v15  ;;  %v4479_v5 = vshll.u32 %v12615_v0, %v11273_v13  ;;  %v4483_v26 = vshrl.u32 %v12630_v47, %v4468_v15 }
 0x4c0   : > { %v6942_v19 = vpop.eup %6941  ;;  %vm3517_vm15 = vcmp.lt.s32.totalorder %v11405_v4, 2  ;;  %v4322_v1 = vor.u32 %v4321_v8, %v4320_v23  ;;  %v4325_v31 = vshll.u32 %v4324_v44, 23  ;;  %v3690_v42 = vadd.s32 536870912, %v3689_v45 }
 0x4c1   : > { %v4460_v25 = vand.u32 8388607, %v4453_v6  ;;  %v4473_v40 = vshll.u32 %v12628_v39, %v11273_v13  ;;  %v4476_v3 = vshll.u32 %v12629_v36, %v11273_v13  ;;  %v4481_v29 = vor.u32 %v4480_v38, %v4479_v5 }
 0x4c2   : > { %v4482_v7 = vshll.u32 %v12619_v12, %v11273_v13  ;;  %v3519_v54 = vxor.u32 2147483648, %v6942_v19  ;;  %v3522_v59 = vxor.u32 2147483648, %v6940_v43  ;;  %v4326_v41 = vor.u32 4788187, %v4325_v31 }
 0x4c3   : > { %v3691_v60 = vshrl.u32 %v3690_v42, 30  ;;  %v4472_v27 = vor.u32 %v4471_v46, %v4470_v30  ;;  %v4475_v53 = vor.u32 %v4474_v21, %v4473_v40  ;;  %v4478_v28 = vor.u32 %v4477_v11, %v4476_v3 }
 0x4c4   : > { %v4484_v34 = vor.u32 %v4483_v26, %v4482_v7  ;;  %vm3515_vm3 = vweird.f32 %v12818_v56  ;;  %v4327_v22 = vand.u32 2147483647, %v4326_v41  ;;  %v4329_v50 = vcvt.s32.f32 %v4322_v1 }
 0x4c5   : > { %v3692_v17 = vshll.u32 %v3691_v60, 30  ;;  %vm4488_vm4 = vcmp.lt.s32.totalorder %v11413_v58, 4  ;;  %v4461_v48 = vor.u32 8388608, %v4460_v25  ;;  %vm4485_vm6 = vcmp.lt.s32.totalorder %v11413_v58, 1 }
 0x4c6   : > { %vm4487_vm7 = vcmp.lt.s32.totalorder %v11413_v58, 3  ;;  %v4494_v13 = vsel %vm4488_vm4, %v4481_v29, 920167782  ;;  %v3520_v2 = vsel %vm3518_vm12, %v6940_v43, %v3519_v54  ;;  %v3523_v16 = vsel %vm3521_vm2, %v3522_v59, %v6942_v19 }
 0x4c7   : > { %v4330_v61 = vmul.f32 %v4329_v50, %v4327_v22  ;;  %v11453_v10 = vsub.s32 %v3689_v45, %v3692_v17  ;;  %v4469_v30 = vshrl.u32 %v12622_v20, %v4468_v15  ;;  %v4493_v46 = vsel %vm4485_vm6, %v4472_v27, %v4475_v53  ;;  %v12832_v17 = vld [vmem:[#allocation29_spill] sm:$0xff] }
 0x4c8   : > { %v4495_v38 = vsel %vm4487_vm7, %v4478_v28, %v4494_v13  ;;  %v4498_v23 = vsel %vm4488_vm4, %v4484_v34, 1326507024  ;;  %v4490_v21 = vsel %vm4488_vm4, %v4478_v28, 2102212464  ;;  %v4497_v43 = vsel %vm4485_vm6, %v4475_v53, %v4478_v28  ;;  %v12831_v34 = vld [vmem:[#allocation44_spill] sm:$0xff] }
 0x4c9   : > { %v4331_v8 = vxor.u32 2147483648, %v4330_v61  ;;  %v3695_v44 = vsub.s32 0, %v11453_v10  ;;  %v3524_v45 = vsel %vm3517_vm15, %v3520_v2, %v3523_v16  ;;  %vm4486_vm9 = vcmp.lt.s32.totalorder %v11413_v58, 2 }
 0x4ca   : > { %v4489_v15 = vsel %vm4485_vm6, %v4469_v30, %v4472_v27  ;;  %v4499_v11 = vsel %vm4487_vm7, %v4481_v29, %v4498_v23  ;;  %v4496_v19 = vsel %vm4486_vm9, %v4493_v46, %v4495_v38  ;;  %v4501_v1 = vshll.u32 %v4461_v48, 8 }
 0x4cb   : > { %v4332_v5 = vsel %vm4249_vm5, %v4331_v8, %v4330_v61  ;;  %v6271_v26 = vmin.u32 %v3695_v44, %v11453_v10  ;;  %v3715_v31 = vsub.s32 4, %v3691_v60  ;;  %v4491_v42 = vsel %vm4487_vm7, %v4475_v53, %v4490_v21 }
 0x4cc   : > { %v4335_v4 = vsel %vm11377_vm8, %v12782_v55, %v4332_v5  ;;  %v4500_v25 = vsel %vm4486_vm9, %v4497_v43, %v4499_v11  ;;  %v3525_v7 = vsel %vm3515_vm3, nan, %v3524_v45  ;;  %v11492_v18 = vsub.s32 32, %v11373_v62 }
 0x4cd   : > { %6943 = vcosq.f32 %v4335_v4  ;;  %v3697_v40 = vclz %v6271_v26  ;;  %v11482_v3 = vmul.u32.u64.low %v4501_v1, %v4500_v25  ;;  %v11483_v29 = vmul.u32.u64.high %v4501_v1, %v4500_v25, %v11482_v3 }
 0x4ce   : > { %6945 = vsinq.f32 %v4335_v4  ;;  %v11487_v54 = vmul.u32.u64.low %v4501_v1, %v4496_v19  ;;  %v11488_v59 = vmul.u32.u64.high %v4501_v1, %v4496_v19, %v11487_v54  ;;  %v11495_v41 = vand.u32 31, %v11388_v33 }
 0x4cf   : > { %v11498_v27 = vand.u32 31, %v11393_v49  ;;  %v6272_v53 = vadd.s32 4294967294, %v3697_v40  ;;  %v11501_v28 = vadd.s32 1, %v11398_v57  ;;  %6947 = vpow2.f32 %v11410_v24 }
 0x4d0   : > { %vm3631_vm5 = vcmp.lt.s32.totalorder %v12740_v35, 0  ;;  %v4492_v56 = vsel %vm4486_vm9, %v4489_v15, %v4491_v42  ;;  %vm4345_vm10 = vcmp.eq.s32.totalorder %v11419_v9, 2  ;;  %v11509_v22 = vmul.f32 %v12831_v34, %v3525_v7 }
 0x4d1   : > { %v3685_v50 = vadd.s32 %v11381_v51, %v11370_v14  ;;  %vm6273_vm11 = vcmp.lt.s32.totalorder %v6272_v53, 0  ;;  %vm4510_vm13 = vc.u32 %v11483_v29, %v11487_v54  ;;  %vm4342_vm8 = vcmp.eq.s32.totalorder %v11419_v9, 0 }
 0x4d2   : > { %v3700_v57 = vsel %vm6273_vm11, 0, %v6272_v53  ;;  %v11518_v24 = vsel %vm3631_vm5, %v3715_v31, %v3691_v60  ;;  %v4511_v58 = vadd.s32 1, %v11488_v59  ;;  %v12472_v48 = vand.u32 2147483647, %v12832_v17 }
 0x4d3   : > { %vm4341_vm14 = vcmp.lt.s32.totalorder %v11419_v9, 2  ;;  %vm11525_vm1 = vcmp.le.f32.partialorder %v3629_v32, 0.7853982  ;;  %v3701_v51 = vsub.s32 32, %v3700_v57  ;;  %v3705_v13 = vsub.s32 4294967266, %v3700_v57 }
 0x4d4   : > { %v4508_v2 = vmul.u32 %v4501_v1, %v4492_v56  ;;  %v3338_v16 = vshrl.u32 %v12628_v39, %v11492_v18  ;;  %vm4339_vm12 = vweird.f32 %v12782_v55  ;;  %v3702_v60 = vshll.u32 %v11453_v10, %v3700_v57 }
 0x4d5   : > { %v4512_v61 = vsel %vm4510_vm13, %v4511_v58, %v11488_v59  ;;  %v3337_v30 = vshll.u32 %v12622_v20, %v11373_v62  ;;  %v3341_v32 = vshrl.u32 %v12629_v36, %v11492_v18  ;;  %v3703_v46 = vshrl.u32 %v3685_v50, %v3701_v51 }
 0x4d6   : > { %v3706_v38 = vadd.s32 127, %v3705_v13  ;;  %v4513_v23 = vadd.s32 %v4512_v61, %v4508_v2  ;;  %v3347_v8 = vshrl.u32 %v12619_v12, %v11492_v18  ;;  %v3327_v44 = vand.u32 8388607, %v12472_v48  ;;  %v12835_v13 = vld [vmem:[#allocation53_spill] sm:$0xff] }
 0x4d7   : > { %v3340_v10 = vshll.u32 %v12628_v39, %v11373_v62  ;;  %v3344_v21 = vshrl.u32 %v12615_v0, %v11492_v18  ;;  %v3346_v43 = vshll.u32 %v12615_v0, %v11373_v62  ;;  %v6944_v45 = vpop.eup %6943  ;;  %v3704_v15 = vor.u32 %v3703_v46, %v3702_v60 }
 0x4d8   : > { %v3707_v11 = vshll.u32 %v3706_v38, 23  ;;  %v4514_v5 = vadd.s32 536870912, %v4513_v23  ;;  %v3339_v26 = vor.u32 %v3338_v16, %v3337_v30  ;;  %v6946_v19 = vpop.eup %6945  ;;  %v4346_v1 = vxor.u32 2147483648, %v6944_v45 }
 0x4d9   : > { %v3343_v4 = vshll.u32 %v12629_v36, %v11373_v62  ;;  %v3348_v31 = vor.u32 %v3347_v8, %v3346_v43  ;;  %v3350_v42 = vshrl.u32 %v12630_v47, %v11492_v18  ;;  %v4343_v25 = vxor.u32 2147483648, %v6946_v19  ;;  %v6948_v59 = vpop.eup %6947 }
 0x4da   : > { %v3708_v40 = vor.u32 4788187, %v3707_v11  ;;  %v4515_v3 = vshrl.u32 %v4514_v5, 30  ;;  %v3342_v7 = vor.u32 %v3341_v32, %v3340_v10  ;;  %v4347_v53 = vsel %vm4345_vm10, %v4346_v1, %v6946_v19 }
 0x4db   : > { %v3711_v56 = vcvt.s32.f32 %v3704_v15  ;;  %v3345_v34 = vor.u32 %v3344_v21, %v3343_v4  ;;  %v3349_v50 = vshll.u32 %v12619_v12, %v11373_v62  ;;  %v4344_v57 = vsel %vm4342_vm8, %v6944_v45, %v4343_v25 }
 0x4dc   : > { %v3709_v58 = vand.u32 2147483647, %v3708_v40  ;;  %v4516_v51 = vshll.u32 %v4515_v3, 30  ;;  %vm3355_vm2 = vcmp.lt.s32.totalorder %v12835_v13, 4  ;;  %vm4361_vm15 = vcmp.gt.s32.totalorder %v11501_v28, 0 }
 0x4dd   : > { %v4348_v2 = vsel %vm4341_vm14, %v4344_v57, %v4347_v53  ;;  %v3718_v16 = vsel %vm11525_vm1, 0, %v11518_v24  ;;  %v3351_v60 = vor.u32 %v3350_v42, %v3349_v50  ;;  %v3361_v62 = vsel %vm3355_vm2, %v3348_v31, 920167782 }
 0x4de   : > { %v4349_v61 = vsel %vm4339_vm12, nan, %v4348_v2  ;;  %v3712_v30 = vmul.f32 %v3711_v56, %v3709_v58  ;;  %v11569_v32 = vsub.s32 %v4513_v23, %v4516_v51  ;;  %v3336_v46 = vshrl.u32 %v12622_v20, %v11492_v18 }
 0x4df   : > { %v4769_v38 = vmul.f32 %v6948_v59, %v4349_v61  ;;  %v3328_v9 = vor.u32 8388608, %v3327_v44  ;;  %vm3352_vm3 = vcmp.lt.s32.totalorder %v12835_v13, 1  ;;  %vm3354_vm4 = vcmp.lt.s32.totalorder %v12835_v13, 3 }
 0x4e0   : > { %v3713_v24 = vxor.u32 2147483648, %v3712_v30  ;;  %v4519_v8 = vsub.s32 0, %v11569_v32  ;;  %v3360_v10 = vsel %vm3352_vm3, %v3339_v26, %v3342_v7  ;;  %v3362_v55 = vsel %vm3354_vm4, %v3345_v34, %v3361_v62 }
 0x4e1   : > { %v6365_v21 = vpack.c.bf16 %v4769_v38, %v11509_v22  ;;  %vm3353_vm6 = vcmp.lt.s32.totalorder %v12835_v13, 2  ;;  %v3364_v23 = vsel %vm3352_vm3, %v3342_v7, %v3345_v34  ;;  %v3365_v18 = vsel %vm3355_vm2, %v3351_v60, 1326507024 }
 0x4e2   : > { %v3714_v44 = vsel %vm3631_vm5, %v3713_v24, %v3712_v30  ;;  %v6303_v43 = vmin.u32 %v4519_v8, %v11569_v32  ;;  %v3356_v45 = vsel %vm3352_vm3, %v3336_v46, %v3339_v26  ;;  %v3357_v15 = vsel %vm3355_vm2, %v3345_v34, 2102212464  ;;  %v12836_v34 = vld [vmem:[#allocation110_spill] sm:$0xff] }
 0x4e3   : > { %6366 = vmatprep.subr.bf16.mxu0 %v6365_v21  ;;  %v3717_v22 = vsel %vm11525_vm1, %v12740_v35, %v3714_v44  ;;  %v3363_v11 = vsel %vm3353_vm6, %v3360_v10, %v3362_v55  ;;  %v3366_v5 = vsel %vm3354_vm4, %v3348_v31, %v3365_v18  ;;  %v3368_v19 = vshll.u32 %v3328_v9, 8 }
 0x4e4   : > { %6949 = vcosq.f32 %v3717_v22  ;;  %v4521_v1 = vclz %v6303_v43  ;;  %v4539_v4 = vsub.s32 4, %v4515_v3  ;;  %v3367_v26 = vsel %vm3353_vm6, %v3364_v23, %v3366_v5 }
 0x4e5   : > { %6951 = vsinq.f32 %v3717_v22  ;;  %v3358_v42 = vsel %vm3354_vm4, %v3342_v7, %v3357_v15  ;;  %v11598_v25 = vmul.u32.u64.low %v3368_v19, %v3367_v26  ;;  %v11599_v14 = vmul.u32.u64.high %v3368_v19, %v3367_v26, %v11598_v25 }
 0x4e6   : > { %v11602_v40 = vshrl.u32 %v11393_v49, 5  ;;  %v6304_v59 = vadd.s32 4294967294, %v4521_v1  ;;  %v11604_v53 = vmul.u32.u64.low %v3368_v19, %v3363_v11  ;;  %v11605_v31 = vmul.u32.u64.high %v3368_v19, %v3363_v11, %v11604_v53 }
 0x4e7   : > { %v11609_v56 = vsub.s32 32, %v11498_v27  ;;  %v11612_v50 = vmul.f32 1.442695, %v12836_v34  ;;  %v11614_v57 = vand.u32 3, %v3718_v16  ;;  %vm4455_vm7 = vcmp.lt.s32.totalorder %v12795_v52, 0  ;;  %v12839_v16 = vld [vmem:[#allocation98_spill] sm:$0xff] }
 0x4e8   : > { %v11620_v49 = vsel %vm4361_vm15, %v11501_v28, 0  ;;  %vm6305_vm9 = vcmp.lt.s32.totalorder %v6304_v59, 0  ;;  %v4540_v7 = vsel %vm4455_vm7, %v4539_v4, %v4515_v3  ;;  %v3359_v58 = vsel %vm3353_vm6, %v3356_v45, %v3358_v42 }
 0x4e9   : > { %vm11628_vm5 = vcmp.le.f32.partialorder %v4453_v6, 0.7853982  ;;  %v4524_v2 = vsel %vm6305_vm9, 0, %v6304_v59  ;;  %vm3377_vm10 = vc.u32 %v11599_v14, %v11604_v53  ;;  %v12471_v28 = vand.u32 2147483647, %v12839_v16 }
 0x4ea   : > { %v4509_v60 = vadd.s32 %v11487_v54, %v11483_v29  ;;  %v4525_v62 = vsub.s32 32, %v4524_v2  ;;  %v4529_v3 = vsub.s32 4294967266, %v4524_v2  ;;  %v3378_v13 = vadd.s32 1, %v11605_v31 }
 0x4eb   : > { %vm3727_vm11 = vcmp.eq.s32.totalorder %v11614_v57, 2  ;;  %v4542_v6 = vsel %vm11628_vm5, 0, %v4540_v7  ;;  %v3375_v61 = vmul.u32 %v3368_v19, %v3359_v58  ;;  %v4162_v30 = vshrl.u32 %v12628_v39, %v11609_v56 }
 0x4ec   : > { %vm3724_vm13 = vcmp.eq.s32.totalorder %v11614_v57, 0  ;;  %v4526_v46 = vshll.u32 %v11569_v32, %v4524_v2  ;;  %v4527_v38 = vshrl.u32 %v4509_v60, %v4525_v62  ;;  %v4530_v9 = vadd.s32 127, %v4529_v3 }
 0x4ed   : > { %v3379_v29 = vsel %vm3377_vm10, %v3378_v13, %v11605_v31  ;;  %v4151_v24 = vand.u32 8388607, %v12471_v28  ;;  %v4161_v8 = vshll.u32 %v12622_v20, %v11498_v27  ;;  %v4171_v10 = vshrl.u32 %v12619_v12, %v11609_v56 }
 0x4ee   : > { %v3380_v54 = vadd.s32 %v3379_v29, %v3375_v61  ;;  %v6950_v55 = vpop.eup %6949  ;;  %v4528_v21 = vor.u32 %v4527_v38, %v4526_v46  ;;  %v4531_v23 = vshll.u32 %v4530_v9, 23  ;;  %v4165_v32 = vshrl.u32 %v12629_v36, %v11609_v56 }
 0x4ef   : > { %v4168_v18 = vshrl.u32 %v12615_v0, %v11609_v56  ;;  %v6952_v44 = vpop.eup %6951  ;;  %vm3723_vm8 = vcmp.lt.s32.totalorder %v11614_v57, 2  ;;  %v4164_v45 = vshll.u32 %v12628_v39, %v11498_v27  ;;  %v4170_v15 = vshll.u32 %v12615_v0, %v11498_v27 }
 0x4f0   : > { %v3381_v43 = vadd.s32 536870912, %v3380_v54  ;;  %v4174_v22 = vshrl.u32 %v12630_v47, %v11609_v56  ;;  %v3728_v11 = vxor.u32 2147483648, %v6950_v55  ;;  %v4532_v5 = vor.u32 4788187, %v4531_v23  ;;  %v11700_v23 = vpop.f32.mrb[48].mxu1 }
 0x4f1   : > { %v4163_v19 = vor.u32 %v4162_v30, %v4161_v8  ;;  %v4167_v1 = vshll.u32 %v12629_v36, %v11498_v27  ;;  %v3725_v4 = vxor.u32 2147483648, %v6952_v44  ;;  %v4172_v42 = vor.u32 %v4171_v10, %v4170_v15 }
 0x4f2   : > { %v11665_v26 = vshrl.u32 %v3381_v43, 30  ;;  %v4173_v25 = vshll.u32 %v12619_v12, %v11498_v27  ;;  %v4533_v59 = vand.u32 2147483647, %v4532_v5  ;;  %v4535_v31 = vcvt.s32.f32 %v4528_v21  ;;  %v11698_v21 = vpop.f32.mrb[48].mxu0 }
 0x4f3   : > { %v4166_v34 = vor.u32 %v4165_v32, %v4164_v45  ;;  %v4169_v7 = vor.u32 %v4168_v18, %v4167_v1  ;;  %vm3721_vm14 = vweird.f32 %v12740_v35  ;;  %v11670_v58 = vand.u32 3, %v4542_v6  ;;  %v11708_v43 = vpop.f32.mrb[49].mxu0  ;;  %v11710_v45 = vpop.f32.mrb[49].mxu1 }
 0x4f4   : > { %v3383_v2 = vshll.u32 %v11665_v26, 30  ;;  %v4152_v60 = vor.u32 8388608, %v4151_v24  ;;  %v4175_v62 = vor.u32 %v4174_v22, %v4173_v25  ;;  %v3729_v3 = vsel %vm3727_vm11, %v3728_v11, %v6952_v44  ;;  %v11718_v11 = vpop.f32.mrb[50].mxu0  ;;  %v11720_v5 = vpop.f32.mrb[50].mxu1 }
 0x4f5   : > { %v4536_v13 = vmul.f32 %v4535_v31, %v4533_v59  ;;  %vm4176_vm1 = vcmp.lt.s32.totalorder %v11602_v40, 1  ;;  %vm4179_vm12 = vcmp.lt.s32.totalorder %v11602_v40, 4  ;;  %v3726_v27 = vsel %vm3724_vm13, %v6950_v55, %v3725_v4  ;;  %v11725_v25 = vpop.f32.mrb[51].mxu0  ;;  %v11727_v59 = vpop.f32.mrb[51].mxu1 }
 0x4f6   : > { %v11679_v61 = vsub.s32 %v3380_v54, %v3383_v2  ;;  %vm4178_vm2 = vcmp.lt.s32.totalorder %v11602_v40, 3  ;;  %v4185_v6 = vsel %vm4179_vm12, %v4172_v42, 920167782  ;;  %v4160_v46 = vshrl.u32 %v12622_v20, %v11609_v56  ;;  %v11738_v2 = vpop.f32.mrb[52].mxu0 }
 0x4f7   : > { %v4537_v30 = vxor.u32 2147483648, %v4536_v13  ;;  %v4184_v38 = vsel %vm4176_vm1, %v4163_v19, %v4166_v34  ;;  %v4186_v9 = vsel %vm4178_vm2, %v4169_v7, %v4185_v6  ;;  %v4181_v24 = vsel %vm4179_vm12, %v4169_v7, 2102212464  ;;  %v11745_v6 = vpop.f32.mrb[53].mxu0 }
 0x4f8   : > { %v3386_v29 = vsub.s32 0, %v11679_v61  ;;  %v4188_v54 = vsel %vm4176_vm1, %v4166_v34, %v4169_v7  ;;  %v4189_v8 = vsel %vm4179_vm12, %v4175_v62, 1326507024  ;;  %v3730_v10 = vsel %vm3723_vm8, %v3726_v27, %v3729_v3 }
 0x4f9   : > { %v4538_v55 = vsel %vm4455_vm7, %v4537_v30, %v4536_v13  ;;  %vm4177_vm15 = vcmp.lt.s32.totalorder %v11602_v40, 2  ;;  %v4190_v56 = vsel %vm4178_vm2, %v4172_v42, %v4189_v8  ;;  %v4192_v44 = vshll.u32 %v4152_v60, 8  ;;  %v11740_v60 = vpop.f32.mrb[52].mxu1  ;;  %v12840_v13 = vld [vmem:[#allocation52_spill] sm:$0xff] }
 0x4fa   : > { %v4541_v32 = vsel %vm11628_vm5, %v12795_v52, %v4538_v55  ;;  %v6259_v18 = vmin.u32 %v3386_v29, %v11679_v61  ;;  %v4187_v57 = vsel %vm4177_vm15, %v4184_v38, %v4186_v9  ;;  %v4180_v15 = vsel %vm4176_vm1, %v4160_v46, %v4163_v19  ;;  %v11747_v30 = vpop.f32.mrb[53].mxu1  ;;  %v11757_v38 = vpop.f32.mrb[54].mxu0  ;;  %v12841_v9 = vld [vmem:[#allocation64_spill] sm:$0xff] }
 0x4fb   : > { %6953 = vcosq.f32 %v4541_v32  ;;  %v4182_v22 = vsel %vm4178_vm2, %v4166_v34, %v4181_v24  ;;  %v4191_v51 = vsel %vm4177_vm15, %v4188_v54, %v4190_v56  ;;  %v11730_v19 = vsub.s32 32, %v11495_v41  ;;  %v11759_v40 = vpop.f32.mrb[54].mxu1  ;;  %v11769_v24 = vpop.f32.mrb[55].mxu0 }
 0x4fc   : > { %6955 = vsinq.f32 %v4541_v32  ;;  %v3388_v1 = vclz %v6259_v18  ;;  %v11722_v4 = vmul.u32.u64.low %v4192_v44, %v4191_v51  ;;  %v11723_v42 = vmul.u32.u64.high %v4192_v44, %v4191_v51, %v11722_v4 }
 0x4fd   : > { %v3731_v31 = vsel %vm3721_vm14, nan, %v3730_v10  ;;  %v11734_v34 = vmul.u32.u64.low %v4192_v44, %v4187_v57  ;;  %v11735_v7 = vmul.u32.u64.high %v4192_v44, %v4187_v57, %v11734_v34  ;;  %v4183_v3 = vsel %vm4177_vm15, %v4180_v15, %v4182_v22 }
 0x4fe   : > { %v6260_v62 = vadd.s32 4294967294, %v3388_v1  ;;  %v12470_v27 = vand.u32 2147483647, %v12840_v13  ;;  %v11750_v35 = vshrl.u32 %v11388_v33, 5  ;;  %v11753_v46 = vand.u32 31, %v11620_v49 }
 0x4ff   : > { %6957 = vpow2.f32 %v11612_v50  ;;  %vm4551_vm3 = vcmp.eq.s32.totalorder %v11670_v58, 2  ;;  %vm4548_vm4 = vcmp.eq.s32.totalorder %v11670_v58, 0  ;;  %v11763_v29 = vmul.f32 %v12841_v9, %v3731_v31  ;;  %v11771_v50 = vpop.f32.mrb[55].mxu1 }
 0x500   : > { %v3376_v33 = vadd.s32 %v11604_v53, %v11599_v14  ;;  %vm6261_vm6 = vcmp.lt.s32.totalorder %v6260_v62, 0  ;;  %vm4201_vm7 = vc.u32 %v11723_v42, %v11734_v34  ;;  %vm4547_vm9 = vcmp.lt.s32.totalorder %v11670_v58, 2 }
 0x501   : > { %v3391_v54 = vsel %vm6261_vm6, 0, %v6260_v62  ;;  %v4199_v8 = vmul.u32 %v4192_v44, %v4183_v3  ;;  %v4202_v10 = vadd.s32 1, %v11735_v7  ;;  %v3544_v55 = vshrl.u32 %v12628_v39, %v11730_v19 }
 0x502   : > { %vm4545_vm5 = vweird.f32 %v12795_v52  ;;  %v3392_v14 = vsub.s32 32, %v3391_v54  ;;  %v3396_v53 = vsub.s32 4294967266, %v3391_v54  ;;  %v11780_v56 = vand.u32 8388607, %v12470_v27 }
 0x503   : > { %v3543_v32 = vshll.u32 %v12622_v20, %v11495_v41  ;;  %v4203_v18 = vsel %vm4201_vm7, %v4202_v10, %v11735_v7  ;;  %v3546_v57 = vshll.u32 %v12628_v39, %v11495_v41  ;;  %v3547_v44 = vshrl.u32 %v12629_v36, %v11730_v19 }
 0x504   : > { %v3553_v15 = vshrl.u32 %v12619_v12, %v11730_v19  ;;  %v3393_v22 = vshll.u32 %v11679_v61, %v3391_v54  ;;  %v3394_v51 = vshrl.u32 %v3376_v33, %v3392_v14  ;;  %v3397_v1 = vadd.s32 127, %v3396_v53 }
 0x505   : > { %v4204_v4 = vadd.s32 %v4203_v18, %v4199_v8  ;;  %v6954_v31 = vpop.eup %6953  ;;  %v3545_v62 = vor.u32 %v3544_v55, %v3543_v32  ;;  %v3550_v3 = vshrl.u32 %v12615_v0, %v11730_v19  ;;  %v3552_v7 = vshll.u32 %v12615_v0, %v11495_v41 }
 0x506   : > { %v3556_v9 = vshrl.u32 %v12630_v47, %v11730_v19  ;;  %v6956_v10 = vpop.eup %6955  ;;  %v4552_v27 = vxor.u32 2147483648, %v6954_v31  ;;  %v3395_v28 = vor.u32 %v3394_v51, %v3393_v22  ;;  %v3398_v48 = vshll.u32 %v3397_v1, 23 }
 0x507   : > { %v4205_v13 = vadd.s32 536870912, %v4204_v4  ;;  %v4549_v61 = vxor.u32 2147483648, %v6956_v10  ;;  %vm3322_vm10 = vcmp.lt.s32.totalorder %v12832_v17, 0  ;;  %v3549_v33 = vshll.u32 %v12629_v36, %v11495_v41 }
 0x508   : > { %v3554_v54 = vor.u32 %v3553_v15, %v3552_v7  ;;  %v3555_v8 = vshll.u32 %v12619_v12, %v11495_v41  ;;  %v4553_v55 = vsel %vm4551_vm3, %v4552_v27, %v6956_v10  ;;  %v3399_v14 = vor.u32 4788187, %v3398_v48 }
 0x509   : > { %v11805_v53 = vshrl.u32 %v4205_v13, 30  ;;  %v3548_v32 = vor.u32 %v3547_v44, %v3546_v57  ;;  %v6958_v18 = vpop.eup %6957  ;;  %v4550_v22 = vsel %vm4548_vm4, %v6954_v31, %v4549_v61  ;;  %v3402_v51 = vcvt.s32.f32 %v3395_v28 }
 0x50a   : > { %v3551_v1 = vor.u32 %v3550_v3, %v3549_v33  ;;  %v3557_v63 = vor.u32 %v3556_v9, %v3555_v8  ;;  %v4554_v15 = vsel %vm4547_vm9, %v4550_v22, %v4553_v55  ;;  %v3400_v7 = vand.u32 2147483647, %v3399_v14 }
 0x50b   : > { %v4207_v41 = vshll.u32 %v11805_v53, 30  ;;  %vm3561_vm11 = vcmp.lt.s32.totalorder %v11750_v35, 4  ;;  %v4555_v48 = vsel %vm4545_vm5, nan, %v4554_v15  ;;  %v3534_v13 = vor.u32 8388608, %v11780_v56 }
 0x50c   : > { %vm3558_vm13 = vcmp.lt.s32.totalorder %v11750_v35, 1  ;;  %v3567_v28 = vsel %vm3561_vm11, %v3554_v54, 920167782  ;;  %v4771_v27 = vmul.f32 %v6958_v18, %v4555_v48  ;;  %v3403_v57 = vmul.f32 %v3402_v51, %v3400_v7  ;;  %v12845_v48 = vld [vmem:[#allocation47_spill] sm:$0xff] }
 0x50d   : > { %v11819_v44 = vsub.s32 %v4204_v4, %v4207_v41  ;;  %vm3560_vm8 = vcmp.lt.s32.totalorder %v11750_v35, 3  ;;  %v3406_v58 = vsub.s32 4, %v11665_v26  ;;  %v3566_v31 = vsel %vm3558_vm13, %v3545_v62, %v3548_v32 }
 0x50e   : > { %v3568_v52 = vsel %vm3560_vm8, %v3551_v1, %v3567_v28  ;;  %v3571_v56 = vsel %vm3561_vm11, %v3557_v63, 1326507024  ;;  %v6373_v3 = vpack.c.bf16 %v4771_v27, %v11763_v29  ;;  %v3404_v9 = vxor.u32 2147483648, %v3403_v57 }
 0x50f   : > { %v4210_v10 = vsub.s32 0, %v11819_v44  ;;  %v3570_v4 = vsel %vm3558_vm13, %v3548_v32, %v3551_v1  ;;  %v3542_v61 = vshrl.u32 %v12622_v20, %v11730_v19  ;;  %vm3559_vm14 = vcmp.lt.s32.totalorder %v11750_v35, 2 }
 0x510   : > { %v3563_v33 = vsel %vm3561_vm11, %v3551_v1, 2102212464  ;;  %v3572_v8 = vsel %vm3560_vm8, %v3554_v54, %v3571_v56  ;;  %6374 = vmatprep.subr.bf16.mxu1 %v6373_v3  ;;  %v3405_v63 = vsel %vm3322_vm10, %v3404_v9, %v3403_v57  ;;  %v3569_v55 = vsel %vm3559_vm14, %v3566_v31, %v3568_v52  ;;  %v11969_v3 = vpop.permute.xlu1 %4787 }
 0x511   : > { %v6291_v29 = vmin.u32 %v4210_v10, %v11819_v44  ;;  %v3574_v14 = vshll.u32 %v3534_v13, 8  ;;  %v12842_v19 = vand.u32 2147483647, %v12832_v17  ;;  %v3407_v54 = vsel %vm3322_vm10, %v3406_v58, %v11665_v26 }
 0x512   : > { %v3562_v22 = vsel %vm3558_vm13, %v3542_v61, %v3545_v62  ;;  %v3573_v51 = vsel %vm3559_vm14, %v3570_v4, %v3572_v8  ;;  %v3564_v15 = vsel %vm3560_vm8, %v3548_v32, %v3563_v33  ;;  %6959 = vpow2.f32 %v12845_v48  ;;  %v12846_v62 = vld [vmem:[#allocation56_spill] sm:$0xff] }
 0x513   : > { %vm11847_vm1 = vcmp.le.f32.partialorder %v12842_v19, 0.7853982  ;;  %v4212_v1 = vclz %v6291_v29  ;;  %v11860_v7 = vmul.u32.u64.low %v3574_v14, %v3573_v51  ;;  %v11861_v41 = vmul.u32.u64.high %v3574_v14, %v3573_v51, %v11860_v7 }
 0x514   : > { %v3408_v13 = vsel %vm11847_vm1, %v12832_v17, %v3405_v63  ;;  %v11867_v26 = vmul.u32.u64.low %v3574_v14, %v3569_v55  ;;  %v11868_v28 = vmul.u32.u64.high %v3574_v14, %v3569_v55, %v11867_v26  ;;  %6961 = vpow2.f32 %v12846_v62 }
 0x515   : > { %v3409_v27 = vsel %vm11847_vm1, 0, %v3407_v54  ;;  %v6292_v57 = vadd.s32 4294967294, %v4212_v1  ;;  %v4230_v32 = vsub.s32 4, %v11805_v53  ;;  %v11876_v58 = vshrl.u32 %v11620_v49, 5 }
 0x516   : > { %v4365_v31 = vsub.s32 32, %v11753_v46  ;;  %vm4146_vm12 = vcmp.lt.s32.totalorder %v12839_v16, 0  ;;  %v3565_v52 = vsel %vm3559_vm14, %v3562_v22, %v3564_v15  ;;  %6963 = vcosq.f32 %v3408_v13 }
 0x517   : > { %v12847_v56 = vand.u32 2147483647, %v12839_v16  ;;  %vm6293_vm15 = vcmp.lt.s32.totalorder %v6292_v57, 0  ;;  %vm3583_vm3 = vc.u32 %v11861_v41, %v11867_v26  ;;  %v11890_v49 = vand.u32 3, %v3409_v27 }
 0x518   : > { %v4200_v9 = vadd.s32 %v11734_v34, %v11723_v42  ;;  %v4215_v10 = vsel %vm6293_vm15, 0, %v6292_v57  ;;  %v3584_v35 = vadd.s32 1, %v11868_v28  ;;  %v4231_v33 = vsel %vm4146_vm12, %v4230_v32, %v11805_v53 }
 0x519   : > { %vm11884_vm2 = vcmp.le.f32.partialorder %v12847_v56, 0.7853982  ;;  %v4216_v4 = vsub.s32 32, %v4215_v10  ;;  %v4220_v61 = vsub.s32 4294967266, %v4215_v10  ;;  %v3581_v8 = vmul.u32 %v3574_v14, %v3565_v52 }
 0x51a   : > { %6965 = vsinq.f32 %v3408_v13  ;;  %v4217_v63 = vshll.u32 %v11819_v44, %v4215_v10  ;;  %v3585_v29 = vsel %vm3583_vm3, %v3584_v35, %v11868_v28  ;;  %v4350_v55 = vand.u32 2147483647, %v12808_v37 }
 0x51b   : > { %v4218_v19 = vshrl.u32 %v4200_v9, %v4216_v4  ;;  %v4221_v18 = vadd.s32 127, %v4220_v61  ;;  %v3586_v42 = vadd.s32 %v3585_v29, %v3581_v8  ;;  %v4374_v34 = vshrl.u32 %v12615_v0, %v4365_v31 }
 0x51c   : > { %v4368_v54 = vshrl.u32 %v12628_v39, %v4365_v31  ;;  %v4371_v22 = vshrl.u32 %v12629_v36, %v4365_v31  ;;  %v4376_v53 = vshll.u32 %v12615_v0, %v11753_v46  ;;  %v4377_v14 = vshrl.u32 %v12619_v12, %v4365_v31  ;;  %v11909_v7 = vpop.eup %6959 }
 0x51d   : > { %v4219_v51 = vor.u32 %v4218_v19, %v4217_v63  ;;  %v4222_v44 = vshll.u32 %v4221_v18, 23  ;;  %v3587_v1 = vadd.s32 536870912, %v3586_v42  ;;  %v4373_v15 = vshll.u32 %v12629_v36, %v11753_v46 }
 0x51e   : > { %v4367_v48 = vshll.u32 %v12622_v20, %v11753_v46  ;;  %v4370_v13 = vshll.u32 %v12628_v39, %v11753_v46  ;;  %v4378_v28 = vor.u32 %v4377_v14, %v4376_v53  ;;  %v4380_v62 = vshrl.u32 %v12630_v47, %v4365_v31  ;;  %v11916_v0 = vpop.eup %6961 }
 0x51f   : > { %v4223_v27 = vor.u32 4788187, %v4222_v44  ;;  %v4233_v57 = vsel %vm11884_vm2, 0, %v4231_v33  ;;  %v11920_v32 = vshrl.u32 %v3587_v1, 30  ;;  %v4375_v36 = vor.u32 %v4374_v34, %v4373_v15 }
 0x520   : > { %v4357_v52 = vand.u32 8388607, %v4350_v55  ;;  %v4369_v56 = vor.u32 %v4368_v54, %v4367_v48  ;;  %v4372_v9 = vor.u32 %v4371_v22, %v4370_v13  ;;  %v4379_v39 = vshll.u32 %v12619_v12, %v11753_v46  ;;  %v6964_v10 = vpop.eup %6963 }
 0x521   : > { %v4224_v35 = vand.u32 2147483647, %v4223_v27  ;;  %v4226_v47 = vcvt.s32.f32 %v4219_v51  ;;  %v3589_v4 = vshll.u32 %v11920_v32, 30  ;;  %vm4385_vm4 = vcmp.lt.s32.totalorder %v11876_v58, 4  ;;  %v11962_v27 = vpop.permute.xlu0 %4782 }
 0x522   : > { %v11928_v61 = vand.u32 3, %v4233_v57  ;;  %v4366_v33 = vshrl.u32 %v12622_v20, %v4365_v31  ;;  %v4381_v8 = vor.u32 %v4380_v62, %v4379_v39  ;;  %v4391_v63 = vsel %vm4385_vm4, %v4378_v28, 920167782 }
 0x523   : > { %vm3415_vm6 = vcmp.eq.s32.totalorder %v11890_v49, 0  ;;  %vm3418_vm7 = vcmp.eq.s32.totalorder %v11890_v49, 2  ;;  %v4227_v12 = vmul.f32 %v4226_v47, %v4224_v35  ;;  %v11937_v46 = vadd.s32 %v11867_v26, %v11861_v41 }
 0x524   : > { %v11939_v29 = vsub.s32 %v3586_v42, %v3589_v4  ;;  %v4387_v19 = vsel %vm4385_vm4, %v4375_v36, 2102212464  ;;  %v6966_v18 = vpop.eup %6965  ;;  %v3419_v20 = vxor.u32 2147483648, %v6964_v10  ;;  %v4358_v31 = vor.u32 8388608, %v4357_v52 }
 0x525   : > { %vm4382_vm9 = vcmp.lt.s32.totalorder %v11876_v58, 1  ;;  %vm4384_vm5 = vcmp.lt.s32.totalorder %v11876_v58, 3  ;;  %v4228_v34 = vxor.u32 2147483648, %v4227_v12  ;;  %v4395_v14 = vsel %vm4385_vm4, %v4381_v8, 1326507024 }
 0x526   : > { %v3592_v54 = vsub.s32 0, %v11939_v29  ;;  %v4390_v22 = vsel %vm4382_vm9, %v4369_v56, %v4372_v9  ;;  %v4392_v41 = vsel %vm4384_vm5, %v4375_v36, %v4391_v63  ;;  %v4386_v26 = vsel %vm4382_vm9, %v4366_v33, %v4369_v56 }
 0x527   : > { %v4388_v42 = vsel %vm4384_vm5, %v4372_v9, %v4387_v19  ;;  %v4394_v53 = vsel %vm4382_vm9, %v4372_v9, %v4375_v36  ;;  %v3416_v51 = vxor.u32 2147483648, %v6966_v18  ;;  %v4229_v44 = vsel %vm4146_vm12, %v4228_v34, %v4227_v12 }
 0x528   : > { %v6267_v1 = vmin.u32 %v3592_v54, %v11939_v29  ;;  %vm4383_vm10 = vcmp.lt.s32.totalorder %v11876_v58, 2  ;;  %vm3414_vm11 = vcmp.lt.s32.totalorder %v11890_v49, 2  ;;  %v4232_v15 = vsel %vm11884_vm2, %v12839_v16, %v4229_v44 }
 0x529   : > { %v4393_v48 = vsel %vm4383_vm10, %v4390_v22, %v4392_v41  ;;  %v4396_v13 = vsel %vm4384_vm5, %v4378_v28, %v4395_v14  ;;  %v4398_v62 = vshll.u32 %v4358_v31, 8  ;;  %6967 = vcosq.f32 %v4232_v15 }
 0x52a   : > { %v3594_v57 = vclz %v6267_v1  ;;  %v4389_v36 = vsel %vm4383_vm10, %v4386_v26, %v4388_v42  ;;  %v4397_v52 = vsel %vm4383_vm10, %v4394_v53, %v4396_v13  ;;  %6969 = vsinq.f32 %v4232_v15  ;;  %v12006_v13 = vpop.permute.xlu0 %4792 }
 0x52b   : > { %v11964_v56 = vmul.u32.u64.low %v4398_v62, %v4397_v52  ;;  %v11965_v9 = vmul.u32.u64.high %v4398_v62, %v4397_v52, %v11964_v56  ;;  %v4880_v39 = vadd.f32 %v11698_v21, %v11962_v27  ;;  %vm3412_vm13 = vweird.f32 %v12832_v17  ;;  %v12019_v17 = vpop.permute.xlu1 %4797 }
 0x52c   : > { %v6268_v58 = vadd.s32 4294967294, %v3594_v57  ;;  %v11972_v28 = vmul.u32.u64.low %v4398_v62, %v4393_v48  ;;  %v11973_v35 = vmul.u32.u64.high %v4398_v62, %v4393_v48, %v11972_v28  ;;  %v4969_v47 = vadd.f32 %v11700_v23, %v11962_v27 }
 0x52d   : > { %v3417_v4 = vsel %vm3415_vm6, %v6964_v10, %v3416_v51  ;;  %v3420_v33 = vsel %vm3418_vm7, %v3419_v20, %v6966_v18  ;;  %v4882_v21 = vadd.f32 %v11708_v43, %v11962_v27  ;;  %v4886_v8 = vadd.f32 %v11718_v11, %v11969_v3 }
 0x52e   : > { %vm6269_vm8 = vcmp.lt.s32.totalorder %v6268_v58, 0  ;;  %v4405_v63 = vmul.u32 %v4398_v62, %v4389_v36  ;;  %v4975_v12 = vadd.f32 %v11720_v5, %v11969_v3  ;;  %v4888_v23 = vadd.f32 %v11725_v25, %v11969_v3 }
 0x52f   : > { %v3597_v19 = vsel %vm6269_vm8, 0, %v6268_v58  ;;  %vm4407_vm14 = vc.u32 %v11965_v9, %v11972_v28  ;;  %v5169_v10 = vmax.f32 %v4880_v39, 0.0  ;;  %v4971_v18 = vadd.f32 %v11710_v45, %v11962_v27 }
 0x530   : > { %v3602_v43 = vsub.s32 4294967266, %v3597_v19  ;;  %v4408_v20 = vadd.s32 1, %v11973_v35  ;;  %v5171_v11 = vmax.f32 %v4969_v47, 0.0  ;;  %v5170_v31 = vmax.f32 %v4882_v21, 0.0 }
 0x531   : > { %vm4236_vm1 = vweird.f32 %v12839_v16  ;;  %v3598_v34 = vsub.s32 32, %v3597_v19  ;;  %v5177_v5 = vmax.f32 %v4886_v8, 0.0  ;;  %v5179_v54 = vmax.f32 %v4975_v12, 0.0 }
 0x532   : > { %v5178_v22 = vmax.f32 %v4888_v23, 0.0  ;;  %v3421_v25 = vsel %vm3414_vm11, %v3417_v4, %v3420_v33  ;;  %v3603_v41 = vadd.s32 127, %v3602_v43  ;;  %v4409_v26 = vsel %vm4407_vm14, %v4408_v20, %v11973_v35 }
 0x533   : > { %v4977_v45 = vadd.f32 %v11727_v59, %v11969_v3  ;;  %v4410_v42 = vadd.s32 %v4409_v26, %v4405_v63  ;;  %v12001_v53 = vpack.c.bf16 %v5177_v5, %v5169_v10  ;;  %v12003_v14 = vpack.c.bf16 %v5179_v54, %v5171_v11  ;;  %v6968_v44 = vpop.eup %6967 }
 0x534   : > { %v6377_v51 = vpack.c.bf16 %v5178_v22, %v5170_v31  ;;  %vm4239_vm12 = vcmp.eq.s32.totalorder %v11928_v61, 0  ;;  %v3604_v1 = vshll.u32 %v3603_v41, 23  ;;  %v5172_v15 = vmax.f32 %v4971_v18, 0.0  ;;  %v6970_v49 = vpop.eup %6969 }
 0x535   : > { %v5180_v48 = vmax.f32 %v4977_v45, 0.0  ;;  %v3422_v62 = vsel %vm3412_vm13, nan, %v3421_v25  ;;  %v4243_v57 = vxor.u32 2147483648, %v6968_v44  ;;  %v3600_v59 = vshrl.u32 %v11937_v46, %v3598_v34 }
 0x536   : > { %v4411_v36 = vadd.s32 536870912, %v4410_v42  ;;  %v4240_v52 = vxor.u32 2147483648, %v6970_v49  ;;  %vm4242_vm2 = vcmp.eq.s32.totalorder %v11928_v61, 2  ;;  %v4892_v39 = vadd.f32 %v11738_v2, %v12006_v13 }
 0x537   : > { %v12012_v56 = vpack.c.bf16 %v5180_v48, %v5172_v15  ;;  %v4244_v58 = vsel %vm4242_vm2, %v4243_v57, %v6970_v49  ;;  %v3599_v35 = vshll.u32 %v11939_v29, %v3597_v19  ;;  %v3605_v47 = vor.u32 4788187, %v3604_v1  ;;  %v12054_v48 = vld [vmem:[#allocation9 + $0x8] sm:$0xff] }
 0x538   : > { %v12017_v4 = vshrl.u32 %v4411_v36, 30  ;;  %vm4238_vm15 = vcmp.lt.s32.totalorder %v11928_v61, 2  ;;  %v4241_v46 = vsel %vm4239_vm12, %v6968_v44, %v4240_v52  ;;  %v4760_v33 = vmul.f32 %v11909_v7, %v3422_v62 }
 0x539   : > { %v4981_v21 = vadd.f32 %v11740_v60, %v12006_v13  ;;  %v4245_v8 = vsel %vm4238_vm15, %v4241_v46, %v4244_v58  ;;  %v3601_v2 = vor.u32 %v3600_v59, %v3599_v35  ;;  %v4898_v29 = vadd.f32 %v11757_v38, %v12019_v17 }
 0x53a   : > { %v4413_v63 = vshll.u32 %v12017_v4, 30  ;;  %v4246_v12 = vsel %vm4236_vm1, nan, %v4245_v8  ;;  %v5185_v23 = vmax.f32 %v4892_v39, 0.0  ;;  %v4894_v61 = vadd.f32 %v11745_v6, %v12006_v13 }
 0x53b   : > { %v4987_v7 = vadd.f32 %v11759_v40, %v12019_v17  ;;  %v4768_v19 = vmul.f32 %v11916_v0, %v4246_v12  ;;  %v3606_v60 = vand.u32 2147483647, %v3605_v47  ;;  %v5193_v18 = vmax.f32 %v4898_v29, 0.0  ;;  %v12072_v47 = vld [vmem:[#allocation9 + $0x10] sm:$0xff] }
 0x53c   : > { %v4414_v10 = vsub.s32 %v4410_v42, %v4413_v63  ;;  %v5187_v43 = vmax.f32 %v4981_v21, 0.0  ;;  %v4983_v20 = vadd.f32 %v11747_v30, %v12006_v13  ;;  %v4900_v16 = vadd.f32 %v11769_v24, %v12019_v17  ;;  %v12045_v24 = vld [vmem:[#allocation9] sm:$0xff] }
 0x53d   : > { %v5195_v38 = vmax.f32 %v4987_v7, 0.0  ;;  %v6367_v11 = vpack.c.bf16 %v4768_v19, %v4760_v33  ;;  %v3608_v31 = vcvt.s32.f32 %v3601_v2  ;;  %v6383_v6 = vpack.c.bf16 %v5193_v18, %v5185_v23  ;;  %v12077_v33 = vld [vmem:[#allocation9 + $0x18] sm:$0xff]  ;;  %v12082_v2 = vld [vmem:[#allocation12] sm:$0xff]  ;;  %v12088_v23 = vld [vmem:[#allocation12 + $0x8] sm:$0xff] }
 0x53e   : > { %v4416_v34 = vsub.s32 0, %v4414_v10  ;;  %v5186_v5 = vmax.f32 %v4894_v61, 0.0  ;;  %v5194_v40 = vmax.f32 %v4900_v16, 0.0  ;;  %v4989_v0 = vadd.f32 %v11771_v50, %v12019_v17  ;;  %v12851_v50 = vld [vmem:[#allocation52_spill] sm:$0xff] }
 0x53f   : > { %v12041_v54 = vpack.c.bf16 %v5195_v38, %v5187_v43  ;;  %6368 = vmatpush1.bf16.msra.mxu0 %v6367_v11  ;;  %v3609_v22 = vmul.f32 %v3608_v31, %v3606_v60  ;;  %v5188_v41 = vmax.f32 %v4983_v20, 0.0  ;;  %v12850_v15 = vmov 0.0   ;;  %v12857_v20 = vld [vmem:[#allocation30_spill] sm:$0xff]  ;;  %v12858_v16 = vld [vmem:[#allocation104_spill] sm:$0xff] }
 0x540   : > { %v6299_v25 = vmin.u32 %v4416_v34, %v4414_v10  ;;  %6378 = vmatprep.subr.bf16.mxu0 %v6377_v51  ;;  %v6381_v30 = vpack.c.bf16 %v5194_v40, %v5186_v5  ;;  %v5196_v26 = vmax.f32 %v4989_v0, 0.0  ;;  %vm3528_vm4 = vcmp.lt.s32.totalorder %v12851_v50, 0  ;;  %v12117_v40 = vld [vmem:[#allocation12 + $0x18] sm:$0xff] }
 0x541   : > { %v3610_v44 = vxor.u32 2147483648, %v3609_v22  ;;  %v4406_v62 = vadd.s32 %v11972_v28, %v11965_v9  ;;  %v3612_v63 = vsub.s32 4, %v11920_v32  ;;  %vm4352_vm7 = vcmp.lt.s32.totalorder %v12808_v37, 0 }
 0x542   : > { %v4418_v45 = vclz %v6299_v25  ;;  %6314 = vmatmul.mubr.msk.f32.vlgmr.msra.gmra.mrb[56].mxu0 %vm4800_vm0, %v12045_v24  ;;  %v12049_v42 = vpack.c.bf16 %v5196_v26, %v5188_v41  ;;  %vm12096_vm9 = vcmp.le.f32.partialorder %v4350_v55, 0.7853982  ;;  %v4436_v60 = vsub.s32 4, %v12017_v4  ;;  %v12109_v55 = vld [vmem:[#allocation12 + $0x10] sm:$0xff] }
 0x543   : > { %5061 = vmatprep.mubr.f32.mxu0 %v12850_v15  ;;  %6380 = vmatpush1.bf16.msra.mxu0 %v12001_v53  ;;  %v3611_v49 = vsel %vm3528_vm4, %v3610_v44, %v3609_v22  ;;  %v12852_v53 = vand.u32 2147483647, %v12851_v50  ;;  %v3613_v61 = vsel %vm3528_vm4, %v3612_v63, %v11920_v32  ;;  %v4720_v38 = vmul.f32 1.442695, %v12857_v20 }
 0x544   : > { %v6300_v1 = vadd.s32 4294967294, %v4418_v45  ;;  %6382 = vmatprep.subr.bf16.mxu0 %v6381_v30  ;;  %v4736_v11 = vmul.f32 1.442695, %v12858_v16  ;;  %v4437_v31 = vsel %vm4352_vm7, %v4436_v60, %v12017_v4  ;;  %vm3618_vm8 = vweird.f32 %v12851_v50 }
 0x545   : > { %vm12065_vm6 = vcmp.le.f32.partialorder %v12852_v53, 0.7853982  ;;  %v4439_v0 = vsel %vm12096_vm9, 0, %v4437_v31  ;;  %vm4442_vm12 = vweird.f32 %v12808_v37  ;;  %v12165_v31 = vpop.permute.xlu1 %5584 }
 0x546   : > { %vm6301_vm3 = vcmp.lt.s32.totalorder %v6300_v1, 0  ;;  %6315 = vmatmul.mubr.msk.f32.gmra.mrb[58].mxu0 %vm4800_vm0, %v12054_v48  ;;  %v3614_v35 = vsel %vm12065_vm6, %v12851_v50, %v3611_v49  ;;  %v3615_v32 = vsel %vm12065_vm6, 0, %v3613_v61  ;;  %v4443_v25 = vand.u32 3, %v4439_v0 }
 0x547   : > { %v4421_v51 = vsel %vm6301_vm3, 0, %v6300_v1  ;;  %5067 = vmatprep.mubr.f32.mxu0 %v12850_v15  ;;  %6384 = vmatpush1.bf16.msra.mxu0 %v6383_v6  ;;  %6971 = vcosq.f32 %v3614_v35  ;;  %v3619_v34 = vand.u32 3, %v3615_v32 }
 0x548   : > { %v4422_v57 = vsub.s32 32, %v4421_v51  ;;  %v4426_v59 = vsub.s32 4294967266, %v4421_v51  ;;  %v4423_v52 = vshll.u32 %v4414_v10, %v4421_v51  ;;  %6973 = vsinq.f32 %v3614_v35 }
 0x549   : > { %vm3621_vm5 = vcmp.eq.s32.totalorder %v3619_v34, 0  ;;  %vm3624_vm10 = vcmp.eq.s32.totalorder %v3619_v34, 2  ;;  %vm3620_vm11 = vcmp.lt.s32.totalorder %v3619_v34, 2  ;;  %vm4448_vm13 = vcmp.eq.s32.totalorder %v4443_v25, 2 }
 0x54a   : > { %v4424_v39 = vshrl.u32 %v4406_v62, %v4422_v57  ;;  %v4427_v58 = vadd.s32 127, %v4426_v59  ;;  %6316 = vmatmul.mubr.msk.f32.gmra.mrb[60].mxu0 %vm4800_vm0, %v12072_v47  ;;  %vm4445_vm14 = vcmp.eq.s32.totalorder %v4443_v25, 0  ;;  %vm4444_vm1 = vcmp.lt.s32.totalorder %v4443_v25, 2 }
 0x54b   : > { %5073 = vmatprep.mubr.f32.mxu0 %v12850_v15 }
 0x54c   : > { %v4425_v9 = vor.u32 %v4424_v39, %v4423_v52  ;;  %v4428_v28 = vshll.u32 %v4427_v58, 23 }
 0x54e   : > { %v4429_v46 = vor.u32 4788187, %v4428_v28  ;;  %6317 = vmatmul.mubr.msk.f32.gmra.mrb[62].mxu0 %vm4800_vm0, %v12077_v33  ;;  %v4432_v8 = vcvt.s32.f32 %v4425_v9 }
 0x54f   : > { %5285 = vmatprep.mubr.f32.mxu0 %v12850_v15 }
 0x550   : > { %v4430_v21 = vand.u32 2147483647, %v4429_v46 }
 0x551   : > { %v6972_v18 = vpop.eup %6971 }
 0x552   : > { %v4433_v29 = vmul.f32 %v4432_v8, %v4430_v21  ;;  %6322 = vmatmul.mubr.msk.f32.vlgmr.msra.gmra.mrb[16].mxu0 %vm4800_vm0, %v12082_v2  ;;  %v6974_v43 = vpop.eup %6973  ;;  %v3625_v5 = vxor.u32 2147483648, %v6972_v18 }
 0x553   : > { %5291 = vmatprep.mubr.f32.mxu0 %v12850_v15  ;;  %v3622_v6 = vxor.u32 2147483648, %v6974_v43 }
 0x554   : > { %v4434_v12 = vxor.u32 2147483648, %v4433_v29  ;;  %v3626_v22 = vsel %vm3624_vm10, %v3625_v5, %v6974_v43 }
 0x555   : > { %v3623_v4 = vsel %vm3621_vm5, %v6972_v18, %v3622_v6 }
 0x556   : > { %v4435_v19 = vsel %vm4352_vm7, %v4434_v12, %v4433_v29  ;;  %6323 = vmatmul.mubr.msk.f32.gmra.mrb[18].mxu0 %vm4800_vm0, %v12088_v23  ;;  %v3627_v26 = vsel %vm3620_vm11, %v3623_v4, %v3626_v22 }
 0x557   : > { %v4438_v10 = vsel %vm12096_vm9, %v12808_v37, %v4435_v19  ;;  %5297 = vmatprep.mubr.f32.mxu0 %v12850_v15  ;;  %v3628_v51 = vsel %vm3618_vm8, nan, %v3627_v26 }
 0x558   : > { %6975 = vcosq.f32 %v4438_v10 }
 0x559   : > { %6977 = vsinq.f32 %v4438_v10 }
 0x55a   : > { %6324 = vmatmul.mubr.msk.f32.gmra.mrb[20].mxu0 %vm4800_vm0, %v12109_v55  ;;  %6979 = vpow2.f32 %v4720_v38  ;;  %v12162_v38 = vpop.permute.xlu0 %5579 }
 0x55b   : > { %5303 = vmatprep.mubr.f32.mxu0 %v12850_v15  ;;  %6981 = vpow2.f32 %v4736_v11 }
 0x55e   : > { %6325 = vmatmul.mubr.msk.f32.gmra.mrb[22].mxu0 %vm4800_vm0, %v12117_v40 }
 0x55f   : > { %5463 = vmatprep.mubr.f32.mxu0 %v12850_v15 }
 0x562   : > { %v6976_v41 = vpop.eup %6975 }
 0x563   : > { %v6978_v30 = vpop.eup %6977  ;;  %v4449_v45 = vxor.u32 2147483648, %v6976_v41 }
 0x564   : > { %v4446_v44 = vxor.u32 2147483648, %v6978_v30  ;;  %v6980_v62 = vpop.eup %6979 }
 0x565   : > { %v4450_v1 = vsel %vm4448_vm13, %v4449_v45, %v6978_v30  ;;  %v6982_v59 = vpop.eup %6981  ;;  %v4762_v36 = vmul.f32 %v6980_v62, %v3628_v51  ;;  %v12176_v62 = vpop.permute.xlu1 %5594 }
 0x566   : > { %v4447_v49 = vsel %vm4445_vm14, %v6976_v41, %v4446_v44 }
 0x567   : > { %v4451_v57 = vsel %vm4444_vm1, %v4447_v49, %v4450_v1  ;;  %v12173_v1 = vpop.permute.xlu0 %5589 }
 0x568   : > { %v4452_v53 = vsel %vm4442_vm12, nan, %v4451_v57 }
 0x569   : > { %v4770_v52 = vmul.f32 %v6982_v59, %v4452_v53 }
 0x56b   : > { %v6375_v39 = vpack.c.bf16 %v4770_v52, %v4762_v36 }
 0x56d   : > { %6376 = vmatpush1.bf16.msra.mxu1 %v6375_v39 }
 0x56e   : > { %6386 = vmatprep.subr.bf16.mxu1 %v12012_v56 }
 0x570   : > { %6318 = vmatmul.mubr.msk.f32.vlgmr.msra.gmra.mrb[56].mxu1 %vm4800_vm0, %v12045_v24 }
 0x571   : > { %5150 = vmatprep.mubr.f32.mxu1 %v12850_v15  ;;  %6388 = vmatpush1.bf16.msra.mxu1 %v12003_v14 }
 0x572   : > { %6390 = vmatprep.subr.bf16.mxu1 %v12049_v42 }
 0x574   : > { %6319 = vmatmul.mubr.msk.f32.gmra.mrb[58].mxu1 %vm4800_vm0, %v12054_v48 }
 0x575   : > { %5156 = vmatprep.mubr.f32.mxu1 %v12850_v15  ;;  %6392 = vmatpush1.bf16.msra.mxu1 %v12041_v54 }
 0x578   : > { %6320 = vmatmul.mubr.msk.f32.gmra.mrb[60].mxu1 %vm4800_vm0, %v12072_v47 }
 0x579   : > { %5162 = vmatprep.mubr.f32.mxu1 %v12850_v15 }
 0x57c   : > { %6321 = vmatmul.mubr.msk.f32.gmra.mrb[62].mxu1 %vm4800_vm0, %v12077_v33 }
 0x57d   : > { %5374 = vmatprep.mubr.f32.mxu1 %v12850_v15 }
 0x580   : > { %6326 = vmatmul.mubr.msk.f32.vlgmr.msra.gmra.mrb[16].mxu1 %vm4800_vm0, %v12082_v2 }
 0x581   : > { %5380 = vmatprep.mubr.f32.mxu1 %v12850_v15 }
 0x584   : > { %6327 = vmatmul.mubr.msk.f32.gmra.mrb[18].mxu1 %vm4800_vm0, %v12088_v23 }
 0x585   : > { %5386 = vmatprep.mubr.f32.mxu1 %v12850_v15 }
 0x588   : > { %6328 = vmatmul.mubr.msk.f32.gmra.mrb[20].mxu1 %vm4800_vm0, %v12109_v55 }
 0x589   : > { %5392 = vmatprep.mubr.f32.mxu1 %v12850_v15 }
 0x58c   : > { %6329 = vmatmul.mubr.msk.f32.gmra.mrb[22].mxu1 %vm4800_vm0, %v12117_v40 }
 0x58d   : > { %5552 = vmatprep.mubr.f32.mxu1 %v12850_v15 }
 0x615   : > { %v5057_v37 = vpop.f32.mrb[56].mxu0 }
 0x616   : > { %v5059_v14 = vpop.f32.mrb[57].mxu0  ;;  %v5058_v56 = vadd.f32 %v5057_v37, %v11962_v27 }
 0x617   : > { %v5060_v54 = vadd.f32 %v5059_v14, %v11962_v27 }
 0x618   : > { %v5173_v58 = vmax.f32 %v5058_v56, 0.0 }
 0x619   : > { %v5063_v24 = vpop.f32.mrb[58].mxu0  ;;  %v5174_v47 = vmax.f32 %v5060_v54, 0.0 }
 0x61a   : > { %v5064_v42 = vadd.f32 %v5063_v24, %v11969_v3  ;;  %v5065_v50 = vpop.f32.mrb[59].mxu0 }
 0x61b   : > { %v5066_v48 = vadd.f32 %v5065_v50, %v11969_v3 }
 0x61c   : > { %v5181_v35 = vmax.f32 %v5064_v42, 0.0  ;;  %v12193_v42 = vld [vmem:[%s12859_s25] sm:$0xff] }
 0x61d   : > { %v5182_v9 = vmax.f32 %v5066_v48, 0.0  ;;  %v5069_v28 = vpop.f32.mrb[60].mxu0 }
 0x61e   : > { %v6395_v46 = vpack.c.bf16 %v5181_v35, %v5173_v58  ;;  %v5071_v33 = vpop.f32.mrb[61].mxu0  ;;  %v5070_v8 = vadd.f32 %v5069_v28, %v12006_v13 }
 0x61f   : > { %v6393_v21 = vpack.c.bf16 %v5182_v9, %v5174_v47  ;;  %v5072_v63 = vadd.f32 %v5071_v33, %v12006_v13 }
 0x620   : > { %v5189_v19 = vmax.f32 %v5070_v8, 0.0 }
 0x621   : > { %v5075_v29 = vpop.f32.mrb[62].mxu0  ;;  %6394 = vmatprep.subr.bf16.mxu0 %v6393_v21  ;;  %v5190_v10 = vmax.f32 %v5072_v63, 0.0 }
 0x622   : > { %v5076_v12 = vadd.f32 %v5075_v29, %v12019_v17  ;;  %v5077_v61 = vpop.f32.mrb[63].mxu0  ;;  %6396 = vmatpush1.bf16.msra.mxu0 %v6395_v46 }
 0x623   : > { %v5078_v7 = vadd.f32 %v5077_v61, %v12019_v17 }
 0x624   : > { %v5197_v60 = vmax.f32 %v5076_v12, 0.0 }
 0x625   : > { %v5198_v18 = vmax.f32 %v5078_v7, 0.0  ;;  %v5287_v32 = vpop.f32.mrb[16].mxu0 }
 0x626   : > { %v6399_v43 = vpack.c.bf16 %v5197_v60, %v5189_v19  ;;  %v5289_v20 = vpop.f32.mrb[17].mxu0  ;;  %v5597_v11 = vadd.f32 %v12162_v38, %v5287_v32 }
 0x627   : > { %v6397_v16 = vpack.c.bf16 %v5198_v18, %v5190_v10  ;;  %v5598_v34 = vadd.f32 %v12162_v38, %v5289_v20 }
 0x628   : > { %v5629_v22 = vmax.f32 %v5597_v11, 0.0 }
 0x629   : > { %6398 = vmatprep.subr.bf16.mxu0 %v6397_v16  ;;  %v5293_v6 = vpop.f32.mrb[18].mxu0  ;;  %v5630_v41 = vmax.f32 %v5598_v34, 0.0 }
 0x62a   : > { %6400 = vmatpush1.bf16.msra.mxu0 %v6399_v43  ;;  %v5605_v5 = vadd.f32 %v12165_v31, %v5293_v6  ;;  %v5295_v0 = vpop.f32.mrb[19].mxu0 }
 0x62b   : > { %v5606_v4 = vadd.f32 %v12165_v31, %v5295_v0 }
 0x62c   : > { %v5637_v25 = vmax.f32 %v5605_v5, 0.0 }
 0x62d   : > { %6330 = vmatmul.mubr.msk.f32.vlgmr.msra.gmra.mrb[40].mxu0 %vm4800_vm0, %v12082_v2  ;;  %v5638_v30 = vmax.f32 %v5606_v4, 0.0  ;;  %v5299_v26 = vpop.f32.mrb[20].mxu0 }
 0x62e   : > { %5469 = vmatprep.mubr.f32.mxu0 %v12850_v15  ;;  %v6411_v45 = vpack.c.bf16 %v5637_v25, %v5629_v22  ;;  %v5301_v44 = vpop.f32.mrb[21].mxu0  ;;  %v5613_v49 = vadd.f32 %v12173_v1, %v5299_v26 }
 0x62f   : > { %v6409_v51 = vpack.c.bf16 %v5638_v30, %v5630_v41  ;;  %v5614_v57 = vadd.f32 %v12173_v1, %v5301_v44 }
 0x630   : > { %v5645_v39 = vmax.f32 %v5613_v49, 0.0 }
 0x631   : > { %6331 = vmatmul.mubr.msk.f32.gmra.mrb[42].mxu0 %vm4800_vm0, %v12088_v23  ;;  %v5305_v59 = vpop.f32.mrb[22].mxu0  ;;  %6410 = vmatprep.subr.bf16.mxu0 %v6409_v51  ;;  %v5646_v14 = vmax.f32 %v5614_v57, 0.0 }
 0x632   : > { %5475 = vmatprep.mubr.f32.mxu0 %v12850_v15  ;;  %v5621_v53 = vadd.f32 %v12176_v62, %v5305_v59  ;;  %v5307_v36 = vpop.f32.mrb[23].mxu0  ;;  %6412 = vmatpush1.bf16.msra.mxu0 %v6411_v45 }
 0x633   : > { %v5622_v52 = vadd.f32 %v12176_v62, %v5307_v36 }
 0x634   : > { %v5653_v37 = vmax.f32 %v5621_v53, 0.0 }
 0x635   : > { %6332 = vmatmul.mubr.msk.f32.gmra.mrb[44].mxu0 %vm4800_vm0, %v12109_v55  ;;  %v5654_v56 = vmax.f32 %v5622_v52, 0.0 }
 0x636   : > { %5481 = vmatprep.mubr.f32.mxu0 %v12850_v15  ;;  %v6415_v54 = vpack.c.bf16 %v5653_v37, %v5645_v39 }
 0x637   : > { %v6413_v24 = vpack.c.bf16 %v5654_v56, %v5646_v14 }
 0x639   : > { %6333 = vmatmul.mubr.msk.f32.gmra.mrb[46].mxu0 %vm4800_vm0, %v12117_v40  ;;  %6414 = vmatprep.subr.bf16.mxu0 %v6413_v24 }
 0x63a   : > { %6416 = vmatpush1.bf16.msra.mxu0 %v6415_v54  ;;  %5735 = vmatprep.mubr.f32.mxu0 %v12850_v15 }
 0x63d   : > { %6338 = vmatmul.mubr.msk.f32.vlgmr.msra.gmra.mrb[64].mxu0 %vm4800_vm0, %v12193_v42 }
 0x63e   : > { %5877 = vmatprep.mubr.f32.mxu0 %v12850_v15 }
 0x643   : > { %v5146_v50 = vpop.f32.mrb[56].mxu1 }
 0x644   : > { %v5148_v48 = vpop.f32.mrb[57].mxu1  ;;  %v5147_v58 = vadd.f32 %v5146_v50, %v11962_v27 }
 0x645   : > { %v5149_v35 = vadd.f32 %v5148_v48, %v11962_v27 }
 0x646   : > { %v5175_v33 = vmax.f32 %v5147_v58, 0.0 }
 0x647   : > { %v5152_v47 = vpop.f32.mrb[58].mxu1  ;;  %v5176_v8 = vmax.f32 %v5149_v35, 0.0 }
 0x648   : > { %v5153_v9 = vadd.f32 %v5152_v47, %v11969_v3  ;;  %v5154_v28 = vpop.f32.mrb[59].mxu1 }
 0x649   : > { %v5155_v46 = vadd.f32 %v5154_v28, %v11969_v3 }
 0x64a   : > { %v5183_v21 = vmax.f32 %v5153_v9, 0.0 }
 0x64b   : > { %v5184_v63 = vmax.f32 %v5155_v46, 0.0  ;;  %v5158_v29 = vpop.f32.mrb[60].mxu1 }
 0x64c   : > { %v6403_v12 = vpack.c.bf16 %v5183_v21, %v5175_v33  ;;  %v5160_v61 = vpop.f32.mrb[61].mxu1  ;;  %v5159_v19 = vadd.f32 %v5158_v29, %v12006_v13 }
 0x64d   : > { %v6401_v7 = vpack.c.bf16 %v5184_v63, %v5176_v8  ;;  %v5161_v60 = vadd.f32 %v5160_v61, %v12006_v13 }
 0x64e   : > { %v5191_v32 = vmax.f32 %v5159_v19, 0.0 }
 0x64f   : > { %v5164_v10 = vpop.f32.mrb[62].mxu1  ;;  %6402 = vmatprep.subr.bf16.mxu1 %v6401_v7  ;;  %v5192_v20 = vmax.f32 %v5161_v60, 0.0 }
 0x650   : > { %v5165_v27 = vadd.f32 %v5164_v10, %v12019_v17  ;;  %v5166_v18 = vpop.f32.mrb[63].mxu1  ;;  %6404 = vmatpush1.bf16.msra.mxu1 %v6403_v12 }
 0x651   : > { %v5167_v3 = vadd.f32 %v5166_v18, %v12019_v17 }
 0x652   : > { %v5199_v43 = vmax.f32 %v5165_v27, 0.0 }
 0x653   : > { %v5200_v16 = vmax.f32 %v5167_v3, 0.0  ;;  %v5376_v11 = vpop.f32.mrb[16].mxu1  ;;  %v12239_v3 = vpop.permute.xlu0 %5665 }
 0x654   : > { %v6407_v34 = vpack.c.bf16 %v5199_v43, %v5191_v32  ;;  %v5378_v6 = vpop.f32.mrb[17].mxu1  ;;  %v5599_v0 = vadd.f32 %v12162_v38, %v5376_v11 }
 0x655   : > { %v6405_v5 = vpack.c.bf16 %v5200_v16, %v5192_v20  ;;  %v5600_v13 = vadd.f32 %v12162_v38, %v5378_v6 }
 0x656   : > { %v5631_v41 = vmax.f32 %v5599_v0, 0.0 }
 0x657   : > { %6406 = vmatprep.subr.bf16.mxu1 %v6405_v5  ;;  %v5382_v4 = vpop.f32.mrb[18].mxu1  ;;  %v5632_v26 = vmax.f32 %v5600_v13, 0.0 }
 0x658   : > { %6408 = vmatpush1.bf16.msra.mxu1 %v6407_v34  ;;  %v5607_v22 = vadd.f32 %v12165_v31, %v5382_v4  ;;  %v5384_v25 = vpop.f32.mrb[19].mxu1 }
 0x659   : > { %v5608_v17 = vadd.f32 %v12165_v31, %v5384_v25 }
 0x65a   : > { %v5639_v30 = vmax.f32 %v5607_v22, 0.0 }
 0x65b   : > { %6334 = vmatmul.mubr.msk.f32.vlgmr.msra.gmra.mrb[40].mxu1 %vm4800_vm0, %v12082_v2  ;;  %v5640_v45 = vmax.f32 %v5608_v17, 0.0  ;;  %v5388_v44 = vpop.f32.mrb[20].mxu1 }
 0x65c   : > { %5558 = vmatprep.mubr.f32.mxu1 %v12850_v15  ;;  %v6419_v51 = vpack.c.bf16 %v5639_v30, %v5631_v41  ;;  %v5390_v49 = vpop.f32.mrb[21].mxu1  ;;  %v5615_v59 = vadd.f32 %v12173_v1, %v5388_v44 }
 0x65d   : > { %v6417_v57 = vpack.c.bf16 %v5640_v45, %v5632_v26  ;;  %v5616_v53 = vadd.f32 %v12173_v1, %v5390_v49 }
 0x65e   : > { %v5647_v37 = vmax.f32 %v5615_v59, 0.0 }
 0x65f   : > { %6335 = vmatmul.mubr.msk.f32.gmra.mrb[42].mxu1 %vm4800_vm0, %v12088_v23  ;;  %v5394_v36 = vpop.f32.mrb[22].mxu1  ;;  %6418 = vmatprep.subr.bf16.mxu1 %v6417_v57  ;;  %v5648_v56 = vmax.f32 %v5616_v53, 0.0 }
 0x660   : > { %5564 = vmatprep.mubr.f32.mxu1 %v12850_v15  ;;  %v5623_v2 = vadd.f32 %v12176_v62, %v5394_v36  ;;  %v5396_v52 = vpop.f32.mrb[23].mxu1  ;;  %6420 = vmatpush1.bf16.msra.mxu1 %v6419_v51 }
 0x661   : > { %v5624_v39 = vadd.f32 %v12176_v62, %v5396_v52 }
 0x662   : > { %v5655_v14 = vmax.f32 %v5623_v2, 0.0 }
 0x663   : > { %6336 = vmatmul.mubr.msk.f32.gmra.mrb[44].mxu1 %vm4800_vm0, %v12109_v55  ;;  %v5656_v23 = vmax.f32 %v5624_v39, 0.0 }
 0x664   : > { %5570 = vmatprep.mubr.f32.mxu1 %v12850_v15  ;;  %v6423_v54 = vpack.c.bf16 %v5655_v14, %v5647_v37 }
 0x665   : > { %v6421_v24 = vpack.c.bf16 %v5656_v23, %v5648_v56 }
 0x667   : > { %6337 = vmatmul.mubr.msk.f32.gmra.mrb[46].mxu1 %vm4800_vm0, %v12117_v40  ;;  %6422 = vmatprep.subr.bf16.mxu1 %v6421_v24 }
 0x668   : > { %6424 = vmatpush1.bf16.msra.mxu1 %v6423_v54  ;;  %5806 = vmatprep.mubr.f32.mxu1 %v12850_v15 }
 0x66b   : > { %6339 = vmatmul.mubr.msk.f32.vlgmr.msra.gmra.mrb[64].mxu1 %vm4800_vm0, %v12193_v42 }
 0x66c   : > { %5948 = vmatprep.mubr.f32.mxu1 %v12850_v15 }
 0x700   : > { %v5465_v50 = vpop.f32.mrb[40].mxu0 }
 0x701   : > { %v5467_v55 = vpop.f32.mrb[41].mxu0  ;;  %v5601_v48 = vadd.f32 %v12162_v38, %v5465_v50 }
 0x702   : > { %v5602_v58 = vadd.f32 %v12162_v38, %v5467_v55 }
 0x703   : > { %v5633_v28 = vmax.f32 %v5601_v48, 0.0 }
 0x704   : > { %v5471_v35 = vpop.f32.mrb[42].mxu0  ;;  %v5634_v33 = vmax.f32 %v5602_v58, 0.0 }
 0x705   : > { %v5609_v40 = vadd.f32 %v12165_v31, %v5471_v35  ;;  %v5473_v47 = vpop.f32.mrb[43].mxu0 }
 0x706   : > { %v5610_v9 = vadd.f32 %v12165_v31, %v5473_v47 }
 0x707   : > { %v5641_v46 = vmax.f32 %v5609_v40, 0.0 }
 0x708   : > { %v5642_v21 = vmax.f32 %v5610_v9, 0.0  ;;  %v5477_v15 = vpop.f32.mrb[44].mxu0 }
 0x709   : > { %v6427_v8 = vpack.c.bf16 %v5641_v46, %v5633_v28  ;;  %v5479_v63 = vpop.f32.mrb[45].mxu0  ;;  %v5617_v12 = vadd.f32 %v12173_v1, %v5477_v15 }
 0x70a   : > { %v6425_v29 = vpack.c.bf16 %v5642_v21, %v5634_v33  ;;  %v5618_v61 = vadd.f32 %v12173_v1, %v5479_v63 }
 0x70b   : > { %v5649_v27 = vmax.f32 %v5617_v12, 0.0 }
 0x70c   : > { %v5483_v7 = vpop.f32.mrb[46].mxu0  ;;  %6426 = vmatprep.subr.bf16.mxu0 %v6425_v29  ;;  %v5650_v32 = vmax.f32 %v5618_v61, 0.0 }
 0x70d   : > { %v5625_v19 = vadd.f32 %v12176_v62, %v5483_v7  ;;  %v5485_v60 = vpop.f32.mrb[47].mxu0  ;;  %6428 = vmatpush1.bf16.msra.mxu0 %v6427_v8 }
 0x70e   : > { %v5626_v10 = vadd.f32 %v12176_v62, %v5485_v60 }
 0x70f   : > { %v5657_v18 = vmax.f32 %v5625_v19, 0.0 }
 0x710   : > { %v5658_v43 = vmax.f32 %v5626_v10, 0.0  ;;  %v5737_v20 = vpop.f32.mrb[64].mxu0 }
 0x711   : > { %v6431_v16 = vpack.c.bf16 %v5657_v18, %v5649_v27  ;;  %v5738_v11 = vadd.f32 %v5737_v20, %v12239_v3  ;;  %v5739_v34 = vpop.f32.mrb[65].mxu0 }
 0x712   : > { %v6429_v6 = vpack.c.bf16 %v5658_v43, %v5650_v32  ;;  %v5740_v5 = vadd.f32 %v5739_v34, %v12239_v3 }
 0x713   : > { %5955 = vst [vmem:[%s12244_s11] sm:$0xff] %v5738_v11 }
 0x714   : > { %6430 = vmatprep.subr.bf16.mxu0 %v6429_v6  ;;  %5956 = vst [vmem:[%s12244_s11 + $0x8] sm:$0xff] %v5740_v5 }
 0x715   : > { %6432 = vmatpush1.bf16.msra.mxu0 %v6431_v16 }
 0x718   : > { %6340 = vmatmul.mubr.msk.f32.vlgmr.msra.gmra.mrb[66].mxu0 %vm4800_vm0, %v12193_v42 }
 0x72e   : > { %v5554_v0 = vpop.f32.mrb[40].mxu1 }
 0x72f   : > { %v5556_v13 = vpop.f32.mrb[41].mxu1  ;;  %v5603_v4 = vadd.f32 %v12162_v38, %v5554_v0 }
 0x730   : > { %v5604_v22 = vadd.f32 %v12162_v38, %v5556_v13 }
 0x731   : > { %v5635_v26 = vmax.f32 %v5603_v4, 0.0 }
 0x732   : > { %v5560_v25 = vpop.f32.mrb[42].mxu1  ;;  %v5636_v44 = vmax.f32 %v5604_v22, 0.0 }
 0x733   : > { %v5611_v17 = vadd.f32 %v12165_v31, %v5560_v25  ;;  %v5562_v41 = vpop.f32.mrb[43].mxu1 }
 0x734   : > { %v5612_v30 = vadd.f32 %v12165_v31, %v5562_v41 }
 0x735   : > { %v5643_v45 = vmax.f32 %v5611_v17, 0.0 }
 0x736   : > { %v5644_v51 = vmax.f32 %v5612_v30, 0.0  ;;  %v5566_v49 = vpop.f32.mrb[44].mxu1 }
 0x737   : > { %v6435_v57 = vpack.c.bf16 %v5643_v45, %v5635_v26  ;;  %v5568_v59 = vpop.f32.mrb[45].mxu1  ;;  %v5619_v36 = vadd.f32 %v12173_v1, %v5566_v49 }
 0x738   : > { %v6433_v53 = vpack.c.bf16 %v5644_v51, %v5636_v44  ;;  %v5620_v2 = vadd.f32 %v12173_v1, %v5568_v59 }
 0x739   : > { %v5651_v37 = vmax.f32 %v5619_v36, 0.0 }
 0x73a   : > { %v5572_v52 = vpop.f32.mrb[46].mxu1  ;;  %6434 = vmatprep.subr.bf16.mxu1 %v6433_v53  ;;  %v5652_v56 = vmax.f32 %v5620_v2, 0.0 }
 0x73b   : > { %v5627_v38 = vadd.f32 %v12176_v62, %v5572_v52  ;;  %v5574_v39 = vpop.f32.mrb[47].mxu1  ;;  %6436 = vmatpush1.bf16.msra.mxu1 %v6435_v57 }
 0x73c   : > { %v5628_v31 = vadd.f32 %v12176_v62, %v5574_v39 }
 0x73d   : > { %v5659_v14 = vmax.f32 %v5627_v38, 0.0 }
 0x73e   : > { %v5660_v23 = vmax.f32 %v5628_v31, 0.0  ;;  %v5808_v54 = vpop.f32.mrb[64].mxu1 }
 0x73f   : > { %v6439_v24 = vpack.c.bf16 %v5659_v14, %v5651_v37  ;;  %v5809_v1 = vadd.f32 %v5808_v54, %v12239_v3  ;;  %v5810_v50 = vpop.f32.mrb[65].mxu1 }
 0x740   : > { %v6437_v55 = vpack.c.bf16 %v5660_v23, %v5652_v56  ;;  %v5811_v48 = vadd.f32 %v5810_v50, %v12239_v3 }
 0x741   : > { %5957 = vst [vmem:[%s12244_s11 + $0x10] sm:$0xff] %v5809_v1 }
 0x742   : > { %6438 = vmatprep.subr.bf16.mxu1 %v6437_v55  ;;  %5958 = vst [vmem:[%s12244_s11 + $0x18] sm:$0xff] %v5811_v48 }
 0x743   : > { %6440 = vmatpush1.bf16.msra.mxu1 %v6439_v24 }
 0x746   : > { %6341 = vmatmul.mubr.msk.f32.vlgmr.msra.gmra.mrb[66].mxu1 %vm4800_vm0, %v12193_v42 }
 0x7eb   : > { %v5879_v62 = vpop.f32.mrb[66].mxu0 }
 0x7ec   : > { %v5880_v58 = vadd.f32 %v5879_v62, %v12239_v3  ;;  %v5881_v35 = vpop.f32.mrb[67].mxu0 }
 0x7ed   : > { %v5882_v40 = vadd.f32 %v5881_v35, %v12239_v3 }
 0x7ee   : > { %5959 = vst [vmem:[%s12244_s11 + $0x20] sm:$0xff] %v5880_v58 }
 0x7ef   : > { %5960 = vst [vmem:[%s12244_s11 + $0x28] sm:$0xff] %v5882_v40 }
 0x819   : > { %v5950_v47 = vpop.f32.mrb[66].mxu1 }
 0x81a   : > { %v5951_v9 = vadd.f32 %v5950_v47, %v12239_v3  ;;  %v5952_v28 = vpop.f32.mrb[67].mxu1 }
 0x81b   : > { %v5953_v46 = vadd.f32 %v5952_v28, %v12239_v3 }
 0x81c   : > { %5961 = vst [vmem:[%s12244_s11 + $0x30] sm:$0xff] %v5951_v9 }
 0x81d   : > { %5962 = vst [vmem:[%s12244_s11 + $0x38] sm:$0xff] %v5953_v46 }
 0x81e PF: > { %p24_p5 = scmp.ge.s32.totalorder %s7554_s24, 6   ;;  %s12862_s13 = smov %s7255_s14 }
 0x81f   : > { %s12863_s14 = smov %s7259_s15  ;;  %s12864_s15 = smov %s7565_s1 }
 0x820   : > { %s12865_s16 = smov %s7554_s24  ;;  %26 = sbr.rel (!%p24_p5) target bundleno = 11 (0xb), region = 128 }
 0x827   :  { %5985 = vsyncpa [#allocation3], 1 }
 0x828   :  { %5987 = vsyncpa [#allocation3 + $0x1], 1 }
 0x829   :  { %5988 = vsyncpa [#allocation5], 1 }
 0x82a   :  { %5989 = vsyncpa [#allocation8], 1 }
 0x82b   :  { %5990 = vsyncpa [#allocation11], 1 }
 0x82c   :  { %5991 = vsyncpa [#allocation14], 1 }

</bundles_post_ra>
